<compile_context>
chip_gen: v7x
topology: tpu7x:2x2x1
jax: 0.10.0
libtpu: 0.0.40
codegen_flags: <defaults>
</compile_context>

<pallas_src>
import functools
import math

import numpy as np
import jax
import jax.numpy as jnp
from jax import lax
from jax.experimental import pallas as pl
from jax.experimental.pallas import tpu as pltpu

# ----------------------------- config (small, deterministic) -----------------------------
VOCAB = 16
D_MODEL = 32
H = 4
DK = D_MODEL // H        # 8
DFF = 64
N_LAYERS = 2
MAX_LEN = 32
LN_EPS = 1e-5            # torch.nn.LayerNorm default
EMB_SCALE = math.sqrt(D_MODEL)

# ----------------------------- packed-parameter layout -----------------------------
N_ATT = 3 * N_LAYERS          # enc-self (N) + dec-self (N) + dec-cross (N) = 6
N_FFN = 2 * N_LAYERS          # enc (N) + dec (N)                           = 4
N_LN = 5 * N_LAYERS + 2       # enc 2/layer + enc-final + dec 3/layer + dec-final = 12

# vec32 slab: [attention W_o biases | LN gammas | LN betas | FFN b2], each row (1, D)
OB_OFF = 0
LNG_OFF = N_ATT
LNB_OFF = N_ATT + N_LN
FB2_OFF = N_ATT + 2 * N_LN
N_VEC32 = N_ATT + 2 * N_LN + N_FFN      # 34


def _att_enc(l):        return l
def _att_dec_self(l):   return N_LAYERS + 2 * l
def _att_dec_cross(l):  return N_LAYERS + 2 * l + 1
def _ln_enc(l, j):      return 2 * l + j
_LN_ENC_FINAL = 2 * N_LAYERS
def _ln_dec(l, j):      return 2 * N_LAYERS + 1 + 3 * l + j
_LN_DEC_FINAL = 2 * N_LAYERS + 1 + 3 * N_LAYERS
def _ffn_enc(l):        return l
def _ffn_dec(l):        return N_LAYERS + l


# ----------------------------- the fused kernel -----------------------------
def _transformer_kernel(
    src_tok_ref, src_pos_ref, tgt_tok_ref, tgt_pos_ref,
    emb_ref, pe_ref,
    qkv_w_ref, qkv_b_ref, o_w_ref,
    ffn_w1_ref, ffn_b1_ref, ffn_w2_ref,
    vec32_ref, gen_w_ref, gen_b_ref,
    out_ref,
    *, B, Ls, Lt,
):
    f32 = jnp.float32
    Ns, Nt = B * Ls, B * Lt

    # ---- embedding: one-hot @ table (gather stays in VMEM, no XLA-side ops) ----
    def embed(tok, pos, table):
        n = tok.shape[0]
        oh_t = (tok == lax.broadcasted_iota(jnp.int32, (n, VOCAB), 1)).astype(f32)
        oh_p = (pos == lax.broadcasted_iota(jnp.int32, (n, MAX_LEN), 1)).astype(f32)
        return (jnp.dot(oh_t, table, preferred_element_type=f32) * EMB_SCALE
                + jnp.dot(oh_p, pe_ref[...], preferred_element_type=f32))

    x_e = embed(src_tok_ref[...], src_pos_ref[...], emb_ref[0])     # (Ns, D)
    x_d = embed(tgt_tok_ref[...], tgt_pos_ref[...], emb_ref[1])     # (Nt, D)

    # ---- block-diagonal (per-batch) edge masks from iota comparisons ----
    def block_mask(nrows, ncols, lq, lk, causal):
        r = lax.broadcasted_iota(jnp.int32, (nrows, ncols), 0)
        c = lax.broadcasted_iota(jnp.int32, (nrows, ncols), 1)
        m = None
        for b in range(B):                                           # static tiny loop
            t = (r >= b * lq) & (r < (b + 1) * lq) & (c >= b * lk) & (c < (b + 1) * lk)
            if causal:
                t = t & ((c - b * lk) <= (r - b * lq))               # dd edges incl. self-loop
            m = t if m is None else (m | t)
        return m.astype(f32)

    m_ee = block_mask(Ns, Ns, Ls, Ls, causal=False)                  # full intra-batch
    m_dd = block_mask(Nt, Nt, Lt, Lt, causal=True)
    m_ed = block_mask(Nt, Ns, Lt, Ls, causal=False)

    def layer_norm(x, idx):
        g = vec32_ref[LNG_OFF + idx]                                 # (1, D)
        b = vec32_ref[LNB_OFF + idx]
        mu = jnp.mean(x, axis=-1, keepdims=True)
        var = jnp.mean(jnp.square(x - mu), axis=-1, keepdims=True)
        return (x - mu) * lax.rsqrt(var + LN_EPS) * g + b

    def mha(xq, xkv, idx, mask):
        """Graph attention: score = exp(clamp(q.k/sqrt(dk),-10,10)) on existing edges,
        out = W_o((score @ v) / sum(score)) — fused qkv projection + single W_o matmul."""
        wqkv = qkv_w_ref[idx]                                        # (D, 3D)
        bqkv = qkv_b_ref[idx]                                        # (1, 3D)
        pq = jnp.dot(xq, wqkv, preferred_element_type=f32) + bqkv
        pkv = pq if xkv is xq else (jnp.dot(xkv, wqkv, preferred_element_type=f32) + bqkv)
        q = pq[:, :D_MODEL]
        k = pkv[:, D_MODEL:2 * D_MODEL]
        v = pkv[:, 2 * D_MODEL:]
        scale = 1.0 / math.sqrt(DK)
        heads = []
        for h in range(H):                                           # static loop, H = 4
            sl = slice(h * DK, (h + 1) * DK)
            qh, kh, vh = q[:, sl], k[:, sl], v[:, sl]
            s = lax.dot_general(qh, kh, (((1,), (1,)), ((), ())),    # no explicit transpose
                                preferred_element_type=f32) * scale
            e = jnp.exp(jnp.clip(s, -10.0, 10.0)) * mask
            z = jnp.sum(e, axis=-1, keepdims=True)                   # > 0 (self edge kept)
            heads.append(jnp.dot(e, vh, preferred_element_type=f32)
                         * pl.reciprocal(z, approx=True))
        o = jnp.concatenate(heads, axis=-1)                          # (Lq, D) lane concat
        return jnp.dot(o, o_w_ref[idx], preferred_element_type=f32) + vec32_ref[OB_OFF + idx]

    def ffn(x, idx):
        h1 = jnp.maximum(jnp.dot(x, ffn_w1_ref[idx], preferred_element_type=f32)
                         + ffn_b1_ref[idx], 0.0)
        return (jnp.dot(h1, ffn_w2_ref[idx], preferred_element_type=f32)
                + vec32_ref[FB2_OFF + idx])

    # ---------------- encoder ----------------
    for l in range(N_LAYERS):
        nx = layer_norm(x_e, _ln_enc(l, 0))                          # pre_func 'qkv'
        x_e = x_e + mha(nx, nx, _att_enc(l), m_ee)
        nx2 = layer_norm(x_e, _ln_enc(l, 1))
        x_e = x_e + ffn(nx2, _ffn_enc(l))
        if l == N_LAYERS - 1:
            x_e = layer_norm(x_e, _LN_ENC_FINAL)

    # ---------------- decoder ----------------
    for l in range(N_LAYERS):
        last = l == N_LAYERS - 1
        # self-attention sublayer (dd edges, causal incl. self-loop)
        nx = layer_norm(x_d, _ln_dec(l, 0))
        x_d = x_d + mha(nx, nx, _att_dec_self(l), m_dd)
        if last:   # matches DGL Decoder.post_func(i, l=0) on the last layer
            x_d = layer_norm(x_d, _LN_DEC_FINAL)
        # cross-attention sublayer (ed edges): q from LN(dec x), k/v from enc output
        nq = layer_norm(x_d, _ln_dec(l, 1))
        x_d = x_d + mha(nq, x_e, _att_dec_cross(l), m_ed)
        # feed-forward sublayer
        nx2 = layer_norm(x_d, _ln_dec(l, 2))
        x_d = x_d + ffn(nx2, _ffn_dec(l))
        if last:   # matches DGL Decoder.post_func(i, l=1) on the last layer
            x_d = layer_norm(x_d, _LN_DEC_FINAL)

    # ---------------- generator: Linear + log_softmax ----------------
    logits = jnp.dot(x_d, gen_w_ref[...], preferred_element_type=f32) + gen_b_ref[...]
    mx = jnp.max(logits, axis=-1, keepdims=True)
    s = logits - mx
    lse = jnp.log(jnp.sum(jnp.exp(s), axis=-1, keepdims=True))
    out_ref[...] = (s - lse).astype(out_ref.dtype)


# ----------------------------- host-side glue -----------------------------
def positional_encoding_table(max_len, d_model):
    pos = np.arange(max_len)[:, None].astype(np.float32)
    div = np.exp(np.arange(0, d_model, 2).astype(np.float32) * -(math.log(10000.0) / d_model))
    pe = np.zeros((max_len, d_model), dtype=np.float32)
    pe[:, 0::2] = np.sin(pos * div)
    pe[:, 1::2] = np.cos(pos * div)
    return jnp.asarray(pe)


def init_params(key):
    d, dff, v = D_MODEL, DFF, VOCAB
    keys = iter(jax.random.split(key, 16))

    def w(shape, scale=0.02):
        return jax.random.normal(next(keys), shape, jnp.float32) * scale

    # vec32 slab: [W_o biases (0) | LN gammas (1) | LN betas (0) | FFN b2 (0)]
    vec32 = jnp.concatenate([
        jnp.zeros((N_ATT, 1, d), jnp.float32),
        jnp.ones((N_LN, 1, d), jnp.float32),
        jnp.zeros((N_LN, 1, d), jnp.float32),
        jnp.zeros((N_FFN, 1, d), jnp.float32),
    ], axis=0)
    assert vec32.shape[0] == N_VEC32

    return dict(
        emb=w((2, v, d), 1.0),                                   # [src_embed, tgt_embed]
        pe=positional_encoding_table(MAX_LEN, d),
        att_qkv_w=w((N_ATT, d, 3 * d)),                          # Wq|Wk|Wv fused per block
        att_qkv_b=jnp.zeros((N_ATT, 1, 3 * d), jnp.float32),
        att_o_w=w((N_ATT, d, d)),
        ffn_w1=w((N_FFN, d, dff)),
        ffn_b1=jnp.zeros((N_FFN, 1, dff), jnp.float32),
        ffn_w2=w((N_FFN, dff, d)),
        vec32=vec32,
        gen_w=w((d, v)),
        gen_b=jnp.zeros((1, v), jnp.float32),
    )


_PARAM_ORDER = ("emb", "pe", "att_qkv_w", "att_qkv_b", "att_o_w",
                "ffn_w1", "ffn_b1", "ffn_w2", "vec32", "gen_w", "gen_b")


def transformer_forward(params, src_tokens, src_pos, tgt_tokens, tgt_pos):
    B, Ls = src_tokens.shape
    _, Lt = tgt_tokens.shape

    # Fold the batch into the row (sublane) dimension: one grid step, one DMA prologue,
    # all weights VMEM-resident as full blocks.
    ids = (src_tokens.reshape(B * Ls, 1).astype(jnp.int32),
           src_pos.reshape(B * Ls, 1).astype(jnp.int32),
           tgt_tokens.reshape(B * Lt, 1).astype(jnp.int32),
           tgt_pos.reshape(B * Lt, 1).astype(jnp.int32))
    weights = tuple(params[name] for name in _PARAM_ORDER)
    inputs = ids + weights

    def full_block(a):
        nd = a.ndim
        return pl.BlockSpec(a.shape, lambda i, _nd=nd: (0,) * _nd)

    out = pl.pallas_call(
        functools.partial(_transformer_kernel, B=B, Ls=Ls, Lt=Lt),
        out_shape=jax.ShapeDtypeStruct((B * Lt, VOCAB), jnp.float32),
        grid=(1,),                                   # single step: no megacore split,
        in_specs=[full_block(a) for a in inputs],    # no duplicated weight DMA prologue
        out_specs=pl.BlockSpec((B * Lt, VOCAB), lambda i: (0, 0)),
        compiler_params=pltpu.CompilerParams(dimension_semantics=("arbitrary",)),
    )(*inputs)
    return out


# ----------------------------- main -----------------------------
if __name__ == "__main__":
    key = jax.random.PRNGKey(0)
    kp, ks, kt = jax.random.split(key, 3)
    params = init_params(kp)

    B, Ls, Lt = 2, 8, 8
    src_tokens = jax.random.randint(ks, (B, Ls), 0, VOCAB)
    tgt_tokens = jax.random.randint(kt, (B, Lt), 0, VOCAB)
    src_pos = jnp.tile(jnp.arange(Ls, dtype=jnp.int32)[None], (B, 1))
    tgt_pos = jnp.tile(jnp.arange(Lt, dtype=jnp.int32)[None], (B, 1))

    fwd = jax.jit(transformer_forward)
    out = jax.block_until_ready(fwd(params, src_tokens, src_pos, tgt_tokens, tgt_pos))
    assert out.shape == (B * Lt, VOCAB), out.shape
    assert bool(jnp.all(jnp.isfinite(out)))
    print("KERNEL_OK")
</pallas_src>

<mosaic_0001>
module attributes {stable_mosaic.version = 11 : i64} {
  func.func @_transformer_kernel(%arg0: i32, %arg1: memref<16x1xi32, #tpu.memory_space<vmem>>, %arg2: memref<16x1xi32, #tpu.memory_space<vmem>>, %arg3: memref<16x1xi32, #tpu.memory_space<vmem>>, %arg4: memref<16x1xi32, #tpu.memory_space<vmem>>, %arg5: memref<2x16x32xf32, #tpu.memory_space<vmem>>, %arg6: memref<32x32xf32, #tpu.memory_space<vmem>>, %arg7: memref<6x32x96xf32, #tpu.memory_space<vmem>>, %arg8: memref<6x1x96xf32, #tpu.memory_space<vmem>>, %arg9: memref<6x32x32xf32, #tpu.memory_space<vmem>>, %arg10: memref<4x32x64xf32, #tpu.memory_space<vmem>>, %arg11: memref<4x1x64xf32, #tpu.memory_space<vmem>>, %arg12: memref<4x64x32xf32, #tpu.memory_space<vmem>>, %arg13: memref<34x1x32xf32, #tpu.memory_space<vmem>>, %arg14: memref<32x16xf32, #tpu.memory_space<vmem>>, %arg15: memref<1x16xf32, #tpu.memory_space<vmem>>, %arg16: memref<16x16xf32, #tpu.memory_space<vmem>>) attributes {dimension_semantics = [#tpu.dimension_semantics<arbitrary>], iteration_bounds = array<i64: 1>, scalar_prefetch = 0 : i64, scratch_operands = 0 : i64, tpu.core_type = #tpu.core_type<tc>, window_params = [{pipeline_mode = #tpu.pipeline_mode<synchronous>, transform_indices = @transform_0, window_bounds = array<i64: 16, 1>}, {pipeline_mode = #tpu.pipeline_mode<synchronous>, transform_indices = @transform_1, window_bounds = array<i64: 16, 1>}, {pipeline_mode = #tpu.pipeline_mode<synchronous>, transform_indices = @transform_2, window_bounds = array<i64: 16, 1>}, {pipeline_mode = #tpu.pipeline_mode<synchronous>, transform_indices = @transform_3, window_bounds = array<i64: 16, 1>}, {pipeline_mode = #tpu.pipeline_mode<synchronous>, transform_indices = @transform_4, window_bounds = array<i64: 2, 16, 32>}, {pipeline_mode = #tpu.pipeline_mode<synchronous>, transform_indices = @transform_5, window_bounds = array<i64: 32, 32>}, {pipeline_mode = #tpu.pipeline_mode<synchronous>, transform_indices = @transform_6, window_bounds = array<i64: 6, 32, 96>}, {pipeline_mode = #tpu.pipeline_mode<synchronous>, transform_indices = @transform_7, window_bounds = array<i64: 6, 1, 96>}, {pipeline_mode = #tpu.pipeline_mode<synchronous>, transform_indices = @transform_8, window_bounds = array<i64: 6, 32, 32>}, {pipeline_mode = #tpu.pipeline_mode<synchronous>, transform_indices = @transform_9, window_bounds = array<i64: 4, 32, 64>}, {pipeline_mode = #tpu.pipeline_mode<synchronous>, transform_indices = @transform_10, window_bounds = array<i64: 4, 1, 64>}, {pipeline_mode = #tpu.pipeline_mode<synchronous>, transform_indices = @transform_11, window_bounds = array<i64: 4, 64, 32>}, {pipeline_mode = #tpu.pipeline_mode<synchronous>, transform_indices = @transform_12, window_bounds = array<i64: 34, 1, 32>}, {pipeline_mode = #tpu.pipeline_mode<synchronous>, transform_indices = @transform_13, window_bounds = array<i64: 32, 16>}, {pipeline_mode = #tpu.pipeline_mode<synchronous>, transform_indices = @transform_14, window_bounds = array<i64: 1, 16>}, {pipeline_mode = #tpu.pipeline_mode<synchronous>, transform_indices = @transform_15, window_bounds = array<i64: 16, 16>}]} {
    %c0 = arith.constant 0 : index
    %c0_0 = arith.constant 0 : index
    %0 = vector.load %arg1[%c0, %c0_0] : memref<16x1xi32, #tpu.memory_space<vmem>>, vector<16x1xi32>
    %c0_1 = arith.constant 0 : index
    %c0_2 = arith.constant 0 : index
    %1 = vector.load %arg2[%c0_1, %c0_2] : memref<16x1xi32, #tpu.memory_space<vmem>>, vector<16x1xi32>
    %c0_3 = arith.constant 0 : index
    %c0_4 = arith.constant 0 : index
    %c0_5 = arith.constant 0 : index
    %2 = vector.load %arg5[%c0_3, %c0_4, %c0_5] : memref<2x16x32xf32, #tpu.memory_space<vmem>>, vector<1x16x32xf32>
    %3 = vector.shape_cast %2 : vector<1x16x32xf32> to vector<16x32xf32>
    %4 = tpu.iota {dimensions = array<i32: 1>} : vector<16x16xi32>
    %5 = vector.broadcast %0 : vector<16x1xi32> to vector<16x16xi32>
    %6 = arith.cmpi eq, %5, %4 : vector<16x16xi32>
    %7 = arith.extui %6 : vector<16x16xi1> to vector<16x16xi32>
    %8 = arith.sitofp %7 : vector<16x16xi32> to vector<16x16xf32>
    %9 = tpu.iota {dimensions = array<i32: 1>} : vector<16x32xi32>
    %10 = vector.broadcast %1 : vector<16x1xi32> to vector<16x32xi32>
    %11 = arith.cmpi eq, %10, %9 : vector<16x32xi32>
    %12 = arith.extui %11 : vector<16x32xi1> to vector<16x32xi32>
    %13 = arith.sitofp %12 : vector<16x32xi32> to vector<16x32xf32>
    %cst = arith.constant dense<0.000000e+00> : vector<16x32xf32>
    %14 = tpu.matmul %8, %3, %cst {dimension_numbers = #tpu.dot_dimension_numbers<[1], [0], [0], [1], [0, 0, 1, 1], [], []>} : vector<16x16xf32>, vector<16x32xf32>, vector<16x32xf32> -> vector<16x32xf32>
    %cst_6 = arith.constant 5.65685415 : f32
    %15 = vector.broadcast %cst_6 : f32 to vector<16x32xf32>
    %16 = arith.mulf %14, %15 : vector<16x32xf32>
    %c0_7 = arith.constant 0 : index
    %c0_8 = arith.constant 0 : index
    %17 = vector.load %arg6[%c0_7, %c0_8] : memref<32x32xf32, #tpu.memory_space<vmem>>, vector<32x32xf32>
    %cst_9 = arith.constant dense<0.000000e+00> : vector<16x32xf32>
    %18 = tpu.matmul %13, %17, %cst_9 {dimension_numbers = #tpu.dot_dimension_numbers<[1], [0], [0], [1], [0, 0, 1, 1], [], []>} : vector<16x32xf32>, vector<32x32xf32>, vector<16x32xf32> -> vector<16x32xf32>
    %19 = arith.addf %16, %18 : vector<16x32xf32>
    %c0_10 = arith.constant 0 : index
    %c0_11 = arith.constant 0 : index
    %20 = vector.load %arg3[%c0_10, %c0_11] : memref<16x1xi32, #tpu.memory_space<vmem>>, vector<16x1xi32>
    %c0_12 = arith.constant 0 : index
    %c0_13 = arith.constant 0 : index
    %21 = vector.load %arg4[%c0_12, %c0_13] : memref<16x1xi32, #tpu.memory_space<vmem>>, vector<16x1xi32>
    %c1 = arith.constant 1 : index
    %c0_14 = arith.constant 0 : index
    %c0_15 = arith.constant 0 : index
    %22 = vector.load %arg5[%c1, %c0_14, %c0_15] : memref<2x16x32xf32, #tpu.memory_space<vmem>>, vector<1x16x32xf32>
    %23 = vector.shape_cast %22 : vector<1x16x32xf32> to vector<16x32xf32>
    %24 = tpu.iota {dimensions = array<i32: 1>} : vector<16x16xi32>
    %25 = vector.broadcast %20 : vector<16x1xi32> to vector<16x16xi32>
    %26 = arith.cmpi eq, %25, %24 : vector<16x16xi32>
    %27 = arith.extui %26 : vector<16x16xi1> to vector<16x16xi32>
    %28 = arith.sitofp %27 : vector<16x16xi32> to vector<16x16xf32>
    %29 = tpu.iota {dimensions = array<i32: 1>} : vector<16x32xi32>
    %30 = vector.broadcast %21 : vector<16x1xi32> to vector<16x32xi32>
    %31 = arith.cmpi eq, %30, %29 : vector<16x32xi32>
    %32 = arith.extui %31 : vector<16x32xi1> to vector<16x32xi32>
    %33 = arith.sitofp %32 : vector<16x32xi32> to vector<16x32xf32>
    %cst_16 = arith.constant dense<0.000000e+00> : vector<16x32xf32>
    %34 = tpu.matmul %28, %23, %cst_16 {dimension_numbers = #tpu.dot_dimension_numbers<[1], [0], [0], [1], [0, 0, 1, 1], [], []>} : vector<16x16xf32>, vector<16x32xf32>, vector<16x32xf32> -> vector<16x32xf32>
    %cst_17 = arith.constant 5.65685415 : f32
    %35 = vector.broadcast %cst_17 : f32 to vector<16x32xf32>
    %36 = arith.mulf %34, %35 : vector<16x32xf32>
    %c0_18 = arith.constant 0 : index
    %c0_19 = arith.constant 0 : index
    %37 = vector.load %arg6[%c0_18, %c0_19] : memref<32x32xf32, #tpu.memory_space<vmem>>, vector<32x32xf32>
    %cst_20 = arith.constant dense<0.000000e+00> : vector<16x32xf32>
    %38 = tpu.matmul %33, %37, %cst_20 {dimension_numbers = #tpu.dot_dimension_numbers<[1], [0], [0], [1], [0, 0, 1, 1], [], []>} : vector<16x32xf32>, vector<32x32xf32>, vector<16x32xf32> -> vector<16x32xf32>
    %39 = arith.addf %36, %38 : vector<16x32xf32>
    %40 = tpu.iota {dimensions = array<i32: 0>} : vector<16x16xi32>
    %41 = tpu.iota {dimensions = array<i32: 1>} : vector<16x16xi32>
    %c0_i32 = arith.constant 0 : i32
    %42 = vector.broadcast %c0_i32 : i32 to vector<16x16xi32>
    %43 = arith.cmpi sge, %40, %42 : vector<16x16xi32>
    %c8_i32 = arith.constant 8 : i32
    %44 = vector.broadcast %c8_i32 : i32 to vector<16x16xi32>
    %45 = arith.cmpi slt, %40, %44 : vector<16x16xi32>
    %46 = arith.andi %43, %45 : vector<16x16xi1>
    %c0_i32_21 = arith.constant 0 : i32
    %47 = vector.broadcast %c0_i32_21 : i32 to vector<16x16xi32>
    %48 = arith.cmpi sge, %41, %47 : vector<16x16xi32>
    %49 = arith.andi %46, %48 : vector<16x16xi1>
    %c8_i32_22 = arith.constant 8 : i32
    %50 = vector.broadcast %c8_i32_22 : i32 to vector<16x16xi32>
    %51 = arith.cmpi slt, %41, %50 : vector<16x16xi32>
    %52 = arith.andi %49, %51 : vector<16x16xi1>
    %c8_i32_23 = arith.constant 8 : i32
    %53 = vector.broadcast %c8_i32_23 : i32 to vector<16x16xi32>
    %54 = arith.cmpi sge, %40, %53 : vector<16x16xi32>
    %c16_i32 = arith.constant 16 : i32
    %55 = vector.broadcast %c16_i32 : i32 to vector<16x16xi32>
    %56 = arith.cmpi slt, %40, %55 : vector<16x16xi32>
    %57 = arith.andi %54, %56 : vector<16x16xi1>
    %c8_i32_24 = arith.constant 8 : i32
    %58 = vector.broadcast %c8_i32_24 : i32 to vector<16x16xi32>
    %59 = arith.cmpi sge, %41, %58 : vector<16x16xi32>
    %60 = arith.andi %57, %59 : vector<16x16xi1>
    %c16_i32_25 = arith.constant 16 : i32
    %61 = vector.broadcast %c16_i32_25 : i32 to vector<16x16xi32>
    %62 = arith.cmpi slt, %41, %61 : vector<16x16xi32>
    %63 = arith.andi %60, %62 : vector<16x16xi1>
    %64 = arith.ori %52, %63 : vector<16x16xi1>
    %65 = arith.extui %64 : vector<16x16xi1> to vector<16x16xi32>
    %66 = arith.sitofp %65 : vector<16x16xi32> to vector<16x16xf32>
    %67 = tpu.iota {dimensions = array<i32: 0>} : vector<16x16xi32>
    %68 = tpu.iota {dimensions = array<i32: 1>} : vector<16x16xi32>
    %c0_i32_26 = arith.constant 0 : i32
    %69 = vector.broadcast %c0_i32_26 : i32 to vector<16x16xi32>
    %70 = arith.cmpi sge, %67, %69 : vector<16x16xi32>
    %c8_i32_27 = arith.constant 8 : i32
    %71 = vector.broadcast %c8_i32_27 : i32 to vector<16x16xi32>
    %72 = arith.cmpi slt, %67, %71 : vector<16x16xi32>
    %73 = arith.andi %70, %72 : vector<16x16xi1>
    %c0_i32_28 = arith.constant 0 : i32
    %74 = vector.broadcast %c0_i32_28 : i32 to vector<16x16xi32>
    %75 = arith.cmpi sge, %68, %74 : vector<16x16xi32>
    %76 = arith.andi %73, %75 : vector<16x16xi1>
    %c8_i32_29 = arith.constant 8 : i32
    %77 = vector.broadcast %c8_i32_29 : i32 to vector<16x16xi32>
    %78 = arith.cmpi slt, %68, %77 : vector<16x16xi32>
    %79 = arith.andi %76, %78 : vector<16x16xi1>
    %c0_i32_30 = arith.constant 0 : i32
    %80 = vector.broadcast %c0_i32_30 : i32 to vector<16x16xi32>
    %81 = arith.subi %68, %80 : vector<16x16xi32>
    %c0_i32_31 = arith.constant 0 : i32
    %82 = vector.broadcast %c0_i32_31 : i32 to vector<16x16xi32>
    %83 = arith.subi %67, %82 : vector<16x16xi32>
    %84 = arith.cmpi sle, %81, %83 : vector<16x16xi32>
    %85 = arith.andi %79, %84 : vector<16x16xi1>
    %c8_i32_32 = arith.constant 8 : i32
    %86 = vector.broadcast %c8_i32_32 : i32 to vector<16x16xi32>
    %87 = arith.cmpi sge, %67, %86 : vector<16x16xi32>
    %c16_i32_33 = arith.constant 16 : i32
    %88 = vector.broadcast %c16_i32_33 : i32 to vector<16x16xi32>
    %89 = arith.cmpi slt, %67, %88 : vector<16x16xi32>
    %90 = arith.andi %87, %89 : vector<16x16xi1>
    %c8_i32_34 = arith.constant 8 : i32
    %91 = vector.broadcast %c8_i32_34 : i32 to vector<16x16xi32>
    %92 = arith.cmpi sge, %68, %91 : vector<16x16xi32>
    %93 = arith.andi %90, %92 : vector<16x16xi1>
    %c16_i32_35 = arith.constant 16 : i32
    %94 = vector.broadcast %c16_i32_35 : i32 to vector<16x16xi32>
    %95 = arith.cmpi slt, %68, %94 : vector<16x16xi32>
    %96 = arith.andi %93, %95 : vector<16x16xi1>
    %c8_i32_36 = arith.constant 8 : i32
    %97 = vector.broadcast %c8_i32_36 : i32 to vector<16x16xi32>
    %98 = arith.subi %68, %97 : vector<16x16xi32>
    %c8_i32_37 = arith.constant 8 : i32
    %99 = vector.broadcast %c8_i32_37 : i32 to vector<16x16xi32>
    %100 = arith.subi %67, %99 : vector<16x16xi32>
    %101 = arith.cmpi sle, %98, %100 : vector<16x16xi32>
    %102 = arith.andi %96, %101 : vector<16x16xi1>
    %103 = arith.ori %85, %102 : vector<16x16xi1>
    %104 = arith.extui %103 : vector<16x16xi1> to vector<16x16xi32>
    %105 = arith.sitofp %104 : vector<16x16xi32> to vector<16x16xf32>
    %106 = tpu.iota {dimensions = array<i32: 0>} : vector<16x16xi32>
    %107 = tpu.iota {dimensions = array<i32: 1>} : vector<16x16xi32>
    %c0_i32_38 = arith.constant 0 : i32
    %108 = vector.broadcast %c0_i32_38 : i32 to vector<16x16xi32>
    %109 = arith.cmpi sge, %106, %108 : vector<16x16xi32>
    %c8_i32_39 = arith.constant 8 : i32
    %110 = vector.broadcast %c8_i32_39 : i32 to vector<16x16xi32>
    %111 = arith.cmpi slt, %106, %110 : vector<16x16xi32>
    %112 = arith.andi %109, %111 : vector<16x16xi1>
    %c0_i32_40 = arith.constant 0 : i32
    %113 = vector.broadcast %c0_i32_40 : i32 to vector<16x16xi32>
    %114 = arith.cmpi sge, %107, %113 : vector<16x16xi32>
    %115 = arith.andi %112, %114 : vector<16x16xi1>
    %c8_i32_41 = arith.constant 8 : i32
    %116 = vector.broadcast %c8_i32_41 : i32 to vector<16x16xi32>
    %117 = arith.cmpi slt, %107, %116 : vector<16x16xi32>
    %118 = arith.andi %115, %117 : vector<16x16xi1>
    %c8_i32_42 = arith.constant 8 : i32
    %119 = vector.broadcast %c8_i32_42 : i32 to vector<16x16xi32>
    %120 = arith.cmpi sge, %106, %119 : vector<16x16xi32>
    %c16_i32_43 = arith.constant 16 : i32
    %121 = vector.broadcast %c16_i32_43 : i32 to vector<16x16xi32>
    %122 = arith.cmpi slt, %106, %121 : vector<16x16xi32>
    %123 = arith.andi %120, %122 : vector<16x16xi1>
    %c8_i32_44 = arith.constant 8 : i32
    %124 = vector.broadcast %c8_i32_44 : i32 to vector<16x16xi32>
    %125 = arith.cmpi sge, %107, %124 : vector<16x16xi32>
    %126 = arith.andi %123, %125 : vector<16x16xi1>
    %c16_i32_45 = arith.constant 16 : i32
    %127 = vector.broadcast %c16_i32_45 : i32 to vector<16x16xi32>
    %128 = arith.cmpi slt, %107, %127 : vector<16x16xi32>
    %129 = arith.andi %126, %128 : vector<16x16xi1>
    %130 = arith.ori %118, %129 : vector<16x16xi1>
    %131 = arith.extui %130 : vector<16x16xi1> to vector<16x16xi32>
    %132 = arith.sitofp %131 : vector<16x16xi32> to vector<16x16xf32>
    %c6 = arith.constant 6 : index
    %c0_46 = arith.constant 0 : index
    %c0_47 = arith.constant 0 : index
    %133 = vector.load %arg13[%c6, %c0_46, %c0_47] : memref<34x1x32xf32, #tpu.memory_space<vmem>>, vector<1x1x32xf32>
    %134 = vector.shape_cast %133 : vector<1x1x32xf32> to vector<1x32xf32>
    %c18 = arith.constant 18 : index
    %c0_48 = arith.constant 0 : index
    %c0_49 = arith.constant 0 : index
    %135 = vector.load %arg13[%c18, %c0_48, %c0_49] : memref<34x1x32xf32, #tpu.memory_space<vmem>>, vector<1x1x32xf32>
    %136 = vector.shape_cast %135 : vector<1x1x32xf32> to vector<1x32xf32>
    %cst_50 = arith.constant dense<0.000000e+00> : vector<16xf32>
    %137 = vector.multi_reduction <add>, %19, %cst_50 [1] : vector<16x32xf32> to vector<16xf32>
    %138 = vector.shape_cast %137 : vector<16xf32> to vector<16x1xf32>
    %cst_51 = arith.constant 3.200000e+01 : f32
    %139 = vector.broadcast %cst_51 : f32 to vector<16x1xf32>
    %140 = arith.divf %138, %139 : vector<16x1xf32>
    %141 = vector.broadcast %140 : vector<16x1xf32> to vector<16x32xf32>
    %142 = arith.subf %19, %141 : vector<16x32xf32>
    %143 = arith.mulf %142, %142 : vector<16x32xf32>
    %cst_52 = arith.constant dense<0.000000e+00> : vector<16xf32>
    %144 = vector.multi_reduction <add>, %143, %cst_52 [1] : vector<16x32xf32> to vector<16xf32>
    %145 = vector.shape_cast %144 : vector<16xf32> to vector<16x1xf32>
    %cst_53 = arith.constant 3.200000e+01 : f32
    %146 = vector.broadcast %cst_53 : f32 to vector<16x1xf32>
    %147 = arith.divf %145, %146 : vector<16x1xf32>
    %148 = vector.broadcast %140 : vector<16x1xf32> to vector<16x32xf32>
    %149 = arith.subf %19, %148 : vector<16x32xf32>
    %cst_54 = arith.constant 9.99999974E-6 : f32
    %150 = vector.broadcast %cst_54 : f32 to vector<16x1xf32>
    %151 = arith.addf %147, %150 : vector<16x1xf32>
    %152 = math.rsqrt %151 : vector<16x1xf32>
    %153 = vector.broadcast %152 : vector<16x1xf32> to vector<16x32xf32>
    %154 = arith.mulf %149, %153 : vector<16x32xf32>
    %155 = vector.broadcast %134 : vector<1x32xf32> to vector<16x32xf32>
    %156 = arith.mulf %154, %155 : vector<16x32xf32>
    %157 = vector.broadcast %136 : vector<1x32xf32> to vector<16x32xf32>
    %158 = arith.addf %156, %157 : vector<16x32xf32>
    %c0_55 = arith.constant 0 : index
    %c0_56 = arith.constant 0 : index
    %c0_57 = arith.constant 0 : index
    %159 = vector.load %arg7[%c0_55, %c0_56, %c0_57] : memref<6x32x96xf32, #tpu.memory_space<vmem>>, vector<1x32x96xf32>
    %160 = vector.shape_cast %159 : vector<1x32x96xf32> to vector<32x96xf32>
    %c0_58 = arith.constant 0 : index
    %c0_59 = arith.constant 0 : index
    %c0_60 = arith.constant 0 : index
    %161 = vector.load %arg8[%c0_58, %c0_59, %c0_60] : memref<6x1x96xf32, #tpu.memory_space<vmem>>, vector<1x1x96xf32>
    %162 = vector.shape_cast %161 : vector<1x1x96xf32> to vector<1x96xf32>
    %cst_61 = arith.constant dense<0.000000e+00> : vector<16x96xf32>
    %163 = tpu.matmul %158, %160, %cst_61 {dimension_numbers = #tpu.dot_dimension_numbers<[1], [0], [0], [1], [0, 0, 1, 1], [], []>} : vector<16x32xf32>, vector<32x96xf32>, vector<16x96xf32> -> vector<16x96xf32>
    %164 = vector.broadcast %162 : vector<1x96xf32> to vector<16x96xf32>
    %165 = arith.addf %163, %164 : vector<16x96xf32>
    %166 = vector.extract_strided_slice %165 {offsets = [0, 0], sizes = [16, 32], strides = [1, 1]} : vector<16x96xf32> to vector<16x32xf32>
    %167 = vector.extract_strided_slice %165 {offsets = [0, 32], sizes = [16, 32], strides = [1, 1]} : vector<16x96xf32> to vector<16x32xf32>
    %168 = vector.extract_strided_slice %165 {offsets = [0, 64], sizes = [16, 32], strides = [1, 1]} : vector<16x96xf32> to vector<16x32xf32>
    %169 = vector.extract_strided_slice %166 {offsets = [0, 0], sizes = [16, 8], strides = [1, 1]} : vector<16x32xf32> to vector<16x8xf32>
    %170 = vector.extract_strided_slice %167 {offsets = [0, 0], sizes = [16, 8], strides = [1, 1]} : vector<16x32xf32> to vector<16x8xf32>
    %171 = vector.extract_strided_slice %168 {offsets = [0, 0], sizes = [16, 8], strides = [1, 1]} : vector<16x32xf32> to vector<16x8xf32>
    %cst_62 = arith.constant dense<0.000000e+00> : vector<16x16xf32>
    %172 = tpu.matmul %169, %170, %cst_62 {dimension_numbers = #tpu.dot_dimension_numbers<[1], [1], [0], [0], [0, 0, 1, 0], [], []>} : vector<16x8xf32>, vector<16x8xf32>, vector<16x16xf32> -> vector<16x16xf32>
    %cst_63 = arith.constant 0.353553385 : f32
    %173 = vector.broadcast %cst_63 : f32 to vector<16x16xf32>
    %174 = arith.mulf %172, %173 : vector<16x16xf32>
    %cst_64 = arith.constant -1.000000e+01 : f32
    %cst_65 = arith.constant 1.000000e+01 : f32
    %175 = vector.broadcast %cst_64 : f32 to vector<16x16xf32>
    %176 = arith.maximumf %175, %174 : vector<16x16xf32>
    %177 = vector.broadcast %cst_65 : f32 to vector<16x16xf32>
    %178 = arith.minimumf %177, %176 : vector<16x16xf32>
    %179 = math.exp %178 : vector<16x16xf32>
    %180 = arith.mulf %179, %66 : vector<16x16xf32>
    %cst_66 = arith.constant dense<0.000000e+00> : vector<16xf32>
    %181 = vector.multi_reduction <add>, %180, %cst_66 [1] : vector<16x16xf32> to vector<16xf32>
    %182 = vector.shape_cast %181 : vector<16xf32> to vector<16x1xf32>
    %cst_67 = arith.constant dense<0.000000e+00> : vector<16x8xf32>
    %183 = tpu.matmul %180, %171, %cst_67 {dimension_numbers = #tpu.dot_dimension_numbers<[1], [0], [0], [1], [0, 0, 1, 1], [], []>} : vector<16x16xf32>, vector<16x8xf32>, vector<16x8xf32> -> vector<16x8xf32>
    %184 = tpu.reciprocal %182 {approx = true} : vector<16x1xf32> -> vector<16x1xf32>
    %185 = vector.broadcast %184 : vector<16x1xf32> to vector<16x8xf32>
    %186 = arith.mulf %183, %185 : vector<16x8xf32>
    %187 = vector.extract_strided_slice %166 {offsets = [0, 8], sizes = [16, 8], strides = [1, 1]} : vector<16x32xf32> to vector<16x8xf32>
    %188 = vector.extract_strided_slice %167 {offsets = [0, 8], sizes = [16, 8], strides = [1, 1]} : vector<16x32xf32> to vector<16x8xf32>
    %189 = vector.extract_strided_slice %168 {offsets = [0, 8], sizes = [16, 8], strides = [1, 1]} : vector<16x32xf32> to vector<16x8xf32>
    %cst_68 = arith.constant dense<0.000000e+00> : vector<16x16xf32>
    %190 = tpu.matmul %187, %188, %cst_68 {dimension_numbers = #tpu.dot_dimension_numbers<[1], [1], [0], [0], [0, 0, 1, 0], [], []>} : vector<16x8xf32>, vector<16x8xf32>, vector<16x16xf32> -> vector<16x16xf32>
    %cst_69 = arith.constant 0.353553385 : f32
    %191 = vector.broadcast %cst_69 : f32 to vector<16x16xf32>
    %192 = arith.mulf %190, %191 : vector<16x16xf32>
    %cst_70 = arith.constant -1.000000e+01 : f32
    %cst_71 = arith.constant 1.000000e+01 : f32
    %193 = vector.broadcast %cst_70 : f32 to vector<16x16xf32>
    %194 = arith.maximumf %193, %192 : vector<16x16xf32>
    %195 = vector.broadcast %cst_71 : f32 to vector<16x16xf32>
    %196 = arith.minimumf %195, %194 : vector<16x16xf32>
    %197 = math.exp %196 : vector<16x16xf32>
    %198 = arith.mulf %197, %66 : vector<16x16xf32>
    %cst_72 = arith.constant dense<0.000000e+00> : vector<16xf32>
    %199 = vector.multi_reduction <add>, %198, %cst_72 [1] : vector<16x16xf32> to vector<16xf32>
    %200 = vector.shape_cast %199 : vector<16xf32> to vector<16x1xf32>
    %cst_73 = arith.constant dense<0.000000e+00> : vector<16x8xf32>
    %201 = tpu.matmul %198, %189, %cst_73 {dimension_numbers = #tpu.dot_dimension_numbers<[1], [0], [0], [1], [0, 0, 1, 1], [], []>} : vector<16x16xf32>, vector<16x8xf32>, vector<16x8xf32> -> vector<16x8xf32>
    %202 = tpu.reciprocal %200 {approx = true} : vector<16x1xf32> -> vector<16x1xf32>
    %203 = vector.broadcast %202 : vector<16x1xf32> to vector<16x8xf32>
    %204 = arith.mulf %201, %203 : vector<16x8xf32>
    %205 = vector.extract_strided_slice %166 {offsets = [0, 16], sizes = [16, 8], strides = [1, 1]} : vector<16x32xf32> to vector<16x8xf32>
    %206 = vector.extract_strided_slice %167 {offsets = [0, 16], sizes = [16, 8], strides = [1, 1]} : vector<16x32xf32> to vector<16x8xf32>
    %207 = vector.extract_strided_slice %168 {offsets = [0, 16], sizes = [16, 8], strides = [1, 1]} : vector<16x32xf32> to vector<16x8xf32>
    %cst_74 = arith.constant dense<0.000000e+00> : vector<16x16xf32>
    %208 = tpu.matmul %205, %206, %cst_74 {dimension_numbers = #tpu.dot_dimension_numbers<[1], [1], [0], [0], [0, 0, 1, 0], [], []>} : vector<16x8xf32>, vector<16x8xf32>, vector<16x16xf32> -> vector<16x16xf32>
    %cst_75 = arith.constant 0.353553385 : f32
    %209 = vector.broadcast %cst_75 : f32 to vector<16x16xf32>
    %210 = arith.mulf %208, %209 : vector<16x16xf32>
    %cst_76 = arith.constant -1.000000e+01 : f32
    %cst_77 = arith.constant 1.000000e+01 : f32
    %211 = vector.broadcast %cst_76 : f32 to vector<16x16xf32>
    %212 = arith.maximumf %211, %210 : vector<16x16xf32>
    %213 = vector.broadcast %cst_77 : f32 to vector<16x16xf32>
    %214 = arith.minimumf %213, %212 : vector<16x16xf32>
    %215 = math.exp %214 : vector<16x16xf32>
    %216 = arith.mulf %215, %66 : vector<16x16xf32>
    %cst_78 = arith.constant dense<0.000000e+00> : vector<16xf32>
    %217 = vector.multi_reduction <add>, %216, %cst_78 [1] : vector<16x16xf32> to vector<16xf32>
    %218 = vector.shape_cast %217 : vector<16xf32> to vector<16x1xf32>
    %cst_79 = arith.constant dense<0.000000e+00> : vector<16x8xf32>
    %219 = tpu.matmul %216, %207, %cst_79 {dimension_numbers = #tpu.dot_dimension_numbers<[1], [0], [0], [1], [0, 0, 1, 1], [], []>} : vector<16x16xf32>, vector<16x8xf32>, vector<16x8xf32> -> vector<16x8xf32>
    %220 = tpu.reciprocal %218 {approx = true} : vector<16x1xf32> -> vector<16x1xf32>
    %221 = vector.broadcast %220 : vector<16x1xf32> to vector<16x8xf32>
    %222 = arith.mulf %219, %221 : vector<16x8xf32>
    %223 = vector.extract_strided_slice %166 {offsets = [0, 24], sizes = [16, 8], strides = [1, 1]} : vector<16x32xf32> to vector<16x8xf32>
    %224 = vector.extract_strided_slice %167 {offsets = [0, 24], sizes = [16, 8], strides = [1, 1]} : vector<16x32xf32> to vector<16x8xf32>
    %225 = vector.extract_strided_slice %168 {offsets = [0, 24], sizes = [16, 8], strides = [1, 1]} : vector<16x32xf32> to vector<16x8xf32>
    %cst_80 = arith.constant dense<0.000000e+00> : vector<16x16xf32>
    %226 = tpu.matmul %223, %224, %cst_80 {dimension_numbers = #tpu.dot_dimension_numbers<[1], [1], [0], [0], [0, 0, 1, 0], [], []>} : vector<16x8xf32>, vector<16x8xf32>, vector<16x16xf32> -> vector<16x16xf32>
    %cst_81 = arith.constant 0.353553385 : f32
    %227 = vector.broadcast %cst_81 : f32 to vector<16x16xf32>
    %228 = arith.mulf %226, %227 : vector<16x16xf32>
    %cst_82 = arith.constant -1.000000e+01 : f32
    %cst_83 = arith.constant 1.000000e+01 : f32
    %229 = vector.broadcast %cst_82 : f32 to vector<16x16xf32>
    %230 = arith.maximumf %229, %228 : vector<16x16xf32>
    %231 = vector.broadcast %cst_83 : f32 to vector<16x16xf32>
    %232 = arith.minimumf %231, %230 : vector<16x16xf32>
    %233 = math.exp %232 : vector<16x16xf32>
    %234 = arith.mulf %233, %66 : vector<16x16xf32>
    %cst_84 = arith.constant dense<0.000000e+00> : vector<16xf32>
    %235 = vector.multi_reduction <add>, %234, %cst_84 [1] : vector<16x16xf32> to vector<16xf32>
    %236 = vector.shape_cast %235 : vector<16xf32> to vector<16x1xf32>
    %cst_85 = arith.constant dense<0.000000e+00> : vector<16x8xf32>
    %237 = tpu.matmul %234, %225, %cst_85 {dimension_numbers = #tpu.dot_dimension_numbers<[1], [0], [0], [1], [0, 0, 1, 1], [], []>} : vector<16x16xf32>, vector<16x8xf32>, vector<16x8xf32> -> vector<16x8xf32>
    %238 = tpu.reciprocal %236 {approx = true} : vector<16x1xf32> -> vector<16x1xf32>
    %239 = vector.broadcast %238 : vector<16x1xf32> to vector<16x8xf32>
    %240 = arith.mulf %237, %239 : vector<16x8xf32>
    %241 = tpu.concatenate %186, %204, %222, %240 in 1 : vector<16x8xf32>, vector<16x8xf32>, vector<16x8xf32>, vector<16x8xf32> -> vector<16x32xf32>
    %c0_86 = arith.constant 0 : index
    %c0_87 = arith.constant 0 : index
    %c0_88 = arith.constant 0 : index
    %242 = vector.load %arg9[%c0_86, %c0_87, %c0_88] : memref<6x32x32xf32, #tpu.memory_space<vmem>>, vector<1x32x32xf32>
    %243 = vector.shape_cast %242 : vector<1x32x32xf32> to vector<32x32xf32>
    %cst_89 = arith.constant dense<0.000000e+00> : vector<16x32xf32>
    %244 = tpu.matmul %241, %243, %cst_89 {dimension_numbers = #tpu.dot_dimension_numbers<[1], [0], [0], [1], [0, 0, 1, 1], [], []>} : vector<16x32xf32>, vector<32x32xf32>, vector<16x32xf32> -> vector<16x32xf32>
    %c0_90 = arith.constant 0 : index
    %c0_91 = arith.constant 0 : index
    %c0_92 = arith.constant 0 : index
    %245 = vector.load %arg13[%c0_90, %c0_91, %c0_92] : memref<34x1x32xf32, #tpu.memory_space<vmem>>, vector<1x1x32xf32>
    %246 = vector.shape_cast %245 : vector<1x1x32xf32> to vector<1x32xf32>
    %247 = vector.broadcast %246 : vector<1x32xf32> to vector<16x32xf32>
    %248 = arith.addf %244, %247 : vector<16x32xf32>
    %249 = arith.addf %19, %248 : vector<16x32xf32>
    %c7 = arith.constant 7 : index
    %c0_93 = arith.constant 0 : index
    %c0_94 = arith.constant 0 : index
    %250 = vector.load %arg13[%c7, %c0_93, %c0_94] : memref<34x1x32xf32, #tpu.memory_space<vmem>>, vector<1x1x32xf32>
    %251 = vector.shape_cast %250 : vector<1x1x32xf32> to vector<1x32xf32>
    %c19 = arith.constant 19 : index
    %c0_95 = arith.constant 0 : index
    %c0_96 = arith.constant 0 : index
    %252 = vector.load %arg13[%c19, %c0_95, %c0_96] : memref<34x1x32xf32, #tpu.memory_space<vmem>>, vector<1x1x32xf32>
    %253 = vector.shape_cast %252 : vector<1x1x32xf32> to vector<1x32xf32>
    %cst_97 = arith.constant dense<0.000000e+00> : vector<16xf32>
    %254 = vector.multi_reduction <add>, %249, %cst_97 [1] : vector<16x32xf32> to vector<16xf32>
    %255 = vector.shape_cast %254 : vector<16xf32> to vector<16x1xf32>
    %cst_98 = arith.constant 3.200000e+01 : f32
    %256 = vector.broadcast %cst_98 : f32 to vector<16x1xf32>
    %257 = arith.divf %255, %256 : vector<16x1xf32>
    %258 = vector.broadcast %257 : vector<16x1xf32> to vector<16x32xf32>
    %259 = arith.subf %249, %258 : vector<16x32xf32>
    %260 = arith.mulf %259, %259 : vector<16x32xf32>
    %cst_99 = arith.constant dense<0.000000e+00> : vector<16xf32>
    %261 = vector.multi_reduction <add>, %260, %cst_99 [1] : vector<16x32xf32> to vector<16xf32>
    %262 = vector.shape_cast %261 : vector<16xf32> to vector<16x1xf32>
    %cst_100 = arith.constant 3.200000e+01 : f32
    %263 = vector.broadcast %cst_100 : f32 to vector<16x1xf32>
    %264 = arith.divf %262, %263 : vector<16x1xf32>
    %265 = vector.broadcast %257 : vector<16x1xf32> to vector<16x32xf32>
    %266 = arith.subf %249, %265 : vector<16x32xf32>
    %cst_101 = arith.constant 9.99999974E-6 : f32
    %267 = vector.broadcast %cst_101 : f32 to vector<16x1xf32>
    %268 = arith.addf %264, %267 : vector<16x1xf32>
    %269 = math.rsqrt %268 : vector<16x1xf32>
    %270 = vector.broadcast %269 : vector<16x1xf32> to vector<16x32xf32>
    %271 = arith.mulf %266, %270 : vector<16x32xf32>
    %272 = vector.broadcast %251 : vector<1x32xf32> to vector<16x32xf32>
    %273 = arith.mulf %271, %272 : vector<16x32xf32>
    %274 = vector.broadcast %253 : vector<1x32xf32> to vector<16x32xf32>
    %275 = arith.addf %273, %274 : vector<16x32xf32>
    %c0_102 = arith.constant 0 : index
    %c0_103 = arith.constant 0 : index
    %c0_104 = arith.constant 0 : index
    %276 = vector.load %arg10[%c0_102, %c0_103, %c0_104] : memref<4x32x64xf32, #tpu.memory_space<vmem>>, vector<1x32x64xf32>
    %277 = vector.shape_cast %276 : vector<1x32x64xf32> to vector<32x64xf32>
    %cst_105 = arith.constant dense<0.000000e+00> : vector<16x64xf32>
    %278 = tpu.matmul %275, %277, %cst_105 {dimension_numbers = #tpu.dot_dimension_numbers<[1], [0], [0], [1], [0, 0, 1, 1], [], []>} : vector<16x32xf32>, vector<32x64xf32>, vector<16x64xf32> -> vector<16x64xf32>
    %c0_106 = arith.constant 0 : index
    %c0_107 = arith.constant 0 : index
    %c0_108 = arith.constant 0 : index
    %279 = vector.load %arg11[%c0_106, %c0_107, %c0_108] : memref<4x1x64xf32, #tpu.memory_space<vmem>>, vector<1x1x64xf32>
    %280 = vector.shape_cast %279 : vector<1x1x64xf32> to vector<1x64xf32>
    %281 = vector.broadcast %280 : vector<1x64xf32> to vector<16x64xf32>
    %282 = arith.addf %278, %281 : vector<16x64xf32>
    %cst_109 = arith.constant 0.000000e+00 : f32
    %283 = vector.broadcast %cst_109 : f32 to vector<16x64xf32>
    %284 = arith.maximumf %282, %283 : vector<16x64xf32>
    %c0_110 = arith.constant 0 : index
    %c0_111 = arith.constant 0 : index
    %c0_112 = arith.constant 0 : index
    %285 = vector.load %arg12[%c0_110, %c0_111, %c0_112] : memref<4x64x32xf32, #tpu.memory_space<vmem>>, vector<1x64x32xf32>
    %286 = vector.shape_cast %285 : vector<1x64x32xf32> to vector<64x32xf32>
    %cst_113 = arith.constant dense<0.000000e+00> : vector<16x32xf32>
    %287 = tpu.matmul %284, %286, %cst_113 {dimension_numbers = #tpu.dot_dimension_numbers<[1], [0], [0], [1], [0, 0, 1, 1], [], []>} : vector<16x64xf32>, vector<64x32xf32>, vector<16x32xf32> -> vector<16x32xf32>
    %c30 = arith.constant 30 : index
    %c0_114 = arith.constant 0 : index
    %c0_115 = arith.constant 0 : index
    %288 = vector.load %arg13[%c30, %c0_114, %c0_115] : memref<34x1x32xf32, #tpu.memory_space<vmem>>, vector<1x1x32xf32>
    %289 = vector.shape_cast %288 : vector<1x1x32xf32> to vector<1x32xf32>
    %290 = vector.broadcast %289 : vector<1x32xf32> to vector<16x32xf32>
    %291 = arith.addf %287, %290 : vector<16x32xf32>
    %292 = arith.addf %249, %291 : vector<16x32xf32>
    %c8 = arith.constant 8 : index
    %c0_116 = arith.constant 0 : index
    %c0_117 = arith.constant 0 : index
    %293 = vector.load %arg13[%c8, %c0_116, %c0_117] : memref<34x1x32xf32, #tpu.memory_space<vmem>>, vector<1x1x32xf32>
    %294 = vector.shape_cast %293 : vector<1x1x32xf32> to vector<1x32xf32>
    %c20 = arith.constant 20 : index
    %c0_118 = arith.constant 0 : index
    %c0_119 = arith.constant 0 : index
    %295 = vector.load %arg13[%c20, %c0_118, %c0_119] : memref<34x1x32xf32, #tpu.memory_space<vmem>>, vector<1x1x32xf32>
    %296 = vector.shape_cast %295 : vector<1x1x32xf32> to vector<1x32xf32>
    %cst_120 = arith.constant dense<0.000000e+00> : vector<16xf32>
    %297 = vector.multi_reduction <add>, %292, %cst_120 [1] : vector<16x32xf32> to vector<16xf32>
    %298 = vector.shape_cast %297 : vector<16xf32> to vector<16x1xf32>
    %cst_121 = arith.constant 3.200000e+01 : f32
    %299 = vector.broadcast %cst_121 : f32 to vector<16x1xf32>
    %300 = arith.divf %298, %299 : vector<16x1xf32>
    %301 = vector.broadcast %300 : vector<16x1xf32> to vector<16x32xf32>
    %302 = arith.subf %292, %301 : vector<16x32xf32>
    %303 = arith.mulf %302, %302 : vector<16x32xf32>
    %cst_122 = arith.constant dense<0.000000e+00> : vector<16xf32>
    %304 = vector.multi_reduction <add>, %303, %cst_122 [1] : vector<16x32xf32> to vector<16xf32>
    %305 = vector.shape_cast %304 : vector<16xf32> to vector<16x1xf32>
    %cst_123 = arith.constant 3.200000e+01 : f32
    %306 = vector.broadcast %cst_123 : f32 to vector<16x1xf32>
    %307 = arith.divf %305, %306 : vector<16x1xf32>
    %308 = vector.broadcast %300 : vector<16x1xf32> to vector<16x32xf32>
    %309 = arith.subf %292, %308 : vector<16x32xf32>
    %cst_124 = arith.constant 9.99999974E-6 : f32
    %310 = vector.broadcast %cst_124 : f32 to vector<16x1xf32>
    %311 = arith.addf %307, %310 : vector<16x1xf32>
    %312 = math.rsqrt %311 : vector<16x1xf32>
    %313 = vector.broadcast %312 : vector<16x1xf32> to vector<16x32xf32>
    %314 = arith.mulf %309, %313 : vector<16x32xf32>
    %315 = vector.broadcast %294 : vector<1x32xf32> to vector<16x32xf32>
    %316 = arith.mulf %314, %315 : vector<16x32xf32>
    %317 = vector.broadcast %296 : vector<1x32xf32> to vector<16x32xf32>
    %318 = arith.addf %316, %317 : vector<16x32xf32>
    %c1_125 = arith.constant 1 : index
    %c0_126 = arith.constant 0 : index
    %c0_127 = arith.constant 0 : index
    %319 = vector.load %arg7[%c1_125, %c0_126, %c0_127] : memref<6x32x96xf32, #tpu.memory_space<vmem>>, vector<1x32x96xf32>
    %320 = vector.shape_cast %319 : vector<1x32x96xf32> to vector<32x96xf32>
    %c1_128 = arith.constant 1 : index
    %c0_129 = arith.constant 0 : index
    %c0_130 = arith.constant 0 : index
    %321 = vector.load %arg8[%c1_128, %c0_129, %c0_130] : memref<6x1x96xf32, #tpu.memory_space<vmem>>, vector<1x1x96xf32>
    %322 = vector.shape_cast %321 : vector<1x1x96xf32> to vector<1x96xf32>
    %cst_131 = arith.constant dense<0.000000e+00> : vector<16x96xf32>
    %323 = tpu.matmul %318, %320, %cst_131 {dimension_numbers = #tpu.dot_dimension_numbers<[1], [0], [0], [1], [0, 0, 1, 1], [], []>} : vector<16x32xf32>, vector<32x96xf32>, vector<16x96xf32> -> vector<16x96xf32>
    %324 = vector.broadcast %322 : vector<1x96xf32> to vector<16x96xf32>
    %325 = arith.addf %323, %324 : vector<16x96xf32>
    %326 = vector.extract_strided_slice %325 {offsets = [0, 0], sizes = [16, 32], strides = [1, 1]} : vector<16x96xf32> to vector<16x32xf32>
    %327 = vector.extract_strided_slice %325 {offsets = [0, 32], sizes = [16, 32], strides = [1, 1]} : vector<16x96xf32> to vector<16x32xf32>
    %328 = vector.extract_strided_slice %325 {offsets = [0, 64], sizes = [16, 32], strides = [1, 1]} : vector<16x96xf32> to vector<16x32xf32>
    %329 = vector.extract_strided_slice %326 {offsets = [0, 0], sizes = [16, 8], strides = [1, 1]} : vector<16x32xf32> to vector<16x8xf32>
    %330 = vector.extract_strided_slice %327 {offsets = [0, 0], sizes = [16, 8], strides = [1, 1]} : vector<16x32xf32> to vector<16x8xf32>
    %331 = vector.extract_strided_slice %328 {offsets = [0, 0], sizes = [16, 8], strides = [1, 1]} : vector<16x32xf32> to vector<16x8xf32>
    %cst_132 = arith.constant dense<0.000000e+00> : vector<16x16xf32>
    %332 = tpu.matmul %329, %330, %cst_132 {dimension_numbers = #tpu.dot_dimension_numbers<[1], [1], [0], [0], [0, 0, 1, 0], [], []>} : vector<16x8xf32>, vector<16x8xf32>, vector<16x16xf32> -> vector<16x16xf32>
    %cst_133 = arith.constant 0.353553385 : f32
    %333 = vector.broadcast %cst_133 : f32 to vector<16x16xf32>
    %334 = arith.mulf %332, %333 : vector<16x16xf32>
    %cst_134 = arith.constant -1.000000e+01 : f32
    %cst_135 = arith.constant 1.000000e+01 : f32
    %335 = vector.broadcast %cst_134 : f32 to vector<16x16xf32>
    %336 = arith.maximumf %335, %334 : vector<16x16xf32>
    %337 = vector.broadcast %cst_135 : f32 to vector<16x16xf32>
    %338 = arith.minimumf %337, %336 : vector<16x16xf32>
    %339 = math.exp %338 : vector<16x16xf32>
    %340 = arith.mulf %339, %66 : vector<16x16xf32>
    %cst_136 = arith.constant dense<0.000000e+00> : vector<16xf32>
    %341 = vector.multi_reduction <add>, %340, %cst_136 [1] : vector<16x16xf32> to vector<16xf32>
    %342 = vector.shape_cast %341 : vector<16xf32> to vector<16x1xf32>
    %cst_137 = arith.constant dense<0.000000e+00> : vector<16x8xf32>
    %343 = tpu.matmul %340, %331, %cst_137 {dimension_numbers = #tpu.dot_dimension_numbers<[1], [0], [0], [1], [0, 0, 1, 1], [], []>} : vector<16x16xf32>, vector<16x8xf32>, vector<16x8xf32> -> vector<16x8xf32>
    %344 = tpu.reciprocal %342 {approx = true} : vector<16x1xf32> -> vector<16x1xf32>
    %345 = vector.broadcast %344 : vector<16x1xf32> to vector<16x8xf32>
    %346 = arith.mulf %343, %345 : vector<16x8xf32>
    %347 = vector.extract_strided_slice %326 {offsets = [0, 8], sizes = [16, 8], strides = [1, 1]} : vector<16x32xf32> to vector<16x8xf32>
    %348 = vector.extract_strided_slice %327 {offsets = [0, 8], sizes = [16, 8], strides = [1, 1]} : vector<16x32xf32> to vector<16x8xf32>
    %349 = vector.extract_strided_slice %328 {offsets = [0, 8], sizes = [16, 8], strides = [1, 1]} : vector<16x32xf32> to vector<16x8xf32>
    %cst_138 = arith.constant dense<0.000000e+00> : vector<16x16xf32>
    %350 = tpu.matmul %347, %348, %cst_138 {dimension_numbers = #tpu.dot_dimension_numbers<[1], [1], [0], [0], [0, 0, 1, 0], [], []>} : vector<16x8xf32>, vector<16x8xf32>, vector<16x16xf32> -> vector<16x16xf32>
    %cst_139 = arith.constant 0.353553385 : f32
    %351 = vector.broadcast %cst_139 : f32 to vector<16x16xf32>
    %352 = arith.mulf %350, %351 : vector<16x16xf32>
    %cst_140 = arith.constant -1.000000e+01 : f32
    %cst_141 = arith.constant 1.000000e+01 : f32
    %353 = vector.broadcast %cst_140 : f32 to vector<16x16xf32>
    %354 = arith.maximumf %353, %352 : vector<16x16xf32>
    %355 = vector.broadcast %cst_141 : f32 to vector<16x16xf32>
    %356 = arith.minimumf %355, %354 : vector<16x16xf32>
    %357 = math.exp %356 : vector<16x16xf32>
    %358 = arith.mulf %357, %66 : vector<16x16xf32>
    %cst_142 = arith.constant dense<0.000000e+00> : vector<16xf32>
    %359 = vector.multi_reduction <add>, %358, %cst_142 [1] : vector<16x16xf32> to vector<16xf32>
    %360 = vector.shape_cast %359 : vector<16xf32> to vector<16x1xf32>
    %cst_143 = arith.constant dense<0.000000e+00> : vector<16x8xf32>
    %361 = tpu.matmul %358, %349, %cst_143 {dimension_numbers = #tpu.dot_dimension_numbers<[1], [0], [0], [1], [0, 0, 1, 1], [], []>} : vector<16x16xf32>, vector<16x8xf32>, vector<16x8xf32> -> vector<16x8xf32>
    %362 = tpu.reciprocal %360 {approx = true} : vector<16x1xf32> -> vector<16x1xf32>
    %363 = vector.broadcast %362 : vector<16x1xf32> to vector<16x8xf32>
    %364 = arith.mulf %361, %363 : vector<16x8xf32>
    %365 = vector.extract_strided_slice %326 {offsets = [0, 16], sizes = [16, 8], strides = [1, 1]} : vector<16x32xf32> to vector<16x8xf32>
    %366 = vector.extract_strided_slice %327 {offsets = [0, 16], sizes = [16, 8], strides = [1, 1]} : vector<16x32xf32> to vector<16x8xf32>
    %367 = vector.extract_strided_slice %328 {offsets = [0, 16], sizes = [16, 8], strides = [1, 1]} : vector<16x32xf32> to vector<16x8xf32>
    %cst_144 = arith.constant dense<0.000000e+00> : vector<16x16xf32>
    %368 = tpu.matmul %365, %366, %cst_144 {dimension_numbers = #tpu.dot_dimension_numbers<[1], [1], [0], [0], [0, 0, 1, 0], [], []>} : vector<16x8xf32>, vector<16x8xf32>, vector<16x16xf32> -> vector<16x16xf32>
    %cst_145 = arith.constant 0.353553385 : f32
    %369 = vector.broadcast %cst_145 : f32 to vector<16x16xf32>
    %370 = arith.mulf %368, %369 : vector<16x16xf32>
    %cst_146 = arith.constant -1.000000e+01 : f32
    %cst_147 = arith.constant 1.000000e+01 : f32
    %371 = vector.broadcast %cst_146 : f32 to vector<16x16xf32>
    %372 = arith.maximumf %371, %370 : vector<16x16xf32>
    %373 = vector.broadcast %cst_147 : f32 to vector<16x16xf32>
    %374 = arith.minimumf %373, %372 : vector<16x16xf32>
    %375 = math.exp %374 : vector<16x16xf32>
    %376 = arith.mulf %375, %66 : vector<16x16xf32>
    %cst_148 = arith.constant dense<0.000000e+00> : vector<16xf32>
    %377 = vector.multi_reduction <add>, %376, %cst_148 [1] : vector<16x16xf32> to vector<16xf32>
    %378 = vector.shape_cast %377 : vector<16xf32> to vector<16x1xf32>
    %cst_149 = arith.constant dense<0.000000e+00> : vector<16x8xf32>
    %379 = tpu.matmul %376, %367, %cst_149 {dimension_numbers = #tpu.dot_dimension_numbers<[1], [0], [0], [1], [0, 0, 1, 1], [], []>} : vector<16x16xf32>, vector<16x8xf32>, vector<16x8xf32> -> vector<16x8xf32>
    %380 = tpu.reciprocal %378 {approx = true} : vector<16x1xf32> -> vector<16x1xf32>
    %381 = vector.broadcast %380 : vector<16x1xf32> to vector<16x8xf32>
    %382 = arith.mulf %379, %381 : vector<16x8xf32>
    %383 = vector.extract_strided_slice %326 {offsets = [0, 24], sizes = [16, 8], strides = [1, 1]} : vector<16x32xf32> to vector<16x8xf32>
    %384 = vector.extract_strided_slice %327 {offsets = [0, 24], sizes = [16, 8], strides = [1, 1]} : vector<16x32xf32> to vector<16x8xf32>
    %385 = vector.extract_strided_slice %328 {offsets = [0, 24], sizes = [16, 8], strides = [1, 1]} : vector<16x32xf32> to vector<16x8xf32>
    %cst_150 = arith.constant dense<0.000000e+00> : vector<16x16xf32>
    %386 = tpu.matmul %383, %384, %cst_150 {dimension_numbers = #tpu.dot_dimension_numbers<[1], [1], [0], [0], [0, 0, 1, 0], [], []>} : vector<16x8xf32>, vector<16x8xf32>, vector<16x16xf32> -> vector<16x16xf32>
    %cst_151 = arith.constant 0.353553385 : f32
    %387 = vector.broadcast %cst_151 : f32 to vector<16x16xf32>
    %388 = arith.mulf %386, %387 : vector<16x16xf32>
    %cst_152 = arith.constant -1.000000e+01 : f32
    %cst_153 = arith.constant 1.000000e+01 : f32
    %389 = vector.broadcast %cst_152 : f32 to vector<16x16xf32>
    %390 = arith.maximumf %389, %388 : vector<16x16xf32>
    %391 = vector.broadcast %cst_153 : f32 to vector<16x16xf32>
    %392 = arith.minimumf %391, %390 : vector<16x16xf32>
    %393 = math.exp %392 : vector<16x16xf32>
    %394 = arith.mulf %393, %66 : vector<16x16xf32>
    %cst_154 = arith.constant dense<0.000000e+00> : vector<16xf32>
    %395 = vector.multi_reduction <add>, %394, %cst_154 [1] : vector<16x16xf32> to vector<16xf32>
    %396 = vector.shape_cast %395 : vector<16xf32> to vector<16x1xf32>
    %cst_155 = arith.constant dense<0.000000e+00> : vector<16x8xf32>
    %397 = tpu.matmul %394, %385, %cst_155 {dimension_numbers = #tpu.dot_dimension_numbers<[1], [0], [0], [1], [0, 0, 1, 1], [], []>} : vector<16x16xf32>, vector<16x8xf32>, vector<16x8xf32> -> vector<16x8xf32>
    %398 = tpu.reciprocal %396 {approx = true} : vector<16x1xf32> -> vector<16x1xf32>
    %399 = vector.broadcast %398 : vector<16x1xf32> to vector<16x8xf32>
    %400 = arith.mulf %397, %399 : vector<16x8xf32>
    %401 = tpu.concatenate %346, %364, %382, %400 in 1 : vector<16x8xf32>, vector<16x8xf32>, vector<16x8xf32>, vector<16x8xf32> -> vector<16x32xf32>
    %c1_156 = arith.constant 1 : index
    %c0_157 = arith.constant 0 : index
    %c0_158 = arith.constant 0 : index
    %402 = vector.load %arg9[%c1_156, %c0_157, %c0_158] : memref<6x32x32xf32, #tpu.memory_space<vmem>>, vector<1x32x32xf32>
    %403 = vector.shape_cast %402 : vector<1x32x32xf32> to vector<32x32xf32>
    %cst_159 = arith.constant dense<0.000000e+00> : vector<16x32xf32>
    %404 = tpu.matmul %401, %403, %cst_159 {dimension_numbers = #tpu.dot_dimension_numbers<[1], [0], [0], [1], [0, 0, 1, 1], [], []>} : vector<16x32xf32>, vector<32x32xf32>, vector<16x32xf32> -> vector<16x32xf32>
    %c1_160 = arith.constant 1 : index
    %c0_161 = arith.constant 0 : index
    %c0_162 = arith.constant 0 : index
    %405 = vector.load %arg13[%c1_160, %c0_161, %c0_162] : memref<34x1x32xf32, #tpu.memory_space<vmem>>, vector<1x1x32xf32>
    %406 = vector.shape_cast %405 : vector<1x1x32xf32> to vector<1x32xf32>
    %407 = vector.broadcast %406 : vector<1x32xf32> to vector<16x32xf32>
    %408 = arith.addf %404, %407 : vector<16x32xf32>
    %409 = arith.addf %292, %408 : vector<16x32xf32>
    %c9 = arith.constant 9 : index
    %c0_163 = arith.constant 0 : index
    %c0_164 = arith.constant 0 : index
    %410 = vector.load %arg13[%c9, %c0_163, %c0_164] : memref<34x1x32xf32, #tpu.memory_space<vmem>>, vector<1x1x32xf32>
    %411 = vector.shape_cast %410 : vector<1x1x32xf32> to vector<1x32xf32>
    %c21 = arith.constant 21 : index
    %c0_165 = arith.constant 0 : index
    %c0_166 = arith.constant 0 : index
    %412 = vector.load %arg13[%c21, %c0_165, %c0_166] : memref<34x1x32xf32, #tpu.memory_space<vmem>>, vector<1x1x32xf32>
    %413 = vector.shape_cast %412 : vector<1x1x32xf32> to vector<1x32xf32>
    %cst_167 = arith.constant dense<0.000000e+00> : vector<16xf32>
    %414 = vector.multi_reduction <add>, %409, %cst_167 [1] : vector<16x32xf32> to vector<16xf32>
    %415 = vector.shape_cast %414 : vector<16xf32> to vector<16x1xf32>
    %cst_168 = arith.constant 3.200000e+01 : f32
    %416 = vector.broadcast %cst_168 : f32 to vector<16x1xf32>
    %417 = arith.divf %415, %416 : vector<16x1xf32>
    %418 = vector.broadcast %417 : vector<16x1xf32> to vector<16x32xf32>
    %419 = arith.subf %409, %418 : vector<16x32xf32>
    %420 = arith.mulf %419, %419 : vector<16x32xf32>
    %cst_169 = arith.constant dense<0.000000e+00> : vector<16xf32>
    %421 = vector.multi_reduction <add>, %420, %cst_169 [1] : vector<16x32xf32> to vector<16xf32>
    %422 = vector.shape_cast %421 : vector<16xf32> to vector<16x1xf32>
    %cst_170 = arith.constant 3.200000e+01 : f32
    %423 = vector.broadcast %cst_170 : f32 to vector<16x1xf32>
    %424 = arith.divf %422, %423 : vector<16x1xf32>
    %425 = vector.broadcast %417 : vector<16x1xf32> to vector<16x32xf32>
    %426 = arith.subf %409, %425 : vector<16x32xf32>
    %cst_171 = arith.constant 9.99999974E-6 : f32
    %427 = vector.broadcast %cst_171 : f32 to vector<16x1xf32>
    %428 = arith.addf %424, %427 : vector<16x1xf32>
    %429 = math.rsqrt %428 : vector<16x1xf32>
    %430 = vector.broadcast %429 : vector<16x1xf32> to vector<16x32xf32>
    %431 = arith.mulf %426, %430 : vector<16x32xf32>
    %432 = vector.broadcast %411 : vector<1x32xf32> to vector<16x32xf32>
    %433 = arith.mulf %431, %432 : vector<16x32xf32>
    %434 = vector.broadcast %413 : vector<1x32xf32> to vector<16x32xf32>
    %435 = arith.addf %433, %434 : vector<16x32xf32>
    %c1_172 = arith.constant 1 : index
    %c0_173 = arith.constant 0 : index
    %c0_174 = arith.constant 0 : index
    %436 = vector.load %arg10[%c1_172, %c0_173, %c0_174] : memref<4x32x64xf32, #tpu.memory_space<vmem>>, vector<1x32x64xf32>
    %437 = vector.shape_cast %436 : vector<1x32x64xf32> to vector<32x64xf32>
    %cst_175 = arith.constant dense<0.000000e+00> : vector<16x64xf32>
    %438 = tpu.matmul %435, %437, %cst_175 {dimension_numbers = #tpu.dot_dimension_numbers<[1], [0], [0], [1], [0, 0, 1, 1], [], []>} : vector<16x32xf32>, vector<32x64xf32>, vector<16x64xf32> -> vector<16x64xf32>
    %c1_176 = arith.constant 1 : index
    %c0_177 = arith.constant 0 : index
    %c0_178 = arith.constant 0 : index
    %439 = vector.load %arg11[%c1_176, %c0_177, %c0_178] : memref<4x1x64xf32, #tpu.memory_space<vmem>>, vector<1x1x64xf32>
    %440 = vector.shape_cast %439 : vector<1x1x64xf32> to vector<1x64xf32>
    %441 = vector.broadcast %440 : vector<1x64xf32> to vector<16x64xf32>
    %442 = arith.addf %438, %441 : vector<16x64xf32>
    %cst_179 = arith.constant 0.000000e+00 : f32
    %443 = vector.broadcast %cst_179 : f32 to vector<16x64xf32>
    %444 = arith.maximumf %442, %443 : vector<16x64xf32>
    %c1_180 = arith.constant 1 : index
    %c0_181 = arith.constant 0 : index
    %c0_182 = arith.constant 0 : index
    %445 = vector.load %arg12[%c1_180, %c0_181, %c0_182] : memref<4x64x32xf32, #tpu.memory_space<vmem>>, vector<1x64x32xf32>
    %446 = vector.shape_cast %445 : vector<1x64x32xf32> to vector<64x32xf32>
    %cst_183 = arith.constant dense<0.000000e+00> : vector<16x32xf32>
    %447 = tpu.matmul %444, %446, %cst_183 {dimension_numbers = #tpu.dot_dimension_numbers<[1], [0], [0], [1], [0, 0, 1, 1], [], []>} : vector<16x64xf32>, vector<64x32xf32>, vector<16x32xf32> -> vector<16x32xf32>
    %c31 = arith.constant 31 : index
    %c0_184 = arith.constant 0 : index
    %c0_185 = arith.constant 0 : index
    %448 = vector.load %arg13[%c31, %c0_184, %c0_185] : memref<34x1x32xf32, #tpu.memory_space<vmem>>, vector<1x1x32xf32>
    %449 = vector.shape_cast %448 : vector<1x1x32xf32> to vector<1x32xf32>
    %450 = vector.broadcast %449 : vector<1x32xf32> to vector<16x32xf32>
    %451 = arith.addf %447, %450 : vector<16x32xf32>
    %452 = arith.addf %409, %451 : vector<16x32xf32>
    %c10 = arith.constant 10 : index
    %c0_186 = arith.constant 0 : index
    %c0_187 = arith.constant 0 : index
    %453 = vector.load %arg13[%c10, %c0_186, %c0_187] : memref<34x1x32xf32, #tpu.memory_space<vmem>>, vector<1x1x32xf32>
    %454 = vector.shape_cast %453 : vector<1x1x32xf32> to vector<1x32xf32>
    %c22 = arith.constant 22 : index
    %c0_188 = arith.constant 0 : index
    %c0_189 = arith.constant 0 : index
    %455 = vector.load %arg13[%c22, %c0_188, %c0_189] : memref<34x1x32xf32, #tpu.memory_space<vmem>>, vector<1x1x32xf32>
    %456 = vector.shape_cast %455 : vector<1x1x32xf32> to vector<1x32xf32>
    %cst_190 = arith.constant dense<0.000000e+00> : vector<16xf32>
    %457 = vector.multi_reduction <add>, %452, %cst_190 [1] : vector<16x32xf32> to vector<16xf32>
    %458 = vector.shape_cast %457 : vector<16xf32> to vector<16x1xf32>
    %cst_191 = arith.constant 3.200000e+01 : f32
    %459 = vector.broadcast %cst_191 : f32 to vector<16x1xf32>
    %460 = arith.divf %458, %459 : vector<16x1xf32>
    %461 = vector.broadcast %460 : vector<16x1xf32> to vector<16x32xf32>
    %462 = arith.subf %452, %461 : vector<16x32xf32>
    %463 = arith.mulf %462, %462 : vector<16x32xf32>
    %cst_192 = arith.constant dense<0.000000e+00> : vector<16xf32>
    %464 = vector.multi_reduction <add>, %463, %cst_192 [1] : vector<16x32xf32> to vector<16xf32>
    %465 = vector.shape_cast %464 : vector<16xf32> to vector<16x1xf32>
    %cst_193 = arith.constant 3.200000e+01 : f32
    %466 = vector.broadcast %cst_193 : f32 to vector<16x1xf32>
    %467 = arith.divf %465, %466 : vector<16x1xf32>
    %468 = vector.broadcast %460 : vector<16x1xf32> to vector<16x32xf32>
    %469 = arith.subf %452, %468 : vector<16x32xf32>
    %cst_194 = arith.constant 9.99999974E-6 : f32
    %470 = vector.broadcast %cst_194 : f32 to vector<16x1xf32>
    %471 = arith.addf %467, %470 : vector<16x1xf32>
    %472 = math.rsqrt %471 : vector<16x1xf32>
    %473 = vector.broadcast %472 : vector<16x1xf32> to vector<16x32xf32>
    %474 = arith.mulf %469, %473 : vector<16x32xf32>
    %475 = vector.broadcast %454 : vector<1x32xf32> to vector<16x32xf32>
    %476 = arith.mulf %474, %475 : vector<16x32xf32>
    %477 = vector.broadcast %456 : vector<1x32xf32> to vector<16x32xf32>
    %478 = arith.addf %476, %477 : vector<16x32xf32>
    %c11 = arith.constant 11 : index
    %c0_195 = arith.constant 0 : index
    %c0_196 = arith.constant 0 : index
    %479 = vector.load %arg13[%c11, %c0_195, %c0_196] : memref<34x1x32xf32, #tpu.memory_space<vmem>>, vector<1x1x32xf32>
    %480 = vector.shape_cast %479 : vector<1x1x32xf32> to vector<1x32xf32>
    %c23 = arith.constant 23 : index
    %c0_197 = arith.constant 0 : index
    %c0_198 = arith.constant 0 : index
    %481 = vector.load %arg13[%c23, %c0_197, %c0_198] : memref<34x1x32xf32, #tpu.memory_space<vmem>>, vector<1x1x32xf32>
    %482 = vector.shape_cast %481 : vector<1x1x32xf32> to vector<1x32xf32>
    %cst_199 = arith.constant dense<0.000000e+00> : vector<16xf32>
    %483 = vector.multi_reduction <add>, %39, %cst_199 [1] : vector<16x32xf32> to vector<16xf32>
    %484 = vector.shape_cast %483 : vector<16xf32> to vector<16x1xf32>
    %cst_200 = arith.constant 3.200000e+01 : f32
    %485 = vector.broadcast %cst_200 : f32 to vector<16x1xf32>
    %486 = arith.divf %484, %485 : vector<16x1xf32>
    %487 = vector.broadcast %486 : vector<16x1xf32> to vector<16x32xf32>
    %488 = arith.subf %39, %487 : vector<16x32xf32>
    %489 = arith.mulf %488, %488 : vector<16x32xf32>
    %cst_201 = arith.constant dense<0.000000e+00> : vector<16xf32>
    %490 = vector.multi_reduction <add>, %489, %cst_201 [1] : vector<16x32xf32> to vector<16xf32>
    %491 = vector.shape_cast %490 : vector<16xf32> to vector<16x1xf32>
    %cst_202 = arith.constant 3.200000e+01 : f32
    %492 = vector.broadcast %cst_202 : f32 to vector<16x1xf32>
    %493 = arith.divf %491, %492 : vector<16x1xf32>
    %494 = vector.broadcast %486 : vector<16x1xf32> to vector<16x32xf32>
    %495 = arith.subf %39, %494 : vector<16x32xf32>
    %cst_203 = arith.constant 9.99999974E-6 : f32
    %496 = vector.broadcast %cst_203 : f32 to vector<16x1xf32>
    %497 = arith.addf %493, %496 : vector<16x1xf32>
    %498 = math.rsqrt %497 : vector<16x1xf32>
    %499 = vector.broadcast %498 : vector<16x1xf32> to vector<16x32xf32>
    %500 = arith.mulf %495, %499 : vector<16x32xf32>
    %501 = vector.broadcast %480 : vector<1x32xf32> to vector<16x32xf32>
    %502 = arith.mulf %500, %501 : vector<16x32xf32>
    %503 = vector.broadcast %482 : vector<1x32xf32> to vector<16x32xf32>
    %504 = arith.addf %502, %503 : vector<16x32xf32>
    %c2 = arith.constant 2 : index
    %c0_204 = arith.constant 0 : index
    %c0_205 = arith.constant 0 : index
    %505 = vector.load %arg7[%c2, %c0_204, %c0_205] : memref<6x32x96xf32, #tpu.memory_space<vmem>>, vector<1x32x96xf32>
    %506 = vector.shape_cast %505 : vector<1x32x96xf32> to vector<32x96xf32>
    %c2_206 = arith.constant 2 : index
    %c0_207 = arith.constant 0 : index
    %c0_208 = arith.constant 0 : index
    %507 = vector.load %arg8[%c2_206, %c0_207, %c0_208] : memref<6x1x96xf32, #tpu.memory_space<vmem>>, vector<1x1x96xf32>
    %508 = vector.shape_cast %507 : vector<1x1x96xf32> to vector<1x96xf32>
    %cst_209 = arith.constant dense<0.000000e+00> : vector<16x96xf32>
    %509 = tpu.matmul %504, %506, %cst_209 {dimension_numbers = #tpu.dot_dimension_numbers<[1], [0], [0], [1], [0, 0, 1, 1], [], []>} : vector<16x32xf32>, vector<32x96xf32>, vector<16x96xf32> -> vector<16x96xf32>
    %510 = vector.broadcast %508 : vector<1x96xf32> to vector<16x96xf32>
    %511 = arith.addf %509, %510 : vector<16x96xf32>
    %512 = vector.extract_strided_slice %511 {offsets = [0, 0], sizes = [16, 32], strides = [1, 1]} : vector<16x96xf32> to vector<16x32xf32>
    %513 = vector.extract_strided_slice %511 {offsets = [0, 32], sizes = [16, 32], strides = [1, 1]} : vector<16x96xf32> to vector<16x32xf32>
    %514 = vector.extract_strided_slice %511 {offsets = [0, 64], sizes = [16, 32], strides = [1, 1]} : vector<16x96xf32> to vector<16x32xf32>
    %515 = vector.extract_strided_slice %512 {offsets = [0, 0], sizes = [16, 8], strides = [1, 1]} : vector<16x32xf32> to vector<16x8xf32>
    %516 = vector.extract_strided_slice %513 {offsets = [0, 0], sizes = [16, 8], strides = [1, 1]} : vector<16x32xf32> to vector<16x8xf32>
    %517 = vector.extract_strided_slice %514 {offsets = [0, 0], sizes = [16, 8], strides = [1, 1]} : vector<16x32xf32> to vector<16x8xf32>
    %cst_210 = arith.constant dense<0.000000e+00> : vector<16x16xf32>
    %518 = tpu.matmul %515, %516, %cst_210 {dimension_numbers = #tpu.dot_dimension_numbers<[1], [1], [0], [0], [0, 0, 1, 0], [], []>} : vector<16x8xf32>, vector<16x8xf32>, vector<16x16xf32> -> vector<16x16xf32>
    %cst_211 = arith.constant 0.353553385 : f32
    %519 = vector.broadcast %cst_211 : f32 to vector<16x16xf32>
    %520 = arith.mulf %518, %519 : vector<16x16xf32>
    %cst_212 = arith.constant -1.000000e+01 : f32
    %cst_213 = arith.constant 1.000000e+01 : f32
    %521 = vector.broadcast %cst_212 : f32 to vector<16x16xf32>
    %522 = arith.maximumf %521, %520 : vector<16x16xf32>
    %523 = vector.broadcast %cst_213 : f32 to vector<16x16xf32>
    %524 = arith.minimumf %523, %522 : vector<16x16xf32>
    %525 = math.exp %524 : vector<16x16xf32>
    %526 = arith.mulf %525, %105 : vector<16x16xf32>
    %cst_214 = arith.constant dense<0.000000e+00> : vector<16xf32>
    %527 = vector.multi_reduction <add>, %526, %cst_214 [1] : vector<16x16xf32> to vector<16xf32>
    %528 = vector.shape_cast %527 : vector<16xf32> to vector<16x1xf32>
    %cst_215 = arith.constant dense<0.000000e+00> : vector<16x8xf32>
    %529 = tpu.matmul %526, %517, %cst_215 {dimension_numbers = #tpu.dot_dimension_numbers<[1], [0], [0], [1], [0, 0, 1, 1], [], []>} : vector<16x16xf32>, vector<16x8xf32>, vector<16x8xf32> -> vector<16x8xf32>
    %530 = tpu.reciprocal %528 {approx = true} : vector<16x1xf32> -> vector<16x1xf32>
    %531 = vector.broadcast %530 : vector<16x1xf32> to vector<16x8xf32>
    %532 = arith.mulf %529, %531 : vector<16x8xf32>
    %533 = vector.extract_strided_slice %512 {offsets = [0, 8], sizes = [16, 8], strides = [1, 1]} : vector<16x32xf32> to vector<16x8xf32>
    %534 = vector.extract_strided_slice %513 {offsets = [0, 8], sizes = [16, 8], strides = [1, 1]} : vector<16x32xf32> to vector<16x8xf32>
    %535 = vector.extract_strided_slice %514 {offsets = [0, 8], sizes = [16, 8], strides = [1, 1]} : vector<16x32xf32> to vector<16x8xf32>
    %cst_216 = arith.constant dense<0.000000e+00> : vector<16x16xf32>
    %536 = tpu.matmul %533, %534, %cst_216 {dimension_numbers = #tpu.dot_dimension_numbers<[1], [1], [0], [0], [0, 0, 1, 0], [], []>} : vector<16x8xf32>, vector<16x8xf32>, vector<16x16xf32> -> vector<16x16xf32>
    %cst_217 = arith.constant 0.353553385 : f32
    %537 = vector.broadcast %cst_217 : f32 to vector<16x16xf32>
    %538 = arith.mulf %536, %537 : vector<16x16xf32>
    %cst_218 = arith.constant -1.000000e+01 : f32
    %cst_219 = arith.constant 1.000000e+01 : f32
    %539 = vector.broadcast %cst_218 : f32 to vector<16x16xf32>
    %540 = arith.maximumf %539, %538 : vector<16x16xf32>
    %541 = vector.broadcast %cst_219 : f32 to vector<16x16xf32>
    %542 = arith.minimumf %541, %540 : vector<16x16xf32>
    %543 = math.exp %542 : vector<16x16xf32>
    %544 = arith.mulf %543, %105 : vector<16x16xf32>
    %cst_220 = arith.constant dense<0.000000e+00> : vector<16xf32>
    %545 = vector.multi_reduction <add>, %544, %cst_220 [1] : vector<16x16xf32> to vector<16xf32>
    %546 = vector.shape_cast %545 : vector<16xf32> to vector<16x1xf32>
    %cst_221 = arith.constant dense<0.000000e+00> : vector<16x8xf32>
    %547 = tpu.matmul %544, %535, %cst_221 {dimension_numbers = #tpu.dot_dimension_numbers<[1], [0], [0], [1], [0, 0, 1, 1], [], []>} : vector<16x16xf32>, vector<16x8xf32>, vector<16x8xf32> -> vector<16x8xf32>
    %548 = tpu.reciprocal %546 {approx = true} : vector<16x1xf32> -> vector<16x1xf32>
    %549 = vector.broadcast %548 : vector<16x1xf32> to vector<16x8xf32>
    %550 = arith.mulf %547, %549 : vector<16x8xf32>
    %551 = vector.extract_strided_slice %512 {offsets = [0, 16], sizes = [16, 8], strides = [1, 1]} : vector<16x32xf32> to vector<16x8xf32>
    %552 = vector.extract_strided_slice %513 {offsets = [0, 16], sizes = [16, 8], strides = [1, 1]} : vector<16x32xf32> to vector<16x8xf32>
    %553 = vector.extract_strided_slice %514 {offsets = [0, 16], sizes = [16, 8], strides = [1, 1]} : vector<16x32xf32> to vector<16x8xf32>
    %cst_222 = arith.constant dense<0.000000e+00> : vector<16x16xf32>
    %554 = tpu.matmul %551, %552, %cst_222 {dimension_numbers = #tpu.dot_dimension_numbers<[1], [1], [0], [0], [0, 0, 1, 0], [], []>} : vector<16x8xf32>, vector<16x8xf32>, vector<16x16xf32> -> vector<16x16xf32>
    %cst_223 = arith.constant 0.353553385 : f32
    %555 = vector.broadcast %cst_223 : f32 to vector<16x16xf32>
    %556 = arith.mulf %554, %555 : vector<16x16xf32>
    %cst_224 = arith.constant -1.000000e+01 : f32
    %cst_225 = arith.constant 1.000000e+01 : f32
    %557 = vector.broadcast %cst_224 : f32 to vector<16x16xf32>
    %558 = arith.maximumf %557, %556 : vector<16x16xf32>
    %559 = vector.broadcast %cst_225 : f32 to vector<16x16xf32>
    %560 = arith.minimumf %559, %558 : vector<16x16xf32>
    %561 = math.exp %560 : vector<16x16xf32>
    %562 = arith.mulf %561, %105 : vector<16x16xf32>
    %cst_226 = arith.constant dense<0.000000e+00> : vector<16xf32>
    %563 = vector.multi_reduction <add>, %562, %cst_226 [1] : vector<16x16xf32> to vector<16xf32>
    %564 = vector.shape_cast %563 : vector<16xf32> to vector<16x1xf32>
    %cst_227 = arith.constant dense<0.000000e+00> : vector<16x8xf32>
    %565 = tpu.matmul %562, %553, %cst_227 {dimension_numbers = #tpu.dot_dimension_numbers<[1], [0], [0], [1], [0, 0, 1, 1], [], []>} : vector<16x16xf32>, vector<16x8xf32>, vector<16x8xf32> -> vector<16x8xf32>
    %566 = tpu.reciprocal %564 {approx = true} : vector<16x1xf32> -> vector<16x1xf32>
    %567 = vector.broadcast %566 : vector<16x1xf32> to vector<16x8xf32>
    %568 = arith.mulf %565, %567 : vector<16x8xf32>
    %569 = vector.extract_strided_slice %512 {offsets = [0, 24], sizes = [16, 8], strides = [1, 1]} : vector<16x32xf32> to vector<16x8xf32>
    %570 = vector.extract_strided_slice %513 {offsets = [0, 24], sizes = [16, 8], strides = [1, 1]} : vector<16x32xf32> to vector<16x8xf32>
    %571 = vector.extract_strided_slice %514 {offsets = [0, 24], sizes = [16, 8], strides = [1, 1]} : vector<16x32xf32> to vector<16x8xf32>
    %cst_228 = arith.constant dense<0.000000e+00> : vector<16x16xf32>
    %572 = tpu.matmul %569, %570, %cst_228 {dimension_numbers = #tpu.dot_dimension_numbers<[1], [1], [0], [0], [0, 0, 1, 0], [], []>} : vector<16x8xf32>, vector<16x8xf32>, vector<16x16xf32> -> vector<16x16xf32>
    %cst_229 = arith.constant 0.353553385 : f32
    %573 = vector.broadcast %cst_229 : f32 to vector<16x16xf32>
    %574 = arith.mulf %572, %573 : vector<16x16xf32>
    %cst_230 = arith.constant -1.000000e+01 : f32
    %cst_231 = arith.constant 1.000000e+01 : f32
    %575 = vector.broadcast %cst_230 : f32 to vector<16x16xf32>
    %576 = arith.maximumf %575, %574 : vector<16x16xf32>
    %577 = vector.broadcast %cst_231 : f32 to vector<16x16xf32>
    %578 = arith.minimumf %577, %576 : vector<16x16xf32>
    %579 = math.exp %578 : vector<16x16xf32>
    %580 = arith.mulf %579, %105 : vector<16x16xf32>
    %cst_232 = arith.constant dense<0.000000e+00> : vector<16xf32>
    %581 = vector.multi_reduction <add>, %580, %cst_232 [1] : vector<16x16xf32> to vector<16xf32>
    %582 = vector.shape_cast %581 : vector<16xf32> to vector<16x1xf32>
    %cst_233 = arith.constant dense<0.000000e+00> : vector<16x8xf32>
    %583 = tpu.matmul %580, %571, %cst_233 {dimension_numbers = #tpu.dot_dimension_numbers<[1], [0], [0], [1], [0, 0, 1, 1], [], []>} : vector<16x16xf32>, vector<16x8xf32>, vector<16x8xf32> -> vector<16x8xf32>
    %584 = tpu.reciprocal %582 {approx = true} : vector<16x1xf32> -> vector<16x1xf32>
    %585 = vector.broadcast %584 : vector<16x1xf32> to vector<16x8xf32>
    %586 = arith.mulf %583, %585 : vector<16x8xf32>
    %587 = tpu.concatenate %532, %550, %568, %586 in 1 : vector<16x8xf32>, vector<16x8xf32>, vector<16x8xf32>, vector<16x8xf32> -> vector<16x32xf32>
    %c2_234 = arith.constant 2 : index
    %c0_235 = arith.constant 0 : index
    %c0_236 = arith.constant 0 : index
    %588 = vector.load %arg9[%c2_234, %c0_235, %c0_236] : memref<6x32x32xf32, #tpu.memory_space<vmem>>, vector<1x32x32xf32>
    %589 = vector.shape_cast %588 : vector<1x32x32xf32> to vector<32x32xf32>
    %cst_237 = arith.constant dense<0.000000e+00> : vector<16x32xf32>
    %590 = tpu.matmul %587, %589, %cst_237 {dimension_numbers = #tpu.dot_dimension_numbers<[1], [0], [0], [1], [0, 0, 1, 1], [], []>} : vector<16x32xf32>, vector<32x32xf32>, vector<16x32xf32> -> vector<16x32xf32>
    %c2_238 = arith.constant 2 : index
    %c0_239 = arith.constant 0 : index
    %c0_240 = arith.constant 0 : index
    %591 = vector.load %arg13[%c2_238, %c0_239, %c0_240] : memref<34x1x32xf32, #tpu.memory_space<vmem>>, vector<1x1x32xf32>
    %592 = vector.shape_cast %591 : vector<1x1x32xf32> to vector<1x32xf32>
    %593 = vector.broadcast %592 : vector<1x32xf32> to vector<16x32xf32>
    %594 = arith.addf %590, %593 : vector<16x32xf32>
    %595 = arith.addf %39, %594 : vector<16x32xf32>
    %c12 = arith.constant 12 : index
    %c0_241 = arith.constant 0 : index
    %c0_242 = arith.constant 0 : index
    %596 = vector.load %arg13[%c12, %c0_241, %c0_242] : memref<34x1x32xf32, #tpu.memory_space<vmem>>, vector<1x1x32xf32>
    %597 = vector.shape_cast %596 : vector<1x1x32xf32> to vector<1x32xf32>
    %c24 = arith.constant 24 : index
    %c0_243 = arith.constant 0 : index
    %c0_244 = arith.constant 0 : index
    %598 = vector.load %arg13[%c24, %c0_243, %c0_244] : memref<34x1x32xf32, #tpu.memory_space<vmem>>, vector<1x1x32xf32>
    %599 = vector.shape_cast %598 : vector<1x1x32xf32> to vector<1x32xf32>
    %cst_245 = arith.constant dense<0.000000e+00> : vector<16xf32>
    %600 = vector.multi_reduction <add>, %595, %cst_245 [1] : vector<16x32xf32> to vector<16xf32>
    %601 = vector.shape_cast %600 : vector<16xf32> to vector<16x1xf32>
    %cst_246 = arith.constant 3.200000e+01 : f32
    %602 = vector.broadcast %cst_246 : f32 to vector<16x1xf32>
    %603 = arith.divf %601, %602 : vector<16x1xf32>
    %604 = vector.broadcast %603 : vector<16x1xf32> to vector<16x32xf32>
    %605 = arith.subf %595, %604 : vector<16x32xf32>
    %606 = arith.mulf %605, %605 : vector<16x32xf32>
    %cst_247 = arith.constant dense<0.000000e+00> : vector<16xf32>
    %607 = vector.multi_reduction <add>, %606, %cst_247 [1] : vector<16x32xf32> to vector<16xf32>
    %608 = vector.shape_cast %607 : vector<16xf32> to vector<16x1xf32>
    %cst_248 = arith.constant 3.200000e+01 : f32
    %609 = vector.broadcast %cst_248 : f32 to vector<16x1xf32>
    %610 = arith.divf %608, %609 : vector<16x1xf32>
    %611 = vector.broadcast %603 : vector<16x1xf32> to vector<16x32xf32>
    %612 = arith.subf %595, %611 : vector<16x32xf32>
    %cst_249 = arith.constant 9.99999974E-6 : f32
    %613 = vector.broadcast %cst_249 : f32 to vector<16x1xf32>
    %614 = arith.addf %610, %613 : vector<16x1xf32>
    %615 = math.rsqrt %614 : vector<16x1xf32>
    %616 = vector.broadcast %615 : vector<16x1xf32> to vector<16x32xf32>
    %617 = arith.mulf %612, %616 : vector<16x32xf32>
    %618 = vector.broadcast %597 : vector<1x32xf32> to vector<16x32xf32>
    %619 = arith.mulf %617, %618 : vector<16x32xf32>
    %620 = vector.broadcast %599 : vector<1x32xf32> to vector<16x32xf32>
    %621 = arith.addf %619, %620 : vector<16x32xf32>
    %c3 = arith.constant 3 : index
    %c0_250 = arith.constant 0 : index
    %c0_251 = arith.constant 0 : index
    %622 = vector.load %arg7[%c3, %c0_250, %c0_251] : memref<6x32x96xf32, #tpu.memory_space<vmem>>, vector<1x32x96xf32>
    %623 = vector.shape_cast %622 : vector<1x32x96xf32> to vector<32x96xf32>
    %c3_252 = arith.constant 3 : index
    %c0_253 = arith.constant 0 : index
    %c0_254 = arith.constant 0 : index
    %624 = vector.load %arg8[%c3_252, %c0_253, %c0_254] : memref<6x1x96xf32, #tpu.memory_space<vmem>>, vector<1x1x96xf32>
    %625 = vector.shape_cast %624 : vector<1x1x96xf32> to vector<1x96xf32>
    %cst_255 = arith.constant dense<0.000000e+00> : vector<16x96xf32>
    %626 = tpu.matmul %621, %623, %cst_255 {dimension_numbers = #tpu.dot_dimension_numbers<[1], [0], [0], [1], [0, 0, 1, 1], [], []>} : vector<16x32xf32>, vector<32x96xf32>, vector<16x96xf32> -> vector<16x96xf32>
    %627 = vector.broadcast %625 : vector<1x96xf32> to vector<16x96xf32>
    %628 = arith.addf %626, %627 : vector<16x96xf32>
    %cst_256 = arith.constant dense<0.000000e+00> : vector<16x96xf32>
    %629 = tpu.matmul %478, %623, %cst_256 {dimension_numbers = #tpu.dot_dimension_numbers<[1], [0], [0], [1], [0, 0, 1, 1], [], []>} : vector<16x32xf32>, vector<32x96xf32>, vector<16x96xf32> -> vector<16x96xf32>
    %630 = vector.broadcast %625 : vector<1x96xf32> to vector<16x96xf32>
    %631 = arith.addf %629, %630 : vector<16x96xf32>
    %632 = vector.extract_strided_slice %628 {offsets = [0, 0], sizes = [16, 32], strides = [1, 1]} : vector<16x96xf32> to vector<16x32xf32>
    %633 = vector.extract_strided_slice %631 {offsets = [0, 32], sizes = [16, 32], strides = [1, 1]} : vector<16x96xf32> to vector<16x32xf32>
    %634 = vector.extract_strided_slice %631 {offsets = [0, 64], sizes = [16, 32], strides = [1, 1]} : vector<16x96xf32> to vector<16x32xf32>
    %635 = vector.extract_strided_slice %632 {offsets = [0, 0], sizes = [16, 8], strides = [1, 1]} : vector<16x32xf32> to vector<16x8xf32>
    %636 = vector.extract_strided_slice %633 {offsets = [0, 0], sizes = [16, 8], strides = [1, 1]} : vector<16x32xf32> to vector<16x8xf32>
    %637 = vector.extract_strided_slice %634 {offsets = [0, 0], sizes = [16, 8], strides = [1, 1]} : vector<16x32xf32> to vector<16x8xf32>
    %cst_257 = arith.constant dense<0.000000e+00> : vector<16x16xf32>
    %638 = tpu.matmul %635, %636, %cst_257 {dimension_numbers = #tpu.dot_dimension_numbers<[1], [1], [0], [0], [0, 0, 1, 0], [], []>} : vector<16x8xf32>, vector<16x8xf32>, vector<16x16xf32> -> vector<16x16xf32>
    %cst_258 = arith.constant 0.353553385 : f32
    %639 = vector.broadcast %cst_258 : f32 to vector<16x16xf32>
    %640 = arith.mulf %638, %639 : vector<16x16xf32>
    %cst_259 = arith.constant -1.000000e+01 : f32
    %cst_260 = arith.constant 1.000000e+01 : f32
    %641 = vector.broadcast %cst_259 : f32 to vector<16x16xf32>
    %642 = arith.maximumf %641, %640 : vector<16x16xf32>
    %643 = vector.broadcast %cst_260 : f32 to vector<16x16xf32>
    %644 = arith.minimumf %643, %642 : vector<16x16xf32>
    %645 = math.exp %644 : vector<16x16xf32>
    %646 = arith.mulf %645, %132 : vector<16x16xf32>
    %cst_261 = arith.constant dense<0.000000e+00> : vector<16xf32>
    %647 = vector.multi_reduction <add>, %646, %cst_261 [1] : vector<16x16xf32> to vector<16xf32>
    %648 = vector.shape_cast %647 : vector<16xf32> to vector<16x1xf32>
    %cst_262 = arith.constant dense<0.000000e+00> : vector<16x8xf32>
    %649 = tpu.matmul %646, %637, %cst_262 {dimension_numbers = #tpu.dot_dimension_numbers<[1], [0], [0], [1], [0, 0, 1, 1], [], []>} : vector<16x16xf32>, vector<16x8xf32>, vector<16x8xf32> -> vector<16x8xf32>
    %650 = tpu.reciprocal %648 {approx = true} : vector<16x1xf32> -> vector<16x1xf32>
    %651 = vector.broadcast %650 : vector<16x1xf32> to vector<16x8xf32>
    %652 = arith.mulf %649, %651 : vector<16x8xf32>
    %653 = vector.extract_strided_slice %632 {offsets = [0, 8], sizes = [16, 8], strides = [1, 1]} : vector<16x32xf32> to vector<16x8xf32>
    %654 = vector.extract_strided_slice %633 {offsets = [0, 8], sizes = [16, 8], strides = [1, 1]} : vector<16x32xf32> to vector<16x8xf32>
    %655 = vector.extract_strided_slice %634 {offsets = [0, 8], sizes = [16, 8], strides = [1, 1]} : vector<16x32xf32> to vector<16x8xf32>
    %cst_263 = arith.constant dense<0.000000e+00> : vector<16x16xf32>
    %656 = tpu.matmul %653, %654, %cst_263 {dimension_numbers = #tpu.dot_dimension_numbers<[1], [1], [0], [0], [0, 0, 1, 0], [], []>} : vector<16x8xf32>, vector<16x8xf32>, vector<16x16xf32> -> vector<16x16xf32>
    %cst_264 = arith.constant 0.353553385 : f32
    %657 = vector.broadcast %cst_264 : f32 to vector<16x16xf32>
    %658 = arith.mulf %656, %657 : vector<16x16xf32>
    %cst_265 = arith.constant -1.000000e+01 : f32
    %cst_266 = arith.constant 1.000000e+01 : f32
    %659 = vector.broadcast %cst_265 : f32 to vector<16x16xf32>
    %660 = arith.maximumf %659, %658 : vector<16x16xf32>
    %661 = vector.broadcast %cst_266 : f32 to vector<16x16xf32>
    %662 = arith.minimumf %661, %660 : vector<16x16xf32>
    %663 = math.exp %662 : vector<16x16xf32>
    %664 = arith.mulf %663, %132 : vector<16x16xf32>
    %cst_267 = arith.constant dense<0.000000e+00> : vector<16xf32>
    %665 = vector.multi_reduction <add>, %664, %cst_267 [1] : vector<16x16xf32> to vector<16xf32>
    %666 = vector.shape_cast %665 : vector<16xf32> to vector<16x1xf32>
    %cst_268 = arith.constant dense<0.000000e+00> : vector<16x8xf32>
    %667 = tpu.matmul %664, %655, %cst_268 {dimension_numbers = #tpu.dot_dimension_numbers<[1], [0], [0], [1], [0, 0, 1, 1], [], []>} : vector<16x16xf32>, vector<16x8xf32>, vector<16x8xf32> -> vector<16x8xf32>
    %668 = tpu.reciprocal %666 {approx = true} : vector<16x1xf32> -> vector<16x1xf32>
    %669 = vector.broadcast %668 : vector<16x1xf32> to vector<16x8xf32>
    %670 = arith.mulf %667, %669 : vector<16x8xf32>
    %671 = vector.extract_strided_slice %632 {offsets = [0, 16], sizes = [16, 8], strides = [1, 1]} : vector<16x32xf32> to vector<16x8xf32>
    %672 = vector.extract_strided_slice %633 {offsets = [0, 16], sizes = [16, 8], strides = [1, 1]} : vector<16x32xf32> to vector<16x8xf32>
    %673 = vector.extract_strided_slice %634 {offsets = [0, 16], sizes = [16, 8], strides = [1, 1]} : vector<16x32xf32> to vector<16x8xf32>
    %cst_269 = arith.constant dense<0.000000e+00> : vector<16x16xf32>
    %674 = tpu.matmul %671, %672, %cst_269 {dimension_numbers = #tpu.dot_dimension_numbers<[1], [1], [0], [0], [0, 0, 1, 0], [], []>} : vector<16x8xf32>, vector<16x8xf32>, vector<16x16xf32> -> vector<16x16xf32>
    %cst_270 = arith.constant 0.353553385 : f32
    %675 = vector.broadcast %cst_270 : f32 to vector<16x16xf32>
    %676 = arith.mulf %674, %675 : vector<16x16xf32>
    %cst_271 = arith.constant -1.000000e+01 : f32
    %cst_272 = arith.constant 1.000000e+01 : f32
    %677 = vector.broadcast %cst_271 : f32 to vector<16x16xf32>
    %678 = arith.maximumf %677, %676 : vector<16x16xf32>
    %679 = vector.broadcast %cst_272 : f32 to vector<16x16xf32>
    %680 = arith.minimumf %679, %678 : vector<16x16xf32>
    %681 = math.exp %680 : vector<16x16xf32>
    %682 = arith.mulf %681, %132 : vector<16x16xf32>
    %cst_273 = arith.constant dense<0.000000e+00> : vector<16xf32>
    %683 = vector.multi_reduction <add>, %682, %cst_273 [1] : vector<16x16xf32> to vector<16xf32>
    %684 = vector.shape_cast %683 : vector<16xf32> to vector<16x1xf32>
    %cst_274 = arith.constant dense<0.000000e+00> : vector<16x8xf32>
    %685 = tpu.matmul %682, %673, %cst_274 {dimension_numbers = #tpu.dot_dimension_numbers<[1], [0], [0], [1], [0, 0, 1, 1], [], []>} : vector<16x16xf32>, vector<16x8xf32>, vector<16x8xf32> -> vector<16x8xf32>
    %686 = tpu.reciprocal %684 {approx = true} : vector<16x1xf32> -> vector<16x1xf32>
    %687 = vector.broadcast %686 : vector<16x1xf32> to vector<16x8xf32>
    %688 = arith.mulf %685, %687 : vector<16x8xf32>
    %689 = vector.extract_strided_slice %632 {offsets = [0, 24], sizes = [16, 8], strides = [1, 1]} : vector<16x32xf32> to vector<16x8xf32>
    %690 = vector.extract_strided_slice %633 {offsets = [0, 24], sizes = [16, 8], strides = [1, 1]} : vector<16x32xf32> to vector<16x8xf32>
    %691 = vector.extract_strided_slice %634 {offsets = [0, 24], sizes = [16, 8], strides = [1, 1]} : vector<16x32xf32> to vector<16x8xf32>
    %cst_275 = arith.constant dense<0.000000e+00> : vector<16x16xf32>
    %692 = tpu.matmul %689, %690, %cst_275 {dimension_numbers = #tpu.dot_dimension_numbers<[1], [1], [0], [0], [0, 0, 1, 0], [], []>} : vector<16x8xf32>, vector<16x8xf32>, vector<16x16xf32> -> vector<16x16xf32>
    %cst_276 = arith.constant 0.353553385 : f32
    %693 = vector.broadcast %cst_276 : f32 to vector<16x16xf32>
    %694 = arith.mulf %692, %693 : vector<16x16xf32>
    %cst_277 = arith.constant -1.000000e+01 : f32
    %cst_278 = arith.constant 1.000000e+01 : f32
    %695 = vector.broadcast %cst_277 : f32 to vector<16x16xf32>
    %696 = arith.maximumf %695, %694 : vector<16x16xf32>
    %697 = vector.broadcast %cst_278 : f32 to vector<16x16xf32>
    %698 = arith.minimumf %697, %696 : vector<16x16xf32>
    %699 = math.exp %698 : vector<16x16xf32>
    %700 = arith.mulf %699, %132 : vector<16x16xf32>
    %cst_279 = arith.constant dense<0.000000e+00> : vector<16xf32>
    %701 = vector.multi_reduction <add>, %700, %cst_279 [1] : vector<16x16xf32> to vector<16xf32>
    %702 = vector.shape_cast %701 : vector<16xf32> to vector<16x1xf32>
    %cst_280 = arith.constant dense<0.000000e+00> : vector<16x8xf32>
    %703 = tpu.matmul %700, %691, %cst_280 {dimension_numbers = #tpu.dot_dimension_numbers<[1], [0], [0], [1], [0, 0, 1, 1], [], []>} : vector<16x16xf32>, vector<16x8xf32>, vector<16x8xf32> -> vector<16x8xf32>
    %704 = tpu.reciprocal %702 {approx = true} : vector<16x1xf32> -> vector<16x1xf32>
    %705 = vector.broadcast %704 : vector<16x1xf32> to vector<16x8xf32>
    %706 = arith.mulf %703, %705 : vector<16x8xf32>
    %707 = tpu.concatenate %652, %670, %688, %706 in 1 : vector<16x8xf32>, vector<16x8xf32>, vector<16x8xf32>, vector<16x8xf32> -> vector<16x32xf32>
    %c3_281 = arith.constant 3 : index
    %c0_282 = arith.constant 0 : index
    %c0_283 = arith.constant 0 : index
    %708 = vector.load %arg9[%c3_281, %c0_282, %c0_283] : memref<6x32x32xf32, #tpu.memory_space<vmem>>, vector<1x32x32xf32>
    %709 = vector.shape_cast %708 : vector<1x32x32xf32> to vector<32x32xf32>
    %cst_284 = arith.constant dense<0.000000e+00> : vector<16x32xf32>
    %710 = tpu.matmul %707, %709, %cst_284 {dimension_numbers = #tpu.dot_dimension_numbers<[1], [0], [0], [1], [0, 0, 1, 1], [], []>} : vector<16x32xf32>, vector<32x32xf32>, vector<16x32xf32> -> vector<16x32xf32>
    %c3_285 = arith.constant 3 : index
    %c0_286 = arith.constant 0 : index
    %c0_287 = arith.constant 0 : index
    %711 = vector.load %arg13[%c3_285, %c0_286, %c0_287] : memref<34x1x32xf32, #tpu.memory_space<vmem>>, vector<1x1x32xf32>
    %712 = vector.shape_cast %711 : vector<1x1x32xf32> to vector<1x32xf32>
    %713 = vector.broadcast %712 : vector<1x32xf32> to vector<16x32xf32>
    %714 = arith.addf %710, %713 : vector<16x32xf32>
    %715 = arith.addf %595, %714 : vector<16x32xf32>
    %c13 = arith.constant 13 : index
    %c0_288 = arith.constant 0 : index
    %c0_289 = arith.constant 0 : index
    %716 = vector.load %arg13[%c13, %c0_288, %c0_289] : memref<34x1x32xf32, #tpu.memory_space<vmem>>, vector<1x1x32xf32>
    %717 = vector.shape_cast %716 : vector<1x1x32xf32> to vector<1x32xf32>
    %c25 = arith.constant 25 : index
    %c0_290 = arith.constant 0 : index
    %c0_291 = arith.constant 0 : index
    %718 = vector.load %arg13[%c25, %c0_290, %c0_291] : memref<34x1x32xf32, #tpu.memory_space<vmem>>, vector<1x1x32xf32>
    %719 = vector.shape_cast %718 : vector<1x1x32xf32> to vector<1x32xf32>
    %cst_292 = arith.constant dense<0.000000e+00> : vector<16xf32>
    %720 = vector.multi_reduction <add>, %715, %cst_292 [1] : vector<16x32xf32> to vector<16xf32>
    %721 = vector.shape_cast %720 : vector<16xf32> to vector<16x1xf32>
    %cst_293 = arith.constant 3.200000e+01 : f32
    %722 = vector.broadcast %cst_293 : f32 to vector<16x1xf32>
    %723 = arith.divf %721, %722 : vector<16x1xf32>
    %724 = vector.broadcast %723 : vector<16x1xf32> to vector<16x32xf32>
    %725 = arith.subf %715, %724 : vector<16x32xf32>
    %726 = arith.mulf %725, %725 : vector<16x32xf32>
    %cst_294 = arith.constant dense<0.000000e+00> : vector<16xf32>
    %727 = vector.multi_reduction <add>, %726, %cst_294 [1] : vector<16x32xf32> to vector<16xf32>
    %728 = vector.shape_cast %727 : vector<16xf32> to vector<16x1xf32>
    %cst_295 = arith.constant 3.200000e+01 : f32
    %729 = vector.broadcast %cst_295 : f32 to vector<16x1xf32>
    %730 = arith.divf %728, %729 : vector<16x1xf32>
    %731 = vector.broadcast %723 : vector<16x1xf32> to vector<16x32xf32>
    %732 = arith.subf %715, %731 : vector<16x32xf32>
    %cst_296 = arith.constant 9.99999974E-6 : f32
    %733 = vector.broadcast %cst_296 : f32 to vector<16x1xf32>
    %734 = arith.addf %730, %733 : vector<16x1xf32>
    %735 = math.rsqrt %734 : vector<16x1xf32>
    %736 = vector.broadcast %735 : vector<16x1xf32> to vector<16x32xf32>
    %737 = arith.mulf %732, %736 : vector<16x32xf32>
    %738 = vector.broadcast %717 : vector<1x32xf32> to vector<16x32xf32>
    %739 = arith.mulf %737, %738 : vector<16x32xf32>
    %740 = vector.broadcast %719 : vector<1x32xf32> to vector<16x32xf32>
    %741 = arith.addf %739, %740 : vector<16x32xf32>
    %c2_297 = arith.constant 2 : index
    %c0_298 = arith.constant 0 : index
    %c0_299 = arith.constant 0 : index
    %742 = vector.load %arg10[%c2_297, %c0_298, %c0_299] : memref<4x32x64xf32, #tpu.memory_space<vmem>>, vector<1x32x64xf32>
    %743 = vector.shape_cast %742 : vector<1x32x64xf32> to vector<32x64xf32>
    %cst_300 = arith.constant dense<0.000000e+00> : vector<16x64xf32>
    %744 = tpu.matmul %741, %743, %cst_300 {dimension_numbers = #tpu.dot_dimension_numbers<[1], [0], [0], [1], [0, 0, 1, 1], [], []>} : vector<16x32xf32>, vector<32x64xf32>, vector<16x64xf32> -> vector<16x64xf32>
    %c2_301 = arith.constant 2 : index
    %c0_302 = arith.constant 0 : index
    %c0_303 = arith.constant 0 : index
    %745 = vector.load %arg11[%c2_301, %c0_302, %c0_303] : memref<4x1x64xf32, #tpu.memory_space<vmem>>, vector<1x1x64xf32>
    %746 = vector.shape_cast %745 : vector<1x1x64xf32> to vector<1x64xf32>
    %747 = vector.broadcast %746 : vector<1x64xf32> to vector<16x64xf32>
    %748 = arith.addf %744, %747 : vector<16x64xf32>
    %cst_304 = arith.constant 0.000000e+00 : f32
    %749 = vector.broadcast %cst_304 : f32 to vector<16x64xf32>
    %750 = arith.maximumf %748, %749 : vector<16x64xf32>
    %c2_305 = arith.constant 2 : index
    %c0_306 = arith.constant 0 : index
    %c0_307 = arith.constant 0 : index
    %751 = vector.load %arg12[%c2_305, %c0_306, %c0_307] : memref<4x64x32xf32, #tpu.memory_space<vmem>>, vector<1x64x32xf32>
    %752 = vector.shape_cast %751 : vector<1x64x32xf32> to vector<64x32xf32>
    %cst_308 = arith.constant dense<0.000000e+00> : vector<16x32xf32>
    %753 = tpu.matmul %750, %752, %cst_308 {dimension_numbers = #tpu.dot_dimension_numbers<[1], [0], [0], [1], [0, 0, 1, 1], [], []>} : vector<16x64xf32>, vector<64x32xf32>, vector<16x32xf32> -> vector<16x32xf32>
    %c32 = arith.constant 32 : index
    %c0_309 = arith.constant 0 : index
    %c0_310 = arith.constant 0 : index
    %754 = vector.load %arg13[%c32, %c0_309, %c0_310] : memref<34x1x32xf32, #tpu.memory_space<vmem>>, vector<1x1x32xf32>
    %755 = vector.shape_cast %754 : vector<1x1x32xf32> to vector<1x32xf32>
    %756 = vector.broadcast %755 : vector<1x32xf32> to vector<16x32xf32>
    %757 = arith.addf %753, %756 : vector<16x32xf32>
    %758 = arith.addf %715, %757 : vector<16x32xf32>
    %c14 = arith.constant 14 : index
    %c0_311 = arith.constant 0 : index
    %c0_312 = arith.constant 0 : index
    %759 = vector.load %arg13[%c14, %c0_311, %c0_312] : memref<34x1x32xf32, #tpu.memory_space<vmem>>, vector<1x1x32xf32>
    %760 = vector.shape_cast %759 : vector<1x1x32xf32> to vector<1x32xf32>
    %c26 = arith.constant 26 : index
    %c0_313 = arith.constant 0 : index
    %c0_314 = arith.constant 0 : index
    %761 = vector.load %arg13[%c26, %c0_313, %c0_314] : memref<34x1x32xf32, #tpu.memory_space<vmem>>, vector<1x1x32xf32>
    %762 = vector.shape_cast %761 : vector<1x1x32xf32> to vector<1x32xf32>
    %cst_315 = arith.constant dense<0.000000e+00> : vector<16xf32>
    %763 = vector.multi_reduction <add>, %758, %cst_315 [1] : vector<16x32xf32> to vector<16xf32>
    %764 = vector.shape_cast %763 : vector<16xf32> to vector<16x1xf32>
    %cst_316 = arith.constant 3.200000e+01 : f32
    %765 = vector.broadcast %cst_316 : f32 to vector<16x1xf32>
    %766 = arith.divf %764, %765 : vector<16x1xf32>
    %767 = vector.broadcast %766 : vector<16x1xf32> to vector<16x32xf32>
    %768 = arith.subf %758, %767 : vector<16x32xf32>
    %769 = arith.mulf %768, %768 : vector<16x32xf32>
    %cst_317 = arith.constant dense<0.000000e+00> : vector<16xf32>
    %770 = vector.multi_reduction <add>, %769, %cst_317 [1] : vector<16x32xf32> to vector<16xf32>
    %771 = vector.shape_cast %770 : vector<16xf32> to vector<16x1xf32>
    %cst_318 = arith.constant 3.200000e+01 : f32
    %772 = vector.broadcast %cst_318 : f32 to vector<16x1xf32>
    %773 = arith.divf %771, %772 : vector<16x1xf32>
    %774 = vector.broadcast %766 : vector<16x1xf32> to vector<16x32xf32>
    %775 = arith.subf %758, %774 : vector<16x32xf32>
    %cst_319 = arith.constant 9.99999974E-6 : f32
    %776 = vector.broadcast %cst_319 : f32 to vector<16x1xf32>
    %777 = arith.addf %773, %776 : vector<16x1xf32>
    %778 = math.rsqrt %777 : vector<16x1xf32>
    %779 = vector.broadcast %778 : vector<16x1xf32> to vector<16x32xf32>
    %780 = arith.mulf %775, %779 : vector<16x32xf32>
    %781 = vector.broadcast %760 : vector<1x32xf32> to vector<16x32xf32>
    %782 = arith.mulf %780, %781 : vector<16x32xf32>
    %783 = vector.broadcast %762 : vector<1x32xf32> to vector<16x32xf32>
    %784 = arith.addf %782, %783 : vector<16x32xf32>
    %c4 = arith.constant 4 : index
    %c0_320 = arith.constant 0 : index
    %c0_321 = arith.constant 0 : index
    %785 = vector.load %arg7[%c4, %c0_320, %c0_321] : memref<6x32x96xf32, #tpu.memory_space<vmem>>, vector<1x32x96xf32>
    %786 = vector.shape_cast %785 : vector<1x32x96xf32> to vector<32x96xf32>
    %c4_322 = arith.constant 4 : index
    %c0_323 = arith.constant 0 : index
    %c0_324 = arith.constant 0 : index
    %787 = vector.load %arg8[%c4_322, %c0_323, %c0_324] : memref<6x1x96xf32, #tpu.memory_space<vmem>>, vector<1x1x96xf32>
    %788 = vector.shape_cast %787 : vector<1x1x96xf32> to vector<1x96xf32>
    %cst_325 = arith.constant dense<0.000000e+00> : vector<16x96xf32>
    %789 = tpu.matmul %784, %786, %cst_325 {dimension_numbers = #tpu.dot_dimension_numbers<[1], [0], [0], [1], [0, 0, 1, 1], [], []>} : vector<16x32xf32>, vector<32x96xf32>, vector<16x96xf32> -> vector<16x96xf32>
    %790 = vector.broadcast %788 : vector<1x96xf32> to vector<16x96xf32>
    %791 = arith.addf %789, %790 : vector<16x96xf32>
    %792 = vector.extract_strided_slice %791 {offsets = [0, 0], sizes = [16, 32], strides = [1, 1]} : vector<16x96xf32> to vector<16x32xf32>
    %793 = vector.extract_strided_slice %791 {offsets = [0, 32], sizes = [16, 32], strides = [1, 1]} : vector<16x96xf32> to vector<16x32xf32>
    %794 = vector.extract_strided_slice %791 {offsets = [0, 64], sizes = [16, 32], strides = [1, 1]} : vector<16x96xf32> to vector<16x32xf32>
    %795 = vector.extract_strided_slice %792 {offsets = [0, 0], sizes = [16, 8], strides = [1, 1]} : vector<16x32xf32> to vector<16x8xf32>
    %796 = vector.extract_strided_slice %793 {offsets = [0, 0], sizes = [16, 8], strides = [1, 1]} : vector<16x32xf32> to vector<16x8xf32>
    %797 = vector.extract_strided_slice %794 {offsets = [0, 0], sizes = [16, 8], strides = [1, 1]} : vector<16x32xf32> to vector<16x8xf32>
    %cst_326 = arith.constant dense<0.000000e+00> : vector<16x16xf32>
    %798 = tpu.matmul %795, %796, %cst_326 {dimension_numbers = #tpu.dot_dimension_numbers<[1], [1], [0], [0], [0, 0, 1, 0], [], []>} : vector<16x8xf32>, vector<16x8xf32>, vector<16x16xf32> -> vector<16x16xf32>
    %cst_327 = arith.constant 0.353553385 : f32
    %799 = vector.broadcast %cst_327 : f32 to vector<16x16xf32>
    %800 = arith.mulf %798, %799 : vector<16x16xf32>
    %cst_328 = arith.constant -1.000000e+01 : f32
    %cst_329 = arith.constant 1.000000e+01 : f32
    %801 = vector.broadcast %cst_328 : f32 to vector<16x16xf32>
    %802 = arith.maximumf %801, %800 : vector<16x16xf32>
    %803 = vector.broadcast %cst_329 : f32 to vector<16x16xf32>
    %804 = arith.minimumf %803, %802 : vector<16x16xf32>
    %805 = math.exp %804 : vector<16x16xf32>
    %806 = arith.mulf %805, %105 : vector<16x16xf32>
    %cst_330 = arith.constant dense<0.000000e+00> : vector<16xf32>
    %807 = vector.multi_reduction <add>, %806, %cst_330 [1] : vector<16x16xf32> to vector<16xf32>
    %808 = vector.shape_cast %807 : vector<16xf32> to vector<16x1xf32>
    %cst_331 = arith.constant dense<0.000000e+00> : vector<16x8xf32>
    %809 = tpu.matmul %806, %797, %cst_331 {dimension_numbers = #tpu.dot_dimension_numbers<[1], [0], [0], [1], [0, 0, 1, 1], [], []>} : vector<16x16xf32>, vector<16x8xf32>, vector<16x8xf32> -> vector<16x8xf32>
    %810 = tpu.reciprocal %808 {approx = true} : vector<16x1xf32> -> vector<16x1xf32>
    %811 = vector.broadcast %810 : vector<16x1xf32> to vector<16x8xf32>
    %812 = arith.mulf %809, %811 : vector<16x8xf32>
    %813 = vector.extract_strided_slice %792 {offsets = [0, 8], sizes = [16, 8], strides = [1, 1]} : vector<16x32xf32> to vector<16x8xf32>
    %814 = vector.extract_strided_slice %793 {offsets = [0, 8], sizes = [16, 8], strides = [1, 1]} : vector<16x32xf32> to vector<16x8xf32>
    %815 = vector.extract_strided_slice %794 {offsets = [0, 8], sizes = [16, 8], strides = [1, 1]} : vector<16x32xf32> to vector<16x8xf32>
    %cst_332 = arith.constant dense<0.000000e+00> : vector<16x16xf32>
    %816 = tpu.matmul %813, %814, %cst_332 {dimension_numbers = #tpu.dot_dimension_numbers<[1], [1], [0], [0], [0, 0, 1, 0], [], []>} : vector<16x8xf32>, vector<16x8xf32>, vector<16x16xf32> -> vector<16x16xf32>
    %cst_333 = arith.constant 0.353553385 : f32
    %817 = vector.broadcast %cst_333 : f32 to vector<16x16xf32>
    %818 = arith.mulf %816, %817 : vector<16x16xf32>
    %cst_334 = arith.constant -1.000000e+01 : f32
    %cst_335 = arith.constant 1.000000e+01 : f32
    %819 = vector.broadcast %cst_334 : f32 to vector<16x16xf32>
    %820 = arith.maximumf %819, %818 : vector<16x16xf32>
    %821 = vector.broadcast %cst_335 : f32 to vector<16x16xf32>
    %822 = arith.minimumf %821, %820 : vector<16x16xf32>
    %823 = math.exp %822 : vector<16x16xf32>
    %824 = arith.mulf %823, %105 : vector<16x16xf32>
    %cst_336 = arith.constant dense<0.000000e+00> : vector<16xf32>
    %825 = vector.multi_reduction <add>, %824, %cst_336 [1] : vector<16x16xf32> to vector<16xf32>
    %826 = vector.shape_cast %825 : vector<16xf32> to vector<16x1xf32>
    %cst_337 = arith.constant dense<0.000000e+00> : vector<16x8xf32>
    %827 = tpu.matmul %824, %815, %cst_337 {dimension_numbers = #tpu.dot_dimension_numbers<[1], [0], [0], [1], [0, 0, 1, 1], [], []>} : vector<16x16xf32>, vector<16x8xf32>, vector<16x8xf32> -> vector<16x8xf32>
    %828 = tpu.reciprocal %826 {approx = true} : vector<16x1xf32> -> vector<16x1xf32>
    %829 = vector.broadcast %828 : vector<16x1xf32> to vector<16x8xf32>
    %830 = arith.mulf %827, %829 : vector<16x8xf32>
    %831 = vector.extract_strided_slice %792 {offsets = [0, 16], sizes = [16, 8], strides = [1, 1]} : vector<16x32xf32> to vector<16x8xf32>
    %832 = vector.extract_strided_slice %793 {offsets = [0, 16], sizes = [16, 8], strides = [1, 1]} : vector<16x32xf32> to vector<16x8xf32>
    %833 = vector.extract_strided_slice %794 {offsets = [0, 16], sizes = [16, 8], strides = [1, 1]} : vector<16x32xf32> to vector<16x8xf32>
    %cst_338 = arith.constant dense<0.000000e+00> : vector<16x16xf32>
    %834 = tpu.matmul %831, %832, %cst_338 {dimension_numbers = #tpu.dot_dimension_numbers<[1], [1], [0], [0], [0, 0, 1, 0], [], []>} : vector<16x8xf32>, vector<16x8xf32>, vector<16x16xf32> -> vector<16x16xf32>
    %cst_339 = arith.constant 0.353553385 : f32
    %835 = vector.broadcast %cst_339 : f32 to vector<16x16xf32>
    %836 = arith.mulf %834, %835 : vector<16x16xf32>
    %cst_340 = arith.constant -1.000000e+01 : f32
    %cst_341 = arith.constant 1.000000e+01 : f32
    %837 = vector.broadcast %cst_340 : f32 to vector<16x16xf32>
    %838 = arith.maximumf %837, %836 : vector<16x16xf32>
    %839 = vector.broadcast %cst_341 : f32 to vector<16x16xf32>
    %840 = arith.minimumf %839, %838 : vector<16x16xf32>
    %841 = math.exp %840 : vector<16x16xf32>
    %842 = arith.mulf %841, %105 : vector<16x16xf32>
    %cst_342 = arith.constant dense<0.000000e+00> : vector<16xf32>
    %843 = vector.multi_reduction <add>, %842, %cst_342 [1] : vector<16x16xf32> to vector<16xf32>
    %844 = vector.shape_cast %843 : vector<16xf32> to vector<16x1xf32>
    %cst_343 = arith.constant dense<0.000000e+00> : vector<16x8xf32>
    %845 = tpu.matmul %842, %833, %cst_343 {dimension_numbers = #tpu.dot_dimension_numbers<[1], [0], [0], [1], [0, 0, 1, 1], [], []>} : vector<16x16xf32>, vector<16x8xf32>, vector<16x8xf32> -> vector<16x8xf32>
    %846 = tpu.reciprocal %844 {approx = true} : vector<16x1xf32> -> vector<16x1xf32>
    %847 = vector.broadcast %846 : vector<16x1xf32> to vector<16x8xf32>
    %848 = arith.mulf %845, %847 : vector<16x8xf32>
    %849 = vector.extract_strided_slice %792 {offsets = [0, 24], sizes = [16, 8], strides = [1, 1]} : vector<16x32xf32> to vector<16x8xf32>
    %850 = vector.extract_strided_slice %793 {offsets = [0, 24], sizes = [16, 8], strides = [1, 1]} : vector<16x32xf32> to vector<16x8xf32>
    %851 = vector.extract_strided_slice %794 {offsets = [0, 24], sizes = [16, 8], strides = [1, 1]} : vector<16x32xf32> to vector<16x8xf32>
    %cst_344 = arith.constant dense<0.000000e+00> : vector<16x16xf32>
    %852 = tpu.matmul %849, %850, %cst_344 {dimension_numbers = #tpu.dot_dimension_numbers<[1], [1], [0], [0], [0, 0, 1, 0], [], []>} : vector<16x8xf32>, vector<16x8xf32>, vector<16x16xf32> -> vector<16x16xf32>
    %cst_345 = arith.constant 0.353553385 : f32
    %853 = vector.broadcast %cst_345 : f32 to vector<16x16xf32>
    %854 = arith.mulf %852, %853 : vector<16x16xf32>
    %cst_346 = arith.constant -1.000000e+01 : f32
    %cst_347 = arith.constant 1.000000e+01 : f32
    %855 = vector.broadcast %cst_346 : f32 to vector<16x16xf32>
    %856 = arith.maximumf %855, %854 : vector<16x16xf32>
    %857 = vector.broadcast %cst_347 : f32 to vector<16x16xf32>
    %858 = arith.minimumf %857, %856 : vector<16x16xf32>
    %859 = math.exp %858 : vector<16x16xf32>
    %860 = arith.mulf %859, %105 : vector<16x16xf32>
    %cst_348 = arith.constant dense<0.000000e+00> : vector<16xf32>
    %861 = vector.multi_reduction <add>, %860, %cst_348 [1] : vector<16x16xf32> to vector<16xf32>
    %862 = vector.shape_cast %861 : vector<16xf32> to vector<16x1xf32>
    %cst_349 = arith.constant dense<0.000000e+00> : vector<16x8xf32>
    %863 = tpu.matmul %860, %851, %cst_349 {dimension_numbers = #tpu.dot_dimension_numbers<[1], [0], [0], [1], [0, 0, 1, 1], [], []>} : vector<16x16xf32>, vector<16x8xf32>, vector<16x8xf32> -> vector<16x8xf32>
    %864 = tpu.reciprocal %862 {approx = true} : vector<16x1xf32> -> vector<16x1xf32>
    %865 = vector.broadcast %864 : vector<16x1xf32> to vector<16x8xf32>
    %866 = arith.mulf %863, %865 : vector<16x8xf32>
    %867 = tpu.concatenate %812, %830, %848, %866 in 1 : vector<16x8xf32>, vector<16x8xf32>, vector<16x8xf32>, vector<16x8xf32> -> vector<16x32xf32>
    %c4_350 = arith.constant 4 : index
    %c0_351 = arith.constant 0 : index
    %c0_352 = arith.constant 0 : index
    %868 = vector.load %arg9[%c4_350, %c0_351, %c0_352] : memref<6x32x32xf32, #tpu.memory_space<vmem>>, vector<1x32x32xf32>
    %869 = vector.shape_cast %868 : vector<1x32x32xf32> to vector<32x32xf32>
    %cst_353 = arith.constant dense<0.000000e+00> : vector<16x32xf32>
    %870 = tpu.matmul %867, %869, %cst_353 {dimension_numbers = #tpu.dot_dimension_numbers<[1], [0], [0], [1], [0, 0, 1, 1], [], []>} : vector<16x32xf32>, vector<32x32xf32>, vector<16x32xf32> -> vector<16x32xf32>
    %c4_354 = arith.constant 4 : index
    %c0_355 = arith.constant 0 : index
    %c0_356 = arith.constant 0 : index
    %871 = vector.load %arg13[%c4_354, %c0_355, %c0_356] : memref<34x1x32xf32, #tpu.memory_space<vmem>>, vector<1x1x32xf32>
    %872 = vector.shape_cast %871 : vector<1x1x32xf32> to vector<1x32xf32>
    %873 = vector.broadcast %872 : vector<1x32xf32> to vector<16x32xf32>
    %874 = arith.addf %870, %873 : vector<16x32xf32>
    %875 = arith.addf %758, %874 : vector<16x32xf32>
    %c17 = arith.constant 17 : index
    %c0_357 = arith.constant 0 : index
    %c0_358 = arith.constant 0 : index
    %876 = vector.load %arg13[%c17, %c0_357, %c0_358] : memref<34x1x32xf32, #tpu.memory_space<vmem>>, vector<1x1x32xf32>
    %877 = vector.shape_cast %876 : vector<1x1x32xf32> to vector<1x32xf32>
    %c29 = arith.constant 29 : index
    %c0_359 = arith.constant 0 : index
    %c0_360 = arith.constant 0 : index
    %878 = vector.load %arg13[%c29, %c0_359, %c0_360] : memref<34x1x32xf32, #tpu.memory_space<vmem>>, vector<1x1x32xf32>
    %879 = vector.shape_cast %878 : vector<1x1x32xf32> to vector<1x32xf32>
    %cst_361 = arith.constant dense<0.000000e+00> : vector<16xf32>
    %880 = vector.multi_reduction <add>, %875, %cst_361 [1] : vector<16x32xf32> to vector<16xf32>
    %881 = vector.shape_cast %880 : vector<16xf32> to vector<16x1xf32>
    %cst_362 = arith.constant 3.200000e+01 : f32
    %882 = vector.broadcast %cst_362 : f32 to vector<16x1xf32>
    %883 = arith.divf %881, %882 : vector<16x1xf32>
    %884 = vector.broadcast %883 : vector<16x1xf32> to vector<16x32xf32>
    %885 = arith.subf %875, %884 : vector<16x32xf32>
    %886 = arith.mulf %885, %885 : vector<16x32xf32>
    %cst_363 = arith.constant dense<0.000000e+00> : vector<16xf32>
    %887 = vector.multi_reduction <add>, %886, %cst_363 [1] : vector<16x32xf32> to vector<16xf32>
    %888 = vector.shape_cast %887 : vector<16xf32> to vector<16x1xf32>
    %cst_364 = arith.constant 3.200000e+01 : f32
    %889 = vector.broadcast %cst_364 : f32 to vector<16x1xf32>
    %890 = arith.divf %888, %889 : vector<16x1xf32>
    %891 = vector.broadcast %883 : vector<16x1xf32> to vector<16x32xf32>
    %892 = arith.subf %875, %891 : vector<16x32xf32>
    %cst_365 = arith.constant 9.99999974E-6 : f32
    %893 = vector.broadcast %cst_365 : f32 to vector<16x1xf32>
    %894 = arith.addf %890, %893 : vector<16x1xf32>
    %895 = math.rsqrt %894 : vector<16x1xf32>
    %896 = vector.broadcast %895 : vector<16x1xf32> to vector<16x32xf32>
    %897 = arith.mulf %892, %896 : vector<16x32xf32>
    %898 = vector.broadcast %877 : vector<1x32xf32> to vector<16x32xf32>
    %899 = arith.mulf %897, %898 : vector<16x32xf32>
    %900 = vector.broadcast %879 : vector<1x32xf32> to vector<16x32xf32>
    %901 = arith.addf %899, %900 : vector<16x32xf32>
    %c15 = arith.constant 15 : index
    %c0_366 = arith.constant 0 : index
    %c0_367 = arith.constant 0 : index
    %902 = vector.load %arg13[%c15, %c0_366, %c0_367] : memref<34x1x32xf32, #tpu.memory_space<vmem>>, vector<1x1x32xf32>
    %903 = vector.shape_cast %902 : vector<1x1x32xf32> to vector<1x32xf32>
    %c27 = arith.constant 27 : index
    %c0_368 = arith.constant 0 : index
    %c0_369 = arith.constant 0 : index
    %904 = vector.load %arg13[%c27, %c0_368, %c0_369] : memref<34x1x32xf32, #tpu.memory_space<vmem>>, vector<1x1x32xf32>
    %905 = vector.shape_cast %904 : vector<1x1x32xf32> to vector<1x32xf32>
    %cst_370 = arith.constant dense<0.000000e+00> : vector<16xf32>
    %906 = vector.multi_reduction <add>, %901, %cst_370 [1] : vector<16x32xf32> to vector<16xf32>
    %907 = vector.shape_cast %906 : vector<16xf32> to vector<16x1xf32>
    %cst_371 = arith.constant 3.200000e+01 : f32
    %908 = vector.broadcast %cst_371 : f32 to vector<16x1xf32>
    %909 = arith.divf %907, %908 : vector<16x1xf32>
    %910 = vector.broadcast %909 : vector<16x1xf32> to vector<16x32xf32>
    %911 = arith.subf %901, %910 : vector<16x32xf32>
    %912 = arith.mulf %911, %911 : vector<16x32xf32>
    %cst_372 = arith.constant dense<0.000000e+00> : vector<16xf32>
    %913 = vector.multi_reduction <add>, %912, %cst_372 [1] : vector<16x32xf32> to vector<16xf32>
    %914 = vector.shape_cast %913 : vector<16xf32> to vector<16x1xf32>
    %cst_373 = arith.constant 3.200000e+01 : f32
    %915 = vector.broadcast %cst_373 : f32 to vector<16x1xf32>
    %916 = arith.divf %914, %915 : vector<16x1xf32>
    %917 = vector.broadcast %909 : vector<16x1xf32> to vector<16x32xf32>
    %918 = arith.subf %901, %917 : vector<16x32xf32>
    %cst_374 = arith.constant 9.99999974E-6 : f32
    %919 = vector.broadcast %cst_374 : f32 to vector<16x1xf32>
    %920 = arith.addf %916, %919 : vector<16x1xf32>
    %921 = math.rsqrt %920 : vector<16x1xf32>
    %922 = vector.broadcast %921 : vector<16x1xf32> to vector<16x32xf32>
    %923 = arith.mulf %918, %922 : vector<16x32xf32>
    %924 = vector.broadcast %903 : vector<1x32xf32> to vector<16x32xf32>
    %925 = arith.mulf %923, %924 : vector<16x32xf32>
    %926 = vector.broadcast %905 : vector<1x32xf32> to vector<16x32xf32>
    %927 = arith.addf %925, %926 : vector<16x32xf32>
    %c5 = arith.constant 5 : index
    %c0_375 = arith.constant 0 : index
    %c0_376 = arith.constant 0 : index
    %928 = vector.load %arg7[%c5, %c0_375, %c0_376] : memref<6x32x96xf32, #tpu.memory_space<vmem>>, vector<1x32x96xf32>
    %929 = vector.shape_cast %928 : vector<1x32x96xf32> to vector<32x96xf32>
    %c5_377 = arith.constant 5 : index
    %c0_378 = arith.constant 0 : index
    %c0_379 = arith.constant 0 : index
    %930 = vector.load %arg8[%c5_377, %c0_378, %c0_379] : memref<6x1x96xf32, #tpu.memory_space<vmem>>, vector<1x1x96xf32>
    %931 = vector.shape_cast %930 : vector<1x1x96xf32> to vector<1x96xf32>
    %cst_380 = arith.constant dense<0.000000e+00> : vector<16x96xf32>
    %932 = tpu.matmul %927, %929, %cst_380 {dimension_numbers = #tpu.dot_dimension_numbers<[1], [0], [0], [1], [0, 0, 1, 1], [], []>} : vector<16x32xf32>, vector<32x96xf32>, vector<16x96xf32> -> vector<16x96xf32>
    %933 = vector.broadcast %931 : vector<1x96xf32> to vector<16x96xf32>
    %934 = arith.addf %932, %933 : vector<16x96xf32>
    %cst_381 = arith.constant dense<0.000000e+00> : vector<16x96xf32>
    %935 = tpu.matmul %478, %929, %cst_381 {dimension_numbers = #tpu.dot_dimension_numbers<[1], [0], [0], [1], [0, 0, 1, 1], [], []>} : vector<16x32xf32>, vector<32x96xf32>, vector<16x96xf32> -> vector<16x96xf32>
    %936 = vector.broadcast %931 : vector<1x96xf32> to vector<16x96xf32>
    %937 = arith.addf %935, %936 : vector<16x96xf32>
    %938 = vector.extract_strided_slice %934 {offsets = [0, 0], sizes = [16, 32], strides = [1, 1]} : vector<16x96xf32> to vector<16x32xf32>
    %939 = vector.extract_strided_slice %937 {offsets = [0, 32], sizes = [16, 32], strides = [1, 1]} : vector<16x96xf32> to vector<16x32xf32>
    %940 = vector.extract_strided_slice %937 {offsets = [0, 64], sizes = [16, 32], strides = [1, 1]} : vector<16x96xf32> to vector<16x32xf32>
    %941 = vector.extract_strided_slice %938 {offsets = [0, 0], sizes = [16, 8], strides = [1, 1]} : vector<16x32xf32> to vector<16x8xf32>
    %942 = vector.extract_strided_slice %939 {offsets = [0, 0], sizes = [16, 8], strides = [1, 1]} : vector<16x32xf32> to vector<16x8xf32>
    %943 = vector.extract_strided_slice %940 {offsets = [0, 0], sizes = [16, 8], strides = [1, 1]} : vector<16x32xf32> to vector<16x8xf32>
    %cst_382 = arith.constant dense<0.000000e+00> : vector<16x16xf32>
    %944 = tpu.matmul %941, %942, %cst_382 {dimension_numbers = #tpu.dot_dimension_numbers<[1], [1], [0], [0], [0, 0, 1, 0], [], []>} : vector<16x8xf32>, vector<16x8xf32>, vector<16x16xf32> -> vector<16x16xf32>
    %cst_383 = arith.constant 0.353553385 : f32
    %945 = vector.broadcast %cst_383 : f32 to vector<16x16xf32>
    %946 = arith.mulf %944, %945 : vector<16x16xf32>
    %cst_384 = arith.constant -1.000000e+01 : f32
    %cst_385 = arith.constant 1.000000e+01 : f32
    %947 = vector.broadcast %cst_384 : f32 to vector<16x16xf32>
    %948 = arith.maximumf %947, %946 : vector<16x16xf32>
    %949 = vector.broadcast %cst_385 : f32 to vector<16x16xf32>
    %950 = arith.minimumf %949, %948 : vector<16x16xf32>
    %951 = math.exp %950 : vector<16x16xf32>
    %952 = arith.mulf %951, %132 : vector<16x16xf32>
    %cst_386 = arith.constant dense<0.000000e+00> : vector<16xf32>
    %953 = vector.multi_reduction <add>, %952, %cst_386 [1] : vector<16x16xf32> to vector<16xf32>
    %954 = vector.shape_cast %953 : vector<16xf32> to vector<16x1xf32>
    %cst_387 = arith.constant dense<0.000000e+00> : vector<16x8xf32>
    %955 = tpu.matmul %952, %943, %cst_387 {dimension_numbers = #tpu.dot_dimension_numbers<[1], [0], [0], [1], [0, 0, 1, 1], [], []>} : vector<16x16xf32>, vector<16x8xf32>, vector<16x8xf32> -> vector<16x8xf32>
    %956 = tpu.reciprocal %954 {approx = true} : vector<16x1xf32> -> vector<16x1xf32>
    %957 = vector.broadcast %956 : vector<16x1xf32> to vector<16x8xf32>
    %958 = arith.mulf %955, %957 : vector<16x8xf32>
    %959 = vector.extract_strided_slice %938 {offsets = [0, 8], sizes = [16, 8], strides = [1, 1]} : vector<16x32xf32> to vector<16x8xf32>
    %960 = vector.extract_strided_slice %939 {offsets = [0, 8], sizes = [16, 8], strides = [1, 1]} : vector<16x32xf32> to vector<16x8xf32>
    %961 = vector.extract_strided_slice %940 {offsets = [0, 8], sizes = [16, 8], strides = [1, 1]} : vector<16x32xf32> to vector<16x8xf32>
    %cst_388 = arith.constant dense<0.000000e+00> : vector<16x16xf32>
    %962 = tpu.matmul %959, %960, %cst_388 {dimension_numbers = #tpu.dot_dimension_numbers<[1], [1], [0], [0], [0, 0, 1, 0], [], []>} : vector<16x8xf32>, vector<16x8xf32>, vector<16x16xf32> -> vector<16x16xf32>
    %cst_389 = arith.constant 0.353553385 : f32
    %963 = vector.broadcast %cst_389 : f32 to vector<16x16xf32>
    %964 = arith.mulf %962, %963 : vector<16x16xf32>
    %cst_390 = arith.constant -1.000000e+01 : f32
    %cst_391 = arith.constant 1.000000e+01 : f32
    %965 = vector.broadcast %cst_390 : f32 to vector<16x16xf32>
    %966 = arith.maximumf %965, %964 : vector<16x16xf32>
    %967 = vector.broadcast %cst_391 : f32 to vector<16x16xf32>
    %968 = arith.minimumf %967, %966 : vector<16x16xf32>
    %969 = math.exp %968 : vector<16x16xf32>
    %970 = arith.mulf %969, %132 : vector<16x16xf32>
    %cst_392 = arith.constant dense<0.000000e+00> : vector<16xf32>
    %971 = vector.multi_reduction <add>, %970, %cst_392 [1] : vector<16x16xf32> to vector<16xf32>
    %972 = vector.shape_cast %971 : vector<16xf32> to vector<16x1xf32>
    %cst_393 = arith.constant dense<0.000000e+00> : vector<16x8xf32>
    %973 = tpu.matmul %970, %961, %cst_393 {dimension_numbers = #tpu.dot_dimension_numbers<[1], [0], [0], [1], [0, 0, 1, 1], [], []>} : vector<16x16xf32>, vector<16x8xf32>, vector<16x8xf32> -> vector<16x8xf32>
    %974 = tpu.reciprocal %972 {approx = true} : vector<16x1xf32> -> vector<16x1xf32>
    %975 = vector.broadcast %974 : vector<16x1xf32> to vector<16x8xf32>
    %976 = arith.mulf %973, %975 : vector<16x8xf32>
    %977 = vector.extract_strided_slice %938 {offsets = [0, 16], sizes = [16, 8], strides = [1, 1]} : vector<16x32xf32> to vector<16x8xf32>
    %978 = vector.extract_strided_slice %939 {offsets = [0, 16], sizes = [16, 8], strides = [1, 1]} : vector<16x32xf32> to vector<16x8xf32>
    %979 = vector.extract_strided_slice %940 {offsets = [0, 16], sizes = [16, 8], strides = [1, 1]} : vector<16x32xf32> to vector<16x8xf32>
    %cst_394 = arith.constant dense<0.000000e+00> : vector<16x16xf32>
    %980 = tpu.matmul %977, %978, %cst_394 {dimension_numbers = #tpu.dot_dimension_numbers<[1], [1], [0], [0], [0, 0, 1, 0], [], []>} : vector<16x8xf32>, vector<16x8xf32>, vector<16x16xf32> -> vector<16x16xf32>
    %cst_395 = arith.constant 0.353553385 : f32
    %981 = vector.broadcast %cst_395 : f32 to vector<16x16xf32>
    %982 = arith.mulf %980, %981 : vector<16x16xf32>
    %cst_396 = arith.constant -1.000000e+01 : f32
    %cst_397 = arith.constant 1.000000e+01 : f32
    %983 = vector.broadcast %cst_396 : f32 to vector<16x16xf32>
    %984 = arith.maximumf %983, %982 : vector<16x16xf32>
    %985 = vector.broadcast %cst_397 : f32 to vector<16x16xf32>
    %986 = arith.minimumf %985, %984 : vector<16x16xf32>
    %987 = math.exp %986 : vector<16x16xf32>
    %988 = arith.mulf %987, %132 : vector<16x16xf32>
    %cst_398 = arith.constant dense<0.000000e+00> : vector<16xf32>
    %989 = vector.multi_reduction <add>, %988, %cst_398 [1] : vector<16x16xf32> to vector<16xf32>
    %990 = vector.shape_cast %989 : vector<16xf32> to vector<16x1xf32>
    %cst_399 = arith.constant dense<0.000000e+00> : vector<16x8xf32>
    %991 = tpu.matmul %988, %979, %cst_399 {dimension_numbers = #tpu.dot_dimension_numbers<[1], [0], [0], [1], [0, 0, 1, 1], [], []>} : vector<16x16xf32>, vector<16x8xf32>, vector<16x8xf32> -> vector<16x8xf32>
    %992 = tpu.reciprocal %990 {approx = true} : vector<16x1xf32> -> vector<16x1xf32>
    %993 = vector.broadcast %992 : vector<16x1xf32> to vector<16x8xf32>
    %994 = arith.mulf %991, %993 : vector<16x8xf32>
    %995 = vector.extract_strided_slice %938 {offsets = [0, 24], sizes = [16, 8], strides = [1, 1]} : vector<16x32xf32> to vector<16x8xf32>
    %996 = vector.extract_strided_slice %939 {offsets = [0, 24], sizes = [16, 8], strides = [1, 1]} : vector<16x32xf32> to vector<16x8xf32>
    %997 = vector.extract_strided_slice %940 {offsets = [0, 24], sizes = [16, 8], strides = [1, 1]} : vector<16x32xf32> to vector<16x8xf32>
    %cst_400 = arith.constant dense<0.000000e+00> : vector<16x16xf32>
    %998 = tpu.matmul %995, %996, %cst_400 {dimension_numbers = #tpu.dot_dimension_numbers<[1], [1], [0], [0], [0, 0, 1, 0], [], []>} : vector<16x8xf32>, vector<16x8xf32>, vector<16x16xf32> -> vector<16x16xf32>
    %cst_401 = arith.constant 0.353553385 : f32
    %999 = vector.broadcast %cst_401 : f32 to vector<16x16xf32>
    %1000 = arith.mulf %998, %999 : vector<16x16xf32>
    %cst_402 = arith.constant -1.000000e+01 : f32
    %cst_403 = arith.constant 1.000000e+01 : f32
    %1001 = vector.broadcast %cst_402 : f32 to vector<16x16xf32>
    %1002 = arith.maximumf %1001, %1000 : vector<16x16xf32>
    %1003 = vector.broadcast %cst_403 : f32 to vector<16x16xf32>
    %1004 = arith.minimumf %1003, %1002 : vector<16x16xf32>
    %1005 = math.exp %1004 : vector<16x16xf32>
    %1006 = arith.mulf %1005, %132 : vector<16x16xf32>
    %cst_404 = arith.constant dense<0.000000e+00> : vector<16xf32>
    %1007 = vector.multi_reduction <add>, %1006, %cst_404 [1] : vector<16x16xf32> to vector<16xf32>
    %1008 = vector.shape_cast %1007 : vector<16xf32> to vector<16x1xf32>
    %cst_405 = arith.constant dense<0.000000e+00> : vector<16x8xf32>
    %1009 = tpu.matmul %1006, %997, %cst_405 {dimension_numbers = #tpu.dot_dimension_numbers<[1], [0], [0], [1], [0, 0, 1, 1], [], []>} : vector<16x16xf32>, vector<16x8xf32>, vector<16x8xf32> -> vector<16x8xf32>
    %1010 = tpu.reciprocal %1008 {approx = true} : vector<16x1xf32> -> vector<16x1xf32>
    %1011 = vector.broadcast %1010 : vector<16x1xf32> to vector<16x8xf32>
    %1012 = arith.mulf %1009, %1011 : vector<16x8xf32>
    %1013 = tpu.concatenate %958, %976, %994, %1012 in 1 : vector<16x8xf32>, vector<16x8xf32>, vector<16x8xf32>, vector<16x8xf32> -> vector<16x32xf32>
    %c5_406 = arith.constant 5 : index
    %c0_407 = arith.constant 0 : index
    %c0_408 = arith.constant 0 : index
    %1014 = vector.load %arg9[%c5_406, %c0_407, %c0_408] : memref<6x32x32xf32, #tpu.memory_space<vmem>>, vector<1x32x32xf32>
    %1015 = vector.shape_cast %1014 : vector<1x32x32xf32> to vector<32x32xf32>
    %cst_409 = arith.constant dense<0.000000e+00> : vector<16x32xf32>
    %1016 = tpu.matmul %1013, %1015, %cst_409 {dimension_numbers = #tpu.dot_dimension_numbers<[1], [0], [0], [1], [0, 0, 1, 1], [], []>} : vector<16x32xf32>, vector<32x32xf32>, vector<16x32xf32> -> vector<16x32xf32>
    %c5_410 = arith.constant 5 : index
    %c0_411 = arith.constant 0 : index
    %c0_412 = arith.constant 0 : index
    %1017 = vector.load %arg13[%c5_410, %c0_411, %c0_412] : memref<34x1x32xf32, #tpu.memory_space<vmem>>, vector<1x1x32xf32>
    %1018 = vector.shape_cast %1017 : vector<1x1x32xf32> to vector<1x32xf32>
    %1019 = vector.broadcast %1018 : vector<1x32xf32> to vector<16x32xf32>
    %1020 = arith.addf %1016, %1019 : vector<16x32xf32>
    %1021 = arith.addf %901, %1020 : vector<16x32xf32>
    %c16 = arith.constant 16 : index
    %c0_413 = arith.constant 0 : index
    %c0_414 = arith.constant 0 : index
    %1022 = vector.load %arg13[%c16, %c0_413, %c0_414] : memref<34x1x32xf32, #tpu.memory_space<vmem>>, vector<1x1x32xf32>
    %1023 = vector.shape_cast %1022 : vector<1x1x32xf32> to vector<1x32xf32>
    %c28 = arith.constant 28 : index
    %c0_415 = arith.constant 0 : index
    %c0_416 = arith.constant 0 : index
    %1024 = vector.load %arg13[%c28, %c0_415, %c0_416] : memref<34x1x32xf32, #tpu.memory_space<vmem>>, vector<1x1x32xf32>
    %1025 = vector.shape_cast %1024 : vector<1x1x32xf32> to vector<1x32xf32>
    %cst_417 = arith.constant dense<0.000000e+00> : vector<16xf32>
    %1026 = vector.multi_reduction <add>, %1021, %cst_417 [1] : vector<16x32xf32> to vector<16xf32>
    %1027 = vector.shape_cast %1026 : vector<16xf32> to vector<16x1xf32>
    %cst_418 = arith.constant 3.200000e+01 : f32
    %1028 = vector.broadcast %cst_418 : f32 to vector<16x1xf32>
    %1029 = arith.divf %1027, %1028 : vector<16x1xf32>
    %1030 = vector.broadcast %1029 : vector<16x1xf32> to vector<16x32xf32>
    %1031 = arith.subf %1021, %1030 : vector<16x32xf32>
    %1032 = arith.mulf %1031, %1031 : vector<16x32xf32>
    %cst_419 = arith.constant dense<0.000000e+00> : vector<16xf32>
    %1033 = vector.multi_reduction <add>, %1032, %cst_419 [1] : vector<16x32xf32> to vector<16xf32>
    %1034 = vector.shape_cast %1033 : vector<16xf32> to vector<16x1xf32>
    %cst_420 = arith.constant 3.200000e+01 : f32
    %1035 = vector.broadcast %cst_420 : f32 to vector<16x1xf32>
    %1036 = arith.divf %1034, %1035 : vector<16x1xf32>
    %1037 = vector.broadcast %1029 : vector<16x1xf32> to vector<16x32xf32>
    %1038 = arith.subf %1021, %1037 : vector<16x32xf32>
    %cst_421 = arith.constant 9.99999974E-6 : f32
    %1039 = vector.broadcast %cst_421 : f32 to vector<16x1xf32>
    %1040 = arith.addf %1036, %1039 : vector<16x1xf32>
    %1041 = math.rsqrt %1040 : vector<16x1xf32>
    %1042 = vector.broadcast %1041 : vector<16x1xf32> to vector<16x32xf32>
    %1043 = arith.mulf %1038, %1042 : vector<16x32xf32>
    %1044 = vector.broadcast %1023 : vector<1x32xf32> to vector<16x32xf32>
    %1045 = arith.mulf %1043, %1044 : vector<16x32xf32>
    %1046 = vector.broadcast %1025 : vector<1x32xf32> to vector<16x32xf32>
    %1047 = arith.addf %1045, %1046 : vector<16x32xf32>
    %c3_422 = arith.constant 3 : index
    %c0_423 = arith.constant 0 : index
    %c0_424 = arith.constant 0 : index
    %1048 = vector.load %arg10[%c3_422, %c0_423, %c0_424] : memref<4x32x64xf32, #tpu.memory_space<vmem>>, vector<1x32x64xf32>
    %1049 = vector.shape_cast %1048 : vector<1x32x64xf32> to vector<32x64xf32>
    %cst_425 = arith.constant dense<0.000000e+00> : vector<16x64xf32>
    %1050 = tpu.matmul %1047, %1049, %cst_425 {dimension_numbers = #tpu.dot_dimension_numbers<[1], [0], [0], [1], [0, 0, 1, 1], [], []>} : vector<16x32xf32>, vector<32x64xf32>, vector<16x64xf32> -> vector<16x64xf32>
    %c3_426 = arith.constant 3 : index
    %c0_427 = arith.constant 0 : index
    %c0_428 = arith.constant 0 : index
    %1051 = vector.load %arg11[%c3_426, %c0_427, %c0_428] : memref<4x1x64xf32, #tpu.memory_space<vmem>>, vector<1x1x64xf32>
    %1052 = vector.shape_cast %1051 : vector<1x1x64xf32> to vector<1x64xf32>
    %1053 = vector.broadcast %1052 : vector<1x64xf32> to vector<16x64xf32>
    %1054 = arith.addf %1050, %1053 : vector<16x64xf32>
    %cst_429 = arith.constant 0.000000e+00 : f32
    %1055 = vector.broadcast %cst_429 : f32 to vector<16x64xf32>
    %1056 = arith.maximumf %1054, %1055 : vector<16x64xf32>
    %c3_430 = arith.constant 3 : index
    %c0_431 = arith.constant 0 : index
    %c0_432 = arith.constant 0 : index
    %1057 = vector.load %arg12[%c3_430, %c0_431, %c0_432] : memref<4x64x32xf32, #tpu.memory_space<vmem>>, vector<1x64x32xf32>
    %1058 = vector.shape_cast %1057 : vector<1x64x32xf32> to vector<64x32xf32>
    %cst_433 = arith.constant dense<0.000000e+00> : vector<16x32xf32>
    %1059 = tpu.matmul %1056, %1058, %cst_433 {dimension_numbers = #tpu.dot_dimension_numbers<[1], [0], [0], [1], [0, 0, 1, 1], [], []>} : vector<16x64xf32>, vector<64x32xf32>, vector<16x32xf32> -> vector<16x32xf32>
    %c33 = arith.constant 33 : index
    %c0_434 = arith.constant 0 : index
    %c0_435 = arith.constant 0 : index
    %1060 = vector.load %arg13[%c33, %c0_434, %c0_435] : memref<34x1x32xf32, #tpu.memory_space<vmem>>, vector<1x1x32xf32>
    %1061 = vector.shape_cast %1060 : vector<1x1x32xf32> to vector<1x32xf32>
    %1062 = vector.broadcast %1061 : vector<1x32xf32> to vector<16x32xf32>
    %1063 = arith.addf %1059, %1062 : vector<16x32xf32>
    %1064 = arith.addf %1021, %1063 : vector<16x32xf32>
    %c17_436 = arith.constant 17 : index
    %c0_437 = arith.constant 0 : index
    %c0_438 = arith.constant 0 : index
    %1065 = vector.load %arg13[%c17_436, %c0_437, %c0_438] : memref<34x1x32xf32, #tpu.memory_space<vmem>>, vector<1x1x32xf32>
    %1066 = vector.shape_cast %1065 : vector<1x1x32xf32> to vector<1x32xf32>
    %c29_439 = arith.constant 29 : index
    %c0_440 = arith.constant 0 : index
    %c0_441 = arith.constant 0 : index
    %1067 = vector.load %arg13[%c29_439, %c0_440, %c0_441] : memref<34x1x32xf32, #tpu.memory_space<vmem>>, vector<1x1x32xf32>
    %1068 = vector.shape_cast %1067 : vector<1x1x32xf32> to vector<1x32xf32>
    %cst_442 = arith.constant dense<0.000000e+00> : vector<16xf32>
    %1069 = vector.multi_reduction <add>, %1064, %cst_442 [1] : vector<16x32xf32> to vector<16xf32>
    %1070 = vector.shape_cast %1069 : vector<16xf32> to vector<16x1xf32>
    %cst_443 = arith.constant 3.200000e+01 : f32
    %1071 = vector.broadcast %cst_443 : f32 to vector<16x1xf32>
    %1072 = arith.divf %1070, %1071 : vector<16x1xf32>
    %1073 = vector.broadcast %1072 : vector<16x1xf32> to vector<16x32xf32>
    %1074 = arith.subf %1064, %1073 : vector<16x32xf32>
    %1075 = arith.mulf %1074, %1074 : vector<16x32xf32>
    %cst_444 = arith.constant dense<0.000000e+00> : vector<16xf32>
    %1076 = vector.multi_reduction <add>, %1075, %cst_444 [1] : vector<16x32xf32> to vector<16xf32>
    %1077 = vector.shape_cast %1076 : vector<16xf32> to vector<16x1xf32>
    %cst_445 = arith.constant 3.200000e+01 : f32
    %1078 = vector.broadcast %cst_445 : f32 to vector<16x1xf32>
    %1079 = arith.divf %1077, %1078 : vector<16x1xf32>
    %1080 = vector.broadcast %1072 : vector<16x1xf32> to vector<16x32xf32>
    %1081 = arith.subf %1064, %1080 : vector<16x32xf32>
    %cst_446 = arith.constant 9.99999974E-6 : f32
    %1082 = vector.broadcast %cst_446 : f32 to vector<16x1xf32>
    %1083 = arith.addf %1079, %1082 : vector<16x1xf32>
    %1084 = math.rsqrt %1083 : vector<16x1xf32>
    %1085 = vector.broadcast %1084 : vector<16x1xf32> to vector<16x32xf32>
    %1086 = arith.mulf %1081, %1085 : vector<16x32xf32>
    %1087 = vector.broadcast %1066 : vector<1x32xf32> to vector<16x32xf32>
    %1088 = arith.mulf %1086, %1087 : vector<16x32xf32>
    %1089 = vector.broadcast %1068 : vector<1x32xf32> to vector<16x32xf32>
    %1090 = arith.addf %1088, %1089 : vector<16x32xf32>
    %c0_447 = arith.constant 0 : index
    %c0_448 = arith.constant 0 : index
    %1091 = vector.load %arg14[%c0_447, %c0_448] : memref<32x16xf32, #tpu.memory_space<vmem>>, vector<32x16xf32>
    %cst_449 = arith.constant dense<0.000000e+00> : vector<16x16xf32>
    %1092 = tpu.matmul %1090, %1091, %cst_449 {dimension_numbers = #tpu.dot_dimension_numbers<[1], [0], [0], [1], [0, 0, 1, 1], [], []>} : vector<16x32xf32>, vector<32x16xf32>, vector<16x16xf32> -> vector<16x16xf32>
    %c0_450 = arith.constant 0 : index
    %c0_451 = arith.constant 0 : index
    %1093 = vector.load %arg15[%c0_450, %c0_451] : memref<1x16xf32, #tpu.memory_space<vmem>>, vector<1x16xf32>
    %1094 = vector.broadcast %1093 : vector<1x16xf32> to vector<16x16xf32>
    %1095 = arith.addf %1092, %1094 : vector<16x16xf32>
    %cst_452 = arith.constant dense<0xFF800000> : vector<16xf32>
    %1096 = vector.multi_reduction <maximumf>, %1095, %cst_452 [1] : vector<16x16xf32> to vector<16xf32>
    %1097 = vector.shape_cast %1096 : vector<16xf32> to vector<16x1xf32>
    %1098 = vector.broadcast %1097 : vector<16x1xf32> to vector<16x16xf32>
    %1099 = arith.subf %1095, %1098 : vector<16x16xf32>
    %1100 = math.exp %1099 : vector<16x16xf32>
    %cst_453 = arith.constant dense<0.000000e+00> : vector<16xf32>
    %1101 = vector.multi_reduction <add>, %1100, %cst_453 [1] : vector<16x16xf32> to vector<16xf32>
    %1102 = vector.shape_cast %1101 : vector<16xf32> to vector<16x1xf32>
    %1103 = math.log %1102 : vector<16x1xf32>
    %1104 = vector.broadcast %1103 : vector<16x1xf32> to vector<16x16xf32>
    %1105 = arith.subf %1099, %1104 : vector<16x16xf32>
    %c0_454 = arith.constant 0 : index
    %c0_455 = arith.constant 0 : index
    %1106 = vector.load %arg16[%c0_454, %c0_455] : memref<16x16xf32, #tpu.memory_space<vmem>>, vector<16x16xf32>
    tpu.vector_store %arg16[%c0_454, %c0_455], %1105 {strides = array<i32>} : memref<16x16xf32, #tpu.memory_space<vmem>>, vector<16x16xf32>,
    return
  }
  func.func @transform_0(%arg0: i32) -> (i32, i32) {
    %c0_i32 = arith.constant 0 : i32
    %c0_i32_0 = arith.constant 0 : i32
    %c0_i32_1 = arith.constant 0 : i32
    return %c0_i32, %c0_i32_0 : i32, i32
  }
  func.func @transform_1(%arg0: i32) -> (i32, i32) {
    %c0_i32 = arith.constant 0 : i32
    %c0_i32_0 = arith.constant 0 : i32
    %c0_i32_1 = arith.constant 0 : i32
    return %c0_i32, %c0_i32_0 : i32, i32
  }
  func.func @transform_2(%arg0: i32) -> (i32, i32) {
    %c0_i32 = arith.constant 0 : i32
    %c0_i32_0 = arith.constant 0 : i32
    %c0_i32_1 = arith.constant 0 : i32
    return %c0_i32, %c0_i32_0 : i32, i32
  }
  func.func @transform_3(%arg0: i32) -> (i32, i32) {
    %c0_i32 = arith.constant 0 : i32
    %c0_i32_0 = arith.constant 0 : i32
    %c0_i32_1 = arith.constant 0 : i32
    return %c0_i32, %c0_i32_0 : i32, i32
  }
  func.func @transform_4(%arg0: i32) -> (i32, i32, i32) {
    %c0_i32 = arith.constant 0 : i32
    %c0_i32_0 = arith.constant 0 : i32
    %c0_i32_1 = arith.constant 0 : i32
    %c0_i32_2 = arith.constant 0 : i32
    return %c0_i32, %c0_i32_0, %c0_i32_1 : i32, i32, i32
  }
  func.func @transform_5(%arg0: i32) -> (i32, i32) {
    %c0_i32 = arith.constant 0 : i32
    %c0_i32_0 = arith.constant 0 : i32
    %c0_i32_1 = arith.constant 0 : i32
    return %c0_i32, %c0_i32_0 : i32, i32
  }
  func.func @transform_6(%arg0: i32) -> (i32, i32, i32) {
    %c0_i32 = arith.constant 0 : i32
    %c0_i32_0 = arith.constant 0 : i32
    %c0_i32_1 = arith.constant 0 : i32
    %c0_i32_2 = arith.constant 0 : i32
    return %c0_i32, %c0_i32_0, %c0_i32_1 : i32, i32, i32
  }
  func.func @transform_7(%arg0: i32) -> (i32, i32, i32) {
    %c0_i32 = arith.constant 0 : i32
    %c0_i32_0 = arith.constant 0 : i32
    %c0_i32_1 = arith.constant 0 : i32
    %c0_i32_2 = arith.constant 0 : i32
    return %c0_i32, %c0_i32_0, %c0_i32_1 : i32, i32, i32
  }
  func.func @transform_8(%arg0: i32) -> (i32, i32, i32) {
    %c0_i32 = arith.constant 0 : i32
    %c0_i32_0 = arith.constant 0 : i32
    %c0_i32_1 = arith.constant 0 : i32
    %c0_i32_2 = arith.constant 0 : i32
    return %c0_i32, %c0_i32_0, %c0_i32_1 : i32, i32, i32
  }
  func.func @transform_9(%arg0: i32) -> (i32, i32, i32) {
    %c0_i32 = arith.constant 0 : i32
    %c0_i32_0 = arith.constant 0 : i32
    %c0_i32_1 = arith.constant 0 : i32
    %c0_i32_2 = arith.constant 0 : i32
    return %c0_i32, %c0_i32_0, %c0_i32_1 : i32, i32, i32
  }
  func.func @transform_10(%arg0: i32) -> (i32, i32, i32) {
    %c0_i32 = arith.constant 0 : i32
    %c0_i32_0 = arith.constant 0 : i32
    %c0_i32_1 = arith.constant 0 : i32
    %c0_i32_2 = arith.constant 0 : i32
    return %c0_i32, %c0_i32_0, %c0_i32_1 : i32, i32, i32
  }
  func.func @transform_11(%arg0: i32) -> (i32, i32, i32) {
    %c0_i32 = arith.constant 0 : i32
    %c0_i32_0 = arith.constant 0 : i32
    %c0_i32_1 = arith.constant 0 : i32
    %c0_i32_2 = arith.constant 0 : i32
    return %c0_i32, %c0_i32_0, %c0_i32_1 : i32, i32, i32
  }
  func.func @transform_12(%arg0: i32) -> (i32, i32, i32) {
    %c0_i32 = arith.constant 0 : i32
    %c0_i32_0 = arith.constant 0 : i32
    %c0_i32_1 = arith.constant 0 : i32
    %c0_i32_2 = arith.constant 0 : i32
    return %c0_i32, %c0_i32_0, %c0_i32_1 : i32, i32, i32
  }
  func.func @transform_13(%arg0: i32) -> (i32, i32) {
    %c0_i32 = arith.constant 0 : i32
    %c0_i32_0 = arith.constant 0 : i32
    %c0_i32_1 = arith.constant 0 : i32
    return %c0_i32, %c0_i32_0 : i32, i32
  }
  func.func @transform_14(%arg0: i32) -> (i32, i32) {
    %c0_i32 = arith.constant 0 : i32
    %c0_i32_0 = arith.constant 0 : i32
    %c0_i32_1 = arith.constant 0 : i32
    return %c0_i32, %c0_i32_0 : i32, i32
  }
  func.func @transform_15(%arg0: i32) -> (i32, i32) {
    %c0_i32 = arith.constant 0 : i32
    %c0_i32_0 = arith.constant 0 : i32
    %c0_i32_1 = arith.constant 0 : i32
    return %c0_i32, %c0_i32_0 : i32, i32
  }
}

</mosaic_0001>

<bundles_post_ra>
// kernel: transformer_forward.1
= control target key start
LH: loop header
LB: loop body
LE: loop exit
PB: predicated region body
PF: predicated region fallthrough
CT: control target
= control target key end

     0   :  { %20 = vsyncpa [#allocation3], 0  ;;  %s12332_s0 = inlined_call_operand.vmem [shape: s32[16,1], index: 0, kind: input, shape index: {}]   ;;  %s12333_s1 = inlined_call_operand.vmem [shape: s32[16,1], index: 1, kind: input, shape index: {}]   ;;  %s12334_s2 = inlined_call_operand.vmem [shape: s32[16,1], index: 2, kind: input, shape index: {}]   ;;  %s12335_s3 = inlined_call_operand.vmem [shape: s32[16,1], index: 3, kind: input, shape index: {}]   ;;  %s12336_s4 = inlined_call_operand.vmem [shape: f32[2,16,32], index: 4, kind: input, shape index: {}]   ;;  %s12337_s5 = inlined_call_operand.vmem [shape: f32[32,32], index: 5, kind: input, shape index: {}]   ;;  %s12338_s6 = inlined_call_operand.vmem [shape: f32[6,32,96], index: 6, kind: input, shape index: {}]   ;;  %s12339_s7 = inlined_call_operand.hbm [shape: f32[6,1,96], index: 7, kind: input, shape index: {}]   ;;  %s12340_s8 = inlined_call_operand.vmem [shape: f32[6,32,32], index: 8, kind: input, shape index: {}]   ;;  %s12341_s9 = inlined_call_operand.hbm [shape: f32[4,32,64], index: 9, kind: input, shape index: {}]   ;;  %s12342_s10 = inlined_call_operand.vmem [shape: f32[4,1,64], index: 10, kind: input, shape index: {}]   ;;  %s12343_s11 = inlined_call_operand.vmem [shape: f32[4,64,32], index: 11, kind: input, shape index: {}]   ;;  %s12344_s12 = inlined_call_operand.vmem [shape: f32[34,1,32], index: 12, kind: input, shape index: {}]   ;;  %s12345_s13 = inlined_call_operand.vmem [shape: f32[32,16], index: 13, kind: input, shape index: {}]   ;;  %s12346_s14 = inlined_call_operand.hbm [shape: f32[1,16], index: 14, kind: input, shape index: {}]   ;;  %s12347_s15 = inlined_call_operand.hbm [shape: f32[16,16], index: 15, kind: output, shape index: {}]  }
   0x1   :  { %21 = vsyncpa [#allocation6], 0 }
   0x2   :  { %22 = vsyncpa [#allocation4], 0  ;;  %s10827_s18 = smov [#allocation5]   ;;  %s10733_s22 = scalar_lea.hbm %s12341_s9, 2048 }
   0x3   :  { %s56_s19 = sshll.u32 %s10827_s18, 4  ;;  %p10734_p0 = scmp.ne.s32.totalorder %s12341_s9, %s10733_s22  ;;  %s57_s19 = int_to_ptr.vmem [resolvable:$true] %s56_s19 }
   0x4   :  { %p10737_p1 = scmp.lt.u32.totalorder %s10733_s22, %s12341_s9 }
   0x6   :  { %p10739_p2 = pnand %p10737_p1, %p10734_p0 }
   0x8   :  { %10742 = shalt.err (!%p10739_p2)
}
   0x9   :  { %s10743_s27 = scalar_lea.vmem %s57_s19, 2048  ;;  %p10748_p4 = scmp.lt.s32.totalorder %s57_s19, %s57_s19 }
   0xa   :  { %p10744_p3 = scmp.ne.s32.totalorder %s57_s19, %s10743_s27  ;;  %p10749_p5 = scmp.lt.s32.totalorder %s10743_s27, %s10743_s27 }
   0xc   :  { %p10750_p6 = por %p10749_p5, %p10748_p4 }
   0xe   :  { %p10751_p7 = pnand %p10750_p6, %p10744_p3 }
  0x10   :  { %10754 = shalt.err (!%p10751_p7)
}
  0x11   :  { %s12348_s28 = smov 128   ;;  %s10829_s29 = smov 8  }
  0x12   :  { %62 = dma.hbm_to_vmem [thread:$0]  %s12341_s9, 2048, %s57_s19, [#allocation6], %s12348_s28, %s12348_s28, %s10829_s29  }
  0x13   :  { %s10830_s17 = smov [#allocation2]   ;;  %s10755_s22 = scalar_lea.hbm %s12339_s7, 96 }
  0x14   :  { %s42_s18 = sshll.u32 %s10830_s17, 4  ;;  %p10756_p8 = scmp.ne.s32.totalorder %s12339_s7, %s10755_s22  ;;  %s43_s18 = int_to_ptr.vmem [resolvable:$true] %s42_s18 }
  0x15   :  { %p10759_p9 = scmp.lt.u32.totalorder %s10755_s22, %s12339_s7 }
  0x17   :  { %p10761_p10 = pnand %p10759_p9, %p10756_p8 }
  0x19   :  { %10764 = shalt.err (!%p10761_p10)
}
  0x1a   :  { %s10765_s27 = scalar_lea.vmem %s43_s18, 96  ;;  %p10770_p12 = scmp.lt.s32.totalorder %s43_s18, %s43_s18 }
  0x1b   :  { %p10766_p11 = scmp.ne.s32.totalorder %s43_s18, %s10765_s27  ;;  %p10771_p13 = scmp.lt.s32.totalorder %s10765_s27, %s10765_s27 }
  0x1d   :  { %p10772_p0 = por %p10771_p13, %p10770_p12 }
  0x1f   :  { %p10773_p1 = pnand %p10772_p0, %p10766_p11 }
  0x21   :  { %10776 = shalt.err (!%p10773_p1)
}
  0x22   :  { %s10831_s9 = smov 16   ;;  %s10832_s19 = smov 1  }
  0x23   :  { %48 = dma.hbm_to_vmem [thread:$0]  %s12339_s7, 96, %s43_s18, [#allocation3], %s10831_s9, %s10831_s9, %s10832_s19  }
  0x24   :  { %s10833_s17 = smov [#allocation7]   ;;  %s10777_s23 = scalar_lea.hbm %s12346_s14, 16 }
  0x25   :  { %s77_s20 = sshll.u32 %s10833_s17, 4  ;;  %p10778_p2 = scmp.ne.s32.totalorder %s12346_s14, %s10777_s23  ;;  %s78_s20 = int_to_ptr.vmem [resolvable:$true] %s77_s20 }
  0x26   :  { %p10781_p3 = scmp.lt.u32.totalorder %s10777_s23, %s12346_s14 }
  0x28   :  { %p10783_p4 = pnand %p10781_p3, %p10778_p2 }
  0x2a   :  { %10786 = shalt.err (!%p10783_p4)
}
  0x2b   :  { %s10787_s28 = scalar_lea.vmem %s78_s20, 16  ;;  %s10791_s7 = scalar_lea.vmem %s78_s20, 32 }
  0x2c   :  { %p10788_p5 = scmp.ne.s32.totalorder %s78_s20, %s10787_s28  ;;  %p10792_p6 = scmp.lt.s32.totalorder %s78_s20, %s78_s20 }
  0x2d   :  { %p10793_p7 = scmp.lt.s32.totalorder %s10791_s7, %s10787_s28 }
  0x2f   :  { %p10794_p8 = por %p10793_p7, %p10792_p6 }
  0x31   :  { %p10795_p9 = pnand %p10794_p8, %p10788_p5 }
  0x33   :  { %10798 = shalt.err (!%p10795_p9)
}
  0x34   :  { %80 = dma.hbm_to_vmem [thread:$0]  %s12346_s14, 16, %s78_s20, [#allocation6]  }
  0x35   :  { %10821 = dma.done.wait [#allocation3], 96  }
  0x36   :  { %10822 = vsyncadd [#allocation3], 4294967200 }
  0x37   :  { %10823 = dma.done.wait [#allocation6], 2064  }
  0x38   :  { %10824 = vsyncadd [#allocation6], 4294965232  ;;  %v10834_v0 = vmov 0   ;;  %v90_v1 = vld [vmem:[%s12332_s0] sm:$0xff]  ;;  %v95_v4 = vld [vmem:[%s12336_s4 + $0x8] sm:$0xff]  ;;  %v96_v11 = vlaneseq  ;;  %vm122_vm0 = vcmask 130048  }
  0x39   :  { %10239 = vset.pattern.permute.xlu0 %v10834_v0  ;;  %10240 = vset.pattern.permute.xlu1 %v10834_v0  ;;  %v92_v2 = vld [vmem:[%s12333_s1] sm:$0xff]  ;;  %v91_v5 = vld [vmem:[%s12332_s0 + $0x8] sm:$0xff]  ;;  %v10835_v15 = vmov 0.0   ;;  %v208_v17 = vld [vmem:[%s12337_s5 + $0x10] sm:$0xff]  ;;  %vm210_vm4 = vcmask 261120   ;;  %vm685_vm10 = vcmask 64512  }
  0x3a   :  { %99 = vperm.xlu0 %10239, %v90_v1   ;;  %111 = vperm.xlu1 %10240, %v92_v2   ;;  %v94_v3 = vld [vmem:[%s12336_s4] sm:$0xff]  ;;  %v93_v6 = vld [vmem:[%s12333_s1 + $0x8] sm:$0xff]  ;;  %v10998_v12 = vand.u32 127, %v96_v11  ;;  %v209_v18 = vld [vmem:[%s12337_s5 + $0x18] sm:$0xff]  ;;  %s10836_s28 = smov 64   ;;  %s10837_s21 = smov 96  }
  0x3b   :  { %v9737_v7 = vpack.c.bf16 %v95_v4, %v94_v3  ;;  %v206_v8 = vld [vmem:[%s12337_s5] sm:$0xff]  ;;  %v207_v9 = vld [vmem:[%s12337_s5 + $0x8] sm:$0xff]  ;;  %v11012_v21 = vpack.c.bf16 %v209_v18, %v208_v17  ;;  %v8315_v50 = vld [vmem:[%s12336_s4 + $0x10] sm:$0xff]  ;;  %s10838_s22 = smov 120   ;;  %s10839_s14 = smov 88  }
  0x3c   :  { %v10994_v10 = vpack.c.bf16 %v207_v9, %v206_v8  ;;  %v294_v35 = vld [vmem:[%s12334_s2] sm:$0xff]  ;;  %v297_v37 = vld [vmem:[%s12335_s3 + $0x8] sm:$0xff]  ;;  %v8316_v51 = vld [vmem:[%s12336_s4 + $0x18] sm:$0xff]  ;;  %s10841_s20 = smov 112   ;;  %s10842_s23 = smov 80   ;;  %vm512_vm12 = vcmp.ge.s32.totalorder %v10998_v12, 8 }
  0x3d   :  { %9738 = vmatprep.subr.bf16.mxu1 %v9737_v7  ;;  %v296_v36 = vld [vmem:[%s12335_s3] sm:$0xff]  ;;  %v9749_v52 = vpack.c.bf16 %v8316_v51, %v8315_v50  ;;  %v295_v53 = vld [vmem:[%s12334_s2 + $0x8] sm:$0xff]  ;;  %v589_v57 = vld [vmem:[%s12338_s6 + $0x10] sm:$0xff]  ;;  %s10840_s3 = smov 56   ;;  %s10843_s24 = smov 48   ;;  %vm515_vm13 = vcmp.lt.s32.totalorder %v10998_v12, 16 }
  0x3e   :  { %102 = vperm.xlu0 %10239, %v91_v5   ;;  %114 = vperm.xlu1 %10240, %v93_v6   ;;  %v587_v54 = vld [vmem:[%s12338_s6] sm:$0xff]  ;;  %v588_v55 = vld [vmem:[%s12338_s6 + $0x8] sm:$0xff]  ;;  %v590_v58 = vld [vmem:[%s12338_s6 + $0x18] sm:$0xff]  ;;  %s10844_s25 = smov 104   ;;  %s10845_s26 = smov 72   ;;  %vm503_vm14 = vcmp.lt.s32.totalorder %v10998_v12, 8 }
  0x3f   :  { %9740 = vmatpush3.bf16.msra.mxu1 %v9737_v7  ;;  %9750 = vmatprep.subr.bf16.mxu0 %v9749_v52  ;;  %v9761_v56 = vpack.c.bf16 %v588_v55, %v587_v54  ;;  %v9765_v59 = vpack.c.bf16 %v590_v58, %v589_v57  ;;  %v8333_v7 = vld [vmem:[%s12344_s12 + $0x6] ss:$0 sm:$0xff]  ;;  %s10846_s27 = smov 40   ;;  %vm11110_vm11 = vmpackc.low %vm685_vm10, %vm685_vm10  ;;  %s10847_s16 = smov 24  }
  0x40   :  { %9742 = vmatprep.subr.bf16.mxu1 %v10994_v10  ;;  %9752 = vmatpush3.bf16.msra.mxu0 %v9749_v52  ;;  %vm11129_vm15 = vmand %vm512_vm12, %vm515_vm13 }
  0x41   :  { %9754 = vmatprep.subr.bf16.mxu0 %v10994_v10 }
  0xb9   :  { %v100_v13 = vpop.permute.xlu0 %99  ;;  %v112_v14 = vpop.permute.xlu1 %111 }
  0xba   :  { %vm104_vm1 = vcmp.eq.s32.totalorder %v100_v13, %v10998_v12  ;;  %vm116_vm2 = vcmp.eq.s32.totalorder %v112_v14, %v10998_v12  ;;  %v8334_v13 = vld [vmem:[%s12344_s12 + $0x12] ss:$0 sm:$0xff] }
  0xbb   :  { %v8307_v16 = vsel %vm104_vm1, 1.0, %v10835_v15  ;;  %v8309_v20 = vsel %vm116_vm2, 1.0, %v10835_v15  ;;  %vm1506_vm1 = vcmask 195584   ;;  %vm1759_vm2 = vcmask 523264  }
  0xbc   :  { %9084 = vmatprep.mubr.msk.f32.mxu1 %vm122_vm0, %v8307_v16 }
  0xbd   :  { %v103_v19 = vpop.permute.xlu0 %102  ;;  %v115_v23 = vpop.permute.xlu1 %114 }
  0xbe   :  { %vm105_vm3 = vcmp.eq.s32.totalorder %v103_v19, %v10998_v12  ;;  %vm117_vm5 = vcmp.eq.s32.totalorder %v115_v23, %v10998_v12 }
  0xbf   :  { %v8308_v22 = vsel %vm105_vm3, 1.0, %v10835_v15  ;;  %v8310_v24 = vsel %vm117_vm5, 1.0, %v10835_v15 }
  0xc0   :  { %9085 = vmatmul.mubr.msk.f32.vlgmr.msra.gmra.mrb[0].mxu1 %vm122_vm0, %v8308_v22 }
  0xc1   :  { %9744 = vmatpush3.bf16.msra.mxu1 %v10994_v10  ;;  %9095 = vmatprep.mubr.msk.f32.mxu1 %vm210_vm4, %v8309_v20 }
  0xc2   :  { %9746 = vmatprep.subr.bf16.mxu1 %v11012_v21 }
  0xc5   :  { %9748 = vmatpush3.bf16.msra.mxu1 %v11012_v21 }
  0xc6   :  { %9762 = vmatprep.subr.bf16.mxu1 %v9761_v56 }
  0xc8   :  { %9096 = vmatmul.mubr.msk.f32.vlgmr.msra.gmra.mrb[2].mxu1 %vm210_vm4, %v8310_v24 }
  0xc9   :  { %9764 = vmatpush3.bf16.msra.mxu1 %v9761_v56 }
  0xca   :  { %9766 = vmatprep.subr.bf16.mxu1 %v9765_v59 }
  0xcd   :  { %9768 = vmatpush3.bf16.msra.mxu1 %v9765_v59 }
 0x193   :  { %v9086_v25 = vpop.f32.mrb[0].mxu1 }
 0x194   :  { %v195_v26 = vpop.f32.mrb[1].mxu1  ;;  %v205_v27 = vmul.f32 5.656854, %v9086_v25 }
 0x195   :  { %v204_v28 = vmul.f32 5.656854, %v195_v26 }
 0x19b   :  { %v9097_v29 = vpop.f32.mrb[2].mxu1 }
 0x19c   :  { %v11023_v30 = vadd.f32 %v9097_v29, %v205_v27  ;;  %v283_v31 = vpop.f32.mrb[3].mxu1 }
 0x19d   :  { %v11025_v32 = vadd.f32 %v283_v31, %v204_v28  ;;  %v8335_v28 = vld [vmem:[#allocation2] ss:$0 sm:$0xff] }
 0x19e   :  { %v547_v33 = vsel %vm210_vm4, %v11023_v30, 0.0 }
 0x19f   :  { %548 = vadd.xlane.f32.xlu1 %v547_v33  ;;  %v544_v34 = vsel %vm210_vm4, %v11025_v32, 0.0 }
 0x1a0   :  { %545 = vadd.xlane.f32.xlu0 %v544_v34 }
 0x1b0   :  { %302 = vperm.xlu1 %10240, %v294_v35  }
 0x1b4   :  { %314 = vperm.xlu1 %10240, %v296_v36  }
 0x1b8   :  { %317 = vperm.xlu1 %10240, %v297_v37  }
 0x22c   :  { %v549_v38 = vpop.xlane.xlu1 %548 }
 0x22d   :  { %v552_v39 = vmul.f32 0.03125, %v549_v38  ;;  %v546_v40 = vpop.xlane.xlu0 %545 }
 0x22e   :  { %v551_v41 = vmul.f32 0.03125, %v546_v40 }
 0x22f   :  { %v554_v42 = vsub.f32 %v11023_v30, %v552_v39 }
 0x230   :  { %v553_v43 = vsub.f32 %v11025_v32, %v551_v41  ;;  %v303_v44 = vpop.permute.xlu1 %302 }
 0x231   :  { %vm307_vm6 = vcmp.eq.s32.totalorder %v303_v44, %v10998_v12  ;;  %v556_v48 = vmul.f32 %v554_v42, %v554_v42 }
 0x232   :  { %v8317_v45 = vsel %vm307_vm6, 1.0, %v10835_v15  ;;  %v555_v46 = vmul.f32 %v553_v43, %v553_v43 }
 0x233   :  { %9102 = vmatprep.mubr.msk.f32.mxu0 %vm122_vm0, %v8317_v45  ;;  %v560_v49 = vsel %vm210_vm4, %v556_v48, 0.0 }
 0x234   :  { %v557_v47 = vsel %vm210_vm4, %v555_v46, 0.0  ;;  %v315_v2 = vpop.permute.xlu1 %314 }
 0x235   :  { %558 = vadd.xlane.f32.xlu0 %v557_v47  ;;  %vm319_vm7 = vcmp.eq.s32.totalorder %v315_v2, %v10998_v12 }
 0x236   :  { %v8319_v6 = vsel %vm319_vm7, 1.0, %v10835_v15 }
 0x238   :  { %v318_v8 = vpop.permute.xlu1 %317 }
 0x239   :  { %561 = vadd.xlane.f32.xlu0 %v560_v49  ;;  %vm320_vm9 = vcmp.eq.s32.totalorder %v318_v8, %v10998_v12 }
 0x23a   :  { %v8320_v19 = vsel %vm320_vm9, 1.0, %v10835_v15 }
 0x24f   :  { %305 = vperm.xlu0 %10239, %v295_v53  }
 0x2c2   :  { %v559_v60 = vpop.xlane.xlu0 %558 }
 0x2c3   :  { %v563_v61 = vmul.f32 0.03125, %v559_v60 }
 0x2c5   :  { %v565_v62 = vadd.f32 1e-05, %v563_v61 }
 0x2c6   :  { %v562_v63 = vpop.xlane.xlu0 %561 }
 0x2c7   :  { %10481 = vrsqrt.f32 %v565_v62  ;;  %v564_v0 = vmul.f32 0.03125, %v562_v63 }
 0x2c9   :  { %v566_v1 = vadd.f32 1e-05, %v564_v0 }
 0x2cb   :  { %10483 = vrsqrt.f32 %v566_v1 }
 0x2ce   :  { %v306_v3 = vpop.permute.xlu0 %305 }
 0x2cf   :  { %vm308_vm8 = vcmp.eq.s32.totalorder %v306_v3, %v10998_v12 }
 0x2d0   :  { %v8318_v4 = vsel %vm308_vm8, 1.0, %v10835_v15 }
 0x2d1   :  { %v10482_v5 = vpop.eup %10481  ;;  %9103 = vmatmul.mubr.msk.f32.vlgmr.msra.gmra.mrb[0].mxu0 %vm122_vm0, %v8318_v4 }
 0x2d2   :  { %9756 = vmatpush3.bf16.msra.mxu0 %v10994_v10  ;;  %9113 = vmatprep.mubr.msk.f32.mxu0 %vm210_vm4, %v8319_v6  ;;  %v569_v9 = vmul.f32 %v10482_v5, %v553_v43 }
 0x2d3   :  { %9758 = vmatprep.subr.bf16.mxu0 %v11012_v21 }
 0x2d4   :  { %v577_v14 = vmul.f32 %v8333_v7, %v569_v9  ;;  %v11141_v9 = vsel %vm11129_vm15, 1.0, %v10835_v15 }
 0x2d5   :  { %v10484_v16 = vpop.eup %10483 }
 0x2d6   :  { %9760 = vmatpush3.bf16.msra.mxu0 %v11012_v21  ;;  %v570_v17 = vmul.f32 %v10484_v16, %v554_v42  ;;  %v585_v18 = vadd.f32 %v8334_v13, %v577_v14 }
 0x2d8   :  { %v578_v10 = vmul.f32 %v8333_v7, %v570_v17  ;;  %9124 = vmatprep.mubr.msk.f32.mxu1 %vm210_vm4, %v585_v18  ;;  %v11136_v7 = vsel %vm503_vm14, 1.0, %v10835_v15 }
 0x2d9   :  { %9114 = vmatmul.mubr.msk.f32.vlgmr.msra.gmra.mrb[2].mxu0 %vm210_vm4, %v8320_v19 }
 0x2da   :  { %v586_v20 = vadd.f32 %v8334_v13, %v578_v10 }
 0x2dc   :  { %9125 = vmatmul.mubr.msk.f32.vlgmr.msra.gmra.mrb[4].mxu1 %vm210_vm4, %v586_v20 }
 0x3a4   :  { %v9104_v22 = vpop.f32.mrb[0].mxu0 }
 0x3a5   :  { %v397_v23 = vpop.f32.mrb[1].mxu0  ;;  %v407_v24 = vmul.f32 5.656854, %v9104_v22 }
 0x3a6   :  { %v406_v25 = vmul.f32 5.656854, %v397_v23 }
 0x3ac   :  { %v9115_v26 = vpop.f32.mrb[2].mxu0 }
 0x3ad   :  { %v11089_v27 = vadd.f32 %v9115_v26, %v407_v24  ;;  %v480_v21 = vpop.f32.mrb[3].mxu0 }
 0x3ae   :  { %v11091_v29 = vadd.f32 %v480_v21, %v406_v25 }
 0x3af   :  { %v9126_v31 = vpop.f32.mrb[4].mxu1 }
 0x3b0   :  { %v676_v33 = vadd.f32 %v9126_v31, %v8335_v28  ;;  %v670_v34 = vpop.f32.mrb[5].mxu1 }
 0x3b1   :  { %v671_v35 = vadd.f32 %v8335_v28, %v670_v34 }
 0x3b3   :  { %9131 = vmatprep.mubr.msk.f32.mxu0 %vm685_vm10, %v671_v35  ;;  %v10246_v36 = vpack.i.bf16 %v676_v33, %v671_v35 }
 0x3b5   :  { %10247 = vrot.lane.b32.xlu1 %v10246_v36, %s10836_s28  ;;  %10242 = vrot.lane.b32.xlu0 %v10246_v36, %s10837_s21 }
 0x3b9   :  { %878 = vrot.lane.b32.xlu1 %v671_v35, %s10838_s22  ;;  %10252 = vrot.lane.b32.xlu0 %v10246_v36, %s10839_s14 }
 0x3bd   :  { %10257 = vrot.lane.b32.xlu1 %v10246_v36, %s10840_s3  ;;  %880 = vrot.lane.b32.xlu0 %v676_v33, %s10838_s22 }
 0x3c1   :  { %1078 = vrot.lane.b32.xlu1 %v671_v35, %s10841_s20  ;;  %10262 = vrot.lane.b32.xlu0 %v10246_v36, %s10842_s23 }
 0x3c5   :  { %10267 = vrot.lane.b32.xlu1 %v10246_v36, %s10843_s24  ;;  %1080 = vrot.lane.b32.xlu0 %v676_v33, %s10841_s20 }
 0x3c9   :  { %1278 = vrot.lane.b32.xlu1 %v671_v35, %s10844_s25  ;;  %10272 = vrot.lane.b32.xlu0 %v10246_v36, %s10845_s26 }
 0x3cd   :  { %10277 = vrot.lane.b32.xlu1 %v10246_v36, %s10846_s27  ;;  %1280 = vrot.lane.b32.xlu0 %v676_v33, %s10844_s25 }
 0x427   :  { %v10248_v37 = vpop.permute.xlu1 %10247  ;;  %v10243_v38 = vpop.permute.xlu0 %10242 }
 0x428   :  { %v10250_v39 = vunpack.i.h.bf16 %v10248_v37  ;;  %v10249_v40 = vunpack.i.l.bf16 %v10248_v37  ;;  %v10245_v41 = vunpack.i.h.bf16 %v10243_v38  ;;  %v10244_v42 = vunpack.i.l.bf16 %v10243_v38 }
 0x42a   :  { %v9769_v44 = vpack.c.bf16 %v10245_v41, %v10244_v42  ;;  %v9775_v45 = vpack.c.bf16 %v10250_v39, %v10249_v40 }
 0x42b   :  { %v879_v46 = vpop.permute.xlu1 %878  ;;  %v10253_v47 = vpop.permute.xlu0 %10252 }
 0x42c   :  { %v10255_v48 = vunpack.i.h.bf16 %v10253_v47  ;;  %v10254_v49 = vunpack.i.l.bf16 %v10253_v47  ;;  %9771 = vmatprep.subr.msk.bf16.mxu0 %vm11110_vm11, %v9769_v44  ;;  %9776 = vmatprep.subr.bf16.mxu1 %v9775_v45 }
 0x42d   :  { %9774 = vmatpush3.bf16.xpose.msk.msra.mxu0 %vm11110_vm11, %v9769_v44  ;;  %9778 = vmatpush3.bf16.msra.mxu1 %v9775_v45 }
 0x42e   :  { %v9779_v50 = vpack.c.bf16 %v10255_v48, %v10254_v49 }
 0x42f   :  { %v10258_v51 = vpop.permute.xlu1 %10257  ;;  %v881_v52 = vpop.permute.xlu0 %880 }
 0x430   :  { %v10260_v53 = vunpack.i.h.bf16 %v10258_v51  ;;  %v10259_v54 = vunpack.i.l.bf16 %v10258_v51  ;;  %9781 = vmatprep.subr.msk.bf16.mxu1 %vm11110_vm11, %v9779_v50 }
 0x432   :  { %v9785_v55 = vpack.c.bf16 %v10260_v53, %v10259_v54 }
 0x433   :  { %v10263_v56 = vpop.permute.xlu0 %10262  ;;  %v1079_v4 = vpop.permute.xlu1 %1078 }
 0x434   :  { %v10265_v57 = vunpack.i.h.bf16 %v10263_v56  ;;  %v10264_v58 = vunpack.i.l.bf16 %v10263_v56  ;;  %9132 = vmatmul.mubr.msk.f32.vlgmr.msra.gmra.mrb[4].mxu0 %vm685_vm10, %v676_v33  ;;  %9786 = vmatprep.subr.bf16.mxu0 %v9785_v55 }
 0x435   :  { %9788 = vmatpush3.bf16.msra.mxu0 %v9785_v55 }
 0x436   :  { %v11121_v59 = vpack.c.bf16 %v10265_v57, %v10264_v58 }
 0x437   :  { %v10268_v6 = vpop.permute.xlu1 %10267  ;;  %v1081_v13 = vpop.permute.xlu0 %1080 }
 0x438   :  { %9791 = vmatprep.subr.msk.bf16.mxu0 %vm11110_vm11, %v11121_v59  ;;  %v10270_v16 = vunpack.i.h.bf16 %v10268_v6  ;;  %v10269_v17 = vunpack.i.l.bf16 %v10268_v6 }
 0x43a   :  { %v9795_v10 = vpack.c.bf16 %v10270_v16, %v10269_v17 }
 0x43b   :  { %v10273_v20 = vpop.permute.xlu0 %10272  ;;  %v1279_v38 = vpop.permute.xlu1 %1278 }
 0x43c   :  { %v10275_v22 = vunpack.i.h.bf16 %v10273_v20  ;;  %v10274_v23 = vunpack.i.l.bf16 %v10273_v20 }
 0x43e   :  { %v9799_v24 = vpack.c.bf16 %v10275_v22, %v10274_v23 }
 0x43f   :  { %v10278_v39 = vpop.permute.xlu1 %10277 }
 0x440   :  { %v10280_v42 = vunpack.i.h.bf16 %v10278_v39  ;;  %v10279_v44 = vunpack.i.l.bf16 %v10278_v39 }
 0x442   :  { %v9805_v49 = vpack.c.bf16 %v10280_v42, %v10279_v44 }
 0x507   :  { %v9133_v60 = vpop.f32.mrb[4].mxu0 }
 0x508   :  { %v770_v61 = vmul.f32 0.35355338, %v9133_v60  ;;  %v760_v62 = vpop.f32.mrb[5].mxu0 }
 0x509   :  { %v769_v63 = vmul.f32 0.35355338, %v760_v62 }
 0x50a   :  { %v8343_v0 = vclamps-f32 %v770_v61, 10.0 }
 0x50b   :  { %v8342_v1 = vclamps-f32 %v769_v63, 10.0 }
 0x50c   :  { %v777_v2 = vmul.f32 1.442695, %v8343_v0 }
 0x50d   :  { %v775_v3 = vmul.f32 1.442695, %v8342_v1 }
 0x50e   :  { %10485 = vpow2.f32 %v777_v2  ;;  %v1281_v2 = vpop.permute.xlu0 %1280 }
 0x50f   :  { %10487 = vpow2.f32 %v775_v3 }
 0x518   :  { %v10486_v8 = vpop.eup %10485 }
 0x519   :  { %v10488_v14 = vpop.eup %10487  ;;  %v11147_v19 = vmul.f32 %v10486_v8, %v11141_v9 }
 0x51a   :  { %v11144_v18 = vmul.f32 %v10488_v14, %v11136_v7 }
 0x51c   :  { %9138 = vmatprep.mubr.msk.f32.mxu1 %vm122_vm0, %v11144_v18 }
 0x51d   :  { %9139 = vmatmul.mubr.msk.f32.vlgmr.msra.gmra.mrb[6].mxu1 %vm122_vm0, %v11147_v19 }
 0x51e   :  { %9784 = vmatpush3.bf16.xpose.msk.msra.mxu1 %vm11110_vm11, %v9779_v50  ;;  %9145 = vmatprep.mubr.msk.f32.mxu1 %vm685_vm10, %v879_v46 }
 0x51f   :  { %9796 = vmatprep.subr.bf16.mxu1 %v9795_v10 }
 0x525   :  { %9146 = vmatmul.mubr.msk.f32.vlgmr.msra.gmra.mrb[8].mxu1 %vm685_vm10, %v881_v52 }
 0x526   :  { %9798 = vmatpush3.bf16.msra.mxu1 %v9795_v10 }
 0x527   :  { %9801 = vmatprep.subr.msk.bf16.mxu1 %vm11110_vm11, %v9799_v24 }
 0x5f0   :  { %v11159_v25 = vpop.f32.mrb[6].mxu1 }
 0x5f1   :  { %v11161_v26 = vpop.f32.mrb[7].mxu1 }
 0x5f8   :  { %v9147_v21 = vpop.f32.mrb[8].mxu1 }
 0x5f9   :  { %v970_v28 = vmul.f32 0.35355338, %v9147_v21  ;;  %v960_v31 = vpop.f32.mrb[9].mxu1 }
 0x5fa   :  { %v969_v33 = vmul.f32 0.35355338, %v960_v31 }
 0x5fb   :  { %v8351_v34 = vclamps-f32 %v970_v28, 10.0 }
 0x5fc   :  { %v8350_v35 = vclamps-f32 %v969_v33, 10.0 }
 0x5fd   :  { %v977_v36 = vmul.f32 1.442695, %v8351_v34  ;;  %v784_v34 = vsel %vm122_vm0, %v11147_v19, 0.0 }
 0x5fe   :  { %v975_v37 = vmul.f32 1.442695, %v8350_v35 }
 0x5ff   :  { %10489 = vpow2.f32 %v977_v36  ;;  %v781_v36 = vsel %vm122_vm0, %v11144_v18, 0.0 }
 0x600   :  { %10491 = vpow2.f32 %v975_v37 }
 0x609   :  { %v10490_v40 = vpop.eup %10489 }
 0x60a   :  { %v10492_v41 = vpop.eup %10491  ;;  %v980_v45 = vmul.f32 %v10490_v40, %v11141_v9 }
 0x60b   :  { %v979_v46 = vmul.f32 %v10492_v41, %v11136_v7 }
 0x60c   :  { %v984_v47 = vsel %vm122_vm0, %v980_v45, 0.0 }
 0x60d   :  { %985 = vadd.xlane.f32.xlu1 %v984_v47  ;;  %9152 = vmatprep.mubr.msk.f32.mxu0 %vm122_vm0, %v979_v46  ;;  %v981_v48 = vsel %vm122_vm0, %v979_v46, 0.0  ;;  %v1509_v46 = vld [vmem:[%s12340_s8] sm:$0xff]  ;;  %v1510_v47 = vld [vmem:[%s12340_s8 + $0x8] sm:$0xff] }
 0x60e   :  { %9153 = vmatmul.mubr.msk.f32.vlgmr.msra.gmra.mrb[6].mxu0 %vm122_vm0, %v980_v45  ;;  %982 = vadd.xlane.f32.xlu0 %v981_v48  ;;  %v1511_v48 = vld [vmem:[%s12340_s8 + $0x10] sm:$0xff] }
 0x60f   :  { %9794 = vmatpush3.bf16.xpose.msk.msra.mxu0 %vm11110_vm11, %v11121_v59  ;;  %9159 = vmatprep.mubr.msk.f32.mxu0 %vm685_vm10, %v1079_v4 }
 0x610   :  { %9806 = vmatprep.subr.bf16.mxu0 %v9805_v49 }
 0x616   :  { %9160 = vmatmul.mubr.msk.f32.vlgmr.msra.gmra.mrb[8].mxu0 %vm685_vm10, %v1081_v13 }
 0x617   :  { %9808 = vmatpush3.bf16.msra.mxu0 %v9805_v49  ;;  %v9809_v49 = vpack.c.bf16 %v1510_v47, %v1509_v46  ;;  %v1652_v46 = vld [vmem:[#allocation5 + $0x18] sm:$0xff] }
 0x619   :  { %9810 = vmatprep.subr.bf16.mxu0 %v9809_v49 }
 0x69a   :  { %v986_v37 = vpop.xlane.xlu1 %985 }
 0x69b   :  { %v983_v31 = vpop.xlane.xlu0 %982 }
 0x6e1   :  { %v11174_v50 = vpop.f32.mrb[6].mxu0 }
 0x6e2   :  { %v1065_v51 = vpop.f32.mrb[7].mxu0 }
 0x6e9   :  { %v9161_v52 = vpop.f32.mrb[8].mxu0 }
 0x6ea   :  { %v1170_v53 = vmul.f32 0.35355338, %v9161_v52  ;;  %v1160_v54 = vpop.f32.mrb[9].mxu0 }
 0x6eb   :  { %v1169_v55 = vmul.f32 0.35355338, %v1160_v54 }
 0x6ec   :  { %v8359_v56 = vclamps-f32 %v1170_v53, 10.0 }
 0x6ed   :  { %v8358_v57 = vclamps-f32 %v1169_v55, 10.0 }
 0x6ee   :  { %v1177_v58 = vmul.f32 1.442695, %v8359_v56 }
 0x6ef   :  { %v1175_v60 = vmul.f32 1.442695, %v8358_v57 }
 0x6f0   :  { %10493 = vpow2.f32 %v1177_v58 }
 0x6f1   :  { %10495 = vpow2.f32 %v1175_v60 }
 0x6fa   :  { %v10494_v59 = vpop.eup %10493 }
 0x6fb   :  { %v10496_v61 = vpop.eup %10495  ;;  %v1180_v62 = vmul.f32 %v10494_v59, %v11141_v9 }
 0x6fc   :  { %v1179_v63 = vmul.f32 %v10496_v61, %v11136_v7 }
 0x6fd   :  { %v1184_v0 = vsel %vm122_vm0, %v1180_v62, 0.0 }
 0x6fe   :  { %9166 = vmatprep.mubr.msk.f32.mxu1 %vm122_vm0, %v1179_v63  ;;  %1185 = vadd.xlane.f32.xlu0 %v1184_v0  ;;  %v1181_v1 = vsel %vm122_vm0, %v1179_v63, 0.0 }
 0x6ff   :  { %9167 = vmatmul.mubr.msk.f32.vlgmr.msra.gmra.mrb[10].mxu1 %vm122_vm0, %v1180_v62 }
 0x700   :  { %9804 = vmatpush3.bf16.xpose.msk.msra.mxu1 %vm11110_vm11, %v9799_v24  ;;  %9173 = vmatprep.mubr.msk.f32.mxu1 %vm685_vm10, %v1279_v38 }
 0x702   :  { %1182 = vadd.xlane.f32.xlu0 %v1181_v1 }
 0x707   :  { %9174 = vmatmul.mubr.msk.f32.vlgmr.msra.gmra.mrb[12].mxu1 %vm685_vm10, %v1281_v2 }
 0x78b   :  { %v1186_v35 = vpop.xlane.xlu0 %1185 }
 0x78f   :  { %v1183_v38 = vpop.xlane.xlu0 %1182 }
 0x7d2   :  { %v9168_v3 = vpop.f32.mrb[10].mxu1 }
 0x7d3   :  { %v1265_v4 = vpop.f32.mrb[11].mxu1 }
 0x7da   :  { %v9175_v6 = vpop.f32.mrb[12].mxu1 }
 0x7db   :  { %v1370_v8 = vmul.f32 0.35355338, %v9175_v6  ;;  %v1360_v13 = vpop.f32.mrb[13].mxu1 }
 0x7dc   :  { %v1369_v14 = vmul.f32 0.35355338, %v1360_v13 }
 0x7dd   :  { %v8367_v16 = vclamps-f32 %v1370_v8, 10.0 }
 0x7de   :  { %v8366_v17 = vclamps-f32 %v1369_v14, 10.0 }
 0x7df   :  { %v1377_v10 = vmul.f32 1.442695, %v8367_v16 }
 0x7e0   :  { %v1375_v20 = vmul.f32 1.442695, %v8366_v17 }
 0x7e1   :  { %10497 = vpow2.f32 %v1377_v10 }
 0x7e2   :  { %10499 = vpow2.f32 %v1375_v20 }
 0x7e3   :  { %10501 = vrcp.f32 %v983_v31 }
 0x7e4   :  { %10503 = vrcp.f32 %v986_v37 }
 0x7e5   :  { %10505 = vrcp.f32 %v1183_v38 }
 0x7e6   :  { %10507 = vrcp.f32 %v1186_v35 }
 0x7eb   :  { %v10498_v22 = vpop.eup %10497 }
 0x7ec   :  { %v10500_v23 = vpop.eup %10499  ;;  %v1380_v24 = vmul.f32 %v10498_v22, %v11141_v9 }
 0x7ed   :  { %v1379_v21 = vmul.f32 %v10500_v23, %v11136_v7  ;;  %v10502_v39 = vpop.eup %10501 }
 0x7ee   :  { %v1384_v28 = vsel %vm122_vm0, %v1380_v24, 0.0  ;;  %v1076_v40 = vmul.f32 %v10502_v39, %v1065_v51  ;;  %v10504_v41 = vpop.eup %10503 }
 0x7ef   :  { %9180 = vmatprep.mubr.msk.f32.mxu0 %vm122_vm0, %v1379_v21  ;;  %1385 = vadd.xlane.f32.xlu0 %v1384_v28  ;;  %v1381_v33 = vsel %vm122_vm0, %v1379_v21, 0.0  ;;  %v10506_v42 = vpop.eup %10505  ;;  %v1077_v19 = vmul.f32 %v10504_v41, %v11174_v50  ;;  %v1512_v50 = vld [vmem:[%s12340_s8 + $0x18] sm:$0xff] }
 0x7f0   :  { %9181 = vmatmul.mubr.msk.f32.vlgmr.msra.gmra.mrb[10].mxu0 %vm122_vm0, %v1380_v24  ;;  %1382 = vadd.xlane.f32.xlu1 %v1381_v33  ;;  %v1276_v44 = vmul.f32 %v10506_v42, %v1265_v4  ;;  %v10508_v18 = vpop.eup %10507  ;;  %v9813_v51 = vpack.c.bf16 %v1512_v50, %v1511_v48  ;;  %v1743_v48 = vld [vmem:[%s12343_s11] sm:$0xff]  ;;  %v1745_v50 = vld [vmem:[%s12343_s11 + $0x10] sm:$0xff] }
 0x7f1   :  { %v1277_v45 = vmul.f32 %v10508_v18, %v9168_v3  ;;  %9812 = vmatpush3.bf16.msra.mxu0 %v9809_v49  ;;  %v1651_v18 = vld [vmem:[#allocation5 + $0x10] sm:$0xff]  ;;  %v1744_v49 = vld [vmem:[%s12343_s11 + $0x8] sm:$0xff] }
 0x7f2   :  { %9814 = vmatprep.subr.bf16.mxu0 %v9813_v51  ;;  %v9821_v47 = vpack.c.bf16 %v1652_v46, %v1651_v18 }
 0x7f3   :  { %785 = vadd.xlane.f32.xlu0 %v784_v34 }
 0x7f4   :  { %782 = vadd.xlane.f32.xlu1 %v781_v36 }
 0x7f5   :  { %9816 = vmatpush3.bf16.msra.mxu0 %v9813_v51  ;;  %v9825_v51 = vpack.c.bf16 %v1744_v49, %v1743_v48  ;;  %v8389_v48 = vld [vmem:[%s12338_s6 + $0x28] sm:$0xff]  ;;  %v8390_v49 = vld [vmem:[%s12338_s6 + $0x30] sm:$0xff] }
 0x7f7   :  { %9826 = vmatprep.subr.bf16.mxu0 %v9825_v51 }
 0x805   :  { %1480 = vrot.lane.b32.xlu1 %v1076_v40, %s10829_s29 }
 0x809   :  { %1482 = vrot.lane.b32.xlu0 %v1077_v19, %s10829_s29  ;;  %1488 = vrot.lane.b32.xlu1 %v1276_v44, %s10831_s9  ;;  %v1649_v19 = vld [vmem:[#allocation5] sm:$0xff]  ;;  %v1650_v44 = vld [vmem:[#allocation5 + $0x8] sm:$0xff] }
 0x80d   :  { %1490 = vrot.lane.b32.xlu1 %v1277_v45, %s10831_s9  ;;  %v9817_v45 = vpack.c.bf16 %v1650_v44, %v1649_v19 }
 0x80f   :  { %9818 = vmatprep.subr.bf16.mxu1 %v9817_v45 }
 0x810   :  { %9820 = vmatpush3.bf16.msra.mxu1 %v9817_v45 }
 0x811   :  { %9822 = vmatprep.subr.bf16.mxu1 %v9821_v47 }
 0x814   :  { %9824 = vmatpush3.bf16.msra.mxu1 %v9821_v47  ;;  %v8388_v47 = vld [vmem:[%s12338_s6 + $0x20] sm:$0xff] }
 0x87c   :  { %v1386_v52 = vpop.xlane.xlu0 %1385 }
 0x87d   :  { %v1383_v53 = vpop.xlane.xlu1 %1382  ;;  %10509 = vrcp.f32 %v1386_v52  ;;  %v1746_v52 = vld [vmem:[%s12343_s11 + $0x18] sm:$0xff] }
 0x87e   :  { %10511 = vrcp.f32 %v1383_v53  ;;  %v9829_v53 = vpack.c.bf16 %v1746_v52, %v1745_v50  ;;  %v9841_v50 = vpack.c.bf16 %v8389_v48, %v8388_v47 }
 0x880   :  { %v786_v61 = vpop.xlane.xlu0 %785  ;;  %9842 = vmatprep.subr.bf16.mxu1 %v9841_v50 }
 0x881   :  { %v783_v59 = vpop.xlane.xlu1 %782 }
 0x882   :  { %10513 = vrcp.f32 %v783_v59 }
 0x883   :  { %10515 = vrcp.f32 %v786_v61 }
 0x884   :  { %v1483_v6 = vpop.permute.xlu0 %1482 }
 0x885   :  { %v1481_v62 = vpop.permute.xlu1 %1480 }
 0x887   :  { %v10510_v54 = vpop.eup %10509 }
 0x888   :  { %v10512_v56 = vpop.eup %10511 }
 0x889   :  { %v1489_v63 = vpop.permute.xlu1 %1488 }
 0x88c   :  { %v10514_v0 = vpop.eup %10513 }
 0x88d   :  { %v10516_v1 = vpop.eup %10515  ;;  %v876_v2 = vmul.f32 %v10514_v0, %v11161_v26  ;;  %v1491_v4 = vpop.permute.xlu1 %1490  ;;  %v8375_v0 = vld [vmem:[%s12344_s12 + $0x7] ss:$0 sm:$0xff] }
 0x88e   :  { %v877_v3 = vmul.f32 %v10516_v1, %v11159_v25  ;;  %v8370_v25 = vld [vmem:[%s12344_s12] ss:$0 sm:$0xff] }
 0x88f   :  { %v1502_v8 = vsel %vm685_vm10, %v876_v2, %v1481_v62  ;;  %v8376_v2 = vld [vmem:[%s12344_s12 + $0x13] ss:$0 sm:$0xff] }
 0x890   :  { %v1503_v13 = vsel %vm685_vm10, %v877_v3, %v1483_v6  ;;  %v1504_v16 = vsel %vm122_vm0, %v1502_v8, %v1489_v63 }
 0x891   :  { %v1505_v10 = vsel %vm122_vm0, %v1503_v13, %v1491_v4 }
 0x8c3   :  { %v9182_v55 = vpop.f32.mrb[10].mxu0 }
 0x8c4   :  { %v1477_v57 = vmul.f32 %v10510_v54, %v9182_v55  ;;  %v1465_v58 = vpop.f32.mrb[11].mxu0  ;;  %v1747_v54 = vld [vmem:[%s12343_s11 + $0x20] sm:$0xff]  ;;  %v1748_v55 = vld [vmem:[%s12343_s11 + $0x28] sm:$0xff] }
 0x8c5   :  { %v1476_v60 = vmul.f32 %v10512_v56, %v1465_v58  ;;  %v9833_v56 = vpack.c.bf16 %v1748_v55, %v1747_v54 }
 0x8c6   :  { %1498 = vrot.lane.b32.xlu1 %v1477_v57, %s10847_s16 }
 0x8c7   :  { %1496 = vrot.lane.b32.xlu0 %v1476_v60, %s10847_s16 }
 0x938   :  { %v1499_v14 = vpop.permute.xlu1 %1498 }
 0x939   :  { %v1497_v17 = vpop.permute.xlu0 %1496  ;;  %v1508_v22 = vsel %vm1506_vm1, %v1505_v10, %v1499_v14 }
 0x93a   :  { %v1507_v20 = vsel %vm1506_vm1, %v1504_v16, %v1497_v17  ;;  %v1749_v16 = vld [vmem:[%s12343_s11 + $0x30] sm:$0xff]  ;;  %v1750_v17 = vld [vmem:[%s12343_s11 + $0x38] sm:$0xff] }
 0x93b   :  { %9191 = vmatprep.mubr.msk.f32.mxu0 %vm210_vm4, %v1507_v20  ;;  %v9837_v10 = vpack.c.bf16 %v1750_v17, %v1749_v16  ;;  %v8377_v20 = vld [vmem:[%s12342_s10] ss:$0 sm:$0xff] }
 0x93c   :  { %9192 = vmatmul.mubr.msk.f32.vlgmr.msra.gmra.mrb[12].mxu0 %vm210_vm4, %v1508_v22 }
 0x93d   :  { %9828 = vmatpush3.bf16.msra.mxu0 %v9825_v51  ;;  %v8391_v51 = vld [vmem:[%s12338_s6 + $0x38] sm:$0xff] }
 0x93e   :  { %9830 = vmatprep.subr.bf16.mxu0 %v9829_v53  ;;  %v9845_v52 = vpack.c.bf16 %v8391_v51, %v8390_v49 }
 0x941   :  { %9832 = vmatpush3.bf16.msra.mxu0 %v9829_v53 }
 0x942   :  { %9834 = vmatprep.subr.bf16.mxu0 %v9833_v56 }
 0x945   :  { %9836 = vmatpush3.bf16.msra.mxu0 %v9833_v56 }
 0x946   :  { %9838 = vmatprep.subr.bf16.mxu0 %v9837_v10 }
 0x949   :  { %9840 = vmatpush3.bf16.msra.mxu0 %v9837_v10 }
 0xa0f   :  { %v9193_v26 = vpop.f32.mrb[12].mxu0 }
 0xa10   :  { %v1598_v23 = vadd.f32 %v9193_v26, %v8370_v25  ;;  %v1592_v24 = vpop.f32.mrb[13].mxu0 }
 0xa11   :  { %v1593_v21 = vadd.f32 %v8370_v25, %v1592_v24 }
 0xa12   :  { %v11229_v28 = vadd.f32 %v1598_v23, %v11023_v30 }
 0xa13   :  { %v11232_v31 = vadd.f32 %v1593_v21, %v11025_v32 }
 0xa14   :  { %v1610_v33 = vsel %vm210_vm4, %v11229_v28, 0.0 }
 0xa15   :  { %1611 = vadd.xlane.f32.xlu1 %v1610_v33  ;;  %v1607_v34 = vsel %vm210_vm4, %v11232_v31, 0.0  ;;  %v8381_v33 = vld [vmem:[%s12344_s12 + $0x1e] ss:$0 sm:$0xff] }
 0xa16   :  { %1608 = vadd.xlane.f32.xlu0 %v1607_v34 }
 0xaa2   :  { %v1612_v35 = vpop.xlane.xlu1 %1611 }
 0xaa3   :  { %v1614_v36 = vmul.f32 0.03125, %v1612_v35  ;;  %v1609_v37 = vpop.xlane.xlu0 %1608 }
 0xaa4   :  { %v1613_v38 = vmul.f32 0.03125, %v1609_v37 }
 0xaa5   :  { %v1616_v39 = vsub.f32 %v11229_v28, %v1614_v36 }
 0xaa6   :  { %v1615_v30 = vsub.f32 %v11232_v31, %v1613_v38 }
 0xaa7   :  { %v1618_v41 = vmul.f32 %v1616_v39, %v1616_v39 }
 0xaa8   :  { %v1617_v40 = vmul.f32 %v1615_v30, %v1615_v30 }
 0xaa9   :  { %v1622_v42 = vsel %vm210_vm4, %v1618_v41, 0.0 }
 0xaaa   :  { %v1619_v32 = vsel %vm210_vm4, %v1617_v40, 0.0 }
 0xaab   :  { %1620 = vadd.xlane.f32.xlu0 %v1619_v32 }
 0xaaf   :  { %1623 = vadd.xlane.f32.xlu0 %v1622_v42 }
 0xb38   :  { %v1621_v57 = vpop.xlane.xlu0 %1620 }
 0xb39   :  { %v1625_v58 = vmul.f32 0.03125, %v1621_v57 }
 0xb3b   :  { %v1627_v60 = vadd.f32 1e-05, %v1625_v58 }
 0xb3c   :  { %v1624_v59 = vpop.xlane.xlu0 %1623 }
 0xb3d   :  { %10517 = vrsqrt.f32 %v1627_v60  ;;  %v1626_v61 = vmul.f32 0.03125, %v1624_v59  ;;  %v8386_v59 = vld [vmem:[%s12344_s12 + $0x8] ss:$0 sm:$0xff] }
 0xb3f   :  { %v1628_v62 = vadd.f32 1e-05, %v1626_v61 }
 0xb41   :  { %10519 = vrsqrt.f32 %v1628_v62 }
 0xb47   :  { %v10518_v63 = vpop.eup %10517 }
 0xb48   :  { %v1631_v1 = vmul.f32 %v10518_v63, %v1615_v30 }
 0xb4a   :  { %v1639_v3 = vmul.f32 %v8375_v0, %v1631_v1 }
 0xb4b   :  { %v10520_v4 = vpop.eup %10519 }
 0xb4c   :  { %v1632_v6 = vmul.f32 %v10520_v4, %v1616_v39  ;;  %v1647_v8 = vadd.f32 %v8376_v2, %v1639_v3 }
 0xb4e   :  { %v1640_v13 = vmul.f32 %v8375_v0, %v1632_v6  ;;  %9202 = vmatprep.mubr.msk.f32.mxu1 %vm210_vm4, %v1647_v8  ;;  %v8387_v0 = vld [vmem:[%s12344_s12 + $0x14] ss:$0 sm:$0xff]  ;;  %v8392_v6 = vld [vmem:[#allocation2 + $0x1] ss:$0 sm:$0xff] }
 0xb50   :  { %v1648_v14 = vadd.f32 %v8376_v2, %v1640_v13 }
 0xb52   :  { %9203 = vmatmul.mubr.msk.f32.vlgmr.msra.gmra.mrb[14].mxu1 %vm210_vm4, %v1648_v14 }
 0xb53   :  { %9844 = vmatpush3.bf16.msra.mxu1 %v9841_v50 }
 0xb54   :  { %9846 = vmatprep.subr.bf16.mxu1 %v9845_v52 }
 0xb57   :  { %9848 = vmatpush3.bf16.msra.mxu1 %v9845_v52 }
 0xc25   :  { %v9204_v22 = vpop.f32.mrb[14].mxu1 }
 0xc26   :  { %v1738_v25 = vadd.f32 %v9204_v22, %v8377_v20  ;;  %v1732_v26 = vpop.f32.mrb[15].mxu1 }
 0xc27   :  { %v1733_v23 = vadd.f32 %v8377_v20, %v1732_v26 }
 0xc28   :  { %v1742_v21 = vmax.f32 %v1738_v25, 0.0 }
 0xc29   :  { %v1741_v24 = vmax.f32 %v1733_v23, 0.0 }
 0xc2b   :  { %9221 = vmatprep.mubr.msk.f32.mxu0 %vm1759_vm2, %v1741_v24 }
 0xc2c   :  { %9222 = vmatmul.mubr.msk.f32.vlgmr.msra.gmra.mrb[14].mxu0 %vm1759_vm2, %v1742_v21 }
 0xcff   :  { %v9223_v34 = vpop.f32.mrb[14].mxu0 }
 0xd00   :  { %v1838_v35 = vadd.f32 %v9223_v34, %v8381_v33  ;;  %v1832_v36 = vpop.f32.mrb[15].mxu0 }
 0xd01   :  { %v1833_v37 = vadd.f32 %v8381_v33, %v1832_v36 }
 0xd02   :  { %v11283_v38 = vadd.f32 %v1838_v35, %v11229_v28 }
 0xd03   :  { %v11286_v39 = vadd.f32 %v1833_v37, %v11232_v31 }
 0xd04   :  { %v1850_v30 = vsel %vm210_vm4, %v11283_v38, 0.0 }
 0xd05   :  { %1851 = vadd.xlane.f32.xlu0 %v1850_v30  ;;  %v1847_v40 = vsel %vm210_vm4, %v11286_v39, 0.0 }
 0xd06   :  { %1848 = vadd.xlane.f32.xlu1 %v1847_v40 }
 0xd92   :  { %v1852_v32 = vpop.xlane.xlu0 %1851 }
 0xd93   :  { %v1854_v41 = vmul.f32 0.03125, %v1852_v32  ;;  %v1849_v42 = vpop.xlane.xlu1 %1848 }
 0xd94   :  { %v1853_v19 = vmul.f32 0.03125, %v1849_v42 }
 0xd95   :  { %v1856_v44 = vsub.f32 %v11283_v38, %v1854_v41 }
 0xd96   :  { %v1855_v28 = vsub.f32 %v11286_v39, %v1853_v19 }
 0xd97   :  { %v1858_v18 = vmul.f32 %v1856_v44, %v1856_v44 }
 0xd98   :  { %v1857_v45 = vmul.f32 %v1855_v28, %v1855_v28 }
 0xd99   :  { %v1862_v31 = vsel %vm210_vm4, %v1858_v18, 0.0 }
 0xd9a   :  { %1863 = vadd.xlane.f32.xlu0 %v1862_v31  ;;  %v1859_v46 = vsel %vm210_vm4, %v1857_v45, 0.0 }
 0xd9b   :  { %1860 = vadd.xlane.f32.xlu1 %v1859_v46 }
 0xe27   :  { %v1864_v53 = vpop.xlane.xlu0 %1863 }
 0xe28   :  { %v1866_v54 = vmul.f32 0.03125, %v1864_v53  ;;  %v1861_v55 = vpop.xlane.xlu1 %1860 }
 0xe29   :  { %v1865_v56 = vmul.f32 0.03125, %v1861_v55 }
 0xe2a   :  { %v1868_v57 = vadd.f32 1e-05, %v1866_v54 }
 0xe2b   :  { %v1867_v58 = vadd.f32 1e-05, %v1865_v56 }
 0xe2c   :  { %10521 = vrsqrt.f32 %v1868_v57 }
 0xe2d   :  { %10523 = vrsqrt.f32 %v1867_v58 }
 0xe36   :  { %v10522_v60 = vpop.eup %10521 }
 0xe37   :  { %v10524_v61 = vpop.eup %10523  ;;  %v1872_v62 = vmul.f32 %v10522_v60, %v1856_v44 }
 0xe38   :  { %v1871_v63 = vmul.f32 %v10524_v61, %v1855_v28 }
 0xe39   :  { %v1880_v1 = vmul.f32 %v8386_v59, %v1872_v62 }
 0xe3a   :  { %v1879_v2 = vmul.f32 %v8386_v59, %v1871_v63 }
 0xe3b   :  { %v1888_v4 = vadd.f32 %v8387_v0, %v1880_v1 }
 0xe3c   :  { %v1887_v3 = vadd.f32 %v8387_v0, %v1879_v2 }
 0xe3e   :  { %9232 = vmatprep.mubr.msk.f32.mxu1 %vm210_vm4, %v1887_v3 }
 0xe3f   :  { %9233 = vmatmul.mubr.msk.f32.vlgmr.msra.gmra.mrb[16].mxu1 %vm210_vm4, %v1888_v4 }
 0xf12   :  { %v9234_v8 = vpop.f32.mrb[16].mxu1 }
 0xf13   :  { %v1980_v13 = vadd.f32 %v9234_v8, %v8392_v6  ;;  %v1974_v14 = vpop.f32.mrb[17].mxu1 }
 0xf14   :  { %v1975_v16 = vadd.f32 %v8392_v6, %v1974_v14 }
 0xf16   :  { %9239 = vmatprep.mubr.msk.f32.mxu1 %vm685_vm10, %v1975_v16  ;;  %v10286_v17 = vpack.i.bf16 %v1980_v13, %v1975_v16 }
 0xf18   :  { %10287 = vrot.lane.b32.xlu0 %v10286_v17, %s10839_s14  ;;  %10282 = vrot.lane.b32.xlu1 %v10286_v17, %s10837_s21 }
 0xf1c   :  { %10292 = vrot.lane.b32.xlu0 %v10286_v17, %s10836_s28  ;;  %2181 = vrot.lane.b32.xlu1 %v1975_v16, %s10838_s22 }
 0xf20   :  { %10302 = vrot.lane.b32.xlu0 %v10286_v17, %s10842_s23  ;;  %2183 = vrot.lane.b32.xlu1 %v1980_v13, %s10838_s22 }
 0xf24   :  { %2383 = vrot.lane.b32.xlu0 %v1980_v13, %s10841_s20  ;;  %10297 = vrot.lane.b32.xlu1 %v10286_v17, %s10840_s3 }
 0xf28   :  { %10312 = vrot.lane.b32.xlu0 %v10286_v17, %s10845_s26  ;;  %2381 = vrot.lane.b32.xlu1 %v1975_v16, %s10841_s20 }
 0xf2c   :  { %2583 = vrot.lane.b32.xlu0 %v1980_v13, %s10844_s25  ;;  %10307 = vrot.lane.b32.xlu1 %v10286_v17, %s10843_s24 }
 0xf30   :  { %2581 = vrot.lane.b32.xlu1 %v1975_v16, %s10844_s25 }
 0xf34   :  { %10317 = vrot.lane.b32.xlu1 %v10286_v17, %s10846_s27 }
 0xf8a   :  { %v10288_v10 = vpop.permute.xlu0 %10287  ;;  %v10283_v20 = vpop.permute.xlu1 %10282 }
 0xf8b   :  { %v10290_v22 = vunpack.i.h.bf16 %v10288_v10  ;;  %v10289_v25 = vunpack.i.l.bf16 %v10288_v10  ;;  %v10285_v26 = vunpack.i.h.bf16 %v10283_v20  ;;  %v10284_v23 = vunpack.i.l.bf16 %v10283_v20 }
 0xf8d   :  { %v9849_v24 = vpack.c.bf16 %v10285_v26, %v10284_v23  ;;  %v9859_v34 = vpack.c.bf16 %v10290_v22, %v10289_v25 }
 0xf8e   :  { %v10293_v21 = vpop.permute.xlu0 %10292  ;;  %v2182_v33 = vpop.permute.xlu1 %2181 }
 0xf8f   :  { %v10295_v35 = vunpack.i.h.bf16 %v10293_v21  ;;  %v10294_v36 = vunpack.i.l.bf16 %v10293_v21  ;;  %9851 = vmatprep.subr.msk.bf16.mxu1 %vm11110_vm11, %v9849_v24 }
 0xf90   :  { %9854 = vmatpush3.bf16.xpose.msk.msra.mxu1 %vm11110_vm11, %v9849_v24 }
 0xf91   :  { %9861 = vmatprep.subr.msk.bf16.mxu1 %vm11110_vm11, %v9859_v34  ;;  %v9855_v37 = vpack.c.bf16 %v10295_v35, %v10294_v36 }
 0xf92   :  { %v10303_v30 = vpop.permute.xlu0 %10302  ;;  %v2184_v40 = vpop.permute.xlu1 %2183 }
 0xf93   :  { %9856 = vmatprep.subr.bf16.mxu0 %v9855_v37  ;;  %v10305_v6 = vunpack.i.h.bf16 %v10303_v30  ;;  %v10304_v8 = vunpack.i.l.bf16 %v10303_v30 }
 0xf94   :  { %9858 = vmatpush3.bf16.msra.mxu0 %v9855_v37 }
 0xf95   :  { %v9869_v17 = vpack.c.bf16 %v10305_v6, %v10304_v8 }
 0xf96   :  { %v11337_v32 = vpop.permute.xlu0 %2383  ;;  %v10298_v41 = vpop.permute.xlu1 %10297 }
 0xf97   :  { %v10300_v42 = vunpack.i.h.bf16 %v10298_v41  ;;  %v10299_v19 = vunpack.i.l.bf16 %v10298_v41  ;;  %9240 = vmatmul.mubr.msk.f32.vlgmr.msra.gmra.mrb[18].mxu1 %vm685_vm10, %v1980_v13 }
 0xf98   :  { %9864 = vmatpush3.bf16.xpose.msk.msra.mxu1 %vm11110_vm11, %v9859_v34  ;;  %9253 = vmatprep.mubr.msk.f32.mxu1 %vm685_vm10, %v2182_v33 }
 0xf99   :  { %v9865_v44 = vpack.c.bf16 %v10300_v42, %v10299_v19 }
 0xf9a   :  { %v2382_v28 = vpop.permute.xlu1 %2381  ;;  %v10313_v18 = vpop.permute.xlu0 %10312 }
 0xf9b   :  { %9866 = vmatprep.subr.bf16.mxu0 %v9865_v44  ;;  %v10315_v31 = vunpack.i.h.bf16 %v10313_v18  ;;  %v10314_v46 = vunpack.i.l.bf16 %v10313_v18 }
 0xf9d   :  { %v11344_v50 = vpack.c.bf16 %v10315_v31, %v10314_v46 }
 0xf9e   :  { %v10308_v45 = vpop.permute.xlu1 %10307 }
 0xf9f   :  { %v10310_v47 = vunpack.i.h.bf16 %v10308_v45  ;;  %v10309_v48 = vunpack.i.l.bf16 %v10308_v45  ;;  %9254 = vmatmul.mubr.msk.f32.vlgmr.msra.gmra.mrb[20].mxu1 %vm685_vm10, %v2184_v40 }
 0xfa1   :  { %v9875_v49 = vpack.c.bf16 %v10310_v47, %v10309_v48 }
 0xfa2   :  { %v2582_v13 = vpop.permute.xlu1 %2581 }
 0xfa3   :  { %9876 = vmatprep.subr.bf16.mxu1 %v9875_v49 }
 0xfa4   :  { %9878 = vmatpush3.bf16.msra.mxu1 %v9875_v49 }
 0xfa5   :  { %9881 = vmatprep.subr.msk.bf16.mxu1 %vm11110_vm11, %v11344_v50 }
 0xfa6   :  { %v10318_v10 = vpop.permute.xlu1 %10317 }
 0xfa7   :  { %v10320_v26 = vunpack.i.h.bf16 %v10318_v10  ;;  %v10319_v23 = vunpack.i.l.bf16 %v10318_v10 }
 0xfa9   :  { %v9885_v34 = vpack.c.bf16 %v10320_v26, %v10319_v23 }
0x106a   :  { %v9241_v51 = vpop.f32.mrb[18].mxu1 }
0x106b   :  { %v2073_v52 = vmul.f32 0.35355338, %v9241_v51  ;;  %v2063_v53 = vpop.f32.mrb[19].mxu1  ;;  %v2584_v51 = vpop.permute.xlu0 %2583 }
0x106c   :  { %v2072_v54 = vmul.f32 0.35355338, %v2063_v53 }
0x106d   :  { %v8400_v55 = vclamps-f32 %v2073_v52, 10.0 }
0x106e   :  { %v8399_v56 = vclamps-f32 %v2072_v54, 10.0 }
0x106f   :  { %v2080_v57 = vmul.f32 1.442695, %v8400_v55 }
0x1070   :  { %v2078_v58 = vmul.f32 1.442695, %v8399_v56 }
0x1071   :  { %10525 = vpow2.f32 %v2080_v57 }
0x1072   :  { %10527 = vpow2.f32 %v2078_v58  ;;  %v9255_v60 = vpop.f32.mrb[20].mxu1 }
0x1073   :  { %v2273_v59 = vmul.f32 0.35355338, %v9255_v60  ;;  %v2263_v61 = vpop.f32.mrb[21].mxu1 }
0x1074   :  { %v2272_v62 = vmul.f32 0.35355338, %v2263_v61 }
0x1075   :  { %v8408_v63 = vclamps-f32 %v2273_v59, 10.0 }
0x1076   :  { %v8407_v0 = vclamps-f32 %v2272_v62, 10.0 }
0x1077   :  { %v2280_v1 = vmul.f32 1.442695, %v8408_v63 }
0x1078   :  { %v2278_v2 = vmul.f32 1.442695, %v8407_v0 }
0x1079   :  { %10529 = vpow2.f32 %v2280_v1 }
0x107a   :  { %10531 = vpow2.f32 %v2278_v2 }
0x107b   :  { %v10526_v3 = vpop.eup %10525 }
0x107c   :  { %v10528_v4 = vpop.eup %10527  ;;  %v11353_v16 = vmul.f32 %v10526_v3, %v11141_v9 }
0x107d   :  { %v11350_v14 = vmul.f32 %v10528_v4, %v11136_v7 }
0x107e   :  { %v2087_v4 = vsel %vm122_vm0, %v11353_v16, 0.0 }
0x107f   :  { %9246 = vmatprep.mubr.msk.f32.mxu0 %vm122_vm0, %v11350_v14  ;;  %v2084_v8 = vsel %vm122_vm0, %v11350_v14, 0.0 }
0x1080   :  { %9247 = vmatmul.mubr.msk.f32.vlgmr.msra.gmra.mrb[16].mxu0 %vm122_vm0, %v11353_v16 }
0x1081   :  { %9868 = vmatpush3.bf16.msra.mxu0 %v9865_v44 }
0x1082   :  { %9871 = vmatprep.subr.msk.bf16.mxu0 %vm11110_vm11, %v9869_v17 }
0x1083   :  { %v10530_v20 = vpop.eup %10529 }
0x1084   :  { %v10532_v22 = vpop.eup %10531  ;;  %v2283_v25 = vmul.f32 %v10530_v20, %v11141_v9 }
0x1085   :  { %v2282_v24 = vmul.f32 %v10532_v22, %v11136_v7 }
0x1086   :  { %v2287_v21 = vsel %vm122_vm0, %v2283_v25, 0.0 }
0x1087   :  { %2288 = vadd.xlane.f32.xlu1 %v2287_v21  ;;  %9260 = vmatprep.mubr.msk.f32.mxu0 %vm122_vm0, %v2282_v24  ;;  %v2284_v33 = vsel %vm122_vm0, %v2282_v24, 0.0  ;;  %v8427_v24 = vld [vmem:[%s12340_s8 + $0x20] sm:$0xff]  ;;  %v8428_v21 = vld [vmem:[%s12340_s8 + $0x28] sm:$0xff] }
0x1088   :  { %2285 = vadd.xlane.f32.xlu0 %v2284_v33  ;;  %9261 = vmatmul.mubr.msk.f32.vlgmr.msra.gmra.mrb[18].mxu0 %vm122_vm0, %v2283_v25  ;;  %v8429_v33 = vld [vmem:[%s12340_s8 + $0x30] sm:$0xff] }
0x1089   :  { %9267 = vmatprep.mubr.msk.f32.mxu0 %vm685_vm10, %v2382_v28 }
0x108a   :  { %9874 = vmatpush3.bf16.xpose.msk.msra.mxu0 %vm11110_vm11, %v9869_v17 }
0x108b   :  { %9886 = vmatprep.subr.bf16.mxu0 %v9885_v34 }
0x1091   :  { %9268 = vmatmul.mubr.msk.f32.vlgmr.msra.gmra.mrb[20].mxu0 %vm685_vm10, %v11337_v32 }
0x1092   :  { %9888 = vmatpush3.bf16.msra.mxu0 %v9885_v34  ;;  %v9889_v34 = vpack.c.bf16 %v8428_v21, %v8427_v24 }
0x1094   :  { %9890 = vmatprep.subr.bf16.mxu0 %v9889_v34 }
0x1115   :  { %v2286_v2 = vpop.xlane.xlu0 %2285 }
0x1153   :  { %v11372_v35 = vpop.f32.mrb[16].mxu0 }
0x1154   :  { %v11374_v36 = vpop.f32.mrb[17].mxu0 }
0x115b   :  { %v11376_v37 = vpop.f32.mrb[18].mxu0 }
0x115c   :  { %v2368_v30 = vpop.f32.mrb[19].mxu0 }
0x1164   :  { %v9269_v40 = vpop.f32.mrb[20].mxu0 }
0x1165   :  { %v2473_v41 = vmul.f32 0.35355338, %v9269_v40  ;;  %v2463_v42 = vpop.f32.mrb[21].mxu0 }
0x1166   :  { %v2472_v19 = vmul.f32 0.35355338, %v2463_v42 }
0x1167   :  { %v8416_v44 = vclamps-f32 %v2473_v41, 10.0 }
0x1168   :  { %v8415_v28 = vclamps-f32 %v2472_v19, 10.0 }
0x1169   :  { %v2480_v18 = vmul.f32 1.442695, %v8416_v44 }
0x116a   :  { %v2478_v45 = vmul.f32 1.442695, %v8415_v28 }
0x116b   :  { %10533 = vpow2.f32 %v2480_v18 }
0x116c   :  { %10535 = vpow2.f32 %v2478_v45 }
0x1175   :  { %v10534_v31 = vpop.eup %10533 }
0x1176   :  { %v10536_v32 = vpop.eup %10535  ;;  %v2483_v46 = vmul.f32 %v10534_v31, %v11141_v9 }
0x1177   :  { %v2482_v47 = vmul.f32 %v10536_v32, %v11136_v7 }
0x1178   :  { %v2487_v48 = vsel %vm122_vm0, %v2483_v46, 0.0 }
0x1179   :  { %2488 = vadd.xlane.f32.xlu0 %v2487_v48  ;;  %9274 = vmatprep.mubr.msk.f32.mxu1 %vm122_vm0, %v2482_v47  ;;  %v2484_v49 = vsel %vm122_vm0, %v2482_v47, 0.0 }
0x117a   :  { %9275 = vmatmul.mubr.msk.f32.vlgmr.msra.gmra.mrb[22].mxu1 %vm122_vm0, %v2483_v46 }
0x117b   :  { %9884 = vmatpush3.bf16.xpose.msk.msra.mxu1 %vm11110_vm11, %v11344_v50  ;;  %9281 = vmatprep.mubr.msk.f32.mxu1 %vm685_vm10, %v2582_v13  ;;  %v2289_v13 = vpop.xlane.xlu1 %2288 }
0x117d   :  { %2485 = vadd.xlane.f32.xlu0 %v2484_v49 }
0x1182   :  { %9282 = vmatmul.mubr.msk.f32.vlgmr.msra.gmra.mrb[24].mxu1 %vm685_vm10, %v2584_v51 }
0x1206   :  { %v2489_v6 = vpop.xlane.xlu0 %2488 }
0x120a   :  { %v2486_v17 = vpop.xlane.xlu0 %2485 }
0x124d   :  { %v9276_v52 = vpop.f32.mrb[22].mxu1 }
0x124e   :  { %v2568_v53 = vpop.f32.mrb[23].mxu1 }
0x1255   :  { %v9283_v54 = vpop.f32.mrb[24].mxu1 }
0x1256   :  { %v2673_v55 = vmul.f32 0.35355338, %v9283_v54  ;;  %v2663_v56 = vpop.f32.mrb[25].mxu1 }
0x1257   :  { %v2672_v57 = vmul.f32 0.35355338, %v2663_v56 }
0x1258   :  { %v8424_v58 = vclamps-f32 %v2673_v55, 10.0 }
0x1259   :  { %v8423_v60 = vclamps-f32 %v2672_v57, 10.0 }
0x125a   :  { %v2680_v59 = vmul.f32 1.442695, %v8424_v58 }
0x125b   :  { %v2678_v61 = vmul.f32 1.442695, %v8423_v60 }
0x125c   :  { %10537 = vpow2.f32 %v2680_v59 }
0x125d   :  { %10539 = vpow2.f32 %v2678_v61 }
0x125e   :  { %10541 = vrcp.f32 %v2286_v2 }
0x125f   :  { %10543 = vrcp.f32 %v2289_v13 }
0x1260   :  { %10545 = vrcp.f32 %v2486_v17 }
0x1261   :  { %10547 = vrcp.f32 %v2489_v6  ;;  %v3199_v6 = vsel %vm210_vm4, %v11091_v29, 0.0 }
0x1266   :  { %v10538_v50 = vpop.eup %10537 }
0x1267   :  { %v10540_v62 = vpop.eup %10539  ;;  %v2683_v63 = vmul.f32 %v10538_v50, %v11141_v9 }
0x1268   :  { %v2682_v0 = vmul.f32 %v10540_v62, %v11136_v7  ;;  %v10542_v10 = vpop.eup %10541 }
0x1269   :  { %v2687_v1 = vsel %vm122_vm0, %v2683_v63, 0.0  ;;  %v2379_v20 = vmul.f32 %v10542_v10, %v2368_v30  ;;  %v10544_v22 = vpop.eup %10543 }
0x126a   :  { %9288 = vmatprep.mubr.msk.f32.mxu0 %vm122_vm0, %v2682_v0  ;;  %2688 = vadd.xlane.f32.xlu0 %v2687_v1  ;;  %v2684_v3 = vsel %vm122_vm0, %v2682_v0, 0.0  ;;  %v10546_v25 = vpop.eup %10545  ;;  %v2380_v16 = vmul.f32 %v10544_v22, %v11376_v37  ;;  %v8430_v37 = vld [vmem:[%s12340_s8 + $0x38] sm:$0xff] }
0x126b   :  { %9289 = vmatmul.mubr.msk.f32.vlgmr.msra.gmra.mrb[22].mxu0 %vm122_vm0, %v2683_v63  ;;  %2685 = vadd.xlane.f32.xlu1 %v2684_v3  ;;  %v2579_v26 = vmul.f32 %v10546_v25, %v2568_v53  ;;  %v10548_v14 = vpop.eup %10547  ;;  %v9893_v30 = vpack.c.bf16 %v8430_v37, %v8429_v33 }
0x126c   :  { %v2580_v23 = vmul.f32 %v10548_v14, %v9276_v52  ;;  %9892 = vmatpush3.bf16.msra.mxu0 %v9889_v34 }
0x126d   :  { %9894 = vmatprep.subr.bf16.mxu0 %v9893_v30 }
0x126e   :  { %2088 = vadd.xlane.f32.xlu0 %v2087_v4 }
0x126f   :  { %2085 = vadd.xlane.f32.xlu1 %v2084_v8  ;;  %v3202_v8 = vsel %vm210_vm4, %v11089_v27, 0.0 }
0x1270   :  { %9896 = vmatpush3.bf16.msra.mxu0 %v9893_v30 }
0x1280   :  { %2783 = vrot.lane.b32.xlu1 %v2379_v20, %s10829_s29 }
0x1284   :  { %2785 = vrot.lane.b32.xlu0 %v2380_v16, %s10829_s29  ;;  %2791 = vrot.lane.b32.xlu1 %v2579_v26, %s10831_s9 }
0x1288   :  { %2793 = vrot.lane.b32.xlu1 %v2580_v23, %s10831_s9 }
0x12f7   :  { %v2689_v40 = vpop.xlane.xlu0 %2688 }
0x12f8   :  { %v2686_v41 = vpop.xlane.xlu1 %2685  ;;  %10549 = vrcp.f32 %v2689_v40 }
0x12f9   :  { %10551 = vrcp.f32 %v2686_v41 }
0x12fb   :  { %v2089_v32 = vpop.xlane.xlu0 %2088 }
0x12fc   :  { %v2086_v31 = vpop.xlane.xlu1 %2085 }
0x12fd   :  { %10553 = vrcp.f32 %v2086_v31  ;;  %v8463_v31 = vld [vmem:[%s12338_s6 + $0x40] sm:$0xff] }
0x12fe   :  { %10555 = vrcp.f32 %v2089_v32  ;;  %v8464_v32 = vld [vmem:[%s12338_s6 + $0x48] sm:$0xff] }
0x12ff   :  { %v2786_v54 = vpop.permute.xlu0 %2785 }
0x1300   :  { %v2784_v46 = vpop.permute.xlu1 %2783 }
0x1302   :  { %v10550_v42 = vpop.eup %10549 }
0x1303   :  { %v10552_v44 = vpop.eup %10551 }
0x1304   :  { %v2792_v47 = vpop.permute.xlu1 %2791 }
0x1307   :  { %v10554_v48 = vpop.eup %10553 }
0x1308   :  { %v10556_v49 = vpop.eup %10555  ;;  %v2179_v51 = vmul.f32 %v10554_v48, %v11374_v36  ;;  %v2794_v53 = vpop.permute.xlu1 %2793  ;;  %v8444_v48 = vld [vmem:[%s12343_s11 + $0x48] sm:$0xff] }
0x1309   :  { %v2180_v52 = vmul.f32 %v10556_v49, %v11372_v35  ;;  %v8432_v35 = vld [vmem:[%s12344_s12 + $0x1] ss:$0 sm:$0xff]  ;;  %v8445_v49 = vld [vmem:[%s12343_s11 + $0x50] sm:$0xff] }
0x130a   :  { %v2805_v55 = vsel %vm685_vm10, %v2179_v51, %v2784_v46  ;;  %v9921_v46 = vpack.c.bf16 %v8464_v32, %v8463_v31 }
0x130b   :  { %v2806_v56 = vsel %vm685_vm10, %v2180_v52, %v2786_v54  ;;  %v2807_v58 = vsel %vm122_vm0, %v2805_v55, %v2792_v47  ;;  %v8443_v47 = vld [vmem:[%s12343_s11 + $0x40] sm:$0xff]  ;;  %v8446_v52 = vld [vmem:[%s12343_s11 + $0x58] sm:$0xff]  ;;  %v8448_v55 = vld [vmem:[%s12343_s11 + $0x68] sm:$0xff] }
0x130c   :  { %v2808_v59 = vsel %vm122_vm0, %v2806_v56, %v2794_v53  ;;  %v9905_v51 = vpack.c.bf16 %v8444_v48, %v8443_v47  ;;  %v9909_v53 = vpack.c.bf16 %v8446_v52, %v8445_v49  ;;  %v8447_v54 = vld [vmem:[%s12343_s11 + $0x60] sm:$0xff] }
0x130d   :  { %v9913_v56 = vpack.c.bf16 %v8448_v55, %v8447_v54  ;;  %v8467_v48 = vld [vmem:[#allocation2 + $0x2] ss:$0 sm:$0xff] }
0x130e   :  { %9906 = vmatprep.subr.bf16.mxu0 %v9905_v51 }
0x133e   :  { %v9290_v19 = vpop.f32.mrb[22].mxu0 }
0x133f   :  { %v2780_v28 = vmul.f32 %v10550_v42, %v9290_v19  ;;  %v2768_v18 = vpop.f32.mrb[23].mxu0  ;;  %v2954_v42 = vld [vmem:[#allocation5 + $0x20] sm:$0xff]  ;;  %v2955_v19 = vld [vmem:[#allocation5 + $0x28] sm:$0xff] }
0x1340   :  { %v2779_v45 = vmul.f32 %v10552_v44, %v2768_v18  ;;  %v9897_v44 = vpack.c.bf16 %v2955_v19, %v2954_v42  ;;  %v2957_v18 = vld [vmem:[#allocation5 + $0x38] sm:$0xff]  ;;  %v8449_v19 = vld [vmem:[%s12343_s11 + $0x70] sm:$0xff] }
0x1341   :  { %2801 = vrot.lane.b32.xlu1 %v2780_v28, %s10847_s16  ;;  %v2956_v28 = vld [vmem:[#allocation5 + $0x30] sm:$0xff] }
0x1342   :  { %2799 = vrot.lane.b32.xlu0 %v2779_v45, %s10847_s16  ;;  %9898 = vmatprep.subr.bf16.mxu1 %v9897_v44  ;;  %v9901_v45 = vpack.c.bf16 %v2957_v18, %v2956_v28 }
0x1343   :  { %9900 = vmatpush3.bf16.msra.mxu1 %v9897_v44  ;;  %v8450_v44 = vld [vmem:[%s12343_s11 + $0x78] sm:$0xff] }
0x1344   :  { %9902 = vmatprep.subr.bf16.mxu1 %v9901_v45  ;;  %v9917_v28 = vpack.c.bf16 %v8450_v44, %v8449_v19 }
0x1347   :  { %9904 = vmatpush3.bf16.msra.mxu1 %v9901_v45 }
0x1348   :  { %9922 = vmatprep.subr.bf16.mxu1 %v9921_v46 }
0x13b3   :  { %v2802_v57 = vpop.permute.xlu1 %2801 }
0x13b4   :  { %v2800_v60 = vpop.permute.xlu0 %2799  ;;  %v2810_v50 = vsel %vm1506_vm1, %v2808_v59, %v2802_v57 }
0x13b5   :  { %v2809_v61 = vsel %vm1506_vm1, %v2807_v58, %v2800_v60 }
0x13b6   :  { %9299 = vmatprep.mubr.msk.f32.mxu0 %vm210_vm4, %v2809_v61 }
0x13b7   :  { %9300 = vmatmul.mubr.msk.f32.vlgmr.msra.gmra.mrb[24].mxu0 %vm210_vm4, %v2810_v50 }
0x13b8   :  { %9908 = vmatpush3.bf16.msra.mxu0 %v9905_v51 }
0x13b9   :  { %9910 = vmatprep.subr.bf16.mxu0 %v9909_v53 }
0x13bc   :  { %9912 = vmatpush3.bf16.msra.mxu0 %v9909_v53 }
0x13bd   :  { %9914 = vmatprep.subr.bf16.mxu0 %v9913_v56 }
0x13c0   :  { %9916 = vmatpush3.bf16.msra.mxu0 %v9913_v56 }
0x13c1   :  { %9918 = vmatprep.subr.bf16.mxu0 %v9917_v28 }
0x13c4   :  { %9920 = vmatpush3.bf16.msra.mxu0 %v9917_v28  ;;  %v492_v28 = vshrl.u32 %v96_v11, 7 }
0x13c6   :  { %vm524_vm3 = vcmp.le.s32.totalorder %v10998_v12, %v492_v28 }
0x13c7   :  { %vm526_vm6 = vmand %vm503_vm14, %vm524_vm3 }
0x13c8   :  { %v11579_v11 = vsel %vm526_vm6, 1.0, %v10835_v15 }
0x148a   :  { %v9301_v36 = vpop.f32.mrb[24].mxu0 }
0x148b   :  { %v2902_v62 = vadd.f32 %v9301_v36, %v8432_v35  ;;  %v2896_v63 = vpop.f32.mrb[25].mxu0 }
0x148c   :  { %v2897_v0 = vadd.f32 %v8432_v35, %v2896_v63 }
0x148d   :  { %v11432_v1 = vadd.f32 %v2902_v62, %v11283_v38 }
0x148e   :  { %v11435_v2 = vadd.f32 %v2897_v0, %v11286_v39 }
0x148f   :  { %v2914_v3 = vsel %vm210_vm4, %v11432_v1, 0.0 }
0x1490   :  { %2915 = vadd.xlane.f32.xlu1 %v2914_v3  ;;  %v2911_v4 = vsel %vm210_vm4, %v11435_v2, 0.0 }
0x1491   :  { %2912 = vadd.xlane.f32.xlu0 %v2911_v4 }
0x1495   :  { %3200 = vadd.xlane.f32.xlu0 %v3199_v6  ;;  %v8437_v6 = vld [vmem:[%s12344_s12 + $0x9] ss:$0 sm:$0xff] }
0x1499   :  { %3203 = vadd.xlane.f32.xlu0 %v3202_v8 }
0x151d   :  { %v2916_v38 = vpop.xlane.xlu1 %2915 }
0x151e   :  { %v2918_v13 = vmul.f32 0.03125, %v2916_v38  ;;  %v2913_v39 = vpop.xlane.xlu0 %2912 }
0x151f   :  { %v2917_v17 = vmul.f32 0.03125, %v2913_v39  ;;  %v8438_v39 = vld [vmem:[%s12344_s12 + $0x15] ss:$0 sm:$0xff] }
0x1520   :  { %v11446_v10 = vsub.f32 %v11432_v1, %v2918_v13 }
0x1521   :  { %v11449_v20 = vsub.f32 %v11435_v2, %v2917_v17 }
0x1522   :  { %v3201_v22 = vpop.xlane.xlu0 %3200  ;;  %v2922_v25 = vmul.f32 %v11446_v10, %v11446_v10 }
0x1523   :  { %v3205_v16 = vmul.f32 0.03125, %v3201_v22  ;;  %v2921_v26 = vmul.f32 %v11449_v20, %v11449_v20 }
0x1524   :  { %v2926_v14 = vsel %vm210_vm4, %v2922_v25, 0.0  ;;  %v8465_v25 = vld [vmem:[%s12338_s6 + $0x50] sm:$0xff] }
0x1525   :  { %v11457_v23 = vsub.f32 %v11091_v29, %v3205_v16  ;;  %2927 = vadd.xlane.f32.xlu0 %v2926_v14  ;;  %v2923_v24 = vsel %vm210_vm4, %v2921_v26, 0.0  ;;  %v8466_v16 = vld [vmem:[%s12338_s6 + $0x58] sm:$0xff] }
0x1526   :  { %2924 = vadd.xlane.f32.xlu1 %v2923_v24  ;;  %v3204_v21 = vpop.xlane.xlu0 %3203 }
0x1527   :  { %v3206_v33 = vmul.f32 0.03125, %v3204_v21  ;;  %v3209_v34 = vmul.f32 %v11457_v23, %v11457_v23  ;;  %v9925_v21 = vpack.c.bf16 %v8466_v16, %v8465_v25 }
0x1529   :  { %v11463_v37 = vsub.f32 %v11089_v27, %v3206_v33  ;;  %v3211_v30 = vsel %vm210_vm4, %v3209_v34, 0.0  ;;  %v8462_v33 = vld [vmem:[%s12344_s12 + $0x17] ss:$0 sm:$0xff] }
0x152a   :  { %3212 = vadd.xlane.f32.xlu1 %v3211_v30 }
0x152b   :  { %v3210_v40 = vmul.f32 %v11463_v37, %v11463_v37 }
0x152d   :  { %v3214_v41 = vsel %vm210_vm4, %v3210_v40, 0.0 }
0x152e   :  { %3215 = vadd.xlane.f32.xlu0 %v3214_v41 }
0x15b2   :  { %v2928_v57 = vpop.xlane.xlu0 %2927 }
0x15b3   :  { %v2930_v58 = vmul.f32 0.03125, %v2928_v57  ;;  %v2925_v60 = vpop.xlane.xlu1 %2924 }
0x15b4   :  { %v2929_v59 = vmul.f32 0.03125, %v2925_v60 }
0x15b5   :  { %v2932_v61 = vadd.f32 1e-05, %v2930_v58 }
0x15b6   :  { %v2931_v50 = vadd.f32 1e-05, %v2929_v59 }
0x15b7   :  { %10557 = vrsqrt.f32 %v2932_v61  ;;  %v3213_v35 = vpop.xlane.xlu1 %3212 }
0x15b8   :  { %10559 = vrsqrt.f32 %v2931_v50  ;;  %v3217_v36 = vmul.f32 0.03125, %v3213_v35 }
0x15ba   :  { %v3219_v62 = vadd.f32 1e-05, %v3217_v36 }
0x15bb   :  { %v3216_v63 = vpop.xlane.xlu0 %3215 }
0x15bc   :  { %10561 = vrsqrt.f32 %v3219_v62  ;;  %v3218_v0 = vmul.f32 0.03125, %v3216_v63 }
0x15be   :  { %v3220_v3 = vadd.f32 1e-05, %v3218_v0 }
0x15c0   :  { %10563 = vrsqrt.f32 %v3220_v3 }
0x15c1   :  { %v10558_v4 = vpop.eup %10557 }
0x15c2   :  { %v10560_v8 = vpop.eup %10559  ;;  %v2936_v38 = vmul.f32 %v10558_v4, %v11446_v10  ;;  %v8461_v10 = vld [vmem:[%s12344_s12 + $0xb] ss:$0 sm:$0xff] }
0x15c3   :  { %v2935_v13 = vmul.f32 %v10560_v8, %v11449_v20 }
0x15c4   :  { %v2944_v17 = vmul.f32 %v8437_v6, %v2936_v38 }
0x15c5   :  { %v2943_v22 = vmul.f32 %v8437_v6, %v2935_v13 }
0x15c6   :  { %v10562_v26 = vpop.eup %10561  ;;  %v2952_v24 = vadd.f32 %v8438_v39, %v2944_v17 }
0x15c7   :  { %v2951_v20 = vadd.f32 %v8438_v39, %v2943_v22  ;;  %v3223_v14 = vmul.f32 %v10562_v26, %v11457_v23 }
0x15c9   :  { %9310 = vmatprep.mubr.msk.f32.mxu1 %vm210_vm4, %v2951_v20  ;;  %v3231_v34 = vmul.f32 %v8461_v10, %v3223_v14 }
0x15ca   :  { %v10564_v30 = vpop.eup %10563  ;;  %9311 = vmatmul.mubr.msk.f32.vlgmr.msra.gmra.mrb[26].mxu1 %vm210_vm4, %v2952_v24 }
0x15cb   :  { %9924 = vmatpush3.bf16.msra.mxu1 %v9921_v46  ;;  %v3224_v40 = vmul.f32 %v10564_v30, %v11463_v37  ;;  %v3239_v41 = vadd.f32 %v8462_v33, %v3231_v34  ;;  %v8440_v37 = vld [vmem:[%s12342_s10 + $0x1] ss:$0 sm:$0xff] }
0x15cc   :  { %9926 = vmatprep.subr.bf16.mxu1 %v9925_v21 }
0x15cd   :  { %v3232_v42 = vmul.f32 %v8461_v10, %v3224_v40  ;;  %9340 = vmatprep.mubr.msk.f32.mxu1 %vm210_vm4, %v3239_v41 }
0x15cf   :  { %v3240_v23 = vadd.f32 %v8462_v33, %v3232_v42  ;;  %9928 = vmatpush3.bf16.msra.mxu1 %v9925_v21 }
0x15d2   :  { %9341 = vmatmul.mubr.msk.f32.vlgmr.msra.gmra.mrb[28].mxu1 %vm210_vm4, %v3240_v23 }
0x169d   :  { %v9312_v18 = vpop.f32.mrb[26].mxu1 }
0x169e   :  { %v3044_v45 = vadd.f32 %v9312_v18, %v8440_v37  ;;  %v3038_v31 = vpop.f32.mrb[27].mxu1 }
0x169f   :  { %v3039_v32 = vadd.f32 %v8440_v37, %v3038_v31  ;;  %v8327_v37 = vadd.s32 4294967288, %v10998_v12 }
0x16a0   :  { %v3048_v47 = vmax.f32 %v3044_v45, 0.0 }
0x16a1   :  { %v3047_v46 = vmax.f32 %v3039_v32, 0.0  ;;  %vm531_vm5 = vcmp.le.s32.totalorder %v8327_v37, %v492_v28 }
0x16a2   :  { %vm533_vm7 = vmand %vm11129_vm15, %vm531_vm5 }
0x16a3   :  { %9329 = vmatprep.mubr.msk.f32.mxu0 %vm1759_vm2, %v3047_v46 }
0x16a4   :  { %9330 = vmatmul.mubr.msk.f32.vlgmr.msra.gmra.mrb[26].mxu0 %vm1759_vm2, %v3048_v47 }
0x16a5   :  { %v9342_v49 = vpop.f32.mrb[28].mxu1 }
0x16a6   :  { %v3332_v51 = vadd.f32 %v9342_v49, %v8467_v48  ;;  %v3326_v52 = vpop.f32.mrb[29].mxu1 }
0x16a7   :  { %v3327_v53 = vadd.f32 %v8467_v48, %v3326_v52  ;;  %v11582_v52 = vsel %vm533_vm7, 1.0, %v10835_v15 }
0x16a9   :  { %9347 = vmatprep.mubr.msk.f32.mxu1 %vm685_vm10, %v3327_v53  ;;  %v10326_v54 = vpack.i.bf16 %v3332_v51, %v3327_v53 }
0x16ab   :  { %10327 = vrot.lane.b32.xlu0 %v10326_v54, %s10839_s14  ;;  %10322 = vrot.lane.b32.xlu1 %v10326_v54, %s10837_s21 }
0x16af   :  { %10332 = vrot.lane.b32.xlu0 %v10326_v54, %s10836_s28  ;;  %3533 = vrot.lane.b32.xlu1 %v3327_v53, %s10838_s22 }
0x16b3   :  { %10342 = vrot.lane.b32.xlu0 %v10326_v54, %s10842_s23  ;;  %3535 = vrot.lane.b32.xlu1 %v3332_v51, %s10838_s22 }
0x16b7   :  { %3735 = vrot.lane.b32.xlu0 %v3332_v51, %s10841_s20  ;;  %10337 = vrot.lane.b32.xlu1 %v10326_v54, %s10840_s3 }
0x16bb   :  { %10352 = vrot.lane.b32.xlu0 %v10326_v54, %s10845_s26  ;;  %3733 = vrot.lane.b32.xlu1 %v3327_v53, %s10841_s20 }
0x16bf   :  { %3935 = vrot.lane.b32.xlu0 %v3332_v51, %s10844_s25  ;;  %10347 = vrot.lane.b32.xlu1 %v10326_v54, %s10843_s24 }
0x16c3   :  { %3933 = vrot.lane.b32.xlu1 %v3327_v53, %s10844_s25 }
0x16c7   :  { %10357 = vrot.lane.b32.xlu1 %v10326_v54, %s10846_s27 }
0x171d   :  { %v10328_v55 = vpop.permute.xlu0 %10327  ;;  %v10323_v56 = vpop.permute.xlu1 %10322 }
0x171e   :  { %v10330_v57 = vunpack.i.h.bf16 %v10328_v55  ;;  %v10329_v58 = vunpack.i.l.bf16 %v10328_v55  ;;  %v10325_v60 = vunpack.i.h.bf16 %v10323_v56  ;;  %v10324_v59 = vunpack.i.l.bf16 %v10323_v56 }
0x1720   :  { %v9929_v61 = vpack.c.bf16 %v10325_v60, %v10324_v59  ;;  %v9939_v36 = vpack.c.bf16 %v10330_v57, %v10329_v58 }
0x1721   :  { %v10333_v50 = vpop.permute.xlu0 %10332  ;;  %v3534_v35 = vpop.permute.xlu1 %3533 }
0x1722   :  { %v10335_v62 = vunpack.i.h.bf16 %v10333_v50  ;;  %v10334_v63 = vunpack.i.l.bf16 %v10333_v50  ;;  %9931 = vmatprep.subr.msk.bf16.mxu1 %vm11110_vm11, %v9929_v61 }
0x1723   :  { %9934 = vmatpush3.bf16.xpose.msk.msra.mxu1 %vm11110_vm11, %v9929_v61 }
0x1724   :  { %9941 = vmatprep.subr.msk.bf16.mxu1 %vm11110_vm11, %v9939_v36  ;;  %v9935_v0 = vpack.c.bf16 %v10335_v62, %v10334_v63 }
0x1725   :  { %v11551_v3 = vpop.permute.xlu0 %10342  ;;  %v3536_v4 = vpop.permute.xlu1 %3535 }
0x1726   :  { %9936 = vmatprep.subr.bf16.mxu0 %v9935_v0  ;;  %v10345_v54 = vunpack.i.h.bf16 %v11551_v3  ;;  %v10344_v55 = vunpack.i.l.bf16 %v11551_v3 }
0x1727   :  { %9938 = vmatpush3.bf16.msra.mxu0 %v9935_v0 }
0x1728   :  { %v9949_v57 = vpack.c.bf16 %v10345_v54, %v10344_v55 }
0x1729   :  { %v11553_v6 = vpop.permute.xlu0 %3735  ;;  %v10338_v8 = vpop.permute.xlu1 %10337 }
0x172a   :  { %v10340_v38 = vunpack.i.h.bf16 %v10338_v8  ;;  %v10339_v13 = vunpack.i.l.bf16 %v10338_v8  ;;  %9348 = vmatmul.mubr.msk.f32.vlgmr.msra.gmra.mrb[30].mxu1 %vm685_vm10, %v3332_v51 }
0x172b   :  { %9944 = vmatpush3.bf16.xpose.msk.msra.mxu1 %vm11110_vm11, %v9939_v36  ;;  %9361 = vmatprep.mubr.msk.f32.mxu1 %vm685_vm10, %v3534_v35 }
0x172c   :  { %v9945_v39 = vpack.c.bf16 %v10340_v38, %v10339_v13 }
0x172d   :  { %v11559_v17 = vpop.permute.xlu1 %3733  ;;  %v10353_v22 = vpop.permute.xlu0 %10352 }
0x172e   :  { %9946 = vmatprep.subr.bf16.mxu0 %v9945_v39  ;;  %v10355_v16 = vunpack.i.h.bf16 %v10353_v22  ;;  %v10354_v26 = vunpack.i.l.bf16 %v10353_v22 }
0x1730   :  { %v11562_v24 = vpack.c.bf16 %v10355_v16, %v10354_v26 }
0x1731   :  { %v10348_v25 = vpop.permute.xlu1 %10347 }
0x1732   :  { %v10350_v10 = vunpack.i.h.bf16 %v10348_v25  ;;  %v10349_v20 = vunpack.i.l.bf16 %v10348_v25  ;;  %9362 = vmatmul.mubr.msk.f32.vlgmr.msra.gmra.mrb[32].mxu1 %vm685_vm10, %v3536_v4 }
0x1734   :  { %v9955_v14 = vpack.c.bf16 %v10350_v10, %v10349_v20 }
0x1735   :  { %v3934_v12 = vpop.permute.xlu1 %3933 }
0x1736   :  { %9956 = vmatprep.subr.bf16.mxu1 %v9955_v14 }
0x1737   :  { %9958 = vmatpush3.bf16.msra.mxu1 %v9955_v14 }
0x1738   :  { %9961 = vmatprep.subr.msk.bf16.mxu1 %vm11110_vm11, %v11562_v24 }
0x1739   :  { %v10358_v15 = vpop.permute.xlu1 %10357 }
0x173a   :  { %v10360_v61 = vunpack.i.h.bf16 %v10358_v15  ;;  %v10359_v50 = vunpack.i.l.bf16 %v10358_v15 }
0x173c   :  { %v9965_v63 = vpack.c.bf16 %v10360_v61, %v10359_v50 }
0x1777   :  { %v11567_v21 = vpop.f32.mrb[26].mxu0 }
0x1778   :  { %v11569_v33 = vpop.f32.mrb[27].mxu0 }
0x17fd   :  { %v9349_v34 = vpop.f32.mrb[30].mxu1 }
0x17fe   :  { %v3425_v30 = vmul.f32 0.35355338, %v9349_v34  ;;  %v3415_v40 = vpop.f32.mrb[31].mxu1 }
0x17ff   :  { %v3424_v41 = vmul.f32 0.35355338, %v3415_v40  ;;  %v3936_v40 = vpop.permute.xlu0 %3935 }
0x1800   :  { %v8475_v42 = vclamps-f32 %v3425_v30, 10.0 }
0x1801   :  { %v8474_v23 = vclamps-f32 %v3424_v41, 10.0 }
0x1802   :  { %v3432_v19 = vmul.f32 1.442695, %v8475_v42 }
0x1803   :  { %v3430_v44 = vmul.f32 1.442695, %v8474_v23 }
0x1804   :  { %10565 = vpow2.f32 %v3432_v19 }
0x1805   :  { %10567 = vpow2.f32 %v3430_v44  ;;  %v9363_v18 = vpop.f32.mrb[32].mxu1 }
0x1806   :  { %v3625_v45 = vmul.f32 0.35355338, %v9363_v18  ;;  %v3615_v31 = vpop.f32.mrb[33].mxu1 }
0x1807   :  { %v3624_v32 = vmul.f32 0.35355338, %v3615_v31 }
0x1808   :  { %v8483_v46 = vclamps-f32 %v3625_v45, 10.0 }
0x1809   :  { %v8482_v47 = vclamps-f32 %v3624_v32, 10.0 }
0x180a   :  { %v3632_v48 = vmul.f32 1.442695, %v8483_v46 }
0x180b   :  { %v3630_v49 = vmul.f32 1.442695, %v8482_v47 }
0x180c   :  { %10569 = vpow2.f32 %v3632_v48 }
0x180d   :  { %10571 = vpow2.f32 %v3630_v49 }
0x180e   :  { %v10566_v51 = vpop.eup %10565 }
0x180f   :  { %v10568_v53 = vpop.eup %10567  ;;  %v11590_v5 = vmul.f32 %v10566_v51, %v11582_v52 }
0x1810   :  { %v11587_v56 = vmul.f32 %v10568_v53, %v11579_v11 }
0x1811   :  { %v3439_v53 = vsel %vm122_vm0, %v11590_v5, 0.0 }
0x1812   :  { %9354 = vmatprep.mubr.msk.f32.mxu0 %vm122_vm0, %v11587_v56  ;;  %v3436_v55 = vsel %vm122_vm0, %v11587_v56, 0.0 }
0x1813   :  { %9355 = vmatmul.mubr.msk.f32.vlgmr.msra.gmra.mrb[28].mxu0 %vm122_vm0, %v11590_v5 }
0x1814   :  { %9948 = vmatpush3.bf16.msra.mxu0 %v9945_v39 }
0x1815   :  { %9951 = vmatprep.subr.msk.bf16.mxu0 %vm11110_vm11, %v9949_v57 }
0x1816   :  { %v10570_v58 = vpop.eup %10569 }
0x1817   :  { %v10572_v60 = vpop.eup %10571  ;;  %v3635_v59 = vmul.f32 %v10570_v58, %v11582_v52 }
0x1818   :  { %v3634_v35 = vmul.f32 %v10572_v60, %v11579_v11 }
0x1819   :  { %v3639_v36 = vsel %vm122_vm0, %v3635_v59, 0.0 }
0x181a   :  { %3640 = vadd.xlane.f32.xlu1 %v3639_v36  ;;  %9368 = vmatprep.mubr.msk.f32.mxu0 %vm122_vm0, %v3634_v35  ;;  %v3636_v62 = vsel %vm122_vm0, %v3634_v35, 0.0  ;;  %v8502_v35 = vld [vmem:[%s12340_s8 + $0x40] sm:$0xff]  ;;  %v8503_v36 = vld [vmem:[%s12340_s8 + $0x48] sm:$0xff] }
0x181b   :  { %3637 = vadd.xlane.f32.xlu0 %v3636_v62  ;;  %9369 = vmatmul.mubr.msk.f32.vlgmr.msra.gmra.mrb[30].mxu0 %vm122_vm0, %v3635_v59  ;;  %v8504_v62 = vld [vmem:[%s12340_s8 + $0x50] sm:$0xff] }
0x181c   :  { %9375 = vmatprep.mubr.msk.f32.mxu0 %vm685_vm10, %v11559_v17 }
0x181d   :  { %9954 = vmatpush3.bf16.xpose.msk.msra.mxu0 %vm11110_vm11, %v9949_v57 }
0x181e   :  { %9966 = vmatprep.subr.bf16.mxu0 %v9965_v63 }
0x1824   :  { %9376 = vmatmul.mubr.msk.f32.vlgmr.msra.gmra.mrb[32].mxu0 %vm685_vm10, %v11553_v6 }
0x1825   :  { %9968 = vmatpush3.bf16.msra.mxu0 %v9965_v63  ;;  %v9969_v63 = vpack.c.bf16 %v8503_v36, %v8502_v35 }
0x1827   :  { %9970 = vmatprep.subr.bf16.mxu0 %v9969_v63 }
0x18a8   :  { %v3638_v49 = vpop.xlane.xlu0 %3637 }
0x18e6   :  { %v11610_v0 = vpop.f32.mrb[28].mxu0 }
0x18e7   :  { %v11612_v3 = vpop.f32.mrb[29].mxu0 }
0x18ee   :  { %v11614_v4 = vpop.f32.mrb[30].mxu0 }
0x18ef   :  { %v3720_v8 = vpop.f32.mrb[31].mxu0 }
0x18f7   :  { %v9377_v38 = vpop.f32.mrb[32].mxu0 }
0x18f8   :  { %v3825_v13 = vmul.f32 0.35355338, %v9377_v38  ;;  %v3815_v39 = vpop.f32.mrb[33].mxu0 }
0x18f9   :  { %v3824_v17 = vmul.f32 0.35355338, %v3815_v39 }
0x18fa   :  { %v8491_v22 = vclamps-f32 %v3825_v13, 10.0 }
0x18fb   :  { %v8490_v25 = vclamps-f32 %v3824_v17, 10.0 }
0x18fc   :  { %v3832_v16 = vmul.f32 1.442695, %v8491_v22 }
0x18fd   :  { %v3830_v26 = vmul.f32 1.442695, %v8490_v25 }
0x18fe   :  { %10573 = vpow2.f32 %v3832_v16 }
0x18ff   :  { %10575 = vpow2.f32 %v3830_v26 }
0x1908   :  { %v10574_v10 = vpop.eup %10573 }
0x1909   :  { %v10576_v6 = vpop.eup %10575  ;;  %v3835_v20 = vmul.f32 %v10574_v10, %v11582_v52  ;;  %v8452_v10 = vld [vmem:[%s12344_s12 + $0x1f] ss:$0 sm:$0xff] }
0x190a   :  { %v3834_v14 = vmul.f32 %v10576_v6, %v11579_v11  ;;  %v3139_v6 = vadd.f32 %v8452_v10, %v11569_v33 }
0x190b   :  { %v3839_v34 = vsel %vm122_vm0, %v3835_v20, 0.0 }
0x190c   :  { %3840 = vadd.xlane.f32.xlu0 %v3839_v34  ;;  %9382 = vmatprep.mubr.msk.f32.mxu1 %vm122_vm0, %v3834_v14  ;;  %v3836_v30 = vsel %vm122_vm0, %v3834_v14, 0.0  ;;  %v3147_v14 = vadd.f32 %v3139_v6, %v11435_v2 }
0x190d   :  { %9383 = vmatmul.mubr.msk.f32.vlgmr.msra.gmra.mrb[34].mxu1 %vm122_vm0, %v3835_v20  ;;  %v3144_v20 = vadd.f32 %v11567_v21, %v8452_v10 }
0x190e   :  { %9964 = vmatpush3.bf16.xpose.msk.msra.mxu1 %vm11110_vm11, %v11562_v24  ;;  %9389 = vmatprep.mubr.msk.f32.mxu1 %vm685_vm10, %v3934_v12  ;;  %v3641_v12 = vpop.xlane.xlu1 %3640 }
0x190f   :  { %v3148_v34 = vadd.f32 %v3144_v20, %v11432_v1 }
0x1910   :  { %3837 = vadd.xlane.f32.xlu0 %v3836_v30  ;;  %v3153_v30 = vsel %vm210_vm4, %v3147_v14, 0.0 }
0x1915   :  { %9390 = vmatmul.mubr.msk.f32.vlgmr.msra.gmra.mrb[36].mxu1 %vm685_vm10, %v3936_v40  ;;  %v3156_v40 = vsel %vm210_vm4, %v3148_v34, 0.0 }
0x1999   :  { %v3841_v54 = vpop.xlane.xlu0 %3840 }
0x199d   :  { %v3838_v57 = vpop.xlane.xlu0 %3837 }
0x19e0   :  { %v9384_v41 = vpop.f32.mrb[34].mxu1 }
0x19e1   :  { %v3920_v42 = vpop.f32.mrb[35].mxu1 }
0x19e8   :  { %v9391_v23 = vpop.f32.mrb[36].mxu1 }
0x19e9   :  { %v4025_v19 = vmul.f32 0.35355338, %v9391_v23  ;;  %v4015_v44 = vpop.f32.mrb[37].mxu1 }
0x19ea   :  { %v4024_v28 = vmul.f32 0.35355338, %v4015_v44 }
0x19eb   :  { %v8499_v37 = vclamps-f32 %v4025_v19, 10.0 }
0x19ec   :  { %v8498_v18 = vclamps-f32 %v4024_v28, 10.0 }
0x19ed   :  { %v4032_v45 = vmul.f32 1.442695, %v8499_v37 }
0x19ee   :  { %v4030_v31 = vmul.f32 1.442695, %v8498_v18 }
0x19ef   :  { %10577 = vpow2.f32 %v4032_v45 }
0x19f0   :  { %10579 = vpow2.f32 %v4030_v31 }
0x19f1   :  { %10581 = vrcp.f32 %v3638_v49 }
0x19f2   :  { %10583 = vrcp.f32 %v3641_v12 }
0x19f3   :  { %10585 = vrcp.f32 %v3838_v57  ;;  %v8507_v57 = vld [vmem:[%s12344_s12 + $0x2] ss:$0 sm:$0xff] }
0x19f4   :  { %10587 = vrcp.f32 %v3841_v54 }
0x19f9   :  { %v10578_v24 = vpop.eup %10577 }
0x19fa   :  { %v10580_v32 = vpop.eup %10579  ;;  %v4035_v46 = vmul.f32 %v10578_v24, %v11582_v52 }
0x19fb   :  { %v4034_v47 = vmul.f32 %v10580_v32, %v11579_v11  ;;  %v10582_v15 = vpop.eup %10581 }
0x19fc   :  { %v4039_v48 = vsel %vm122_vm0, %v4035_v46, 0.0  ;;  %v3731_v58 = vmul.f32 %v10582_v15, %v3720_v8  ;;  %v10584_v60 = vpop.eup %10583 }
0x19fd   :  { %9396 = vmatprep.mubr.msk.f32.mxu0 %vm122_vm0, %v4034_v47  ;;  %4040 = vadd.xlane.f32.xlu0 %v4039_v48  ;;  %v4036_v51 = vsel %vm122_vm0, %v4034_v47, 0.0  ;;  %v10586_v59 = vpop.eup %10585  ;;  %v3732_v5 = vmul.f32 %v10584_v60, %v11614_v4  ;;  %v8505_v4 = vld [vmem:[%s12340_s8 + $0x58] sm:$0xff] }
0x19fe   :  { %9397 = vmatmul.mubr.msk.f32.vlgmr.msra.gmra.mrb[34].mxu0 %vm122_vm0, %v4035_v46  ;;  %4037 = vadd.xlane.f32.xlu1 %v4036_v51  ;;  %v3931_v61 = vmul.f32 %v10586_v59, %v3920_v42  ;;  %v10588_v56 = vpop.eup %10587  ;;  %v9973_v8 = vpack.c.bf16 %v8505_v4, %v8504_v62  ;;  %v8457_v62 = vld [vmem:[%s12344_s12 + $0xa] ss:$0 sm:$0xff] }
0x19ff   :  { %v3932_v50 = vmul.f32 %v10588_v56, %v9384_v41  ;;  %9972 = vmatpush3.bf16.msra.mxu0 %v9969_v63 }
0x1a00   :  { %9974 = vmatprep.subr.bf16.mxu0 %v9973_v8 }
0x1a01   :  { %3440 = vadd.xlane.f32.xlu0 %v3439_v53 }
0x1a02   :  { %3437 = vadd.xlane.f32.xlu1 %v3436_v55 }
0x1a03   :  { %9976 = vmatpush3.bf16.msra.mxu0 %v9973_v8 }
0x1a13   :  { %4135 = vrot.lane.b32.xlu1 %v3731_v58, %s10829_s29 }
0x1a17   :  { %4137 = vrot.lane.b32.xlu0 %v3732_v5, %s10829_s29  ;;  %4143 = vrot.lane.b32.xlu1 %v3931_v61, %s10831_s9 }
0x1a1b   :  { %4145 = vrot.lane.b32.xlu1 %v3932_v50, %s10831_s9 }
0x1a8a   :  { %v4041_v38 = vpop.xlane.xlu0 %4040 }
0x1a8b   :  { %v4038_v13 = vpop.xlane.xlu1 %4037  ;;  %10589 = vrcp.f32 %v4041_v38 }
0x1a8c   :  { %10591 = vrcp.f32 %v4038_v13 }
0x1a8e   :  { %v3441_v42 = vpop.xlane.xlu0 %3440 }
0x1a8f   :  { %v3438_v41 = vpop.xlane.xlu1 %3437 }
0x1a90   :  { %10593 = vrcp.f32 %v3438_v41 }
0x1a91   :  { %10595 = vrcp.f32 %v3441_v42 }
0x1a92   :  { %v4138_v1 = vpop.permute.xlu0 %4137 }
0x1a93   :  { %v4136_v23 = vpop.permute.xlu1 %4135 }
0x1a95   :  { %v10590_v39 = vpop.eup %10589 }
0x1a96   :  { %v10592_v22 = vpop.eup %10591 }
0x1a97   :  { %v4144_v19 = vpop.permute.xlu1 %4143 }
0x1a9a   :  { %v10594_v44 = vpop.eup %10593 }
0x1a9b   :  { %v10596_v33 = vpop.eup %10595  ;;  %v3531_v21 = vmul.f32 %v10594_v44, %v11612_v3  ;;  %v4146_v28 = vpop.permute.xlu1 %4145 }
0x1a9c   :  { %v3532_v2 = vmul.f32 %v10596_v33, %v11610_v0 }
0x1a9d   :  { %v4157_v37 = vsel %vm685_vm10, %v3531_v21, %v4136_v23 }
0x1a9e   :  { %v4158_v18 = vsel %vm685_vm10, %v3532_v2, %v4138_v1  ;;  %v4159_v31 = vsel %vm122_vm0, %v4157_v37, %v4144_v19 }
0x1a9f   :  { %v4160_v32 = vsel %vm122_vm0, %v4158_v18, %v4146_v28 }
0x1ad1   :  { %v9398_v17 = vpop.f32.mrb[34].mxu0 }
0x1ad2   :  { %v4132_v25 = vmul.f32 %v10590_v39, %v9398_v17  ;;  %v4120_v16 = vpop.f32.mrb[35].mxu0  ;;  %v8514_v39 = vld [vmem:[%s12338_s6 + $0x60] sm:$0xff]  ;;  %v8515_v17 = vld [vmem:[%s12338_s6 + $0x68] sm:$0xff] }
0x1ad3   :  { %v4131_v26 = vmul.f32 %v10592_v22, %v4120_v16  ;;  %v9977_v22 = vpack.c.bf16 %v8515_v17, %v8514_v39  ;;  %v8517_v16 = vld [vmem:[%s12338_s6 + $0x78] sm:$0xff] }
0x1ad4   :  { %4153 = vrot.lane.b32.xlu1 %v4132_v25, %s10847_s16  ;;  %v8516_v25 = vld [vmem:[%s12338_s6 + $0x70] sm:$0xff] }
0x1ad5   :  { %4151 = vrot.lane.b32.xlu0 %v4131_v26, %s10847_s16  ;;  %9986 = vmatprep.subr.bf16.mxu0 %v9977_v22  ;;  %v9981_v26 = vpack.c.bf16 %v8517_v16, %v8516_v25 }
0x1ad6   :  { %9978 = vmatprep.subr.bf16.mxu1 %v9977_v22 }
0x1ad7   :  { %9980 = vmatpush3.bf16.msra.mxu1 %v9977_v22 }
0x1ad8   :  { %9982 = vmatprep.subr.bf16.mxu1 %v9981_v26 }
0x1adb   :  { %9984 = vmatpush3.bf16.msra.mxu1 %v9981_v26 }
0x1af4   :  { %3154 = vadd.xlane.f32.xlu0 %v3153_v30 }
0x1af8   :  { %3157 = vadd.xlane.f32.xlu1 %v3156_v40 }
0x1b46   :  { %v4154_v45 = vpop.permute.xlu1 %4153 }
0x1b47   :  { %v4152_v24 = vpop.permute.xlu0 %4151  ;;  %v4162_v47 = vsel %vm1506_vm1, %v4160_v32, %v4154_v45 }
0x1b48   :  { %v4161_v46 = vsel %vm1506_vm1, %v4159_v31, %v4152_v24 }
0x1b49   :  { %9407 = vmatprep.mubr.msk.f32.mxu0 %vm210_vm4, %v4161_v46 }
0x1b4a   :  { %9408 = vmatmul.mubr.msk.f32.vlgmr.msra.gmra.mrb[36].mxu0 %vm210_vm4, %v4162_v47  ;;  %v8512_v47 = vld [vmem:[%s12344_s12 + $0xc] ss:$0 sm:$0xff] }
0x1b4b   :  { %9988 = vmatpush3.bf16.msra.mxu0 %v9977_v22 }
0x1b4c   :  { %9990 = vmatprep.subr.bf16.mxu0 %v9981_v26 }
0x1b4f   :  { %9992 = vmatpush3.bf16.msra.mxu0 %v9981_v26 }
0x1b81   :  { %v3155_v0 = vpop.xlane.xlu0 %3154 }
0x1b82   :  { %v3159_v3 = vmul.f32 0.03125, %v3155_v0 }
0x1b84   :  { %v3161_v48 = vsub.f32 %v3147_v14, %v3159_v3  ;;  %v8513_v3 = vld [vmem:[%s12344_s12 + $0x18] ss:$0 sm:$0xff] }
0x1b85   :  { %v3158_v53 = vpop.xlane.xlu1 %3157 }
0x1b86   :  { %v3163_v49 = vmul.f32 %v3161_v48, %v3161_v48  ;;  %v3160_v60 = vmul.f32 0.03125, %v3158_v53 }
0x1b88   :  { %v3165_v51 = vsel %vm210_vm4, %v3163_v49, 0.0  ;;  %v3162_v56 = vsub.f32 %v3148_v34, %v3160_v60 }
0x1b89   :  { %3166 = vadd.xlane.f32.xlu1 %v3165_v51 }
0x1b8a   :  { %v3164_v8 = vmul.f32 %v3162_v56, %v3162_v56 }
0x1b8c   :  { %v3168_v13 = vsel %vm210_vm4, %v3164_v8, 0.0 }
0x1c16   :  { %v3167_v54 = vpop.xlane.xlu1 %3166 }
0x1c17   :  { %v3171_v55 = vmul.f32 0.03125, %v3167_v54 }
0x1c19   :  { %v3173_v12 = vadd.f32 1e-05, %v3171_v55 }
0x1c1b   :  { %10597 = vrsqrt.f32 %v3173_v12  ;;  %v8518_v12 = vld [vmem:[#allocation2 + $0x3] ss:$0 sm:$0xff] }
0x1c1d   :  { %v9409_v15 = vpop.f32.mrb[36].mxu0 }
0x1c1e   :  { %v4248_v58 = vpop.f32.mrb[37].mxu0  ;;  %v4254_v59 = vadd.f32 %v9409_v15, %v8507_v57 }
0x1c1f   :  { %v4249_v5 = vadd.f32 %v8507_v57, %v4248_v58 }
0x1c20   :  { %v11683_v50 = vadd.f32 %v4254_v59, %v11089_v27 }
0x1c21   :  { %v11680_v61 = vadd.f32 %v4249_v5, %v11091_v29  ;;  %v8458_v29 = vld [vmem:[%s12344_s12 + $0x16] ss:$0 sm:$0xff] }
0x1c22   :  { %v4266_v4 = vsel %vm210_vm4, %v11683_v50, 0.0 }
0x1c23   :  { %v4263_v35 = vsel %vm210_vm4, %v11680_v61, 0.0 }
0x1c24   :  { %4264 = vadd.xlane.f32.xlu0 %v4263_v35 }
0x1c25   :  { %v10598_v36 = vpop.eup %10597 }
0x1c26   :  { %v3177_v63 = vmul.f32 %v10598_v36, %v3161_v48 }
0x1c28   :  { %4267 = vadd.xlane.f32.xlu0 %v4266_v4  ;;  %v3185_v27 = vmul.f32 %v8457_v62, %v3177_v63 }
0x1c2a   :  { %v11695_v38 = vadd.f32 %v8458_v29, %v3185_v27 }
0x1c2c   :  { %3169 = vadd.xlane.f32.xlu0 %v3168_v13  ;;  %9429 = vmatprep.mubr.msk.f32.mxu0 %vm210_vm4, %v11695_v38 }
0x1cb1   :  { %v4265_v10 = vpop.xlane.xlu0 %4264 }
0x1cb2   :  { %v4269_v6 = vmul.f32 0.03125, %v4265_v10 }
0x1cb4   :  { %v4271_v20 = vsub.f32 %v11680_v61, %v4269_v6 }
0x1cb5   :  { %v4268_v14 = vpop.xlane.xlu0 %4267 }
0x1cb6   :  { %v4270_v34 = vmul.f32 0.03125, %v4268_v14  ;;  %v4273_v30 = vmul.f32 %v4271_v20, %v4271_v20 }
0x1cb8   :  { %v4272_v40 = vsub.f32 %v11683_v50, %v4270_v34  ;;  %v4275_v41 = vsel %vm210_vm4, %v4273_v30, 0.0 }
0x1cb9   :  { %4276 = vadd.xlane.f32.xlu1 %v4275_v41  ;;  %v3170_v42 = vpop.xlane.xlu0 %3169 }
0x1cba   :  { %v3172_v23 = vmul.f32 0.03125, %v3170_v42  ;;  %v4274_v19 = vmul.f32 %v4272_v40, %v4272_v40 }
0x1cbc   :  { %v3174_v44 = vadd.f32 1e-05, %v3172_v23  ;;  %v4278_v33 = vsel %vm210_vm4, %v4274_v19, 0.0 }
0x1cbd   :  { %4279 = vadd.xlane.f32.xlu0 %v4278_v33 }
0x1cbe   :  { %10599 = vrsqrt.f32 %v3174_v44 }
0x1cc8   :  { %v10600_v21 = vpop.eup %10599 }
0x1cc9   :  { %v3178_v2 = vmul.f32 %v10600_v21, %v3162_v56 }
0x1ccb   :  { %v3186_v28 = vmul.f32 %v8457_v62, %v3178_v2 }
0x1ccd   :  { %v11716_v1 = vadd.f32 %v8458_v29, %v3186_v28 }
0x1ccf   :  { %9430 = vmatmul.mubr.msk.f32.vlgmr.msra.gmra.mrb[38].mxu0 %vm210_vm4, %v11716_v1 }
0x1d46   :  { %v4277_v37 = vpop.xlane.xlu1 %4276 }
0x1d47   :  { %v4281_v18 = vmul.f32 0.03125, %v4277_v37 }
0x1d49   :  { %v4283_v45 = vadd.f32 1e-05, %v4281_v18 }
0x1d4a   :  { %v4280_v31 = vpop.xlane.xlu0 %4279 }
0x1d4b   :  { %10601 = vrsqrt.f32 %v4283_v45  ;;  %v4282_v24 = vmul.f32 0.03125, %v4280_v31 }
0x1d4d   :  { %v4284_v32 = vadd.f32 1e-05, %v4282_v24 }
0x1d4f   :  { %10603 = vrsqrt.f32 %v4284_v32 }
0x1d55   :  { %v10602_v46 = vpop.eup %10601 }
0x1d56   :  { %v4287_v0 = vmul.f32 %v10602_v46, %v4271_v20 }
0x1d58   :  { %v4295_v48 = vmul.f32 %v8512_v47, %v4287_v0 }
0x1d59   :  { %v10604_v49 = vpop.eup %10603 }
0x1d5a   :  { %v4288_v51 = vmul.f32 %v10604_v49, %v4272_v40  ;;  %v4303_v53 = vadd.f32 %v8513_v3, %v4295_v48 }
0x1d5c   :  { %v4296_v54 = vmul.f32 %v8512_v47, %v4288_v51  ;;  %9418 = vmatprep.mubr.msk.f32.mxu1 %vm210_vm4, %v4303_v53 }
0x1d5e   :  { %v4304_v55 = vadd.f32 %v8513_v3, %v4296_v54 }
0x1d60   :  { %9419 = vmatmul.mubr.msk.f32.vlgmr.msra.gmra.mrb[38].mxu1 %vm210_vm4, %v4304_v55 }
0x1da2   :  { %v9431_v57 = vpop.f32.mrb[38].mxu0 }
0x1da3   :  { %v4477_v15 = vadd.f32 %v9431_v57, %v8518_v12  ;;  %v4471_v58 = vpop.f32.mrb[39].mxu0 }
0x1da4   :  { %v4472_v60 = vadd.f32 %v8518_v12, %v4471_v58 }
0x1da6   :  { %v10366_v59 = vpack.i.bf16 %v4477_v15, %v4472_v60 }
0x1da8   :  { %10367 = vrot.lane.b32.xlu0 %v10366_v59, %s10839_s14  ;;  %10362 = vrot.lane.b32.xlu1 %v10366_v59, %s10837_s21 }
0x1dac   :  { %10372 = vrot.lane.b32.xlu0 %v10366_v59, %s10836_s28 }
0x1db0   :  { %10382 = vrot.lane.b32.xlu0 %v10366_v59, %s10842_s23 }
0x1e1a   :  { %v10368_v5 = vpop.permute.xlu0 %10367  ;;  %v10363_v56 = vpop.permute.xlu1 %10362 }
0x1e1b   :  { %v10370_v35 = vunpack.i.h.bf16 %v10368_v5  ;;  %v10369_v36 = vunpack.i.l.bf16 %v10368_v5  ;;  %v10365_v62 = vunpack.i.h.bf16 %v10363_v56  ;;  %v10364_v63 = vunpack.i.l.bf16 %v10363_v56 }
0x1e1d   :  { %v9993_v4 = vpack.c.bf16 %v10365_v62, %v10364_v63  ;;  %v10003_v29 = vpack.c.bf16 %v10370_v35, %v10369_v36 }
0x1e1e   :  { %v10373_v8 = vpop.permute.xlu0 %10372 }
0x1e1f   :  { %v10375_v27 = vunpack.i.h.bf16 %v10373_v8  ;;  %v10374_v13 = vunpack.i.l.bf16 %v10373_v8  ;;  %9995 = vmatprep.subr.msk.bf16.mxu1 %vm11110_vm11, %v9993_v4 }
0x1e20   :  { %9998 = vmatpush3.bf16.xpose.msk.msra.mxu1 %vm11110_vm11, %v9993_v4 }
0x1e21   :  { %10005 = vmatprep.subr.msk.bf16.mxu1 %vm11110_vm11, %v10003_v29  ;;  %v9999_v39 = vpack.c.bf16 %v10375_v27, %v10374_v13 }
0x1e22   :  { %v10383_v10 = vpop.permute.xlu0 %10382 }
0x1e23   :  { %10000 = vmatprep.subr.bf16.mxu0 %v9999_v39  ;;  %v10385_v48 = vunpack.i.h.bf16 %v10383_v10  ;;  %v10384_v49 = vunpack.i.l.bf16 %v10383_v10 }
0x1e24   :  { %10002 = vmatpush3.bf16.msra.mxu0 %v9999_v39 }
0x1e25   :  { %v10013_v54 = vpack.c.bf16 %v10385_v48, %v10384_v49 }
0x1e33   :  { %v9420_v17 = vpop.f32.mrb[38].mxu1 }
0x1e34   :  { %v4396_v22 = vadd.f32 %v9420_v17, %v8518_v12  ;;  %v4390_v25 = vpop.f32.mrb[39].mxu1 }
0x1e35   :  { %v4391_v16 = vadd.f32 %v8518_v12, %v4390_v25 }
0x1e36   :  { %4882 = vrot.lane.b32.xlu0 %v4396_v22, %s10841_s20 }
0x1e37   :  { %4680 = vrot.lane.b32.xlu1 %v4391_v16, %s10838_s22  ;;  %9436 = vmatprep.mubr.msk.f32.mxu1 %vm685_vm10, %v4391_v16 }
0x1e38   :  { %9437 = vmatmul.mubr.msk.f32.vlgmr.msra.gmra.mrb[40].mxu1 %vm685_vm10, %v4396_v22 }
0x1e39   :  { %10008 = vmatpush3.bf16.xpose.msk.msra.mxu1 %vm11110_vm11, %v10003_v29 }
0x1e3a   :  { %10392 = vrot.lane.b32.xlu0 %v10366_v59, %s10845_s26 }
0x1e3b   :  { %4682 = vrot.lane.b32.xlu1 %v4396_v22, %s10838_s22 }
0x1e3e   :  { %5082 = vrot.lane.b32.xlu0 %v4396_v22, %s10844_s25 }
0x1e3f   :  { %10377 = vrot.lane.b32.xlu1 %v10366_v59, %s10840_s3 }
0x1e43   :  { %4880 = vrot.lane.b32.xlu1 %v4391_v16, %s10841_s20 }
0x1e47   :  { %10387 = vrot.lane.b32.xlu1 %v10366_v59, %s10843_s24 }
0x1e4b   :  { %5080 = vrot.lane.b32.xlu1 %v4391_v16, %s10844_s25 }
0x1e4f   :  { %10397 = vrot.lane.b32.xlu1 %v10366_v59, %s10846_s27 }
0x1ea8   :  { %v11754_v20 = vpop.permute.xlu0 %4882 }
0x1ea9   :  { %v4681_v26 = vpop.permute.xlu1 %4680 }
0x1eaa   :  { %9450 = vmatprep.mubr.msk.f32.mxu1 %vm685_vm10, %v4681_v26 }
0x1eac   :  { %v10393_v42 = vpop.permute.xlu0 %10392 }
0x1ead   :  { %v4683_v6 = vpop.permute.xlu1 %4682  ;;  %v10395_v19 = vunpack.i.h.bf16 %v10393_v42  ;;  %v10394_v44 = vunpack.i.l.bf16 %v10393_v42 }
0x1eae   :  { %9451 = vmatmul.mubr.msk.f32.vlgmr.msra.gmra.mrb[42].mxu1 %vm685_vm10, %v4683_v6 }
0x1eaf   :  { %v11756_v28 = vpack.c.bf16 %v10395_v19, %v10394_v44 }
0x1eb1   :  { %v10378_v14 = vpop.permute.xlu1 %10377 }
0x1eb2   :  { %v10380_v34 = vunpack.i.h.bf16 %v10378_v14  ;;  %v10379_v30 = vunpack.i.l.bf16 %v10378_v14 }
0x1eb4   :  { %v10009_v40 = vpack.c.bf16 %v10380_v34, %v10379_v30 }
0x1eb5   :  { %v4881_v41 = vpop.permute.xlu1 %4880 }
0x1eb6   :  { %10010 = vmatprep.subr.bf16.mxu0 %v10009_v40 }
0x1eb9   :  { %v10388_v23 = vpop.permute.xlu1 %10387 }
0x1eba   :  { %v10390_v33 = vunpack.i.h.bf16 %v10388_v23  ;;  %v10389_v21 = vunpack.i.l.bf16 %v10388_v23 }
0x1ebc   :  { %v10019_v2 = vpack.c.bf16 %v10390_v33, %v10389_v21  ;;  %v5083_v21 = vpop.permute.xlu0 %5082 }
0x1ebd   :  { %v5081_v56 = vpop.permute.xlu1 %5080 }
0x1ebe   :  { %10020 = vmatprep.subr.bf16.mxu1 %v10019_v2 }
0x1ebf   :  { %10022 = vmatpush3.bf16.msra.mxu1 %v10019_v2 }
0x1ec0   :  { %10025 = vmatprep.subr.msk.bf16.mxu1 %vm11110_vm11, %v11756_v28 }
0x1ec1   :  { %v10398_v35 = vpop.permute.xlu1 %10397 }
0x1ec2   :  { %v10400_v63 = vunpack.i.h.bf16 %v10398_v35  ;;  %v10399_v4 = vunpack.i.l.bf16 %v10398_v35 }
0x1ec4   :  { %v10029_v39 = vpack.c.bf16 %v10400_v63, %v10399_v4  ;;  %v8555_v4 = vld [vmem:[%s12340_s8 + $0x60] sm:$0xff] }
0x1f0b   :  { %v9438_v37 = vpop.f32.mrb[40].mxu1 }
0x1f0c   :  { %v4572_v18 = vmul.f32 0.35355338, %v9438_v37  ;;  %v4562_v45 = vpop.f32.mrb[41].mxu1 }
0x1f0d   :  { %v4571_v31 = vmul.f32 0.35355338, %v4562_v45 }
0x1f0e   :  { %v8528_v24 = vclamps-f32 %v4572_v18, 10.0 }
0x1f0f   :  { %v8527_v32 = vclamps-f32 %v4571_v31, 10.0 }
0x1f10   :  { %v4579_v46 = vmul.f32 1.442695, %v8528_v24 }
0x1f11   :  { %v4577_v47 = vmul.f32 1.442695, %v8527_v32 }
0x1f12   :  { %10605 = vpow2.f32 %v4579_v46 }
0x1f13   :  { %10607 = vpow2.f32 %v4577_v47 }
0x1f1c   :  { %v10606_v0 = vpop.eup %10605 }
0x1f1d   :  { %v10608_v3 = vpop.eup %10607  ;;  %v11765_v53 = vmul.f32 %v10606_v0, %v11141_v9 }
0x1f1e   :  { %v11762_v51 = vmul.f32 %v10608_v3, %v11136_v7 }
0x1f20   :  { %9443 = vmatprep.mubr.msk.f32.mxu0 %vm122_vm0, %v11762_v51 }
0x1f21   :  { %9444 = vmatmul.mubr.msk.f32.vlgmr.msra.gmra.mrb[40].mxu0 %vm122_vm0, %v11765_v53 }
0x1f22   :  { %10012 = vmatpush3.bf16.msra.mxu0 %v10009_v40 }
0x1f23   :  { %10015 = vmatprep.subr.msk.bf16.mxu0 %vm11110_vm11, %v10013_v54 }
0x1f81   :  { %v9452_v55 = vpop.f32.mrb[42].mxu1 }
0x1f82   :  { %v4772_v12 = vmul.f32 0.35355338, %v9452_v55  ;;  %v4762_v57 = vpop.f32.mrb[43].mxu1 }
0x1f83   :  { %v4771_v15 = vmul.f32 0.35355338, %v4762_v57  ;;  %v4586_v57 = vsel %vm122_vm0, %v11765_v53, 0.0 }
0x1f84   :  { %v8536_v58 = vclamps-f32 %v4772_v12, 10.0 }
0x1f85   :  { %v8535_v60 = vclamps-f32 %v4771_v15, 10.0 }
0x1f86   :  { %v4779_v59 = vmul.f32 1.442695, %v8536_v58  ;;  %v4583_v58 = vsel %vm122_vm0, %v11762_v51, 0.0 }
0x1f87   :  { %v4777_v5 = vmul.f32 1.442695, %v8535_v60 }
0x1f88   :  { %10609 = vpow2.f32 %v4779_v59 }
0x1f89   :  { %10611 = vpow2.f32 %v4777_v5 }
0x1f92   :  { %v10610_v36 = vpop.eup %10609 }
0x1f93   :  { %v10612_v62 = vpop.eup %10611  ;;  %v4782_v8 = vmul.f32 %v10610_v36, %v11141_v9 }
0x1f94   :  { %v4781_v29 = vmul.f32 %v10612_v62, %v11136_v7 }
0x1f95   :  { %v4786_v27 = vsel %vm122_vm0, %v4782_v8, 0.0 }
0x1f96   :  { %4787 = vadd.xlane.f32.xlu1 %v4786_v27  ;;  %9457 = vmatprep.mubr.msk.f32.mxu0 %vm122_vm0, %v4781_v29  ;;  %v4783_v13 = vsel %vm122_vm0, %v4781_v29, 0.0  ;;  %v8557_v29 = vld [vmem:[%s12340_s8 + $0x70] sm:$0xff] }
0x1f97   :  { %4784 = vadd.xlane.f32.xlu0 %v4783_v13  ;;  %9458 = vmatmul.mubr.msk.f32.vlgmr.msra.gmra.mrb[42].mxu0 %vm122_vm0, %v4782_v8  ;;  %v8556_v8 = vld [vmem:[%s12340_s8 + $0x68] sm:$0xff]  ;;  %v8558_v13 = vld [vmem:[%s12340_s8 + $0x78] sm:$0xff] }
0x1f98   :  { %10018 = vmatpush3.bf16.xpose.msk.msra.mxu0 %vm11110_vm11, %v10013_v54  ;;  %9464 = vmatprep.mubr.msk.f32.mxu0 %vm685_vm10, %v4881_v41  ;;  %v10033_v27 = vpack.c.bf16 %v8556_v8, %v8555_v4  ;;  %v8571_v4 = vld [vmem:[%s12343_s11 + $0x80] sm:$0xff]  ;;  %v8572_v8 = vld [vmem:[%s12343_s11 + $0x88] sm:$0xff] }
0x1f99   :  { %10030 = vmatprep.subr.bf16.mxu0 %v10029_v39 }
0x1f9f   :  { %9465 = vmatmul.mubr.msk.f32.vlgmr.msra.gmra.mrb[44].mxu0 %vm685_vm10, %v11754_v20 }
0x1fa0   :  { %10032 = vmatpush3.bf16.msra.mxu0 %v10029_v39  ;;  %v10037_v39 = vpack.c.bf16 %v8558_v13, %v8557_v29  ;;  %v8573_v29 = vld [vmem:[%s12343_s11 + $0x90] sm:$0xff]  ;;  %v8574_v13 = vld [vmem:[%s12343_s11 + $0x98] sm:$0xff] }
0x1fa1   :  { %10034 = vmatprep.subr.bf16.mxu0 %v10033_v27 }
0x1ff4   :  { %v11784_v17 = vpop.f32.mrb[40].mxu0 }
0x1ff5   :  { %v11786_v22 = vpop.f32.mrb[41].mxu0 }
0x2023   :  { %v4788_v60 = vpop.xlane.xlu1 %4787 }
0x2024   :  { %v4785_v55 = vpop.xlane.xlu0 %4784 }
0x206a   :  { %v11788_v25 = vpop.f32.mrb[42].mxu0 }
0x206b   :  { %v4867_v16 = vpop.f32.mrb[43].mxu0 }
0x2072   :  { %v9466_v26 = vpop.f32.mrb[44].mxu0 }
0x2073   :  { %v4972_v10 = vmul.f32 0.35355338, %v9466_v26  ;;  %v4962_v6 = vpop.f32.mrb[45].mxu0 }
0x2074   :  { %v4971_v14 = vmul.f32 0.35355338, %v4962_v6 }
0x2075   :  { %v8544_v34 = vclamps-f32 %v4972_v10, 10.0 }
0x2076   :  { %v8543_v30 = vclamps-f32 %v4971_v14, 10.0 }
0x2077   :  { %v4979_v40 = vmul.f32 1.442695, %v8544_v34 }
0x2078   :  { %v4977_v41 = vmul.f32 1.442695, %v8543_v30 }
0x2079   :  { %10613 = vpow2.f32 %v4979_v40 }
0x207a   :  { %10615 = vpow2.f32 %v4977_v41 }
0x2083   :  { %v10614_v42 = vpop.eup %10613 }
0x2084   :  { %v10616_v20 = vpop.eup %10615  ;;  %v4982_v23 = vmul.f32 %v10614_v42, %v11141_v9 }
0x2085   :  { %v4981_v19 = vmul.f32 %v10616_v20, %v11136_v7 }
0x2086   :  { %v4986_v44 = vsel %vm122_vm0, %v4982_v23, 0.0 }
0x2087   :  { %4987 = vadd.xlane.f32.xlu0 %v4986_v44  ;;  %9471 = vmatprep.mubr.msk.f32.mxu1 %vm122_vm0, %v4981_v19  ;;  %v4983_v33 = vsel %vm122_vm0, %v4981_v19, 0.0 }
0x2088   :  { %9472 = vmatmul.mubr.msk.f32.vlgmr.msra.gmra.mrb[44].mxu1 %vm122_vm0, %v4982_v23 }
0x2089   :  { %10028 = vmatpush3.bf16.xpose.msk.msra.mxu1 %vm11110_vm11, %v11756_v28  ;;  %9478 = vmatprep.mubr.msk.f32.mxu1 %vm685_vm10, %v5081_v56 }
0x208b   :  { %4984 = vadd.xlane.f32.xlu0 %v4983_v33 }
0x2090   :  { %9479 = vmatmul.mubr.msk.f32.vlgmr.msra.gmra.mrb[46].mxu1 %vm685_vm10, %v5083_v21 }
0x2114   :  { %v4988_v15 = vpop.xlane.xlu0 %4987 }
0x2118   :  { %v4985_v59 = vpop.xlane.xlu0 %4984 }
0x215b   :  { %v9473_v2 = vpop.f32.mrb[44].mxu1 }
0x215c   :  { %v5067_v37 = vpop.f32.mrb[45].mxu1 }
0x2163   :  { %v9480_v18 = vpop.f32.mrb[46].mxu1 }
0x2164   :  { %v5172_v45 = vmul.f32 0.35355338, %v9480_v18  ;;  %v5162_v31 = vpop.f32.mrb[47].mxu1 }
0x2165   :  { %v5171_v24 = vmul.f32 0.35355338, %v5162_v31 }
0x2166   :  { %v8552_v32 = vclamps-f32 %v5172_v45, 10.0 }
0x2167   :  { %v8551_v46 = vclamps-f32 %v5171_v24, 10.0 }
0x2168   :  { %v5179_v47 = vmul.f32 1.442695, %v8552_v32 }
0x2169   :  { %v5177_v0 = vmul.f32 1.442695, %v8551_v46 }
0x216a   :  { %10617 = vpow2.f32 %v5179_v47 }
0x216b   :  { %10619 = vpow2.f32 %v5177_v0 }
0x216c   :  { %10621 = vrcp.f32 %v4785_v55 }
0x216d   :  { %10623 = vrcp.f32 %v4788_v60 }
0x216e   :  { %10625 = vrcp.f32 %v4985_v59 }
0x216f   :  { %10627 = vrcp.f32 %v4988_v15 }
0x2174   :  { %v10618_v28 = vpop.eup %10617 }
0x2175   :  { %v10620_v3 = vpop.eup %10619  ;;  %v5182_v48 = vmul.f32 %v10618_v28, %v11141_v9 }
0x2176   :  { %v5181_v49 = vmul.f32 %v10620_v3, %v11136_v7  ;;  %v10622_v5 = vpop.eup %10621 }
0x2177   :  { %v5186_v54 = vsel %vm122_vm0, %v5182_v48, 0.0  ;;  %v4878_v56 = vmul.f32 %v10622_v5, %v4867_v16  ;;  %v10624_v35 = vpop.eup %10623 }
0x2178   :  { %9485 = vmatprep.mubr.msk.f32.mxu0 %vm122_vm0, %v5181_v49  ;;  %5187 = vadd.xlane.f32.xlu0 %v5186_v54  ;;  %v5183_v12 = vsel %vm122_vm0, %v5181_v49, 0.0  ;;  %v10626_v36 = vpop.eup %10625  ;;  %v4879_v53 = vmul.f32 %v10624_v35, %v11788_v25  ;;  %v5453_v35 = vld [vmem:[#allocation5 + $0x40] sm:$0xff] }
0x2179   :  { %9486 = vmatmul.mubr.msk.f32.vlgmr.msra.gmra.mrb[46].mxu0 %vm122_vm0, %v5182_v48  ;;  %5184 = vadd.xlane.f32.xlu1 %v5183_v12  ;;  %v5078_v62 = vmul.f32 %v10626_v36, %v5067_v37  ;;  %v10628_v51 = vpop.eup %10627  ;;  %v5454_v36 = vld [vmem:[#allocation5 + $0x48] sm:$0xff] }
0x217a   :  { %v5079_v63 = vmul.f32 %v10628_v51, %v9473_v2  ;;  %10036 = vmatpush3.bf16.msra.mxu0 %v10033_v27  ;;  %v5456_v51 = vld [vmem:[#allocation5 + $0x58] sm:$0xff]  ;;  %v10049_v27 = vpack.c.bf16 %v8572_v8, %v8571_v4  ;;  %v8589_v4 = vld [vmem:[%s12338_s6 + $0x90] sm:$0xff] }
0x217b   :  { %10038 = vmatprep.subr.bf16.mxu0 %v10037_v39  ;;  %v8590_v8 = vld [vmem:[%s12338_s6 + $0x98] sm:$0xff] }
0x217c   :  { %4587 = vadd.xlane.f32.xlu0 %v4586_v57 }
0x217d   :  { %4584 = vadd.xlane.f32.xlu1 %v4583_v58 }
0x217e   :  { %10040 = vmatpush3.bf16.msra.mxu0 %v10037_v39  ;;  %v10053_v39 = vpack.c.bf16 %v8574_v13, %v8573_v29  ;;  %v10069_v29 = vpack.c.bf16 %v8590_v8, %v8589_v4 }
0x217f   :  { %10050 = vmatprep.subr.bf16.mxu0 %v10049_v27 }
0x218e   :  { %5282 = vrot.lane.b32.xlu1 %v4878_v56, %s10829_s29 }
0x2192   :  { %5284 = vrot.lane.b32.xlu0 %v4879_v53, %s10829_s29  ;;  %5290 = vrot.lane.b32.xlu1 %v5078_v62, %s10831_s9  ;;  %v10041_v53 = vpack.c.bf16 %v5454_v36, %v5453_v35  ;;  %v5455_v62 = vld [vmem:[#allocation5 + $0x50] sm:$0xff] }
0x2194   :  { %10042 = vmatprep.subr.bf16.mxu1 %v10041_v53 }
0x2195   :  { %10044 = vmatpush3.bf16.msra.mxu1 %v10041_v53 }
0x2196   :  { %5292 = vrot.lane.b32.xlu1 %v5079_v63, %s10831_s9  ;;  %v10045_v63 = vpack.c.bf16 %v5456_v51, %v5455_v62  ;;  %v8587_v62 = vld [vmem:[%s12338_s6 + $0x80] sm:$0xff]  ;;  %v8588_v51 = vld [vmem:[%s12338_s6 + $0x88] sm:$0xff] }
0x2198   :  { %10046 = vmatprep.subr.bf16.mxu1 %v10045_v63 }
0x2199   :  { %10048 = vmatpush3.bf16.msra.mxu1 %v10045_v63  ;;  %v10065_v63 = vpack.c.bf16 %v8588_v51, %v8587_v62 }
0x219b   :  { %10066 = vmatprep.subr.bf16.mxu1 %v10065_v63 }
0x2205   :  { %v5188_v25 = vpop.xlane.xlu0 %5187 }
0x2206   :  { %v5185_v16 = vpop.xlane.xlu1 %5184  ;;  %10629 = vrcp.f32 %v5188_v25  ;;  %v8575_v25 = vld [vmem:[%s12343_s11 + $0xa0] sm:$0xff] }
0x2207   :  { %10631 = vrcp.f32 %v5185_v16  ;;  %v8576_v16 = vld [vmem:[%s12343_s11 + $0xa8] sm:$0xff] }
0x2209   :  { %v4588_v41 = vpop.xlane.xlu0 %4587 }
0x220a   :  { %v4585_v40 = vpop.xlane.xlu1 %4584 }
0x220b   :  { %10633 = vrcp.f32 %v4585_v40 }
0x220c   :  { %10635 = vrcp.f32 %v4588_v41 }
0x220d   :  { %v5285_v2 = vpop.permute.xlu0 %5284 }
0x220e   :  { %v5283_v42 = vpop.permute.xlu1 %5282 }
0x2210   :  { %v10630_v26 = vpop.eup %10629 }
0x2211   :  { %v10632_v6 = vpop.eup %10631 }
0x2212   :  { %v5291_v20 = vpop.permute.xlu1 %5290 }
0x2215   :  { %v10634_v23 = vpop.eup %10633 }
0x2216   :  { %v10636_v19 = vpop.eup %10635  ;;  %v4678_v44 = vmul.f32 %v10634_v23, %v11786_v22  ;;  %v5293_v21 = vpop.permute.xlu1 %5292  ;;  %v8566_v23 = vld [vmem:[%s12344_s12 + $0x19] ss:$0 sm:$0xff] }
0x2217   :  { %v4679_v33 = vmul.f32 %v10636_v19, %v11784_v17  ;;  %v8560_v17 = vld [vmem:[%s12344_s12 + $0x3] ss:$0 sm:$0xff] }
0x2218   :  { %v5304_v37 = vsel %vm685_vm10, %v4678_v44, %v5283_v42  ;;  %v8565_v42 = vld [vmem:[%s12344_s12 + $0xd] ss:$0 sm:$0xff] }
0x2219   :  { %v5305_v18 = vsel %vm685_vm10, %v4679_v33, %v5285_v2  ;;  %v5306_v31 = vsel %vm122_vm0, %v5304_v37, %v5291_v20 }
0x221a   :  { %v5307_v32 = vsel %vm122_vm0, %v5305_v18, %v5293_v21  ;;  %v8577_v18 = vld [vmem:[%s12343_s11 + $0xb0] sm:$0xff] }
0x224c   :  { %v9487_v10 = vpop.f32.mrb[46].mxu0 }
0x224d   :  { %v5279_v14 = vmul.f32 %v10630_v26, %v9487_v10  ;;  %v5267_v34 = vpop.f32.mrb[47].mxu0  ;;  %v10057_v26 = vpack.c.bf16 %v8576_v16, %v8575_v25 }
0x224e   :  { %v5278_v30 = vmul.f32 %v10632_v6, %v5267_v34 }
0x224f   :  { %5300 = vrot.lane.b32.xlu1 %v5279_v14, %s10847_s16 }
0x2250   :  { %5298 = vrot.lane.b32.xlu0 %v5278_v30, %s10847_s16 }
0x22c1   :  { %v5301_v45 = vpop.permute.xlu1 %5300 }
0x22c2   :  { %v5299_v24 = vpop.permute.xlu0 %5298  ;;  %v5309_v47 = vsel %vm1506_vm1, %v5307_v32, %v5301_v45  ;;  %v8578_v45 = vld [vmem:[%s12343_s11 + $0xb8] sm:$0xff] }
0x22c3   :  { %v5308_v46 = vsel %vm1506_vm1, %v5306_v31, %v5299_v24  ;;  %v10061_v31 = vpack.c.bf16 %v8578_v45, %v8577_v18  ;;  %v8568_v24 = vld [vmem:[%s12342_s10 + $0x2] ss:$0 sm:$0xff] }
0x22c4   :  { %9496 = vmatprep.mubr.msk.f32.mxu0 %vm210_vm4, %v5308_v46 }
0x22c5   :  { %9497 = vmatmul.mubr.msk.f32.vlgmr.msra.gmra.mrb[48].mxu0 %vm210_vm4, %v5309_v47 }
0x22c6   :  { %10052 = vmatpush3.bf16.msra.mxu0 %v10049_v27 }
0x22c7   :  { %10054 = vmatprep.subr.bf16.mxu0 %v10053_v39 }
0x22ca   :  { %10056 = vmatpush3.bf16.msra.mxu0 %v10053_v39 }
0x22cb   :  { %10058 = vmatprep.subr.bf16.mxu0 %v10057_v26 }
0x22ce   :  { %10060 = vmatpush3.bf16.msra.mxu0 %v10057_v26 }
0x22cf   :  { %10062 = vmatprep.subr.bf16.mxu0 %v10061_v31 }
0x22d2   :  { %10064 = vmatpush3.bf16.msra.mxu0 %v10061_v31 }
0x2398   :  { %v9498_v22 = vpop.f32.mrb[48].mxu0 }
0x2399   :  { %v5401_v0 = vadd.f32 %v9498_v22, %v8560_v17  ;;  %v5395_v28 = vpop.f32.mrb[49].mxu0 }
0x239a   :  { %v5396_v3 = vadd.f32 %v8560_v17, %v5395_v28  ;;  %v8580_v28 = vld [vmem:[%s12344_s12 + $0x20] ss:$0 sm:$0xff] }
0x239b   :  { %v11844_v48 = vadd.f32 %v5401_v0, %v11683_v50 }
0x239c   :  { %v11847_v49 = vadd.f32 %v5396_v3, %v11680_v61 }
0x239d   :  { %v5413_v54 = vsel %vm210_vm4, %v11844_v48, 0.0 }
0x239e   :  { %5414 = vadd.xlane.f32.xlu1 %v5413_v54  ;;  %v5410_v55 = vsel %vm210_vm4, %v11847_v49, 0.0 }
0x239f   :  { %5411 = vadd.xlane.f32.xlu0 %v5410_v55 }
0x242b   :  { %v5415_v12 = vpop.xlane.xlu1 %5414 }
0x242c   :  { %v5417_v57 = vmul.f32 0.03125, %v5415_v12  ;;  %v5412_v15 = vpop.xlane.xlu0 %5411 }
0x242d   :  { %v5416_v58 = vmul.f32 0.03125, %v5412_v15 }
0x242e   :  { %v5419_v60 = vsub.f32 %v11844_v48, %v5417_v57 }
0x242f   :  { %v5418_v50 = vsub.f32 %v11847_v49, %v5416_v58 }
0x2430   :  { %v5421_v5 = vmul.f32 %v5419_v60, %v5419_v60 }
0x2431   :  { %v5420_v59 = vmul.f32 %v5418_v50, %v5418_v50 }
0x2432   :  { %v5425_v56 = vsel %vm210_vm4, %v5421_v5, 0.0 }
0x2433   :  { %v5422_v61 = vsel %vm210_vm4, %v5420_v59, 0.0 }
0x2434   :  { %5423 = vadd.xlane.f32.xlu0 %v5422_v61 }
0x2438   :  { %5426 = vadd.xlane.f32.xlu0 %v5425_v56 }
0x24c1   :  { %v5424_v10 = vpop.xlane.xlu0 %5423 }
0x24c2   :  { %v5428_v6 = vmul.f32 0.03125, %v5424_v10 }
0x24c4   :  { %v5430_v14 = vadd.f32 1e-05, %v5428_v6  ;;  %v8585_v6 = vld [vmem:[%s12344_s12 + $0xe] ss:$0 sm:$0xff] }
0x24c5   :  { %v5427_v34 = vpop.xlane.xlu0 %5426 }
0x24c6   :  { %10637 = vrsqrt.f32 %v5430_v14  ;;  %v5429_v30 = vmul.f32 0.03125, %v5427_v34 }
0x24c8   :  { %v5431_v40 = vadd.f32 1e-05, %v5429_v30 }
0x24ca   :  { %10639 = vrsqrt.f32 %v5431_v40  ;;  %v8586_v40 = vld [vmem:[%s12344_s12 + $0x1a] ss:$0 sm:$0xff] }
0x24d0   :  { %v10638_v41 = vpop.eup %10637 }
0x24d1   :  { %v5434_v20 = vmul.f32 %v10638_v41, %v5418_v50 }
0x24d3   :  { %v5442_v19 = vmul.f32 %v8565_v42, %v5434_v20 }
0x24d4   :  { %v10640_v44 = vpop.eup %10639 }
0x24d5   :  { %v5435_v33 = vmul.f32 %v10640_v44, %v5419_v60  ;;  %v5450_v21 = vadd.f32 %v8566_v23, %v5442_v19  ;;  %v8591_v19 = vld [vmem:[#allocation2 + $0x4] ss:$0 sm:$0xff] }
0x24d7   :  { %v5443_v2 = vmul.f32 %v8565_v42, %v5435_v33  ;;  %9507 = vmatprep.mubr.msk.f32.mxu1 %vm210_vm4, %v5450_v21 }
0x24d9   :  { %v5451_v37 = vadd.f32 %v8566_v23, %v5443_v2 }
0x24db   :  { %9508 = vmatmul.mubr.msk.f32.vlgmr.msra.gmra.mrb[48].mxu1 %vm210_vm4, %v5451_v37 }
0x24dc   :  { %10068 = vmatpush3.bf16.msra.mxu1 %v10065_v63 }
0x24dd   :  { %10070 = vmatprep.subr.bf16.mxu1 %v10069_v29 }
0x24e0   :  { %10072 = vmatpush3.bf16.msra.mxu1 %v10069_v29 }
0x25ae   :  { %v9509_v32 = vpop.f32.mrb[48].mxu1 }
0x25af   :  { %v5543_v46 = vadd.f32 %v9509_v32, %v8568_v24  ;;  %v5537_v47 = vpop.f32.mrb[49].mxu1 }
0x25b0   :  { %v5538_v17 = vadd.f32 %v8568_v24, %v5537_v47 }
0x25b1   :  { %v5547_v0 = vmax.f32 %v5543_v46, 0.0 }
0x25b2   :  { %v5546_v22 = vmax.f32 %v5538_v17, 0.0 }
0x25b4   :  { %9526 = vmatprep.mubr.msk.f32.mxu0 %vm1759_vm2, %v5546_v22 }
0x25b5   :  { %9527 = vmatmul.mubr.msk.f32.vlgmr.msra.gmra.mrb[50].mxu0 %vm1759_vm2, %v5547_v0 }
0x2688   :  { %v9528_v3 = vpop.f32.mrb[50].mxu0 }
0x2689   :  { %v5643_v54 = vadd.f32 %v9528_v3, %v8580_v28  ;;  %v5637_v55 = vpop.f32.mrb[51].mxu0 }
0x268a   :  { %v5638_v12 = vadd.f32 %v8580_v28, %v5637_v55 }
0x268b   :  { %v11898_v57 = vadd.f32 %v5643_v54, %v11844_v48 }
0x268c   :  { %v11901_v15 = vadd.f32 %v5638_v12, %v11847_v49 }
0x268d   :  { %v5655_v58 = vsel %vm210_vm4, %v11898_v57, 0.0 }
0x268e   :  { %5656 = vadd.xlane.f32.xlu0 %v5655_v58  ;;  %v5652_v60 = vsel %vm210_vm4, %v11901_v15, 0.0 }
0x268f   :  { %5653 = vadd.xlane.f32.xlu1 %v5652_v60 }
0x271b   :  { %v5657_v50 = vpop.xlane.xlu0 %5656 }
0x271c   :  { %v5659_v59 = vmul.f32 0.03125, %v5657_v50  ;;  %v5654_v61 = vpop.xlane.xlu1 %5653 }
0x271d   :  { %v5658_v5 = vmul.f32 0.03125, %v5654_v61 }
0x271e   :  { %v5661_v56 = vsub.f32 %v11898_v57, %v5659_v59 }
0x271f   :  { %v5660_v48 = vsub.f32 %v11901_v15, %v5658_v5 }
0x2720   :  { %v5663_v35 = vmul.f32 %v5661_v56, %v5661_v56 }
0x2721   :  { %v5662_v36 = vmul.f32 %v5660_v48, %v5660_v48 }
0x2722   :  { %v5667_v49 = vsel %vm210_vm4, %v5663_v35, 0.0 }
0x2723   :  { %5668 = vadd.xlane.f32.xlu0 %v5667_v49  ;;  %v5664_v53 = vsel %vm210_vm4, %v5662_v36, 0.0 }
0x2724   :  { %5665 = vadd.xlane.f32.xlu1 %v5664_v53 }
0x27b0   :  { %v5669_v27 = vpop.xlane.xlu0 %5668 }
0x27b1   :  { %v5671_v13 = vmul.f32 0.03125, %v5669_v27  ;;  %v5666_v39 = vpop.xlane.xlu1 %5665 }
0x27b2   :  { %v5670_v25 = vmul.f32 0.03125, %v5666_v39 }
0x27b3   :  { %v5673_v16 = vadd.f32 1e-05, %v5671_v13 }
0x27b4   :  { %v5672_v26 = vadd.f32 1e-05, %v5670_v25 }
0x27b5   :  { %10641 = vrsqrt.f32 %v5673_v16 }
0x27b6   :  { %10643 = vrsqrt.f32 %v5672_v26 }
0x27bf   :  { %v10642_v10 = vpop.eup %10641 }
0x27c0   :  { %v10644_v14 = vpop.eup %10643  ;;  %v5677_v34 = vmul.f32 %v10642_v10, %v5661_v56 }
0x27c1   :  { %v5676_v30 = vmul.f32 %v10644_v14, %v5660_v48 }
0x27c2   :  { %v5685_v41 = vmul.f32 %v8585_v6, %v5677_v34 }
0x27c3   :  { %v5684_v42 = vmul.f32 %v8585_v6, %v5676_v30 }
0x27c4   :  { %v5693_v23 = vadd.f32 %v8586_v40, %v5685_v41 }
0x27c5   :  { %v5692_v20 = vadd.f32 %v8586_v40, %v5684_v42 }
0x27c7   :  { %9537 = vmatprep.mubr.msk.f32.mxu1 %vm210_vm4, %v5692_v20 }
0x27c8   :  { %9538 = vmatmul.mubr.msk.f32.vlgmr.msra.gmra.mrb[50].mxu1 %vm210_vm4, %v5693_v23 }
0x289b   :  { %v9539_v44 = vpop.f32.mrb[50].mxu1 }
0x289c   :  { %v5785_v33 = vadd.f32 %v9539_v44, %v8591_v19  ;;  %v5779_v21 = vpop.f32.mrb[51].mxu1 }
0x289d   :  { %v5780_v2 = vadd.f32 %v8591_v19, %v5779_v21 }
0x289f   :  { %9544 = vmatprep.mubr.msk.f32.mxu1 %vm685_vm10, %v5780_v2  ;;  %v10406_v37 = vpack.i.bf16 %v5785_v33, %v5780_v2 }
0x28a1   :  { %10407 = vrot.lane.b32.xlu0 %v10406_v37, %s10839_s14  ;;  %10402 = vrot.lane.b32.xlu1 %v10406_v37, %s10837_s21 }
0x28a5   :  { %10412 = vrot.lane.b32.xlu0 %v10406_v37, %s10836_s28  ;;  %5986 = vrot.lane.b32.xlu1 %v5780_v2, %s10838_s22 }
0x28a9   :  { %10422 = vrot.lane.b32.xlu0 %v10406_v37, %s10842_s23  ;;  %5988 = vrot.lane.b32.xlu1 %v5785_v33, %s10838_s22 }
0x28ad   :  { %6188 = vrot.lane.b32.xlu0 %v5785_v33, %s10841_s20  ;;  %10417 = vrot.lane.b32.xlu1 %v10406_v37, %s10840_s3 }
0x28b1   :  { %10432 = vrot.lane.b32.xlu0 %v10406_v37, %s10845_s26  ;;  %6186 = vrot.lane.b32.xlu1 %v5780_v2, %s10841_s20 }
0x28b5   :  { %6388 = vrot.lane.b32.xlu0 %v5785_v33, %s10844_s25  ;;  %10427 = vrot.lane.b32.xlu1 %v10406_v37, %s10843_s24 }
0x28b9   :  { %6386 = vrot.lane.b32.xlu1 %v5780_v2, %s10844_s25 }
0x28bd   :  { %10437 = vrot.lane.b32.xlu1 %v10406_v37, %s10846_s27 }
0x2913   :  { %v10408_v18 = vpop.permute.xlu0 %10407  ;;  %v10403_v45 = vpop.permute.xlu1 %10402 }
0x2914   :  { %v10410_v31 = vunpack.i.h.bf16 %v10408_v18  ;;  %v10409_v24 = vunpack.i.l.bf16 %v10408_v18  ;;  %v10405_v32 = vunpack.i.h.bf16 %v10403_v45  ;;  %v10404_v46 = vunpack.i.l.bf16 %v10403_v45 }
0x2916   :  { %v10073_v47 = vpack.c.bf16 %v10405_v32, %v10404_v46  ;;  %v10083_v0 = vpack.c.bf16 %v10410_v31, %v10409_v24 }
0x2917   :  { %v10413_v17 = vpop.permute.xlu0 %10412  ;;  %v5987_v22 = vpop.permute.xlu1 %5986 }
0x2918   :  { %v10415_v28 = vunpack.i.h.bf16 %v10413_v17  ;;  %v10414_v3 = vunpack.i.l.bf16 %v10413_v17  ;;  %10075 = vmatprep.subr.msk.bf16.mxu1 %vm11110_vm11, %v10073_v47 }
0x2919   :  { %10078 = vmatpush3.bf16.xpose.msk.msra.mxu1 %vm11110_vm11, %v10073_v47 }
0x291a   :  { %v10079_v54 = vpack.c.bf16 %v10415_v28, %v10414_v3  ;;  %10085 = vmatprep.subr.msk.bf16.mxu1 %vm11110_vm11, %v10083_v0 }
0x291b   :  { %v10423_v55 = vpop.permute.xlu0 %10422  ;;  %v5989_v12 = vpop.permute.xlu1 %5988 }
0x291c   :  { %10080 = vmatprep.subr.bf16.mxu0 %v10079_v54  ;;  %v10425_v20 = vunpack.i.h.bf16 %v10423_v55  ;;  %v10424_v23 = vunpack.i.l.bf16 %v10423_v55 }
0x291d   :  { %10082 = vmatpush3.bf16.msra.mxu0 %v10079_v54 }
0x291e   :  { %v10093_v21 = vpack.c.bf16 %v10425_v20, %v10424_v23 }
0x291f   :  { %v11952_v58 = vpop.permute.xlu0 %6188  ;;  %v10418_v60 = vpop.permute.xlu1 %10417 }
0x2920   :  { %v10420_v50 = vunpack.i.h.bf16 %v10418_v60  ;;  %v10419_v59 = vunpack.i.l.bf16 %v10418_v60  ;;  %9545 = vmatmul.mubr.msk.f32.vlgmr.msra.gmra.mrb[52].mxu1 %vm685_vm10, %v5785_v33 }
0x2921   :  { %10088 = vmatpush3.bf16.xpose.msk.msra.mxu1 %vm11110_vm11, %v10083_v0  ;;  %9558 = vmatprep.mubr.msk.f32.mxu1 %vm685_vm10, %v5987_v22 }
0x2922   :  { %v10089_v61 = vpack.c.bf16 %v10420_v50, %v10419_v59 }
0x2923   :  { %v6187_v5 = vpop.permute.xlu1 %6186  ;;  %v10433_v56 = vpop.permute.xlu0 %10432 }
0x2924   :  { %10090 = vmatprep.subr.bf16.mxu0 %v10089_v61  ;;  %v10435_v35 = vunpack.i.h.bf16 %v10433_v56  ;;  %v10434_v36 = vunpack.i.l.bf16 %v10433_v56 }
0x2926   :  { %v11959_v51 = vpack.c.bf16 %v10435_v35, %v10434_v36 }
0x2927   :  { %v10428_v48 = vpop.permute.xlu1 %10427 }
0x2928   :  { %v10430_v49 = vunpack.i.h.bf16 %v10428_v48  ;;  %v10429_v53 = vunpack.i.l.bf16 %v10428_v48  ;;  %9559 = vmatmul.mubr.msk.f32.vlgmr.msra.gmra.mrb[54].mxu1 %vm685_vm10, %v5989_v12 }
0x292a   :  { %v10099_v62 = vpack.c.bf16 %v10430_v49, %v10429_v53  ;;  %v6389_v53 = vpop.permute.xlu0 %6388 }
0x292b   :  { %v6387_v19 = vpop.permute.xlu1 %6386 }
0x292c   :  { %10100 = vmatprep.subr.bf16.mxu1 %v10099_v62 }
0x292d   :  { %10102 = vmatpush3.bf16.msra.mxu1 %v10099_v62 }
0x292e   :  { %10105 = vmatprep.subr.msk.bf16.mxu1 %vm11110_vm11, %v11959_v51 }
0x292f   :  { %v10438_v2 = vpop.permute.xlu1 %10437 }
0x2930   :  { %v10440_v31 = vunpack.i.h.bf16 %v10438_v2  ;;  %v10439_v24 = vunpack.i.l.bf16 %v10438_v2 }
0x2932   :  { %v10109_v17 = vpack.c.bf16 %v10440_v31, %v10439_v24  ;;  %v8628_v31 = vld [vmem:[%s12340_s8 + $0x90] sm:$0xff] }
0x29f3   :  { %v9546_v63 = vpop.f32.mrb[52].mxu1 }
0x29f4   :  { %v5878_v4 = vmul.f32 0.35355338, %v9546_v63  ;;  %v5868_v8 = vpop.f32.mrb[53].mxu1 }
0x29f5   :  { %v5877_v29 = vmul.f32 0.35355338, %v5868_v8 }
0x29f6   :  { %v8599_v27 = vclamps-f32 %v5878_v4, 10.0 }
0x29f7   :  { %v8598_v13 = vclamps-f32 %v5877_v29, 10.0 }
0x29f8   :  { %v5885_v39 = vmul.f32 1.442695, %v8599_v27 }
0x29f9   :  { %v5883_v25 = vmul.f32 1.442695, %v8598_v13 }
0x29fa   :  { %10645 = vpow2.f32 %v5885_v39 }
0x29fb   :  { %10647 = vpow2.f32 %v5883_v25  ;;  %v9560_v16 = vpop.f32.mrb[54].mxu1 }
0x29fc   :  { %v6078_v26 = vmul.f32 0.35355338, %v9560_v16  ;;  %v6068_v10 = vpop.f32.mrb[55].mxu1 }
0x29fd   :  { %v6077_v6 = vmul.f32 0.35355338, %v6068_v10 }
0x29fe   :  { %v8607_v14 = vclamps-f32 %v6078_v26, 10.0 }
0x29ff   :  { %v8606_v34 = vclamps-f32 %v6077_v6, 10.0 }
0x2a00   :  { %v6085_v30 = vmul.f32 1.442695, %v8607_v14 }
0x2a01   :  { %v6083_v40 = vmul.f32 1.442695, %v8606_v34 }
0x2a02   :  { %10649 = vpow2.f32 %v6085_v30 }
0x2a03   :  { %10651 = vpow2.f32 %v6083_v40 }
0x2a04   :  { %v10646_v41 = vpop.eup %10645 }
0x2a05   :  { %v10648_v42 = vpop.eup %10647  ;;  %v11968_v33 = vmul.f32 %v10646_v41, %v11582_v52 }
0x2a06   :  { %v11965_v44 = vmul.f32 %v10648_v42, %v11579_v11 }
0x2a07   :  { %v5892_v40 = vsel %vm122_vm0, %v11968_v33, 0.0 }
0x2a08   :  { %9551 = vmatprep.mubr.msk.f32.mxu0 %vm122_vm0, %v11965_v44 }
0x2a09   :  { %9552 = vmatmul.mubr.msk.f32.vlgmr.msra.gmra.mrb[52].mxu0 %vm122_vm0, %v11968_v33 }
0x2a0a   :  { %10092 = vmatpush3.bf16.msra.mxu0 %v10089_v61 }
0x2a0b   :  { %10095 = vmatprep.subr.msk.bf16.mxu0 %vm11110_vm11, %v10093_v21 }
0x2a0c   :  { %v10650_v37 = vpop.eup %10649 }
0x2a0d   :  { %v10652_v18 = vpop.eup %10651  ;;  %v6088_v45 = vmul.f32 %v10650_v37, %v11582_v52 }
0x2a0e   :  { %v6087_v32 = vmul.f32 %v10652_v18, %v11579_v11  ;;  %v8626_v18 = vld [vmem:[%s12340_s8 + $0x80] sm:$0xff] }
0x2a0f   :  { %v6092_v46 = vsel %vm122_vm0, %v6088_v45, 0.0 }
0x2a10   :  { %6093 = vadd.xlane.f32.xlu1 %v6092_v46  ;;  %9565 = vmatprep.mubr.msk.f32.mxu0 %vm122_vm0, %v6087_v32  ;;  %v6089_v47 = vsel %vm122_vm0, %v6087_v32, 0.0  ;;  %v8629_v32 = vld [vmem:[%s12340_s8 + $0x98] sm:$0xff] }
0x2a11   :  { %6090 = vadd.xlane.f32.xlu0 %v6089_v47  ;;  %9566 = vmatmul.mubr.msk.f32.vlgmr.msra.gmra.mrb[54].mxu0 %vm122_vm0, %v6088_v45  ;;  %v8627_v45 = vld [vmem:[%s12340_s8 + $0x88] sm:$0xff]  ;;  %v10117_v46 = vpack.c.bf16 %v8629_v32, %v8628_v31 }
0x2a12   :  { %9572 = vmatprep.mubr.msk.f32.mxu0 %vm685_vm10, %v6187_v5  ;;  %v10113_v24 = vpack.c.bf16 %v8627_v45, %v8626_v18 }
0x2a13   :  { %10098 = vmatpush3.bf16.xpose.msk.msra.mxu0 %vm11110_vm11, %v10093_v21 }
0x2a14   :  { %10110 = vmatprep.subr.bf16.mxu0 %v10109_v17 }
0x2a1a   :  { %9573 = vmatmul.mubr.msk.f32.vlgmr.msra.gmra.mrb[56].mxu0 %vm685_vm10, %v11952_v58 }
0x2a1b   :  { %10112 = vmatpush3.bf16.msra.mxu0 %v10109_v17 }
0x2a1c   :  { %10114 = vmatprep.subr.bf16.mxu0 %v10113_v24 }
0x2a9e   :  { %v6091_v34 = vpop.xlane.xlu0 %6090 }
0x2adc   :  { %v11987_v22 = vpop.f32.mrb[52].mxu0 }
0x2add   :  { %v11989_v0 = vpop.f32.mrb[53].mxu0 }
0x2ae4   :  { %v11991_v28 = vpop.f32.mrb[54].mxu0 }
0x2ae5   :  { %v6173_v3 = vpop.f32.mrb[55].mxu0 }
0x2aed   :  { %v9574_v54 = vpop.f32.mrb[56].mxu0 }
0x2aee   :  { %v6278_v55 = vmul.f32 0.35355338, %v9574_v54  ;;  %v6268_v12 = vpop.f32.mrb[57].mxu0 }
0x2aef   :  { %v6277_v60 = vmul.f32 0.35355338, %v6268_v12  ;;  %v8645_v12 = vld [vmem:[%s12338_s6 + $0xb8] sm:$0xff] }
0x2af0   :  { %v8615_v50 = vclamps-f32 %v6278_v55, 10.0  ;;  %v8644_v55 = vld [vmem:[%s12338_s6 + $0xb0] sm:$0xff] }
0x2af1   :  { %v8614_v59 = vclamps-f32 %v6277_v60, 10.0  ;;  %v10125_v60 = vpack.c.bf16 %v8645_v12, %v8644_v55  ;;  %v12082_v55 = vld [vmem:[%s12344_s12 + $0x1d] ss:$0 sm:$0xff] }
0x2af2   :  { %v6285_v61 = vmul.f32 1.442695, %v8615_v50 }
0x2af3   :  { %v6283_v5 = vmul.f32 1.442695, %v8614_v59 }
0x2af4   :  { %10653 = vpow2.f32 %v6285_v61 }
0x2af5   :  { %10655 = vpow2.f32 %v6283_v5 }
0x2afe   :  { %v10654_v56 = vpop.eup %10653 }
0x2aff   :  { %v10656_v58 = vpop.eup %10655  ;;  %v6288_v48 = vmul.f32 %v10654_v56, %v11582_v52 }
0x2b00   :  { %v6287_v35 = vmul.f32 %v10656_v58, %v11579_v11 }
0x2b01   :  { %v6292_v36 = vsel %vm122_vm0, %v6288_v48, 0.0 }
0x2b02   :  { %6293 = vadd.xlane.f32.xlu0 %v6292_v36  ;;  %9579 = vmatprep.mubr.msk.f32.mxu1 %vm122_vm0, %v6287_v35  ;;  %v6289_v49 = vsel %vm122_vm0, %v6287_v35, 0.0 }
0x2b03   :  { %9580 = vmatmul.mubr.msk.f32.vlgmr.msra.gmra.mrb[56].mxu1 %vm122_vm0, %v6288_v48 }
0x2b04   :  { %10108 = vmatpush3.bf16.xpose.msk.msra.mxu1 %vm11110_vm11, %v11959_v51  ;;  %9586 = vmatprep.mubr.msk.f32.mxu1 %vm685_vm10, %v6387_v19 }
0x2b06   :  { %6290 = vadd.xlane.f32.xlu0 %v6289_v49 }
0x2b0b   :  { %9587 = vmatmul.mubr.msk.f32.vlgmr.msra.gmra.mrb[58].mxu1 %vm685_vm10, %v6389_v53 }
0x2b8f   :  { %v6294_v41 = vpop.xlane.xlu0 %6293 }
0x2b93   :  { %v6291_v42 = vpop.xlane.xlu0 %6290 }
0x2bd6   :  { %v9581_v62 = vpop.f32.mrb[56].mxu1 }
0x2bd7   :  { %v6373_v63 = vpop.f32.mrb[57].mxu1 }
0x2bde   :  { %v9588_v4 = vpop.f32.mrb[58].mxu1 }
0x2bdf   :  { %v6478_v8 = vmul.f32 0.35355338, %v9588_v4  ;;  %v6468_v29 = vpop.f32.mrb[59].mxu1 }
0x2be0   :  { %v6477_v27 = vmul.f32 0.35355338, %v6468_v29 }
0x2be1   :  { %v8623_v13 = vclamps-f32 %v6478_v8, 10.0 }
0x2be2   :  { %v8622_v39 = vclamps-f32 %v6477_v27, 10.0 }
0x2be3   :  { %v6485_v25 = vmul.f32 1.442695, %v8623_v13 }
0x2be4   :  { %v6483_v16 = vmul.f32 1.442695, %v8622_v39 }
0x2be5   :  { %10657 = vpow2.f32 %v6485_v25 }
0x2be6   :  { %10659 = vpow2.f32 %v6483_v16 }
0x2be7   :  { %10661 = vrcp.f32 %v6091_v34 }
0x2bef   :  { %v10658_v51 = vpop.eup %10657 }
0x2bf0   :  { %v10660_v26 = vpop.eup %10659  ;;  %v6488_v10 = vmul.f32 %v10658_v51, %v11582_v52  ;;  %v5889_v52 = vsel %vm122_vm0, %v11965_v44, 0.0 }
0x2bf1   :  { %v6487_v6 = vmul.f32 %v10660_v26, %v11579_v11  ;;  %v6094_v11 = vpop.xlane.xlu1 %6093  ;;  %v10662_v20 = vpop.eup %10661 }
0x2bf2   :  { %v6492_v14 = vsel %vm122_vm0, %v6488_v10, 0.0  ;;  %10663 = vrcp.f32 %v6094_v11  ;;  %v6184_v23 = vmul.f32 %v10662_v20, %v6173_v3  ;;  %v8643_v3 = vld [vmem:[%s12338_s6 + $0xa8] sm:$0xff] }
0x2bf3   :  { %9593 = vmatprep.mubr.msk.f32.mxu0 %vm122_vm0, %v6487_v6  ;;  %6493 = vadd.xlane.f32.xlu0 %v6492_v14  ;;  %v6489_v30 = vsel %vm122_vm0, %v6487_v6, 0.0  ;;  %10665 = vrcp.f32 %v6291_v42 }
0x2bf4   :  { %9594 = vmatmul.mubr.msk.f32.vlgmr.msra.gmra.mrb[58].mxu0 %vm122_vm0, %v6488_v10  ;;  %6490 = vadd.xlane.f32.xlu1 %v6489_v30  ;;  %10667 = vrcp.f32 %v6294_v41 }
0x2bf5   :  { %10116 = vmatpush3.bf16.msra.mxu0 %v10113_v24 }
0x2bf6   :  { %10118 = vmatprep.subr.bf16.mxu0 %v10117_v46 }
0x2bf7   :  { %5893 = vadd.xlane.f32.xlu0 %v5892_v40 }
0x2bf8   :  { %5890 = vadd.xlane.f32.xlu1 %v5889_v52 }
0x2bf9   :  { %10120 = vmatpush3.bf16.msra.mxu0 %v10117_v46 }
0x2bfc   :  { %v10664_v19 = vpop.eup %10663 }
0x2bfd   :  { %v10666_v21 = vpop.eup %10665  ;;  %v6185_v33 = vmul.f32 %v10664_v19, %v11991_v28  ;;  %v8642_v28 = vld [vmem:[%s12338_s6 + $0xa0] sm:$0xff] }
0x2bfe   :  { %v6384_v2 = vmul.f32 %v10666_v21, %v6373_v63  ;;  %v10668_v44 = vpop.eup %10667  ;;  %v10121_v54 = vpack.c.bf16 %v8643_v3, %v8642_v28  ;;  %v12077_v3 = vld [vmem:[%s12344_s12 + $0x11] ss:$0 sm:$0xff] }
0x2bff   :  { %v6385_v37 = vmul.f32 %v10668_v44, %v9581_v62 }
0x2c00   :  { %10130 = vmatprep.subr.bf16.mxu0 %v10121_v54  ;;  %10122 = vmatprep.subr.bf16.mxu1 %v10121_v54 }
0x2c01   :  { %10124 = vmatpush3.bf16.msra.mxu1 %v10121_v54 }
0x2c02   :  { %10126 = vmatprep.subr.bf16.mxu1 %v10125_v60 }
0x2c05   :  { %10128 = vmatpush3.bf16.msra.mxu1 %v10125_v60 }
0x2c09   :  { %6588 = vrot.lane.b32.xlu1 %v6184_v23, %s10829_s29 }
0x2c0d   :  { %6590 = vrot.lane.b32.xlu0 %v6185_v33, %s10829_s29  ;;  %6596 = vrot.lane.b32.xlu1 %v6384_v2, %s10831_s9 }
0x2c11   :  { %6598 = vrot.lane.b32.xlu1 %v6385_v37, %s10831_s9 }
0x2c80   :  { %v6494_v47 = vpop.xlane.xlu0 %6493 }
0x2c81   :  { %v6491_v17 = vpop.xlane.xlu1 %6490  ;;  %10669 = vrcp.f32 %v6494_v47 }
0x2c82   :  { %10671 = vrcp.f32 %v6491_v17 }
0x2c84   :  { %v5894_v35 = vpop.xlane.xlu0 %5893 }
0x2c85   :  { %v5891_v48 = vpop.xlane.xlu1 %5890 }
0x2c86   :  { %10673 = vrcp.f32 %v5891_v48 }
0x2c87   :  { %10675 = vrcp.f32 %v5894_v35 }
0x2c88   :  { %v6591_v29 = vpop.permute.xlu0 %6590 }
0x2c89   :  { %v6589_v36 = vpop.permute.xlu1 %6588 }
0x2c8b   :  { %v10670_v50 = vpop.eup %10669 }
0x2c8c   :  { %v10672_v61 = vpop.eup %10671 }
0x2c8d   :  { %v6597_v49 = vpop.permute.xlu1 %6596 }
0x2c90   :  { %v10674_v53 = vpop.eup %10673 }
0x2c91   :  { %v10676_v62 = vpop.eup %10675  ;;  %v5984_v63 = vmul.f32 %v10674_v53, %v11989_v0  ;;  %v6599_v8 = vpop.permute.xlu1 %6598 }
0x2c92   :  { %v5985_v4 = vmul.f32 %v10676_v62, %v11987_v22  ;;  %v8631_v22 = vld [vmem:[%s12344_s12 + $0x4] ss:$0 sm:$0xff] }
0x2c93   :  { %v6610_v27 = vsel %vm685_vm10, %v5984_v63, %v6589_v36 }
0x2c94   :  { %v6611_v13 = vsel %vm685_vm10, %v5985_v4, %v6591_v29  ;;  %v6612_v25 = vsel %vm122_vm0, %v6610_v27, %v6597_v49 }
0x2c95   :  { %v6613_v51 = vsel %vm122_vm0, %v6611_v13, %v6599_v8 }
0x2cc7   :  { %v9595_v59 = vpop.f32.mrb[58].mxu0 }
0x2cc8   :  { %v6585_v5 = vmul.f32 %v10670_v50, %v9595_v59  ;;  %v6573_v56 = vpop.f32.mrb[59].mxu0 }
0x2cc9   :  { %v6584_v58 = vmul.f32 %v10672_v61, %v6573_v56 }
0x2cca   :  { %6606 = vrot.lane.b32.xlu1 %v6585_v5, %s10847_s16 }
0x2ccb   :  { %6604 = vrot.lane.b32.xlu0 %v6584_v58, %s10847_s16 }
0x2d3c   :  { %v6607_v39 = vpop.permute.xlu1 %6606 }
0x2d3d   :  { %v6605_v16 = vpop.permute.xlu0 %6604  ;;  %v6615_v10 = vsel %vm1506_vm1, %v6613_v51, %v6607_v39 }
0x2d3e   :  { %v6614_v26 = vsel %vm1506_vm1, %v6612_v25, %v6605_v16 }
0x2d3f   :  { %9604 = vmatprep.mubr.msk.f32.mxu0 %vm210_vm4, %v6614_v26 }
0x2d40   :  { %9605 = vmatmul.mubr.msk.f32.vlgmr.msra.gmra.mrb[60].mxu0 %vm210_vm4, %v6615_v10 }
0x2d41   :  { %10132 = vmatpush3.bf16.msra.mxu0 %v10121_v54  ;;  %9626 = vmatprep.mubr.msk.f32.mxu0 %vm210_vm4, %v11695_v38  ;;  %v12065_v38 = vld [vmem:[#allocation2 + $0x5] ss:$0 sm:$0xff] }
0x2d42   :  { %10134 = vmatprep.subr.bf16.mxu0 %v10125_v60 }
0x2d45   :  { %10136 = vmatpush3.bf16.msra.mxu0 %v10125_v60 }
0x2d48   :  { %9627 = vmatmul.mubr.msk.f32.vlgmr.msra.gmra.mrb[62].mxu0 %vm210_vm4, %v11716_v1 }
0x2e13   :  { %v9606_v0 = vpop.f32.mrb[60].mxu0 }
0x2e14   :  { %v6707_v6 = vadd.f32 %v9606_v0, %v8631_v22  ;;  %v6701_v14 = vpop.f32.mrb[61].mxu0 }
0x2e15   :  { %v6702_v34 = vadd.f32 %v8631_v22, %v6701_v14 }
0x2e16   :  { %v6711_v30 = vadd.f32 %v6707_v6, %v11898_v57 }
0x2e17   :  { %v6710_v40 = vadd.f32 %v6702_v34, %v11901_v15 }
0x2e18   :  { %v6719_v41 = vsel %vm210_vm4, %v6711_v30, 0.0 }
0x2e19   :  { %6720 = vadd.xlane.f32.xlu1 %v6719_v41  ;;  %v6716_v52 = vsel %vm210_vm4, %v6710_v40, 0.0 }
0x2e1a   :  { %6717 = vadd.xlane.f32.xlu0 %v6716_v52  ;;  %v8640_v52 = vld [vmem:[%s12344_s12 + $0xf] ss:$0 sm:$0xff] }
0x2e1b   :  { %v9628_v1 = vpop.f32.mrb[62].mxu0 }
0x2e1c   :  { %v6970_v11 = vadd.f32 %v9628_v1, %v12065_v38  ;;  %v6964_v42 = vpop.f32.mrb[63].mxu0 }
0x2e1d   :  { %v6965_v20 = vadd.f32 %v12065_v38, %v6964_v42 }
0x2e1f   :  { %v12070_v23 = vpack.i.bf16 %v6970_v11, %v6965_v20  ;;  %v8641_v11 = vld [vmem:[%s12344_s12 + $0x1b] ss:$0 sm:$0xff] }
0x2ea6   :  { %v6721_v19 = vpop.xlane.xlu1 %6720 }
0x2ea7   :  { %v6723_v57 = vmul.f32 0.03125, %v6721_v19  ;;  %v6718_v21 = vpop.xlane.xlu0 %6717 }
0x2ea8   :  { %v6722_v15 = vmul.f32 0.03125, %v6718_v21 }
0x2ea9   :  { %v6725_v33 = vsub.f32 %v6711_v30, %v6723_v57 }
0x2eaa   :  { %v6724_v2 = vsub.f32 %v6710_v40, %v6722_v15 }
0x2eab   :  { %v6727_v18 = vmul.f32 %v6725_v33, %v6725_v33 }
0x2eac   :  { %v6726_v44 = vmul.f32 %v6724_v2, %v6724_v2 }
0x2ead   :  { %v6731_v45 = vsel %vm210_vm4, %v6727_v18, 0.0 }
0x2eae   :  { %v6728_v37 = vsel %vm210_vm4, %v6726_v44, 0.0 }
0x2eaf   :  { %6729 = vadd.xlane.f32.xlu0 %v6728_v37 }
0x2eb3   :  { %6732 = vadd.xlane.f32.xlu0 %v6731_v45 }
0x2f3c   :  { %v6730_v31 = vpop.xlane.xlu0 %6729 }
0x2f3d   :  { %v6734_v24 = vmul.f32 0.03125, %v6730_v31 }
0x2f3f   :  { %v6736_v32 = vadd.f32 1e-05, %v6734_v24 }
0x2f40   :  { %v6733_v46 = vpop.xlane.xlu0 %6732 }
0x2f41   :  { %10677 = vrsqrt.f32 %v6736_v32  ;;  %v6735_v47 = vmul.f32 0.03125, %v6733_v46 }
0x2f43   :  { %v6737_v17 = vadd.f32 1e-05, %v6735_v47 }
0x2f45   :  { %10679 = vrsqrt.f32 %v6737_v17 }
0x2f4b   :  { %v10678_v28 = vpop.eup %10677 }
0x2f4c   :  { %v6740_v54 = vmul.f32 %v10678_v28, %v6724_v2 }
0x2f4e   :  { %v6748_v12 = vmul.f32 %v12077_v3, %v6740_v54 }
0x2f4f   :  { %v10680_v60 = vpop.eup %10679 }
0x2f50   :  { %v12086_v50 = vadd.f32 %v12082_v55, %v6748_v12  ;;  %v6741_v59 = vmul.f32 %v10680_v60, %v6725_v33 }
0x2f52   :  { %v6762_v61 = vsel %vm210_vm4, %v12086_v50, 0.0  ;;  %v6749_v5 = vmul.f32 %v12077_v3, %v6741_v59 }
0x2f53   :  { %6763 = vadd.xlane.f32.xlu1 %v6762_v61 }
0x2f54   :  { %v12092_v56 = vadd.f32 %v12082_v55, %v6749_v5 }
0x2f56   :  { %v6765_v58 = vsel %vm210_vm4, %v12092_v56, 0.0 }
0x2f57   :  { %6766 = vadd.xlane.f32.xlu0 %v6765_v58 }
0x2fe0   :  { %v6764_v48 = vpop.xlane.xlu1 %6763 }
0x2fe1   :  { %v6768_v35 = vmul.f32 0.03125, %v6764_v48 }
0x2fe3   :  { %v6770_v36 = vsub.f32 %v12086_v50, %v6768_v35 }
0x2fe4   :  { %v6767_v49 = vpop.xlane.xlu0 %6766 }
0x2fe5   :  { %v6769_v53 = vmul.f32 0.03125, %v6767_v49  ;;  %v6772_v62 = vmul.f32 %v6770_v36, %v6770_v36 }
0x2fe7   :  { %v6771_v63 = vsub.f32 %v12092_v56, %v6769_v53  ;;  %v6774_v4 = vsel %vm210_vm4, %v6772_v62, 0.0 }
0x2fe8   :  { %6775 = vadd.xlane.f32.xlu1 %v6774_v4 }
0x2fe9   :  { %v6773_v8 = vmul.f32 %v6771_v63, %v6771_v63 }
0x2feb   :  { %v6777_v29 = vsel %vm210_vm4, %v6773_v8, 0.0 }
0x2fec   :  { %6778 = vadd.xlane.f32.xlu0 %v6777_v29 }
0x2ff9   :  { %10442 = vrot.lane.b32.xlu1 %v12070_v23, %s10837_s21 }
0x3002   :  { %10447 = vrot.lane.b32.xlu0 %v12070_v23, %s10839_s14 }
0x3006   :  { %10452 = vrot.lane.b32.xlu0 %v12070_v23, %s10836_s28 }
0x300a   :  { %10462 = vrot.lane.b32.xlu0 %v12070_v23, %s10842_s23 }
0x3075   :  { %v6776_v27 = vpop.xlane.xlu1 %6775 }
0x3076   :  { %v6780_v13 = vmul.f32 0.03125, %v6776_v27 }
0x3078   :  { %v6782_v39 = vadd.f32 1e-05, %v6780_v13 }
0x3079   :  { %v10443_v25 = vpop.permute.xlu1 %10442  ;;  %v6779_v16 = vpop.xlane.xlu0 %6778 }
0x307a   :  { %10681 = vrsqrt.f32 %v6782_v39  ;;  %v10445_v51 = vunpack.i.h.bf16 %v10443_v25  ;;  %v10444_v26 = vunpack.i.l.bf16 %v10443_v25  ;;  %v6781_v10 = vmul.f32 0.03125, %v6779_v16 }
0x307c   :  { %v10137_v22 = vpack.c.bf16 %v10445_v51, %v10444_v26  ;;  %v6783_v0 = vadd.f32 1e-05, %v6781_v10 }
0x307d   :  { %v10448_v6 = vpop.permute.xlu0 %10447 }
0x307e   :  { %10683 = vrsqrt.f32 %v6783_v0  ;;  %10139 = vmatprep.subr.msk.bf16.mxu1 %vm11110_vm11, %v10137_v22  ;;  %v10450_v21 = vunpack.i.h.bf16 %v10448_v6  ;;  %v10449_v15 = vunpack.i.l.bf16 %v10448_v6 }
0x3080   :  { %v10147_v44 = vpack.c.bf16 %v10450_v21, %v10449_v15 }
0x3081   :  { %v10453_v14 = vpop.permute.xlu0 %10452 }
0x3082   :  { %v10455_v34 = vunpack.i.h.bf16 %v10453_v14  ;;  %v10454_v30 = vunpack.i.l.bf16 %v10453_v14 }
0x3084   :  { %v10682_v40 = vpop.eup %10681  ;;  %v10143_v41 = vpack.c.bf16 %v10455_v34, %v10454_v30 }
0x3085   :  { %v6786_v1 = vmul.f32 %v10682_v40, %v6770_v36  ;;  %v10463_v24 = vpop.permute.xlu0 %10462 }
0x3086   :  { %10144 = vmatprep.subr.bf16.mxu0 %v10143_v41  ;;  %v10465_v39 = vunpack.i.h.bf16 %v10463_v24  ;;  %v10464_v25 = vunpack.i.l.bf16 %v10463_v24 }
0x3087   :  { %10146 = vmatpush3.bf16.msra.mxu0 %v10143_v41  ;;  %v6794_v42 = vmul.f32 %v8640_v52, %v6786_v1 }
0x3088   :  { %v10684_v20 = vpop.eup %10683  ;;  %v10157_v26 = vpack.c.bf16 %v10465_v39, %v10464_v25 }
0x3089   :  { %v6787_v19 = vmul.f32 %v10684_v20, %v6771_v63  ;;  %v6802_v57 = vadd.f32 %v8641_v11, %v6794_v42 }
0x308b   :  { %v6795_v33 = vmul.f32 %v8640_v52, %v6787_v19  ;;  %9615 = vmatprep.mubr.msk.f32.mxu1 %vm210_vm4, %v6802_v57 }
0x308d   :  { %v6803_v2 = vadd.f32 %v8641_v11, %v6795_v33 }
0x308f   :  { %9616 = vmatmul.mubr.msk.f32.vlgmr.msra.gmra.mrb[60].mxu1 %vm210_vm4, %v6803_v2 }
0x3090   :  { %10142 = vmatpush3.bf16.xpose.msk.msra.mxu1 %vm11110_vm11, %v10137_v22 }
0x3091   :  { %10149 = vmatprep.subr.msk.bf16.mxu1 %vm11110_vm11, %v10147_v44 }
0x3162   :  { %v9617_v37 = vpop.f32.mrb[60].mxu1 }
0x3163   :  { %v6895_v18 = vadd.f32 %v9617_v37, %v12065_v38  ;;  %v6889_v45 = vpop.f32.mrb[61].mxu1 }
0x3164   :  { %v6890_v31 = vadd.f32 %v12065_v38, %v6889_v45 }
0x3165   :  { %7375 = vrot.lane.b32.xlu0 %v6895_v18, %s10841_s20 }
0x3166   :  { %7173 = vrot.lane.b32.xlu1 %v6890_v31, %s10838_s22  ;;  %9633 = vmatprep.mubr.msk.f32.mxu1 %vm685_vm10, %v6890_v31 }
0x3167   :  { %9634 = vmatmul.mubr.msk.f32.vlgmr.msra.gmra.mrb[62].mxu1 %vm685_vm10, %v6895_v18 }
0x3168   :  { %10152 = vmatpush3.bf16.xpose.msk.msra.mxu1 %vm11110_vm11, %v10147_v44 }
0x3169   :  { %10472 = vrot.lane.b32.xlu0 %v12070_v23, %s10845_s26 }
0x316a   :  { %7175 = vrot.lane.b32.xlu1 %v6895_v18, %s10838_s22 }
0x316d   :  { %7575 = vrot.lane.b32.xlu0 %v6895_v18, %s10844_s25 }
0x316e   :  { %10457 = vrot.lane.b32.xlu1 %v12070_v23, %s10840_s3 }
0x3172   :  { %7373 = vrot.lane.b32.xlu1 %v6890_v31, %s10841_s20 }
0x3176   :  { %10467 = vrot.lane.b32.xlu1 %v12070_v23, %s10843_s24 }
0x317a   :  { %7573 = vrot.lane.b32.xlu1 %v6890_v31, %s10844_s25 }
0x317e   :  { %10477 = vrot.lane.b32.xlu1 %v12070_v23, %s10846_s27 }
0x31d7   :  { %v12144_v46 = vpop.permute.xlu0 %7375 }
0x31d8   :  { %v7174_v38 = vpop.permute.xlu1 %7173 }
0x31d9   :  { %9647 = vmatprep.mubr.msk.f32.mxu1 %vm685_vm10, %v7174_v38 }
0x31db   :  { %v10473_v60 = vpop.permute.xlu0 %10472 }
0x31dc   :  { %v7176_v32 = vpop.permute.xlu1 %7175  ;;  %v10475_v61 = vunpack.i.h.bf16 %v10473_v60  ;;  %v10474_v5 = vunpack.i.l.bf16 %v10473_v60 }
0x31dd   :  { %9648 = vmatmul.mubr.msk.f32.vlgmr.msra.gmra.mrb[64].mxu1 %vm685_vm10, %v7176_v32 }
0x31de   :  { %v12146_v35 = vpack.c.bf16 %v10475_v61, %v10474_v5 }
0x31df   :  { %v7576_v5 = vpop.permute.xlu0 %7575 }
0x31e0   :  { %v10458_v47 = vpop.permute.xlu1 %10457 }
0x31e1   :  { %v10460_v17 = vunpack.i.h.bf16 %v10458_v47  ;;  %v10459_v28 = vunpack.i.l.bf16 %v10458_v47 }
0x31e3   :  { %v10153_v54 = vpack.c.bf16 %v10460_v17, %v10459_v28 }
0x31e4   :  { %v7374_v12 = vpop.permute.xlu1 %7373 }
0x31e5   :  { %10154 = vmatprep.subr.bf16.mxu0 %v10153_v54 }
0x31e8   :  { %v10468_v59 = vpop.permute.xlu1 %10467 }
0x31e9   :  { %v10470_v23 = vunpack.i.h.bf16 %v10468_v59  ;;  %v10469_v58 = vunpack.i.l.bf16 %v10468_v59 }
0x31eb   :  { %v10163_v48 = vpack.c.bf16 %v10470_v23, %v10469_v58 }
0x31ec   :  { %v7574_v41 = vpop.permute.xlu1 %7573 }
0x31ed   :  { %10164 = vmatprep.subr.bf16.mxu1 %v10163_v48 }
0x31ee   :  { %10166 = vmatpush3.bf16.msra.mxu1 %v10163_v48 }
0x31ef   :  { %10169 = vmatprep.subr.msk.bf16.mxu1 %vm11110_vm11, %v12146_v35 }
0x31f0   :  { %v10478_v52 = vpop.permute.xlu1 %10477 }
0x31f1   :  { %v10480_v42 = vunpack.i.h.bf16 %v10478_v52  ;;  %v10479_v20 = vunpack.i.l.bf16 %v10478_v52  ;;  %v8684_v52 = vld [vmem:[%s12340_s8 + $0xa8] sm:$0xff] }
0x31f3   :  { %v10173_v33 = vpack.c.bf16 %v10480_v42, %v10479_v20  ;;  %v8686_v42 = vld [vmem:[%s12340_s8 + $0xb8] sm:$0xff] }
0x323a   :  { %v9635_v36 = vpop.f32.mrb[62].mxu1 }
0x323b   :  { %v7065_v49 = vmul.f32 0.35355338, %v9635_v36  ;;  %v7055_v53 = vpop.f32.mrb[63].mxu1 }
0x323c   :  { %v7064_v62 = vmul.f32 0.35355338, %v7055_v53 }
0x323d   :  { %v8656_v63 = vclamps-f32 %v7065_v49, 10.0 }
0x323e   :  { %v8655_v4 = vclamps-f32 %v7064_v62, 10.0 }
0x323f   :  { %v7072_v8 = vmul.f32 1.442695, %v8656_v63 }
0x3240   :  { %v7070_v29 = vmul.f32 1.442695, %v8655_v4 }
0x3241   :  { %10685 = vpow2.f32 %v7072_v8 }
0x3242   :  { %10687 = vpow2.f32 %v7070_v29 }
0x324b   :  { %v10686_v27 = vpop.eup %10685 }
0x324c   :  { %v10688_v13 = vpop.eup %10687  ;;  %v12155_v51 = vmul.f32 %v10686_v27, %v11141_v9 }
0x324d   :  { %v12152_v16 = vmul.f32 %v10688_v13, %v11136_v7 }
0x324f   :  { %9640 = vmatprep.mubr.msk.f32.mxu0 %vm122_vm0, %v12152_v16 }
0x3250   :  { %9641 = vmatmul.mubr.msk.f32.vlgmr.msra.gmra.mrb[64].mxu0 %vm122_vm0, %v12155_v51 }
0x3251   :  { %10156 = vmatpush3.bf16.msra.mxu0 %v10153_v54 }
0x3252   :  { %10159 = vmatprep.subr.msk.bf16.mxu0 %vm11110_vm11, %v10157_v26 }
0x32b0   :  { %v9649_v10 = vpop.f32.mrb[64].mxu1 }
0x32b1   :  { %v7265_v22 = vmul.f32 0.35355338, %v9649_v10  ;;  %v7255_v0 = vpop.f32.mrb[65].mxu1 }
0x32b2   :  { %v7264_v6 = vmul.f32 0.35355338, %v7255_v0 }
0x32b3   :  { %v8664_v14 = vclamps-f32 %v7265_v22, 10.0 }
0x32b4   :  { %v8663_v34 = vclamps-f32 %v7264_v6, 10.0 }
0x32b5   :  { %v7272_v30 = vmul.f32 1.442695, %v8664_v14 }
0x32b6   :  { %v7270_v40 = vmul.f32 1.442695, %v8663_v34 }
0x32b7   :  { %10689 = vpow2.f32 %v7272_v30 }
0x32b8   :  { %10691 = vpow2.f32 %v7270_v40 }
0x32c1   :  { %v10690_v1 = vpop.eup %10689 }
0x32c2   :  { %v10692_v11 = vpop.eup %10691  ;;  %v7275_v19 = vmul.f32 %v10690_v1, %v11141_v9  ;;  %v8685_v1 = vld [vmem:[%s12340_s8 + $0xb0] sm:$0xff] }
0x32c3   :  { %v7274_v57 = vmul.f32 %v10692_v11, %v11136_v7  ;;  %v10181_v20 = vpack.c.bf16 %v8686_v42, %v8685_v1  ;;  %v8704_v1 = vld [vmem:[%s12343_s11 + $0xe8] sm:$0xff] }
0x32c4   :  { %v7279_v21 = vsel %vm122_vm0, %v7275_v19, 0.0 }
0x32c5   :  { %7280 = vadd.xlane.f32.xlu1 %v7279_v21  ;;  %9654 = vmatprep.mubr.msk.f32.mxu0 %vm122_vm0, %v7274_v57  ;;  %v7276_v15 = vsel %vm122_vm0, %v7274_v57, 0.0 }
0x32c6   :  { %9655 = vmatmul.mubr.msk.f32.vlgmr.msra.gmra.mrb[66].mxu0 %vm122_vm0, %v7275_v19  ;;  %7277 = vadd.xlane.f32.xlu0 %v7276_v15 }
0x32c7   :  { %10162 = vmatpush3.bf16.xpose.msk.msra.mxu0 %vm11110_vm11, %v10157_v26  ;;  %9661 = vmatprep.mubr.msk.f32.mxu0 %vm685_vm10, %v7374_v12  ;;  %v7079_v26 = vsel %vm122_vm0, %v12155_v51, 0.0 }
0x32c8   :  { %10174 = vmatprep.subr.bf16.mxu0 %v10173_v33 }
0x32ce   :  { %9662 = vmatmul.mubr.msk.f32.vlgmr.msra.gmra.mrb[68].mxu0 %vm685_vm10, %v12144_v46 }
0x32cf   :  { %10176 = vmatpush3.bf16.msra.mxu0 %v10173_v33 }
0x3323   :  { %v12174_v2 = vpop.f32.mrb[64].mxu0 }
0x3324   :  { %v12176_v44 = vpop.f32.mrb[65].mxu0 }
0x3353   :  { %v7278_v39 = vpop.xlane.xlu0 %7277 }
0x3399   :  { %v12178_v37 = vpop.f32.mrb[66].mxu0 }
0x339a   :  { %v7360_v18 = vpop.f32.mrb[67].mxu0 }
0x33a1   :  { %v9663_v45 = vpop.f32.mrb[68].mxu0 }
0x33a2   :  { %v7465_v31 = vmul.f32 0.35355338, %v9663_v45  ;;  %v7455_v38 = vpop.f32.mrb[69].mxu0 }
0x33a3   :  { %v7464_v24 = vmul.f32 0.35355338, %v7455_v38 }
0x33a4   :  { %v8672_v32 = vclamps-f32 %v7465_v31, 10.0 }
0x33a5   :  { %v8671_v47 = vclamps-f32 %v7464_v24, 10.0 }
0x33a6   :  { %v7472_v17 = vmul.f32 1.442695, %v8672_v32 }
0x33a7   :  { %v7470_v28 = vmul.f32 1.442695, %v8671_v47 }
0x33a8   :  { %10693 = vpow2.f32 %v7472_v17 }
0x33a9   :  { %10695 = vpow2.f32 %v7470_v28 }
0x33b2   :  { %v10694_v54 = vpop.eup %10693 }
0x33b3   :  { %v10696_v46 = vpop.eup %10695  ;;  %v7475_v12 = vmul.f32 %v10694_v54, %v11141_v9 }
0x33b4   :  { %v7474_v60 = vmul.f32 %v10696_v46, %v11136_v7 }
0x33b5   :  { %v7479_v59 = vsel %vm122_vm0, %v7475_v12, 0.0 }
0x33b6   :  { %9668 = vmatprep.mubr.msk.f32.mxu1 %vm122_vm0, %v7474_v60  ;;  %7480 = vadd.xlane.f32.xlu0 %v7479_v59  ;;  %v7476_v61 = vsel %vm122_vm0, %v7474_v60, 0.0 }
0x33b7   :  { %9669 = vmatmul.mubr.msk.f32.vlgmr.msra.gmra.mrb[66].mxu1 %vm122_vm0, %v7475_v12 }
0x33b8   :  { %10172 = vmatpush3.bf16.xpose.msk.msra.mxu1 %vm11110_vm11, %v12146_v35  ;;  %9675 = vmatprep.mubr.msk.f32.mxu1 %vm685_vm10, %v7574_v41  ;;  %v8683_v41 = vld [vmem:[%s12340_s8 + $0xa0] sm:$0xff] }
0x33b9   :  { %v10177_v11 = vpack.c.bf16 %v8684_v52, %v8683_v41  ;;  %v8703_v52 = vld [vmem:[%s12343_s11 + $0xe0] sm:$0xff] }
0x33ba   :  { %7477 = vadd.xlane.f32.xlu0 %v7476_v61 }
0x33bb   :  { %10178 = vmatprep.subr.bf16.mxu0 %v10177_v11 }
0x33bf   :  { %9676 = vmatmul.mubr.msk.f32.vlgmr.msra.gmra.mrb[68].mxu1 %vm685_vm10, %v7576_v5 }
0x3443   :  { %v7481_v10 = vpop.xlane.xlu0 %7480 }
0x3447   :  { %v7478_v22 = vpop.xlane.xlu0 %7477 }
0x348a   :  { %v9670_v23 = vpop.f32.mrb[66].mxu1 }
0x348b   :  { %v7560_v58 = vpop.f32.mrb[67].mxu1 }
0x3492   :  { %v9677_v48 = vpop.f32.mrb[68].mxu1 }
0x3493   :  { %v7665_v36 = vmul.f32 0.35355338, %v9677_v48  ;;  %v7655_v49 = vpop.f32.mrb[69].mxu1 }
0x3494   :  { %v7664_v53 = vmul.f32 0.35355338, %v7655_v49 }
0x3495   :  { %v8680_v62 = vclamps-f32 %v7665_v36, 10.0 }
0x3496   :  { %v8679_v63 = vclamps-f32 %v7664_v53, 10.0 }
0x3497   :  { %v7672_v4 = vmul.f32 1.442695, %v8680_v62 }
0x3498   :  { %v7670_v8 = vmul.f32 1.442695, %v8679_v63 }
0x3499   :  { %10697 = vpow2.f32 %v7672_v4 }
0x349a   :  { %10699 = vpow2.f32 %v7670_v8 }
0x349b   :  { %10701 = vrcp.f32 %v7278_v39 }
0x34a3   :  { %v10698_v43 = vpop.eup %10697 }
0x34a4   :  { %v10700_v35 = vpop.eup %10699  ;;  %v7675_v29 = vmul.f32 %v10698_v43, %v11141_v9  ;;  %v7076_v9 = vsel %vm122_vm0, %v12152_v16, 0.0 }
0x34a5   :  { %v7674_v27 = vmul.f32 %v10700_v35, %v11136_v7  ;;  %v7281_v7 = vpop.xlane.xlu1 %7280  ;;  %v10702_v0 = vpop.eup %10701 }
0x34a6   :  { %v7679_v13 = vsel %vm122_vm0, %v7675_v29, 0.0  ;;  %10703 = vrcp.f32 %v7281_v7  ;;  %v7371_v6 = vmul.f32 %v10702_v0, %v7360_v18  ;;  %v7947_v7 = vld [vmem:[#allocation5 + $0x68] sm:$0xff]  ;;  %v7948_v0 = vld [vmem:[#allocation5 + $0x70] sm:$0xff] }
0x34a7   :  { %9682 = vmatprep.mubr.msk.f32.mxu0 %vm122_vm0, %v7674_v27  ;;  %7680 = vadd.xlane.f32.xlu0 %v7679_v13  ;;  %v7676_v25 = vsel %vm122_vm0, %v7674_v27, 0.0  ;;  %10705 = vrcp.f32 %v7478_v22 }
0x34a8   :  { %9683 = vmatmul.mubr.msk.f32.vlgmr.msra.gmra.mrb[70].mxu0 %vm122_vm0, %v7675_v29  ;;  %7677 = vadd.xlane.f32.xlu1 %v7676_v25  ;;  %10707 = vrcp.f32 %v7481_v10 }
0x34a9   :  { %10180 = vmatpush3.bf16.msra.mxu0 %v10177_v11  ;;  %v10201_v11 = vpack.c.bf16 %v8704_v1, %v8703_v52 }
0x34aa   :  { %10182 = vmatprep.subr.bf16.mxu0 %v10181_v20 }
0x34ab   :  { %7080 = vadd.xlane.f32.xlu0 %v7079_v26 }
0x34ac   :  { %7077 = vadd.xlane.f32.xlu1 %v7076_v9  ;;  %v7946_v9 = vld [vmem:[#allocation5 + $0x60] sm:$0xff] }
0x34ad   :  { %10184 = vmatpush3.bf16.msra.mxu0 %v10181_v20  ;;  %v10185_v22 = vpack.c.bf16 %v7947_v7, %v7946_v9  ;;  %v8173_v7 = vld [vmem:[%s12345_s13 + $0x10] sm:$0xff] }
0x34af   :  { %10186 = vmatprep.subr.bf16.mxu1 %v10185_v22 }
0x34b0   :  { %v10704_v14 = vpop.eup %10703  ;;  %10188 = vmatpush3.bf16.msra.mxu1 %v10185_v22  ;;  %v8174_v22 = vld [vmem:[%s12345_s13 + $0x18] sm:$0xff] }
0x34b1   :  { %v10706_v34 = vpop.eup %10705  ;;  %v7372_v51 = vmul.f32 %v10704_v14, %v12178_v37 }
0x34b2   :  { %v7571_v30 = vmul.f32 %v10706_v34, %v7560_v58  ;;  %v10708_v16 = vpop.eup %10707  ;;  %v8699_v34 = vld [vmem:[%s12343_s11 + $0xc0] sm:$0xff] }
0x34b3   :  { %v7572_v40 = vmul.f32 %v10708_v16, %v9670_v23 }
0x34bd   :  { %7775 = vrot.lane.b32.xlu1 %v7371_v6, %s10829_s29  ;;  %v7949_v6 = vld [vmem:[#allocation5 + $0x78] sm:$0xff] }
0x34be   :  { %v10189_v14 = vpack.c.bf16 %v7949_v6, %v7948_v0  ;;  %v10213_v0 = vpack.c.bf16 %v8174_v22, %v8173_v7 }
0x34c0   :  { %10190 = vmatprep.subr.bf16.mxu1 %v10189_v14 }
0x34c1   :  { %7777 = vrot.lane.b32.xlu0 %v7372_v51, %s10829_s29  ;;  %7783 = vrot.lane.b32.xlu1 %v7571_v30, %s10831_s9  ;;  %v8700_v51 = vld [vmem:[%s12343_s11 + $0xc8] sm:$0xff]  ;;  %v8701_v30 = vld [vmem:[%s12343_s11 + $0xd0] sm:$0xff] }
0x34c2   :  { %10192 = vmatpush3.bf16.msra.mxu1 %v10189_v14  ;;  %v10193_v16 = vpack.c.bf16 %v8700_v51, %v8699_v34 }
0x34c4   :  { %10194 = vmatprep.subr.bf16.mxu0 %v10193_v16 }
0x34c5   :  { %7785 = vrot.lane.b32.xlu1 %v7572_v40, %s10831_s9  ;;  %v8702_v40 = vld [vmem:[%s12343_s11 + $0xd8] sm:$0xff] }
0x34c6   :  { %v10197_v41 = vpack.c.bf16 %v8702_v40, %v8701_v30 }
0x3534   :  { %v7681_v19 = vpop.xlane.xlu0 %7680 }
0x3535   :  { %v7678_v57 = vpop.xlane.xlu1 %7677  ;;  %10709 = vrcp.f32 %v7681_v19 }
0x3536   :  { %10711 = vrcp.f32 %v7678_v57 }
0x3538   :  { %v7081_v38 = vpop.xlane.xlu0 %7080 }
0x3539   :  { %v7078_v31 = vpop.xlane.xlu1 %7077 }
0x353a   :  { %10713 = vrcp.f32 %v7078_v31 }
0x353b   :  { %10715 = vrcp.f32 %v7081_v38 }
0x353c   :  { %v7778_v12 = vpop.permute.xlu0 %7777 }
0x353d   :  { %v7776_v24 = vpop.permute.xlu1 %7775 }
0x353f   :  { %v10710_v21 = vpop.eup %10709 }
0x3540   :  { %v10712_v33 = vpop.eup %10711 }
0x3541   :  { %v7784_v32 = vpop.permute.xlu1 %7783 }
0x3544   :  { %v10714_v47 = vpop.eup %10713 }
0x3545   :  { %v10716_v17 = vpop.eup %10715  ;;  %v7171_v28 = vmul.f32 %v10714_v47, %v12176_v44  ;;  %v7786_v46 = vpop.permute.xlu1 %7785 }
0x3546   :  { %v7172_v54 = vmul.f32 %v10716_v17, %v12174_v2  ;;  %v8688_v2 = vld [vmem:[%s12344_s12 + $0x5] ss:$0 sm:$0xff] }
0x3547   :  { %v7797_v60 = vsel %vm685_vm10, %v7171_v28, %v7776_v24  ;;  %v8705_v28 = vld [vmem:[%s12343_s11 + $0xf0] sm:$0xff] }
0x3548   :  { %v7798_v59 = vsel %vm685_vm10, %v7172_v54, %v7778_v12  ;;  %v7799_v5 = vsel %vm122_vm0, %v7797_v60, %v7784_v32  ;;  %v8706_v54 = vld [vmem:[%s12343_s11 + $0xf8] sm:$0xff]  ;;  %v8696_v12 = vld [vmem:[%s12342_s10 + $0x3] ss:$0 sm:$0xff] }
0x3549   :  { %v7800_v58 = vsel %vm122_vm0, %v7798_v59, %v7786_v46  ;;  %v10205_v46 = vpack.c.bf16 %v8706_v54, %v8705_v28 }
0x357b   :  { %v9684_v15 = vpop.f32.mrb[70].mxu0 }
0x357c   :  { %v7772_v37 = vmul.f32 %v10710_v21, %v9684_v15  ;;  %v7760_v18 = vpop.f32.mrb[71].mxu0 }
0x357d   :  { %v7771_v45 = vmul.f32 %v10712_v33, %v7760_v18 }
0x357e   :  { %7793 = vrot.lane.b32.xlu1 %v7772_v37, %s10847_s16  ;;  %v8693_v37 = vld [vmem:[%s12344_s12 + $0x10] ss:$0 sm:$0xff] }
0x357f   :  { %7791 = vrot.lane.b32.xlu0 %v7771_v45, %s10847_s16  ;;  %v8694_v45 = vld [vmem:[%s12344_s12 + $0x1c] ss:$0 sm:$0xff] }
0x35f0   :  { %v7794_v61 = vpop.permute.xlu1 %7793 }
0x35f1   :  { %v7792_v23 = vpop.permute.xlu0 %7791  ;;  %v7802_v36 = vsel %vm1506_vm1, %v7800_v58, %v7794_v61 }
0x35f2   :  { %v7801_v48 = vsel %vm1506_vm1, %v7799_v5, %v7792_v23 }
0x35f3   :  { %9693 = vmatprep.mubr.msk.f32.mxu0 %vm210_vm4, %v7801_v48  ;;  %v8708_v48 = vld [vmem:[%s12344_s12 + $0x21] ss:$0 sm:$0xff] }
0x35f4   :  { %9694 = vmatmul.mubr.msk.f32.vlgmr.msra.gmra.mrb[72].mxu0 %vm210_vm4, %v7802_v36 }
0x35f5   :  { %10196 = vmatpush3.bf16.msra.mxu0 %v10193_v16 }
0x35f6   :  { %10198 = vmatprep.subr.bf16.mxu0 %v10197_v41 }
0x35f9   :  { %10200 = vmatpush3.bf16.msra.mxu0 %v10197_v41 }
0x35fa   :  { %10202 = vmatprep.subr.bf16.mxu0 %v10201_v11 }
0x35fd   :  { %10204 = vmatpush3.bf16.msra.mxu0 %v10201_v11 }
0x35fe   :  { %10206 = vmatprep.subr.bf16.mxu0 %v10205_v46 }
0x3601   :  { %10208 = vmatpush3.bf16.msra.mxu0 %v10205_v46 }
0x36c7   :  { %v9695_v44 = vpop.f32.mrb[72].mxu0 }
0x36c8   :  { %v7894_v49 = vadd.f32 %v9695_v44, %v8688_v2  ;;  %v7888_v53 = vpop.f32.mrb[73].mxu0 }
0x36c9   :  { %v7889_v62 = vadd.f32 %v8688_v2, %v7888_v53 }
0x36ca   :  { %v12234_v63 = vadd.f32 %v7894_v49, %v12092_v56 }
0x36cb   :  { %v12237_v4 = vadd.f32 %v7889_v62, %v12086_v50 }
0x36cc   :  { %v7906_v8 = vsel %vm210_vm4, %v12234_v63, 0.0 }
0x36cd   :  { %7907 = vadd.xlane.f32.xlu1 %v7906_v8  ;;  %v7903_v43 = vsel %vm210_vm4, %v12237_v4, 0.0 }
0x36ce   :  { %7904 = vadd.xlane.f32.xlu0 %v7903_v43 }
0x375a   :  { %v7908_v35 = vpop.xlane.xlu1 %7907 }
0x375b   :  { %v7910_v29 = vmul.f32 0.03125, %v7908_v35  ;;  %v7905_v27 = vpop.xlane.xlu0 %7904 }
0x375c   :  { %v7909_v13 = vmul.f32 0.03125, %v7905_v27 }
0x375d   :  { %v7912_v39 = vsub.f32 %v12234_v63, %v7910_v29 }
0x375e   :  { %v7911_v56 = vsub.f32 %v12237_v4, %v7909_v13 }
0x375f   :  { %v7914_v26 = vmul.f32 %v7912_v39, %v7912_v39 }
0x3760   :  { %v7913_v25 = vmul.f32 %v7911_v56, %v7911_v56 }
0x3761   :  { %v7918_v10 = vsel %vm210_vm4, %v7914_v26, 0.0 }
0x3762   :  { %v7915_v50 = vsel %vm210_vm4, %v7913_v25, 0.0 }
0x3763   :  { %7916 = vadd.xlane.f32.xlu0 %v7915_v50 }
0x3767   :  { %7919 = vadd.xlane.f32.xlu0 %v7918_v10  ;;  %v8172_v10 = vld [vmem:[%s12345_s13 + $0x8] sm:$0xff] }
0x37f0   :  { %v7917_v42 = vpop.xlane.xlu0 %7916 }
0x37f1   :  { %v7921_v20 = vmul.f32 0.03125, %v7917_v42 }
0x37f3   :  { %v7923_v19 = vadd.f32 1e-05, %v7921_v20 }
0x37f4   :  { %v7920_v57 = vpop.xlane.xlu0 %7919 }
0x37f5   :  { %10717 = vrsqrt.f32 %v7923_v19  ;;  %v7922_v21 = vmul.f32 0.03125, %v7920_v57  ;;  %v8711_v57 = vld [vmem:[#allocation7] ss:$0 sm:$0xff] }
0x37f7   :  { %v7924_v15 = vadd.f32 1e-05, %v7922_v21 }
0x37f9   :  { %10719 = vrsqrt.f32 %v7924_v15 }
0x37ff   :  { %v10718_v33 = vpop.eup %10717 }
0x3800   :  { %v7927_v18 = vmul.f32 %v10718_v33, %v7911_v56 }
0x3802   :  { %v7935_v31 = vmul.f32 %v8693_v37, %v7927_v18 }
0x3803   :  { %v10720_v38 = vpop.eup %10719 }
0x3804   :  { %v7928_v24 = vmul.f32 %v10720_v38, %v7912_v39  ;;  %v7943_v32 = vadd.f32 %v8694_v45, %v7935_v31 }
0x3806   :  { %v7936_v47 = vmul.f32 %v8693_v37, %v7928_v24  ;;  %9704 = vmatprep.mubr.msk.f32.mxu1 %vm210_vm4, %v7943_v32 }
0x3808   :  { %v7944_v17 = vadd.f32 %v8694_v45, %v7936_v47 }
0x380a   :  { %9705 = vmatmul.mubr.msk.f32.vlgmr.msra.gmra.mrb[70].mxu1 %vm210_vm4, %v7944_v17 }
0x38dd   :  { %v9706_v60 = vpop.f32.mrb[70].mxu1 }
0x38de   :  { %v8036_v59 = vadd.f32 %v9706_v60, %v8696_v12  ;;  %v8030_v61 = vpop.f32.mrb[71].mxu1 }
0x38df   :  { %v8031_v5 = vadd.f32 %v8696_v12, %v8030_v61 }
0x38e0   :  { %v8040_v58 = vmax.f32 %v8036_v59, 0.0 }
0x38e1   :  { %v8039_v23 = vmax.f32 %v8031_v5, 0.0 }
0x38e3   :  { %9723 = vmatprep.mubr.msk.f32.mxu0 %vm1759_vm2, %v8039_v23 }
0x38e4   :  { %9724 = vmatmul.mubr.msk.f32.vlgmr.msra.gmra.mrb[74].mxu0 %vm1759_vm2, %v8040_v58 }
0x39b7   :  { %v9725_v36 = vpop.f32.mrb[74].mxu0 }
0x39b8   :  { %v8136_v2 = vadd.f32 %v9725_v36, %v8708_v48  ;;  %v8130_v44 = vpop.f32.mrb[75].mxu0 }
0x39b9   :  { %v8131_v49 = vadd.f32 %v8708_v48, %v8130_v44 }
0x39ba   :  { %v8140_v53 = vadd.f32 %v8136_v2, %v12234_v63 }
0x39bb   :  { %v8139_v62 = vadd.f32 %v8131_v49, %v12237_v4  ;;  %v8171_v4 = vld [vmem:[%s12345_s13] sm:$0xff]  ;;  %s10848_s13 = smov [#allocation8]  }
0x39bc   :  { %v8144_v8 = vsel %vm210_vm4, %v8140_v53, 0.0  ;;  %v10209_v9 = vpack.c.bf16 %v8172_v10, %v8171_v4  ;;  %s8294_s17 = sshll.u32 %s10848_s13, 4  ;;  %s8295_s17 = int_to_ptr.vmem [resolvable:$true] %s8294_s17 }
0x39bd   :  { %8145 = vadd.xlane.f32.xlu0 %v8144_v8  ;;  %v8141_v43 = vsel %vm210_vm4, %v8139_v62, 0.0  ;;  %s10799_s6 = scalar_lea.vmem %s8295_s17, 256  ;;  %p10804_p11 = scmp.lt.s32.totalorder %s8295_s17, %s8295_s17 }
0x39be   :  { %8142 = vadd.xlane.f32.xlu1 %v8141_v43  ;;  %10210 = vmatprep.subr.bf16.mxu1 %v10209_v9  ;;  %p10800_p10 = scmp.ne.s32.totalorder %s8295_s17, %s10799_s6  ;;  %p10805_p12 = scmp.lt.s32.totalorder %s10799_s6, %s10799_s6 }
0x39bf   :  { %10212 = vmatpush3.bf16.msra.mxu1 %v10209_v9 }
0x39c0   :  { %10214 = vmatprep.subr.bf16.mxu1 %v10213_v0  ;;  %p10806_p13 = por %p10805_p12, %p10804_p11 }
0x39c2   :  { %p10807_p0 = pnand %p10806_p13, %p10800_p10 }
0x39c3   :  { %10216 = vmatpush3.bf16.msra.mxu1 %v10213_v0 }
0x3a4a   :  { %v8146_v35 = vpop.xlane.xlu0 %8145 }
0x3a4b   :  { %v8148_v29 = vmul.f32 0.03125, %v8146_v35  ;;  %v8143_v27 = vpop.xlane.xlu1 %8142 }
0x3a4c   :  { %v8147_v13 = vmul.f32 0.03125, %v8143_v27 }
0x3a4d   :  { %v8150_v39 = vsub.f32 %v8140_v53, %v8148_v29 }
0x3a4e   :  { %v8149_v56 = vsub.f32 %v8139_v62, %v8147_v13 }
0x3a4f   :  { %v8152_v25 = vmul.f32 %v8150_v39, %v8150_v39 }
0x3a50   :  { %v8151_v50 = vmul.f32 %v8149_v56, %v8149_v56 }
0x3a51   :  { %v8156_v26 = vsel %vm210_vm4, %v8152_v25, 0.0 }
0x3a52   :  { %8157 = vadd.xlane.f32.xlu0 %v8156_v26  ;;  %v8153_v63 = vsel %vm210_vm4, %v8151_v50, 0.0 }
0x3a53   :  { %8154 = vadd.xlane.f32.xlu1 %v8153_v63 }
0x3adf   :  { %v8158_v6 = vpop.xlane.xlu0 %8157 }
0x3ae0   :  { %v8160_v14 = vmul.f32 0.03125, %v8158_v6  ;;  %v8155_v34 = vpop.xlane.xlu1 %8154 }
0x3ae1   :  { %v8159_v51 = vmul.f32 0.03125, %v8155_v34 }
0x3ae2   :  { %v8162_v30 = vadd.f32 1e-05, %v8160_v14 }
0x3ae3   :  { %v8161_v16 = vadd.f32 1e-05, %v8159_v51 }
0x3ae4   :  { %10721 = vrsqrt.f32 %v8162_v30 }
0x3ae5   :  { %10723 = vrsqrt.f32 %v8161_v16 }
0x3aee   :  { %v10722_v40 = vpop.eup %10721 }
0x3aef   :  { %v10724_v41 = vpop.eup %10723  ;;  %v8166_v52 = vmul.f32 %v10722_v40, %v8150_v39 }
0x3af0   :  { %v8165_v1 = vmul.f32 %v10724_v41, %v8149_v56 }
0x3af1   :  { %v8168_v11 = vmul.f32 %v12077_v3, %v8166_v52 }
0x3af2   :  { %v8167_v42 = vmul.f32 %v12077_v3, %v8165_v1 }
0x3af3   :  { %v8170_v19 = vadd.f32 %v12082_v55, %v8168_v11 }
0x3af4   :  { %v8169_v20 = vadd.f32 %v12082_v55, %v8167_v42 }
0x3af6   :  { %9734 = vmatprep.mubr.msk.f32.mxu1 %vm210_vm4, %v8169_v20 }
0x3af7   :  { %9735 = vmatmul.mubr.msk.f32.vlgmr.msra.gmra.mrb[72].mxu1 %vm210_vm4, %v8170_v19 }
0x3bca   :  { %v9736_v21 = vpop.f32.mrb[72].mxu1 }
0x3bcb   :  { %v8260_v15 = vadd.f32 %v9736_v21, %v8711_v57  ;;  %v8254_v33 = vpop.f32.mrb[73].mxu1 }
0x3bcc   :  { %v8255_v37 = vadd.f32 %v8711_v57, %v8254_v33 }
0x3bcd   :  { %v8266_v18 = vsel %vm122_vm0, %v8260_v15, -inf }
0x3bce   :  { %8267 = vmax.xlane.f32.xlu0 %v8266_v18  ;;  %v8263_v45 = vsel %vm122_vm0, %v8255_v37, -inf }
0x3bcf   :  { %8264 = vmax.xlane.f32.xlu1 %v8263_v45 }
0x3c5b   :  { %v8268_v3 = vpop.xlane.xlu0 %8267 }
0x3c5c   :  { %v8270_v31 = vsub.f32 %v8260_v15, %v8268_v3  ;;  %v8265_v38 = vpop.xlane.xlu1 %8264 }
0x3c5d   :  { %v8269_v24 = vsub.f32 %v8255_v37, %v8265_v38 }
0x3c5e   :  { %v8273_v55 = vmul.f32 1.442695, %v8270_v31 }
0x3c5f   :  { %v8271_v32 = vmul.f32 1.442695, %v8269_v24 }
0x3c60   :  { %10725 = vpow2.f32 %v8273_v55 }
0x3c61   :  { %10727 = vpow2.f32 %v8271_v32 }
0x3c6a   :  { %v10726_v47 = vpop.eup %10725 }
0x3c6b   :  { %v10728_v17 = vpop.eup %10727  ;;  %v8278_v28 = vsel %vm122_vm0, %v10726_v47, 0.0 }
0x3c6c   :  { %8279 = vadd.xlane.f32.xlu0 %v8278_v28  ;;  %v8275_v54 = vsel %vm122_vm0, %v10728_v17, 0.0 }
0x3c6d   :  { %8276 = vadd.xlane.f32.xlu1 %v8275_v54 }
0x3cf9   :  { %v8280_v46 = vpop.xlane.xlu0 %8279 }
0x3cfa   :  { %10729 = vlog2.f32 %v8280_v46  ;;  %v8277_v12 = vpop.xlane.xlu1 %8276 }
0x3cfb   :  { %10731 = vlog2.f32 %v8277_v12 }
0x3d04   :  { %v10730_v60 = vpop.eup %10729 }
0x3d05   :  { %v10732_v59 = vpop.eup %10731  ;;  %v8284_v61 = vmul.f32 0.6931472, %v10730_v60 }
0x3d06   :  { %v8282_v5 = vmul.f32 0.6931472, %v10732_v59 }
0x3d07   :  { %v8286_v23 = vsub.f32 %v8270_v31, %v8284_v61 }
0x3d08   :  { %v8285_v58 = vsub.f32 %v8269_v24, %v8282_v5 }
0x3d09   :  { %8288 = vst.msk [vmem:[#allocation8 + $0x8] sm:$0xff] %vm122_vm0, %v8286_v23 }
0x3d0a   :  { %8287 = vst.msk [vmem:[#allocation8] sm:$0xff] %vm122_vm0, %v8285_v58 }
0x3d0b   :  { %10810 = shalt.err (!%p10807_p0)
}
0x3d0c   :  { %s10811_s19 = scalar_lea.hbm %s12347_s15, 256 }
0x3d0d   :  { %p10812_p1 = scmp.ne.s32.totalorder %s12347_s15, %s10811_s19  ;;  %p10815_p2 = scmp.lt.u32.totalorder %s10811_s19, %s12347_s15 }
0x3d0f   :  { %p10817_p3 = pnand %p10815_p2, %p10812_p1 }
0x3d11   :  { %10820 = shalt.err (!%p10817_p3)
}
0x3d12   :  { %s12353_s14 = smov 128  }
0x3d13   :  { %8300 = dma.vmem_to_hbm [thread:$0]  %s8295_s17, 256, %s12347_s15, [#allocation4], %s12353_s14, %s12353_s14, %s10829_s29  }
0x3d14   :  { %10825 = dma.done.wait [#allocation4], 256  }
0x3d15   :  { %10826 = vsyncadd [#allocation4], 4294967040 }
0x3d16   :  { %8304 = vsyncpa [#allocation3], 1 }
0x3d17   :  { %8305 = vsyncpa [#allocation6], 1 }
0x3d18   :  { %8306 = vsyncpa [#allocation4], 1 }

</bundles_post_ra>
